<compile_context>
chip_gen: v7x
topology: tpu7x:2x2x1
jax: 0.10.0
libtpu: 0.0.40
codegen_flags: <defaults>
</compile_context>

<pallas_src>
import math

import numpy as np

import jax
import jax.numpy as jnp
from jax import lax
from jax.experimental import pallas as pl
from jax.experimental.pallas import tpu as pltpu

_VMEM = pl.BlockSpec(memory_space=pltpu.MemorySpace.VMEM)
_BN_EPS = 1e-5


# ----------------------------------------------------------------------------
# Fused forward kernel: the whole network in one kernel body.
# ----------------------------------------------------------------------------
def _fused_forward_kernel(*refs):
    (x_ref, rsA, rsB, rsC,
     k1, k2, k3, k4, k5, k6, k7, k8, k9,
     b1, b2, b3, b4, b5, b6, b7, b8, b9,
     ls1, pc1, pr1, ls2, pc2, pr2,
     kh, gh, bh, o_ref) = refs

    def mm(a, b):
        return jnp.dot(a, b, preferred_element_type=jnp.float32)

    def conv(a, rs_ref, k_ref, b_ref):
        # y = relu( sum_dy RS[dy] @ (A @ K[dy]) + bias )   -- all MXU matmuls
        acc = mm(rs_ref[0], mm(a, k_ref[0]))
        acc = acc + mm(rs_ref[1], mm(a, k_ref[1]))
        acc = acc + mm(rs_ref[2], mm(a, k_ref[2]))
        return jnp.maximum(acc + b_ref[...], 0.0)

    def pool(a, ls_ref, pc_ref, pr_ref):
        # horizontal pair-max via lane-shift matmul, then 0/1 selection
        # matmuls do the column / row subsampling (+ re-padding of the target)
        hm = jnp.maximum(a, mm(a, ls_ref[...]))
        hs = mm(hm, pc_ref[...])
        return jnp.maximum(mm(pr_ref[0], hs), mm(pr_ref[1], hs))

    a = x_ref[...]                       # (N*30, 30)   padded 28x28x1 slab
    a = conv(a, rsA, k1, b1)             # (N*30, 180)  28x28x6
    a = conv(a, rsA, k2, b2)
    a = conv(a, rsA, k3, b3)
    a = conv(a, rsA, k4, b4)
    a = pool(a, ls1, pc1, pr1)           # (N*16, 96)   14x14x6 (padded)
    a = conv(a, rsB, k5, b5)             # (N*16, 192)  14x14x12
    a = conv(a, rsB, k6, b6)
    a = conv(a, rsB, k7, b7)
    a = conv(a, rsB, k8, b8)
    a = pool(a, ls2, pc2, pr2)           # (N*7, 84)    7x7x12 (unpadded)
    a = conv(a, rsC, k9, b9)             # (N*5, 60)    5x5x12 (valid conv)

    # head: 1x1 conv (12->10) folded with the spatial sum, then GAP + bias
    t = mm(a, kh[...])                   # (N*5, 10): summed over w
    g = mm(gh[...], t) * (1.0 / 25.0) + bh[...]   # (N, 10): GAP + conv10 bias
    # numerically-stable log_softmax
    m = jnp.max(g, axis=-1, keepdims=True)
    z = g - m
    lse = jnp.log(jnp.sum(jnp.exp(z), axis=-1, keepdims=True))
    o_ref[...] = z - lse


# ----------------------------------------------------------------------------
# Constant-matrix builders (run once, outside the kernel).
# ----------------------------------------------------------------------------
def _row_shift_padded(n, hp):
    """(3, n*hp, n*hp): dy row-shift + zeroing of the padded border rows."""
    rs = np.zeros((3, n * hp, n * hp), np.float32)
    for dy in range(3):
        for b in range(n):
            for p in range(1, hp - 1):
                q = p + dy - 1
                if 1 <= q <= hp - 2:          # padded source rows contribute 0
                    rs[dy, b * hp + p, b * hp + q] = 1.0
    return rs


def _row_shift_valid(n, h_in, h_out):
    rs = np.zeros((3, n * h_out, n * h_in), np.float32)
    for dy in range(3):
        for b in range(n):
            for i in range(h_out):
                rs[dy, b * h_out + i, b * h_in + i + dy] = 1.0
    return rs


def _col_taps_padded(wp):
    """(3, wp, wp): dx column taps for a 'same' conv, border columns zeroed."""
    s = np.zeros((3, wp, wp), np.float32)
    for dx in range(3):
        for qd in range(1, wp - 1):
            s[dx, qd + dx - 1, qd] = 1.0
    return s


def _col_taps_valid(w_in, w_out):
    s = np.zeros((3, w_in, w_out), np.float32)
    for dx in range(3):
        for qd in range(w_out):
            s[dx, qd + dx, qd] = 1.0
    return s


def _fold_conv(w, scale, s_taps):
    """Fold 3x3 HWIO weights + BN scale into 3 block matrices (dy, Win*Cin, Wout*Cout)."""
    ws = (w * scale).astype(jnp.float32)                 # (3,3,Cin,Cout)
    s = jnp.asarray(s_taps)                              # (3, Win, Wout)
    k = jnp.einsum("xst,yxic->ysitc", s, ws)             # (dy, Win, Cin, Wout, Cout)
    dy, win, cin, wout, cout = k.shape
    return k.reshape(dy, win * cin, wout * cout)


def _fold_bias_padded(bias_eff, wp):
    mask = np.zeros((wp, 1), np.float32)
    mask[1:wp - 1] = 1.0                                 # keep padded columns at 0
    return (jnp.asarray(mask) * bias_eff[None, :]).reshape(1, -1)


def _fold_bias_valid(bias_eff, w_out):
    return jnp.tile(bias_eff[None, :], (w_out, 1)).reshape(1, -1)


def _pool_consts(n, hp_in, c, hp_out, pad_out):
    """Constants for 2x2 maxpool on a square padded (n, hp_in, hp_in, c) slab."""
    h_pool = (hp_in - 2) // 2
    off = 1 if pad_out else 0
    l_in, l_out = hp_in * c, hp_out * c
    ls = np.eye(l_in, k=-c, dtype=np.float32)            # lane shift by +c
    pc = np.zeros((l_in, l_out), np.float32)             # column select (+pad)
    for j in range(h_pool):
        for ch in range(c):
            pc[(2 * j + 1) * c + ch, (j + off) * c + ch] = 1.0
    pr = np.zeros((2, n * hp_out, n * hp_in), np.float32)  # two row selects
    for a in range(2):
        for b in range(n):
            for i in range(h_pool):
                pr[a, b * hp_out + i + off, b * hp_in + 2 * i + 1 + a] = 1.0
    return ls, pc, pr


def fold_params(params, n):
    """Turn PyTorch-style weights into the kernel's constant operand tuple."""
    rsA = _row_shift_padded(n, 30)
    rsB = _row_shift_padded(n, 16)
    rsC = _row_shift_valid(n, 7, 5)
    sA, sB, sC = _col_taps_padded(30), _col_taps_padded(16), _col_taps_valid(7, 5)

    ks, bs = [], []
    for i in range(1, 10):
        w, scale, bias = params[f"conv{i}"]
        if i <= 4:
            s, wp, padded = sA, 30, True
        elif i <= 8:
            s, wp, padded = sB, 16, True
        else:
            s, wp, padded = sC, 5, False
        ks.append(_fold_conv(w, scale, s))
        bs.append(_fold_bias_padded(bias, wp) if padded
                  else _fold_bias_valid(bias, wp))

    ls1, pc1, pr1 = _pool_consts(n, 30, 6, 16, True)     # 28x28x6 -> 14x14x6 (padded)
    ls2, pc2, pr2 = _pool_consts(n, 16, 12, 7, False)    # 14x14x12 -> 7x7x12

    kh = jnp.tile(params["conv10_w"], (5, 1))            # (5*12, 10)
    gh = np.kron(np.eye(n, dtype=np.float32), np.ones((1, 5), np.float32))
    bh = params["conv10_b"][None, :]

    arrs = ([rsA, rsB, rsC] + ks + bs +
            [ls1, pc1, pr1, ls2, pc2, pr2, kh, gh, bh])
    return tuple(jnp.asarray(a, jnp.float32) for a in arrs)


# ----------------------------------------------------------------------------
# Forward pass: one fused pallas_call.
# ----------------------------------------------------------------------------
def forward(x_nchw, kparams):
    n = x_nchw.shape[0]
    x = x_nchw.astype(jnp.float32).reshape(n, 28, 28)     # Cin = 1
    xpad = jnp.pad(x, ((0, 0), (1, 1), (1, 1)))
    a0 = xpad.reshape(n * 30, 30)                         # (N*Hpad, Wpad*Cin)
    operands = (a0,) + tuple(kparams)
    return pl.pallas_call(
        _fused_forward_kernel,
        out_shape=jax.ShapeDtypeStruct((n, 10), jnp.float32),
        in_specs=[_VMEM] * len(operands),
        out_specs=_VMEM,
        cost_estimate=pl.CostEstimate(flops=100_000_000, transcendentals=32,
                                      bytes_accessed=6_000_000),
    )(*operands)


# ----------------------------------------------------------------------------
# Parameter construction (PyTorch-like init; BN folded in eval mode).
# ----------------------------------------------------------------------------
def make_params(key):
    chans = [(1, 6), (6, 6), (6, 6), (6, 6),
             (6, 12), (12, 12), (12, 12), (12, 12),
             (12, 12)]
    keys = jax.random.split(key, 10)
    params = {}
    for i, (cin, cout) in enumerate(chans):
        k1, k2 = jax.random.split(keys[i])
        bound = 1.0 / math.sqrt(cin * 9)
        w = jax.random.uniform(k1, (3, 3, cin, cout), jnp.float32, -bound, bound)
        cb = jax.random.uniform(k2, (cout,), jnp.float32, -bound, bound)
        gamma = jnp.ones((cout,), jnp.float32)
        beta = jnp.zeros((cout,), jnp.float32)
        r_mean = jnp.zeros((cout,), jnp.float32)
        r_var = jnp.ones((cout,), jnp.float32)
        scale = gamma / jnp.sqrt(r_var + _BN_EPS)
        bias = (cb - r_mean) * scale + beta
        params[f"conv{i + 1}"] = (w, scale, bias)
    k1, k2 = jax.random.split(keys[9])
    bound = 1.0 / math.sqrt(12)
    params["conv10_w"] = jax.random.uniform(k1, (12, 10), jnp.float32, -bound, bound)
    params["conv10_b"] = jax.random.uniform(k2, (10,), jnp.float32, -bound, bound)
    return params


# ----------------------------------------------------------------------------
# Pure-XLA reference (for a correctness cross-check only).
# ----------------------------------------------------------------------------
def _reference_forward(x_nchw, params):
    x = jnp.transpose(x_nchw.astype(jnp.float32), (0, 2, 3, 1))   # NHWC

    def conv_bn_relu(x, w, scale, bias, padding):
        y = lax.conv_general_dilated(
            x, w * scale, (1, 1), padding,
            dimension_numbers=("NHWC", "HWIO", "NHWC"),
            precision=lax.Precision.HIGHEST)
        return jnp.maximum(y + bias, 0.0)

    def pool(x):
        return lax.reduce_window(x, -jnp.inf, lax.max,
                                 (1, 2, 2, 1), (1, 2, 2, 1), "VALID")

    for i in range(1, 5):
        w, s, b = params[f"conv{i}"]
        x = conv_bn_relu(x, w, s, b, [(1, 1), (1, 1)])
    x = pool(x)
    for i in range(5, 9):
        w, s, b = params[f"conv{i}"]
        x = conv_bn_relu(x, w, s, b, [(1, 1), (1, 1)])
    x = pool(x)
    w, s, b = params["conv9"]
    x = conv_bn_relu(x, w, s, b, [(0, 0), (0, 0)])
    y = jnp.einsum("nhwc,cd->nhwd", x, params["conv10_w"],
                   precision=lax.Precision.HIGHEST) + params["conv10_b"]
    g = jnp.mean(y, axis=(1, 2))
    return jax.nn.log_softmax(g, axis=-1)


if __name__ == "__main__":
    root = jax.random.PRNGKey(0)
    k_param, k_x = jax.random.split(root)
    params = make_params(k_param)

    n = 2
    x = jax.random.normal(k_x, (n, 1, 28, 28), jnp.float32)   # NCHW, like PyTorch
    kparams = fold_params(params, n)

    out = jax.jit(forward)(x, kparams)
    out = jax.block_until_ready(out)

    assert out.shape == (n, 10)
    assert bool(jnp.all(jnp.isfinite(out)))
    # log_softmax rows must exponentiate-sum to ~1
    row_sums = jnp.sum(jnp.exp(out), axis=1)
    assert bool(jnp.all(jnp.abs(row_sums - 1.0) < 1e-4))
    # cross-check against a pure-XLA reference of the same network
    ref = _reference_forward(x, params)
    assert bool(jnp.max(jnp.abs(out - ref)) < 1e-2)

    print("KERNEL_OK")
</pallas_src>

<mosaic_0001>
module attributes {stable_mosaic.version = 11 : i64} {
  func.func @_fused_forward_kernel(%arg0: memref<60x30xf32, #tpu.memory_space<vmem>>, %arg1: memref<3x60x60xf32, #tpu.memory_space<vmem>>, %arg2: memref<3x32x32xf32, #tpu.memory_space<vmem>>, %arg3: memref<3x10x14xf32, #tpu.memory_space<vmem>>, %arg4: memref<3x30x180xf32, #tpu.memory_space<vmem>>, %arg5: memref<3x180x180xf32, #tpu.memory_space<vmem>>, %arg6: memref<3x180x180xf32, #tpu.memory_space<vmem>>, %arg7: memref<3x180x180xf32, #tpu.memory_space<vmem>>, %arg8: memref<3x96x192xf32, #tpu.memory_space<vmem>>, %arg9: memref<3x192x192xf32, #tpu.memory_space<vmem>>, %arg10: memref<3x192x192xf32, #tpu.memory_space<vmem>>, %arg11: memref<3x192x192xf32, #tpu.memory_space<vmem>>, %arg12: memref<3x84x60xf32, #tpu.memory_space<vmem>>, %arg13: memref<1x180xf32, #tpu.memory_space<vmem>>, %arg14: memref<1x180xf32, #tpu.memory_space<vmem>>, %arg15: memref<1x180xf32, #tpu.memory_space<vmem>>, %arg16: memref<1x180xf32, #tpu.memory_space<vmem>>, %arg17: memref<1x192xf32, #tpu.memory_space<vmem>>, %arg18: memref<1x192xf32, #tpu.memory_space<vmem>>, %arg19: memref<1x192xf32, #tpu.memory_space<vmem>>, %arg20: memref<1x192xf32, #tpu.memory_space<vmem>>, %arg21: memref<1x60xf32, #tpu.memory_space<vmem>>, %arg22: memref<180x180xf32, #tpu.memory_space<vmem>>, %arg23: memref<180x96xf32, #tpu.memory_space<vmem>>, %arg24: memref<2x32x60xf32, #tpu.memory_space<vmem>>, %arg25: memref<192x192xf32, #tpu.memory_space<vmem>>, %arg26: memref<192x84xf32, #tpu.memory_space<vmem>>, %arg27: memref<2x14x32xf32, #tpu.memory_space<vmem>>, %arg28: memref<60x10xf32, #tpu.memory_space<vmem>>, %arg29: memref<2x10xf32, #tpu.memory_space<vmem>>, %arg30: memref<1x10xf32, #tpu.memory_space<vmem>>, %arg31: memref<2x10xf32, #tpu.memory_space<vmem>>) attributes {dimension_semantics = [], scalar_prefetch = 0 : i64, scratch_operands = 0 : i64, tpu.core_type = #tpu.core_type<tc>} {
    %c0 = arith.constant 0 : index
    %c0_0 = arith.constant 0 : index
    %0 = vector.load %arg0[%c0, %c0_0] : memref<60x30xf32, #tpu.memory_space<vmem>>, vector<60x30xf32>
    %c0_1 = arith.constant 0 : index
    %c0_2 = arith.constant 0 : index
    %c0_3 = arith.constant 0 : index
    %1 = vector.load %arg1[%c0_1, %c0_2, %c0_3] : memref<3x60x60xf32, #tpu.memory_space<vmem>>, vector<1x60x60xf32>
    %2 = vector.shape_cast %1 : vector<1x60x60xf32> to vector<60x60xf32>
    %c0_4 = arith.constant 0 : index
    %c0_5 = arith.constant 0 : index
    %c0_6 = arith.constant 0 : index
    %3 = vector.load %arg4[%c0_4, %c0_5, %c0_6] : memref<3x30x180xf32, #tpu.memory_space<vmem>>, vector<1x30x180xf32>
    %4 = vector.shape_cast %3 : vector<1x30x180xf32> to vector<30x180xf32>
    %cst = arith.constant dense<0.000000e+00> : vector<60x180xf32>
    %5 = tpu.matmul %0, %4, %cst {dimension_numbers = #tpu.dot_dimension_numbers<[1], [0], [0], [1], [0, 0, 1, 1], [], []>} : vector<60x30xf32>, vector<30x180xf32>, vector<60x180xf32> -> vector<60x180xf32>
    %cst_7 = arith.constant dense<0.000000e+00> : vector<60x180xf32>
    %6 = tpu.matmul %2, %5, %cst_7 {dimension_numbers = #tpu.dot_dimension_numbers<[1], [0], [0], [1], [0, 0, 1, 1], [], []>} : vector<60x60xf32>, vector<60x180xf32>, vector<60x180xf32> -> vector<60x180xf32>
    %c1 = arith.constant 1 : index
    %c0_8 = arith.constant 0 : index
    %c0_9 = arith.constant 0 : index
    %7 = vector.load %arg1[%c1, %c0_8, %c0_9] : memref<3x60x60xf32, #tpu.memory_space<vmem>>, vector<1x60x60xf32>
    %8 = vector.shape_cast %7 : vector<1x60x60xf32> to vector<60x60xf32>
    %c1_10 = arith.constant 1 : index
    %c0_11 = arith.constant 0 : index
    %c0_12 = arith.constant 0 : index
    %9 = vector.load %arg4[%c1_10, %c0_11, %c0_12] : memref<3x30x180xf32, #tpu.memory_space<vmem>>, vector<1x30x180xf32>
    %10 = vector.shape_cast %9 : vector<1x30x180xf32> to vector<30x180xf32>
    %cst_13 = arith.constant dense<0.000000e+00> : vector<60x180xf32>
    %11 = tpu.matmul %0, %10, %cst_13 {dimension_numbers = #tpu.dot_dimension_numbers<[1], [0], [0], [1], [0, 0, 1, 1], [], []>} : vector<60x30xf32>, vector<30x180xf32>, vector<60x180xf32> -> vector<60x180xf32>
    %cst_14 = arith.constant dense<0.000000e+00> : vector<60x180xf32>
    %12 = tpu.matmul %8, %11, %cst_14 {dimension_numbers = #tpu.dot_dimension_numbers<[1], [0], [0], [1], [0, 0, 1, 1], [], []>} : vector<60x60xf32>, vector<60x180xf32>, vector<60x180xf32> -> vector<60x180xf32>
    %13 = arith.addf %6, %12 : vector<60x180xf32>
    %c2 = arith.constant 2 : index
    %c0_15 = arith.constant 0 : index
    %c0_16 = arith.constant 0 : index
    %14 = vector.load %arg1[%c2, %c0_15, %c0_16] : memref<3x60x60xf32, #tpu.memory_space<vmem>>, vector<1x60x60xf32>
    %15 = vector.shape_cast %14 : vector<1x60x60xf32> to vector<60x60xf32>
    %c2_17 = arith.constant 2 : index
    %c0_18 = arith.constant 0 : index
    %c0_19 = arith.constant 0 : index
    %16 = vector.load %arg4[%c2_17, %c0_18, %c0_19] : memref<3x30x180xf32, #tpu.memory_space<vmem>>, vector<1x30x180xf32>
    %17 = vector.shape_cast %16 : vector<1x30x180xf32> to vector<30x180xf32>
    %cst_20 = arith.constant dense<0.000000e+00> : vector<60x180xf32>
    %18 = tpu.matmul %0, %17, %cst_20 {dimension_numbers = #tpu.dot_dimension_numbers<[1], [0], [0], [1], [0, 0, 1, 1], [], []>} : vector<60x30xf32>, vector<30x180xf32>, vector<60x180xf32> -> vector<60x180xf32>
    %cst_21 = arith.constant dense<0.000000e+00> : vector<60x180xf32>
    %19 = tpu.matmul %15, %18, %cst_21 {dimension_numbers = #tpu.dot_dimension_numbers<[1], [0], [0], [1], [0, 0, 1, 1], [], []>} : vector<60x60xf32>, vector<60x180xf32>, vector<60x180xf32> -> vector<60x180xf32>
    %20 = arith.addf %13, %19 : vector<60x180xf32>
    %c0_22 = arith.constant 0 : index
    %c0_23 = arith.constant 0 : index
    %21 = vector.load %arg13[%c0_22, %c0_23] : memref<1x180xf32, #tpu.memory_space<vmem>>, vector<1x180xf32>
    %22 = vector.broadcast %21 : vector<1x180xf32> to vector<60x180xf32>
    %23 = arith.addf %20, %22 : vector<60x180xf32>
    %cst_24 = arith.constant 0.000000e+00 : f32
    %24 = vector.broadcast %cst_24 : f32 to vector<60x180xf32>
    %25 = arith.maximumf %23, %24 : vector<60x180xf32>
    %c0_25 = arith.constant 0 : index
    %c0_26 = arith.constant 0 : index
    %c0_27 = arith.constant 0 : index
    %26 = vector.load %arg1[%c0_25, %c0_26, %c0_27] : memref<3x60x60xf32, #tpu.memory_space<vmem>>, vector<1x60x60xf32>
    %27 = vector.shape_cast %26 : vector<1x60x60xf32> to vector<60x60xf32>
    %c0_28 = arith.constant 0 : index
    %c0_29 = arith.constant 0 : index
    %c0_30 = arith.constant 0 : index
    %28 = vector.load %arg5[%c0_28, %c0_29, %c0_30] : memref<3x180x180xf32, #tpu.memory_space<vmem>>, vector<1x180x180xf32>
    %29 = vector.shape_cast %28 : vector<1x180x180xf32> to vector<180x180xf32>
    %cst_31 = arith.constant dense<0.000000e+00> : vector<60x180xf32>
    %30 = tpu.matmul %25, %29, %cst_31 {dimension_numbers = #tpu.dot_dimension_numbers<[1], [0], [0], [1], [0, 0, 1, 1], [], []>} : vector<60x180xf32>, vector<180x180xf32>, vector<60x180xf32> -> vector<60x180xf32>
    %cst_32 = arith.constant dense<0.000000e+00> : vector<60x180xf32>
    %31 = tpu.matmul %27, %30, %cst_32 {dimension_numbers = #tpu.dot_dimension_numbers<[1], [0], [0], [1], [0, 0, 1, 1], [], []>} : vector<60x60xf32>, vector<60x180xf32>, vector<60x180xf32> -> vector<60x180xf32>
    %c1_33 = arith.constant 1 : index
    %c0_34 = arith.constant 0 : index
    %c0_35 = arith.constant 0 : index
    %32 = vector.load %arg1[%c1_33, %c0_34, %c0_35] : memref<3x60x60xf32, #tpu.memory_space<vmem>>, vector<1x60x60xf32>
    %33 = vector.shape_cast %32 : vector<1x60x60xf32> to vector<60x60xf32>
    %c1_36 = arith.constant 1 : index
    %c0_37 = arith.constant 0 : index
    %c0_38 = arith.constant 0 : index
    %34 = vector.load %arg5[%c1_36, %c0_37, %c0_38] : memref<3x180x180xf32, #tpu.memory_space<vmem>>, vector<1x180x180xf32>
    %35 = vector.shape_cast %34 : vector<1x180x180xf32> to vector<180x180xf32>
    %cst_39 = arith.constant dense<0.000000e+00> : vector<60x180xf32>
    %36 = tpu.matmul %25, %35, %cst_39 {dimension_numbers = #tpu.dot_dimension_numbers<[1], [0], [0], [1], [0, 0, 1, 1], [], []>} : vector<60x180xf32>, vector<180x180xf32>, vector<60x180xf32> -> vector<60x180xf32>
    %cst_40 = arith.constant dense<0.000000e+00> : vector<60x180xf32>
    %37 = tpu.matmul %33, %36, %cst_40 {dimension_numbers = #tpu.dot_dimension_numbers<[1], [0], [0], [1], [0, 0, 1, 1], [], []>} : vector<60x60xf32>, vector<60x180xf32>, vector<60x180xf32> -> vector<60x180xf32>
    %38 = arith.addf %31, %37 : vector<60x180xf32>
    %c2_41 = arith.constant 2 : index
    %c0_42 = arith.constant 0 : index
    %c0_43 = arith.constant 0 : index
    %39 = vector.load %arg1[%c2_41, %c0_42, %c0_43] : memref<3x60x60xf32, #tpu.memory_space<vmem>>, vector<1x60x60xf32>
    %40 = vector.shape_cast %39 : vector<1x60x60xf32> to vector<60x60xf32>
    %c2_44 = arith.constant 2 : index
    %c0_45 = arith.constant 0 : index
    %c0_46 = arith.constant 0 : index
    %41 = vector.load %arg5[%c2_44, %c0_45, %c0_46] : memref<3x180x180xf32, #tpu.memory_space<vmem>>, vector<1x180x180xf32>
    %42 = vector.shape_cast %41 : vector<1x180x180xf32> to vector<180x180xf32>
    %cst_47 = arith.constant dense<0.000000e+00> : vector<60x180xf32>
    %43 = tpu.matmul %25, %42, %cst_47 {dimension_numbers = #tpu.dot_dimension_numbers<[1], [0], [0], [1], [0, 0, 1, 1], [], []>} : vector<60x180xf32>, vector<180x180xf32>, vector<60x180xf32> -> vector<60x180xf32>
    %cst_48 = arith.constant dense<0.000000e+00> : vector<60x180xf32>
    %44 = tpu.matmul %40, %43, %cst_48 {dimension_numbers = #tpu.dot_dimension_numbers<[1], [0], [0], [1], [0, 0, 1, 1], [], []>} : vector<60x60xf32>, vector<60x180xf32>, vector<60x180xf32> -> vector<60x180xf32>
    %45 = arith.addf %38, %44 : vector<60x180xf32>
    %c0_49 = arith.constant 0 : index
    %c0_50 = arith.constant 0 : index
    %46 = vector.load %arg14[%c0_49, %c0_50] : memref<1x180xf32, #tpu.memory_space<vmem>>, vector<1x180xf32>
    %47 = vector.broadcast %46 : vector<1x180xf32> to vector<60x180xf32>
    %48 = arith.addf %45, %47 : vector<60x180xf32>
    %cst_51 = arith.constant 0.000000e+00 : f32
    %49 = vector.broadcast %cst_51 : f32 to vector<60x180xf32>
    %50 = arith.maximumf %48, %49 : vector<60x180xf32>
    %c0_52 = arith.constant 0 : index
    %c0_53 = arith.constant 0 : index
    %c0_54 = arith.constant 0 : index
    %51 = vector.load %arg1[%c0_52, %c0_53, %c0_54] : memref<3x60x60xf32, #tpu.memory_space<vmem>>, vector<1x60x60xf32>
    %52 = vector.shape_cast %51 : vector<1x60x60xf32> to vector<60x60xf32>
    %c0_55 = arith.constant 0 : index
    %c0_56 = arith.constant 0 : index
    %c0_57 = arith.constant 0 : index
    %53 = vector.load %arg6[%c0_55, %c0_56, %c0_57] : memref<3x180x180xf32, #tpu.memory_space<vmem>>, vector<1x180x180xf32>
    %54 = vector.shape_cast %53 : vector<1x180x180xf32> to vector<180x180xf32>
    %cst_58 = arith.constant dense<0.000000e+00> : vector<60x180xf32>
    %55 = tpu.matmul %50, %54, %cst_58 {dimension_numbers = #tpu.dot_dimension_numbers<[1], [0], [0], [1], [0, 0, 1, 1], [], []>} : vector<60x180xf32>, vector<180x180xf32>, vector<60x180xf32> -> vector<60x180xf32>
    %cst_59 = arith.constant dense<0.000000e+00> : vector<60x180xf32>
    %56 = tpu.matmul %52, %55, %cst_59 {dimension_numbers = #tpu.dot_dimension_numbers<[1], [0], [0], [1], [0, 0, 1, 1], [], []>} : vector<60x60xf32>, vector<60x180xf32>, vector<60x180xf32> -> vector<60x180xf32>
    %c1_60 = arith.constant 1 : index
    %c0_61 = arith.constant 0 : index
    %c0_62 = arith.constant 0 : index
    %57 = vector.load %arg1[%c1_60, %c0_61, %c0_62] : memref<3x60x60xf32, #tpu.memory_space<vmem>>, vector<1x60x60xf32>
    %58 = vector.shape_cast %57 : vector<1x60x60xf32> to vector<60x60xf32>
    %c1_63 = arith.constant 1 : index
    %c0_64 = arith.constant 0 : index
    %c0_65 = arith.constant 0 : index
    %59 = vector.load %arg6[%c1_63, %c0_64, %c0_65] : memref<3x180x180xf32, #tpu.memory_space<vmem>>, vector<1x180x180xf32>
    %60 = vector.shape_cast %59 : vector<1x180x180xf32> to vector<180x180xf32>
    %cst_66 = arith.constant dense<0.000000e+00> : vector<60x180xf32>
    %61 = tpu.matmul %50, %60, %cst_66 {dimension_numbers = #tpu.dot_dimension_numbers<[1], [0], [0], [1], [0, 0, 1, 1], [], []>} : vector<60x180xf32>, vector<180x180xf32>, vector<60x180xf32> -> vector<60x180xf32>
    %cst_67 = arith.constant dense<0.000000e+00> : vector<60x180xf32>
    %62 = tpu.matmul %58, %61, %cst_67 {dimension_numbers = #tpu.dot_dimension_numbers<[1], [0], [0], [1], [0, 0, 1, 1], [], []>} : vector<60x60xf32>, vector<60x180xf32>, vector<60x180xf32> -> vector<60x180xf32>
    %63 = arith.addf %56, %62 : vector<60x180xf32>
    %c2_68 = arith.constant 2 : index
    %c0_69 = arith.constant 0 : index
    %c0_70 = arith.constant 0 : index
    %64 = vector.load %arg1[%c2_68, %c0_69, %c0_70] : memref<3x60x60xf32, #tpu.memory_space<vmem>>, vector<1x60x60xf32>
    %65 = vector.shape_cast %64 : vector<1x60x60xf32> to vector<60x60xf32>
    %c2_71 = arith.constant 2 : index
    %c0_72 = arith.constant 0 : index
    %c0_73 = arith.constant 0 : index
    %66 = vector.load %arg6[%c2_71, %c0_72, %c0_73] : memref<3x180x180xf32, #tpu.memory_space<vmem>>, vector<1x180x180xf32>
    %67 = vector.shape_cast %66 : vector<1x180x180xf32> to vector<180x180xf32>
    %cst_74 = arith.constant dense<0.000000e+00> : vector<60x180xf32>
    %68 = tpu.matmul %50, %67, %cst_74 {dimension_numbers = #tpu.dot_dimension_numbers<[1], [0], [0], [1], [0, 0, 1, 1], [], []>} : vector<60x180xf32>, vector<180x180xf32>, vector<60x180xf32> -> vector<60x180xf32>
    %cst_75 = arith.constant dense<0.000000e+00> : vector<60x180xf32>
    %69 = tpu.matmul %65, %68, %cst_75 {dimension_numbers = #tpu.dot_dimension_numbers<[1], [0], [0], [1], [0, 0, 1, 1], [], []>} : vector<60x60xf32>, vector<60x180xf32>, vector<60x180xf32> -> vector<60x180xf32>
    %70 = arith.addf %63, %69 : vector<60x180xf32>
    %c0_76 = arith.constant 0 : index
    %c0_77 = arith.constant 0 : index
    %71 = vector.load %arg15[%c0_76, %c0_77] : memref<1x180xf32, #tpu.memory_space<vmem>>, vector<1x180xf32>
    %72 = vector.broadcast %71 : vector<1x180xf32> to vector<60x180xf32>
    %73 = arith.addf %70, %72 : vector<60x180xf32>
    %cst_78 = arith.constant 0.000000e+00 : f32
    %74 = vector.broadcast %cst_78 : f32 to vector<60x180xf32>
    %75 = arith.maximumf %73, %74 : vector<60x180xf32>
    %c0_79 = arith.constant 0 : index
    %c0_80 = arith.constant 0 : index
    %c0_81 = arith.constant 0 : index
    %76 = vector.load %arg1[%c0_79, %c0_80, %c0_81] : memref<3x60x60xf32, #tpu.memory_space<vmem>>, vector<1x60x60xf32>
    %77 = vector.shape_cast %76 : vector<1x60x60xf32> to vector<60x60xf32>
    %c0_82 = arith.constant 0 : index
    %c0_83 = arith.constant 0 : index
    %c0_84 = arith.constant 0 : index
    %78 = vector.load %arg7[%c0_82, %c0_83, %c0_84] : memref<3x180x180xf32, #tpu.memory_space<vmem>>, vector<1x180x180xf32>
    %79 = vector.shape_cast %78 : vector<1x180x180xf32> to vector<180x180xf32>
    %cst_85 = arith.constant dense<0.000000e+00> : vector<60x180xf32>
    %80 = tpu.matmul %75, %79, %cst_85 {dimension_numbers = #tpu.dot_dimension_numbers<[1], [0], [0], [1], [0, 0, 1, 1], [], []>} : vector<60x180xf32>, vector<180x180xf32>, vector<60x180xf32> -> vector<60x180xf32>
    %cst_86 = arith.constant dense<0.000000e+00> : vector<60x180xf32>
    %81 = tpu.matmul %77, %80, %cst_86 {dimension_numbers = #tpu.dot_dimension_numbers<[1], [0], [0], [1], [0, 0, 1, 1], [], []>} : vector<60x60xf32>, vector<60x180xf32>, vector<60x180xf32> -> vector<60x180xf32>
    %c1_87 = arith.constant 1 : index
    %c0_88 = arith.constant 0 : index
    %c0_89 = arith.constant 0 : index
    %82 = vector.load %arg1[%c1_87, %c0_88, %c0_89] : memref<3x60x60xf32, #tpu.memory_space<vmem>>, vector<1x60x60xf32>
    %83 = vector.shape_cast %82 : vector<1x60x60xf32> to vector<60x60xf32>
    %c1_90 = arith.constant 1 : index
    %c0_91 = arith.constant 0 : index
    %c0_92 = arith.constant 0 : index
    %84 = vector.load %arg7[%c1_90, %c0_91, %c0_92] : memref<3x180x180xf32, #tpu.memory_space<vmem>>, vector<1x180x180xf32>
    %85 = vector.shape_cast %84 : vector<1x180x180xf32> to vector<180x180xf32>
    %cst_93 = arith.constant dense<0.000000e+00> : vector<60x180xf32>
    %86 = tpu.matmul %75, %85, %cst_93 {dimension_numbers = #tpu.dot_dimension_numbers<[1], [0], [0], [1], [0, 0, 1, 1], [], []>} : vector<60x180xf32>, vector<180x180xf32>, vector<60x180xf32> -> vector<60x180xf32>
    %cst_94 = arith.constant dense<0.000000e+00> : vector<60x180xf32>
    %87 = tpu.matmul %83, %86, %cst_94 {dimension_numbers = #tpu.dot_dimension_numbers<[1], [0], [0], [1], [0, 0, 1, 1], [], []>} : vector<60x60xf32>, vector<60x180xf32>, vector<60x180xf32> -> vector<60x180xf32>
    %88 = arith.addf %81, %87 : vector<60x180xf32>
    %c2_95 = arith.constant 2 : index
    %c0_96 = arith.constant 0 : index
    %c0_97 = arith.constant 0 : index
    %89 = vector.load %arg1[%c2_95, %c0_96, %c0_97] : memref<3x60x60xf32, #tpu.memory_space<vmem>>, vector<1x60x60xf32>
    %90 = vector.shape_cast %89 : vector<1x60x60xf32> to vector<60x60xf32>
    %c2_98 = arith.constant 2 : index
    %c0_99 = arith.constant 0 : index
    %c0_100 = arith.constant 0 : index
    %91 = vector.load %arg7[%c2_98, %c0_99, %c0_100] : memref<3x180x180xf32, #tpu.memory_space<vmem>>, vector<1x180x180xf32>
    %92 = vector.shape_cast %91 : vector<1x180x180xf32> to vector<180x180xf32>
    %cst_101 = arith.constant dense<0.000000e+00> : vector<60x180xf32>
    %93 = tpu.matmul %75, %92, %cst_101 {dimension_numbers = #tpu.dot_dimension_numbers<[1], [0], [0], [1], [0, 0, 1, 1], [], []>} : vector<60x180xf32>, vector<180x180xf32>, vector<60x180xf32> -> vector<60x180xf32>
    %cst_102 = arith.constant dense<0.000000e+00> : vector<60x180xf32>
    %94 = tpu.matmul %90, %93, %cst_102 {dimension_numbers = #tpu.dot_dimension_numbers<[1], [0], [0], [1], [0, 0, 1, 1], [], []>} : vector<60x60xf32>, vector<60x180xf32>, vector<60x180xf32> -> vector<60x180xf32>
    %95 = arith.addf %88, %94 : vector<60x180xf32>
    %c0_103 = arith.constant 0 : index
    %c0_104 = arith.constant 0 : index
    %96 = vector.load %arg16[%c0_103, %c0_104] : memref<1x180xf32, #tpu.memory_space<vmem>>, vector<1x180xf32>
    %97 = vector.broadcast %96 : vector<1x180xf32> to vector<60x180xf32>
    %98 = arith.addf %95, %97 : vector<60x180xf32>
    %cst_105 = arith.constant 0.000000e+00 : f32
    %99 = vector.broadcast %cst_105 : f32 to vector<60x180xf32>
    %100 = arith.maximumf %98, %99 : vector<60x180xf32>
    %c0_106 = arith.constant 0 : index
    %c0_107 = arith.constant 0 : index
    %101 = vector.load %arg22[%c0_106, %c0_107] : memref<180x180xf32, #tpu.memory_space<vmem>>, vector<180x180xf32>
    %cst_108 = arith.constant dense<0.000000e+00> : vector<60x180xf32>
    %102 = tpu.matmul %100, %101, %cst_108 {dimension_numbers = #tpu.dot_dimension_numbers<[1], [0], [0], [1], [0, 0, 1, 1], [], []>} : vector<60x180xf32>, vector<180x180xf32>, vector<60x180xf32> -> vector<60x180xf32>
    %103 = arith.maximumf %100, %102 : vector<60x180xf32>
    %c0_109 = arith.constant 0 : index
    %c0_110 = arith.constant 0 : index
    %104 = vector.load %arg23[%c0_109, %c0_110] : memref<180x96xf32, #tpu.memory_space<vmem>>, vector<180x96xf32>
    %cst_111 = arith.constant dense<0.000000e+00> : vector<60x96xf32>
    %105 = tpu.matmul %103, %104, %cst_111 {dimension_numbers = #tpu.dot_dimension_numbers<[1], [0], [0], [1], [0, 0, 1, 1], [], []>} : vector<60x180xf32>, vector<180x96xf32>, vector<60x96xf32> -> vector<60x96xf32>
    %c0_112 = arith.constant 0 : index
    %c0_113 = arith.constant 0 : index
    %c0_114 = arith.constant 0 : index
    %106 = vector.load %arg24[%c0_112, %c0_113, %c0_114] : memref<2x32x60xf32, #tpu.memory_space<vmem>>, vector<1x32x60xf32>
    %107 = vector.shape_cast %106 : vector<1x32x60xf32> to vector<32x60xf32>
    %cst_115 = arith.constant dense<0.000000e+00> : vector<32x96xf32>
    %108 = tpu.matmul %107, %105, %cst_115 {dimension_numbers = #tpu.dot_dimension_numbers<[1], [0], [0], [1], [0, 0, 1, 1], [], []>} : vector<32x60xf32>, vector<60x96xf32>, vector<32x96xf32> -> vector<32x96xf32>
    %c1_116 = arith.constant 1 : index
    %c0_117 = arith.constant 0 : index
    %c0_118 = arith.constant 0 : index
    %109 = vector.load %arg24[%c1_116, %c0_117, %c0_118] : memref<2x32x60xf32, #tpu.memory_space<vmem>>, vector<1x32x60xf32>
    %110 = vector.shape_cast %109 : vector<1x32x60xf32> to vector<32x60xf32>
    %cst_119 = arith.constant dense<0.000000e+00> : vector<32x96xf32>
    %111 = tpu.matmul %110, %105, %cst_119 {dimension_numbers = #tpu.dot_dimension_numbers<[1], [0], [0], [1], [0, 0, 1, 1], [], []>} : vector<32x60xf32>, vector<60x96xf32>, vector<32x96xf32> -> vector<32x96xf32>
    %112 = arith.maximumf %108, %111 : vector<32x96xf32>
    %c0_120 = arith.constant 0 : index
    %c0_121 = arith.constant 0 : index
    %c0_122 = arith.constant 0 : index
    %113 = vector.load %arg2[%c0_120, %c0_121, %c0_122] : memref<3x32x32xf32, #tpu.memory_space<vmem>>, vector<1x32x32xf32>
    %114 = vector.shape_cast %113 : vector<1x32x32xf32> to vector<32x32xf32>
    %c0_123 = arith.constant 0 : index
    %c0_124 = arith.constant 0 : index
    %c0_125 = arith.constant 0 : index
    %115 = vector.load %arg8[%c0_123, %c0_124, %c0_125] : memref<3x96x192xf32, #tpu.memory_space<vmem>>, vector<1x96x192xf32>
    %116 = vector.shape_cast %115 : vector<1x96x192xf32> to vector<96x192xf32>
    %cst_126 = arith.constant dense<0.000000e+00> : vector<32x192xf32>
    %117 = tpu.matmul %112, %116, %cst_126 {dimension_numbers = #tpu.dot_dimension_numbers<[1], [0], [0], [1], [0, 0, 1, 1], [], []>} : vector<32x96xf32>, vector<96x192xf32>, vector<32x192xf32> -> vector<32x192xf32>
    %cst_127 = arith.constant dense<0.000000e+00> : vector<32x192xf32>
    %118 = tpu.matmul %114, %117, %cst_127 {dimension_numbers = #tpu.dot_dimension_numbers<[1], [0], [0], [1], [0, 0, 1, 1], [], []>} : vector<32x32xf32>, vector<32x192xf32>, vector<32x192xf32> -> vector<32x192xf32>
    %c1_128 = arith.constant 1 : index
    %c0_129 = arith.constant 0 : index
    %c0_130 = arith.constant 0 : index
    %119 = vector.load %arg2[%c1_128, %c0_129, %c0_130] : memref<3x32x32xf32, #tpu.memory_space<vmem>>, vector<1x32x32xf32>
    %120 = vector.shape_cast %119 : vector<1x32x32xf32> to vector<32x32xf32>
    %c1_131 = arith.constant 1 : index
    %c0_132 = arith.constant 0 : index
    %c0_133 = arith.constant 0 : index
    %121 = vector.load %arg8[%c1_131, %c0_132, %c0_133] : memref<3x96x192xf32, #tpu.memory_space<vmem>>, vector<1x96x192xf32>
    %122 = vector.shape_cast %121 : vector<1x96x192xf32> to vector<96x192xf32>
    %cst_134 = arith.constant dense<0.000000e+00> : vector<32x192xf32>
    %123 = tpu.matmul %112, %122, %cst_134 {dimension_numbers = #tpu.dot_dimension_numbers<[1], [0], [0], [1], [0, 0, 1, 1], [], []>} : vector<32x96xf32>, vector<96x192xf32>, vector<32x192xf32> -> vector<32x192xf32>
    %cst_135 = arith.constant dense<0.000000e+00> : vector<32x192xf32>
    %124 = tpu.matmul %120, %123, %cst_135 {dimension_numbers = #tpu.dot_dimension_numbers<[1], [0], [0], [1], [0, 0, 1, 1], [], []>} : vector<32x32xf32>, vector<32x192xf32>, vector<32x192xf32> -> vector<32x192xf32>
    %125 = arith.addf %118, %124 : vector<32x192xf32>
    %c2_136 = arith.constant 2 : index
    %c0_137 = arith.constant 0 : index
    %c0_138 = arith.constant 0 : index
    %126 = vector.load %arg2[%c2_136, %c0_137, %c0_138] : memref<3x32x32xf32, #tpu.memory_space<vmem>>, vector<1x32x32xf32>
    %127 = vector.shape_cast %126 : vector<1x32x32xf32> to vector<32x32xf32>
    %c2_139 = arith.constant 2 : index
    %c0_140 = arith.constant 0 : index
    %c0_141 = arith.constant 0 : index
    %128 = vector.load %arg8[%c2_139, %c0_140, %c0_141] : memref<3x96x192xf32, #tpu.memory_space<vmem>>, vector<1x96x192xf32>
    %129 = vector.shape_cast %128 : vector<1x96x192xf32> to vector<96x192xf32>
    %cst_142 = arith.constant dense<0.000000e+00> : vector<32x192xf32>
    %130 = tpu.matmul %112, %129, %cst_142 {dimension_numbers = #tpu.dot_dimension_numbers<[1], [0], [0], [1], [0, 0, 1, 1], [], []>} : vector<32x96xf32>, vector<96x192xf32>, vector<32x192xf32> -> vector<32x192xf32>
    %cst_143 = arith.constant dense<0.000000e+00> : vector<32x192xf32>
    %131 = tpu.matmul %127, %130, %cst_143 {dimension_numbers = #tpu.dot_dimension_numbers<[1], [0], [0], [1], [0, 0, 1, 1], [], []>} : vector<32x32xf32>, vector<32x192xf32>, vector<32x192xf32> -> vector<32x192xf32>
    %132 = arith.addf %125, %131 : vector<32x192xf32>
    %c0_144 = arith.constant 0 : index
    %c0_145 = arith.constant 0 : index
    %133 = vector.load %arg17[%c0_144, %c0_145] : memref<1x192xf32, #tpu.memory_space<vmem>>, vector<1x192xf32>
    %134 = vector.broadcast %133 : vector<1x192xf32> to vector<32x192xf32>
    %135 = arith.addf %132, %134 : vector<32x192xf32>
    %cst_146 = arith.constant 0.000000e+00 : f32
    %136 = vector.broadcast %cst_146 : f32 to vector<32x192xf32>
    %137 = arith.maximumf %135, %136 : vector<32x192xf32>
    %c0_147 = arith.constant 0 : index
    %c0_148 = arith.constant 0 : index
    %c0_149 = arith.constant 0 : index
    %138 = vector.load %arg2[%c0_147, %c0_148, %c0_149] : memref<3x32x32xf32, #tpu.memory_space<vmem>>, vector<1x32x32xf32>
    %139 = vector.shape_cast %138 : vector<1x32x32xf32> to vector<32x32xf32>
    %c0_150 = arith.constant 0 : index
    %c0_151 = arith.constant 0 : index
    %c0_152 = arith.constant 0 : index
    %140 = vector.load %arg9[%c0_150, %c0_151, %c0_152] : memref<3x192x192xf32, #tpu.memory_space<vmem>>, vector<1x192x192xf32>
    %141 = vector.shape_cast %140 : vector<1x192x192xf32> to vector<192x192xf32>
    %cst_153 = arith.constant dense<0.000000e+00> : vector<32x192xf32>
    %142 = tpu.matmul %137, %141, %cst_153 {dimension_numbers = #tpu.dot_dimension_numbers<[1], [0], [0], [1], [0, 0, 1, 1], [], []>} : vector<32x192xf32>, vector<192x192xf32>, vector<32x192xf32> -> vector<32x192xf32>
    %cst_154 = arith.constant dense<0.000000e+00> : vector<32x192xf32>
    %143 = tpu.matmul %139, %142, %cst_154 {dimension_numbers = #tpu.dot_dimension_numbers<[1], [0], [0], [1], [0, 0, 1, 1], [], []>} : vector<32x32xf32>, vector<32x192xf32>, vector<32x192xf32> -> vector<32x192xf32>
    %c1_155 = arith.constant 1 : index
    %c0_156 = arith.constant 0 : index
    %c0_157 = arith.constant 0 : index
    %144 = vector.load %arg2[%c1_155, %c0_156, %c0_157] : memref<3x32x32xf32, #tpu.memory_space<vmem>>, vector<1x32x32xf32>
    %145 = vector.shape_cast %144 : vector<1x32x32xf32> to vector<32x32xf32>
    %c1_158 = arith.constant 1 : index
    %c0_159 = arith.constant 0 : index
    %c0_160 = arith.constant 0 : index
    %146 = vector.load %arg9[%c1_158, %c0_159, %c0_160] : memref<3x192x192xf32, #tpu.memory_space<vmem>>, vector<1x192x192xf32>
    %147 = vector.shape_cast %146 : vector<1x192x192xf32> to vector<192x192xf32>
    %cst_161 = arith.constant dense<0.000000e+00> : vector<32x192xf32>
    %148 = tpu.matmul %137, %147, %cst_161 {dimension_numbers = #tpu.dot_dimension_numbers<[1], [0], [0], [1], [0, 0, 1, 1], [], []>} : vector<32x192xf32>, vector<192x192xf32>, vector<32x192xf32> -> vector<32x192xf32>
    %cst_162 = arith.constant dense<0.000000e+00> : vector<32x192xf32>
    %149 = tpu.matmul %145, %148, %cst_162 {dimension_numbers = #tpu.dot_dimension_numbers<[1], [0], [0], [1], [0, 0, 1, 1], [], []>} : vector<32x32xf32>, vector<32x192xf32>, vector<32x192xf32> -> vector<32x192xf32>
    %150 = arith.addf %143, %149 : vector<32x192xf32>
    %c2_163 = arith.constant 2 : index
    %c0_164 = arith.constant 0 : index
    %c0_165 = arith.constant 0 : index
    %151 = vector.load %arg2[%c2_163, %c0_164, %c0_165] : memref<3x32x32xf32, #tpu.memory_space<vmem>>, vector<1x32x32xf32>
    %152 = vector.shape_cast %151 : vector<1x32x32xf32> to vector<32x32xf32>
    %c2_166 = arith.constant 2 : index
    %c0_167 = arith.constant 0 : index
    %c0_168 = arith.constant 0 : index
    %153 = vector.load %arg9[%c2_166, %c0_167, %c0_168] : memref<3x192x192xf32, #tpu.memory_space<vmem>>, vector<1x192x192xf32>
    %154 = vector.shape_cast %153 : vector<1x192x192xf32> to vector<192x192xf32>
    %cst_169 = arith.constant dense<0.000000e+00> : vector<32x192xf32>
    %155 = tpu.matmul %137, %154, %cst_169 {dimension_numbers = #tpu.dot_dimension_numbers<[1], [0], [0], [1], [0, 0, 1, 1], [], []>} : vector<32x192xf32>, vector<192x192xf32>, vector<32x192xf32> -> vector<32x192xf32>
    %cst_170 = arith.constant dense<0.000000e+00> : vector<32x192xf32>
    %156 = tpu.matmul %152, %155, %cst_170 {dimension_numbers = #tpu.dot_dimension_numbers<[1], [0], [0], [1], [0, 0, 1, 1], [], []>} : vector<32x32xf32>, vector<32x192xf32>, vector<32x192xf32> -> vector<32x192xf32>
    %157 = arith.addf %150, %156 : vector<32x192xf32>
    %c0_171 = arith.constant 0 : index
    %c0_172 = arith.constant 0 : index
    %158 = vector.load %arg18[%c0_171, %c0_172] : memref<1x192xf32, #tpu.memory_space<vmem>>, vector<1x192xf32>
    %159 = vector.broadcast %158 : vector<1x192xf32> to vector<32x192xf32>
    %160 = arith.addf %157, %159 : vector<32x192xf32>
    %cst_173 = arith.constant 0.000000e+00 : f32
    %161 = vector.broadcast %cst_173 : f32 to vector<32x192xf32>
    %162 = arith.maximumf %160, %161 : vector<32x192xf32>
    %c0_174 = arith.constant 0 : index
    %c0_175 = arith.constant 0 : index
    %c0_176 = arith.constant 0 : index
    %163 = vector.load %arg2[%c0_174, %c0_175, %c0_176] : memref<3x32x32xf32, #tpu.memory_space<vmem>>, vector<1x32x32xf32>
    %164 = vector.shape_cast %163 : vector<1x32x32xf32> to vector<32x32xf32>
    %c0_177 = arith.constant 0 : index
    %c0_178 = arith.constant 0 : index
    %c0_179 = arith.constant 0 : index
    %165 = vector.load %arg10[%c0_177, %c0_178, %c0_179] : memref<3x192x192xf32, #tpu.memory_space<vmem>>, vector<1x192x192xf32>
    %166 = vector.shape_cast %165 : vector<1x192x192xf32> to vector<192x192xf32>
    %cst_180 = arith.constant dense<0.000000e+00> : vector<32x192xf32>
    %167 = tpu.matmul %162, %166, %cst_180 {dimension_numbers = #tpu.dot_dimension_numbers<[1], [0], [0], [1], [0, 0, 1, 1], [], []>} : vector<32x192xf32>, vector<192x192xf32>, vector<32x192xf32> -> vector<32x192xf32>
    %cst_181 = arith.constant dense<0.000000e+00> : vector<32x192xf32>
    %168 = tpu.matmul %164, %167, %cst_181 {dimension_numbers = #tpu.dot_dimension_numbers<[1], [0], [0], [1], [0, 0, 1, 1], [], []>} : vector<32x32xf32>, vector<32x192xf32>, vector<32x192xf32> -> vector<32x192xf32>
    %c1_182 = arith.constant 1 : index
    %c0_183 = arith.constant 0 : index
    %c0_184 = arith.constant 0 : index
    %169 = vector.load %arg2[%c1_182, %c0_183, %c0_184] : memref<3x32x32xf32, #tpu.memory_space<vmem>>, vector<1x32x32xf32>
    %170 = vector.shape_cast %169 : vector<1x32x32xf32> to vector<32x32xf32>
    %c1_185 = arith.constant 1 : index
    %c0_186 = arith.constant 0 : index
    %c0_187 = arith.constant 0 : index
    %171 = vector.load %arg10[%c1_185, %c0_186, %c0_187] : memref<3x192x192xf32, #tpu.memory_space<vmem>>, vector<1x192x192xf32>
    %172 = vector.shape_cast %171 : vector<1x192x192xf32> to vector<192x192xf32>
    %cst_188 = arith.constant dense<0.000000e+00> : vector<32x192xf32>
    %173 = tpu.matmul %162, %172, %cst_188 {dimension_numbers = #tpu.dot_dimension_numbers<[1], [0], [0], [1], [0, 0, 1, 1], [], []>} : vector<32x192xf32>, vector<192x192xf32>, vector<32x192xf32> -> vector<32x192xf32>
    %cst_189 = arith.constant dense<0.000000e+00> : vector<32x192xf32>
    %174 = tpu.matmul %170, %173, %cst_189 {dimension_numbers = #tpu.dot_dimension_numbers<[1], [0], [0], [1], [0, 0, 1, 1], [], []>} : vector<32x32xf32>, vector<32x192xf32>, vector<32x192xf32> -> vector<32x192xf32>
    %175 = arith.addf %168, %174 : vector<32x192xf32>
    %c2_190 = arith.constant 2 : index
    %c0_191 = arith.constant 0 : index
    %c0_192 = arith.constant 0 : index
    %176 = vector.load %arg2[%c2_190, %c0_191, %c0_192] : memref<3x32x32xf32, #tpu.memory_space<vmem>>, vector<1x32x32xf32>
    %177 = vector.shape_cast %176 : vector<1x32x32xf32> to vector<32x32xf32>
    %c2_193 = arith.constant 2 : index
    %c0_194 = arith.constant 0 : index
    %c0_195 = arith.constant 0 : index
    %178 = vector.load %arg10[%c2_193, %c0_194, %c0_195] : memref<3x192x192xf32, #tpu.memory_space<vmem>>, vector<1x192x192xf32>
    %179 = vector.shape_cast %178 : vector<1x192x192xf32> to vector<192x192xf32>
    %cst_196 = arith.constant dense<0.000000e+00> : vector<32x192xf32>
    %180 = tpu.matmul %162, %179, %cst_196 {dimension_numbers = #tpu.dot_dimension_numbers<[1], [0], [0], [1], [0, 0, 1, 1], [], []>} : vector<32x192xf32>, vector<192x192xf32>, vector<32x192xf32> -> vector<32x192xf32>
    %cst_197 = arith.constant dense<0.000000e+00> : vector<32x192xf32>
    %181 = tpu.matmul %177, %180, %cst_197 {dimension_numbers = #tpu.dot_dimension_numbers<[1], [0], [0], [1], [0, 0, 1, 1], [], []>} : vector<32x32xf32>, vector<32x192xf32>, vector<32x192xf32> -> vector<32x192xf32>
    %182 = arith.addf %175, %181 : vector<32x192xf32>
    %c0_198 = arith.constant 0 : index
    %c0_199 = arith.constant 0 : index
    %183 = vector.load %arg19[%c0_198, %c0_199] : memref<1x192xf32, #tpu.memory_space<vmem>>, vector<1x192xf32>
    %184 = vector.broadcast %183 : vector<1x192xf32> to vector<32x192xf32>
    %185 = arith.addf %182, %184 : vector<32x192xf32>
    %cst_200 = arith.constant 0.000000e+00 : f32
    %186 = vector.broadcast %cst_200 : f32 to vector<32x192xf32>
    %187 = arith.maximumf %185, %186 : vector<32x192xf32>
    %c0_201 = arith.constant 0 : index
    %c0_202 = arith.constant 0 : index
    %c0_203 = arith.constant 0 : index
    %188 = vector.load %arg2[%c0_201, %c0_202, %c0_203] : memref<3x32x32xf32, #tpu.memory_space<vmem>>, vector<1x32x32xf32>
    %189 = vector.shape_cast %188 : vector<1x32x32xf32> to vector<32x32xf32>
    %c0_204 = arith.constant 0 : index
    %c0_205 = arith.constant 0 : index
    %c0_206 = arith.constant 0 : index
    %190 = vector.load %arg11[%c0_204, %c0_205, %c0_206] : memref<3x192x192xf32, #tpu.memory_space<vmem>>, vector<1x192x192xf32>
    %191 = vector.shape_cast %190 : vector<1x192x192xf32> to vector<192x192xf32>
    %cst_207 = arith.constant dense<0.000000e+00> : vector<32x192xf32>
    %192 = tpu.matmul %187, %191, %cst_207 {dimension_numbers = #tpu.dot_dimension_numbers<[1], [0], [0], [1], [0, 0, 1, 1], [], []>} : vector<32x192xf32>, vector<192x192xf32>, vector<32x192xf32> -> vector<32x192xf32>
    %cst_208 = arith.constant dense<0.000000e+00> : vector<32x192xf32>
    %193 = tpu.matmul %189, %192, %cst_208 {dimension_numbers = #tpu.dot_dimension_numbers<[1], [0], [0], [1], [0, 0, 1, 1], [], []>} : vector<32x32xf32>, vector<32x192xf32>, vector<32x192xf32> -> vector<32x192xf32>
    %c1_209 = arith.constant 1 : index
    %c0_210 = arith.constant 0 : index
    %c0_211 = arith.constant 0 : index
    %194 = vector.load %arg2[%c1_209, %c0_210, %c0_211] : memref<3x32x32xf32, #tpu.memory_space<vmem>>, vector<1x32x32xf32>
    %195 = vector.shape_cast %194 : vector<1x32x32xf32> to vector<32x32xf32>
    %c1_212 = arith.constant 1 : index
    %c0_213 = arith.constant 0 : index
    %c0_214 = arith.constant 0 : index
    %196 = vector.load %arg11[%c1_212, %c0_213, %c0_214] : memref<3x192x192xf32, #tpu.memory_space<vmem>>, vector<1x192x192xf32>
    %197 = vector.shape_cast %196 : vector<1x192x192xf32> to vector<192x192xf32>
    %cst_215 = arith.constant dense<0.000000e+00> : vector<32x192xf32>
    %198 = tpu.matmul %187, %197, %cst_215 {dimension_numbers = #tpu.dot_dimension_numbers<[1], [0], [0], [1], [0, 0, 1, 1], [], []>} : vector<32x192xf32>, vector<192x192xf32>, vector<32x192xf32> -> vector<32x192xf32>
    %cst_216 = arith.constant dense<0.000000e+00> : vector<32x192xf32>
    %199 = tpu.matmul %195, %198, %cst_216 {dimension_numbers = #tpu.dot_dimension_numbers<[1], [0], [0], [1], [0, 0, 1, 1], [], []>} : vector<32x32xf32>, vector<32x192xf32>, vector<32x192xf32> -> vector<32x192xf32>
    %200 = arith.addf %193, %199 : vector<32x192xf32>
    %c2_217 = arith.constant 2 : index
    %c0_218 = arith.constant 0 : index
    %c0_219 = arith.constant 0 : index
    %201 = vector.load %arg2[%c2_217, %c0_218, %c0_219] : memref<3x32x32xf32, #tpu.memory_space<vmem>>, vector<1x32x32xf32>
    %202 = vector.shape_cast %201 : vector<1x32x32xf32> to vector<32x32xf32>
    %c2_220 = arith.constant 2 : index
    %c0_221 = arith.constant 0 : index
    %c0_222 = arith.constant 0 : index
    %203 = vector.load %arg11[%c2_220, %c0_221, %c0_222] : memref<3x192x192xf32, #tpu.memory_space<vmem>>, vector<1x192x192xf32>
    %204 = vector.shape_cast %203 : vector<1x192x192xf32> to vector<192x192xf32>
    %cst_223 = arith.constant dense<0.000000e+00> : vector<32x192xf32>
    %205 = tpu.matmul %187, %204, %cst_223 {dimension_numbers = #tpu.dot_dimension_numbers<[1], [0], [0], [1], [0, 0, 1, 1], [], []>} : vector<32x192xf32>, vector<192x192xf32>, vector<32x192xf32> -> vector<32x192xf32>
    %cst_224 = arith.constant dense<0.000000e+00> : vector<32x192xf32>
    %206 = tpu.matmul %202, %205, %cst_224 {dimension_numbers = #tpu.dot_dimension_numbers<[1], [0], [0], [1], [0, 0, 1, 1], [], []>} : vector<32x32xf32>, vector<32x192xf32>, vector<32x192xf32> -> vector<32x192xf32>
    %207 = arith.addf %200, %206 : vector<32x192xf32>
    %c0_225 = arith.constant 0 : index
    %c0_226 = arith.constant 0 : index
    %208 = vector.load %arg20[%c0_225, %c0_226] : memref<1x192xf32, #tpu.memory_space<vmem>>, vector<1x192xf32>
    %209 = vector.broadcast %208 : vector<1x192xf32> to vector<32x192xf32>
    %210 = arith.addf %207, %209 : vector<32x192xf32>
    %cst_227 = arith.constant 0.000000e+00 : f32
    %211 = vector.broadcast %cst_227 : f32 to vector<32x192xf32>
    %212 = arith.maximumf %210, %211 : vector<32x192xf32>
    %c0_228 = arith.constant 0 : index
    %c0_229 = arith.constant 0 : index
    %213 = vector.load %arg25[%c0_228, %c0_229] : memref<192x192xf32, #tpu.memory_space<vmem>>, vector<192x192xf32>
    %cst_230 = arith.constant dense<0.000000e+00> : vector<32x192xf32>
    %214 = tpu.matmul %212, %213, %cst_230 {dimension_numbers = #tpu.dot_dimension_numbers<[1], [0], [0], [1], [0, 0, 1, 1], [], []>} : vector<32x192xf32>, vector<192x192xf32>, vector<32x192xf32> -> vector<32x192xf32>
    %215 = arith.maximumf %212, %214 : vector<32x192xf32>
    %c0_231 = arith.constant 0 : index
    %c0_232 = arith.constant 0 : index
    %216 = vector.load %arg26[%c0_231, %c0_232] : memref<192x84xf32, #tpu.memory_space<vmem>>, vector<192x84xf32>
    %cst_233 = arith.constant dense<0.000000e+00> : vector<32x84xf32>
    %217 = tpu.matmul %215, %216, %cst_233 {dimension_numbers = #tpu.dot_dimension_numbers<[1], [0], [0], [1], [0, 0, 1, 1], [], []>} : vector<32x192xf32>, vector<192x84xf32>, vector<32x84xf32> -> vector<32x84xf32>
    %c0_234 = arith.constant 0 : index
    %c0_235 = arith.constant 0 : index
    %c0_236 = arith.constant 0 : index
    %218 = vector.load %arg27[%c0_234, %c0_235, %c0_236] : memref<2x14x32xf32, #tpu.memory_space<vmem>>, vector<1x14x32xf32>
    %219 = vector.shape_cast %218 : vector<1x14x32xf32> to vector<14x32xf32>
    %cst_237 = arith.constant dense<0.000000e+00> : vector<14x84xf32>
    %220 = tpu.matmul %219, %217, %cst_237 {dimension_numbers = #tpu.dot_dimension_numbers<[1], [0], [0], [1], [0, 0, 1, 1], [], []>} : vector<14x32xf32>, vector<32x84xf32>, vector<14x84xf32> -> vector<14x84xf32>
    %c1_238 = arith.constant 1 : index
    %c0_239 = arith.constant 0 : index
    %c0_240 = arith.constant 0 : index
    %221 = vector.load %arg27[%c1_238, %c0_239, %c0_240] : memref<2x14x32xf32, #tpu.memory_space<vmem>>, vector<1x14x32xf32>
    %222 = vector.shape_cast %221 : vector<1x14x32xf32> to vector<14x32xf32>
    %cst_241 = arith.constant dense<0.000000e+00> : vector<14x84xf32>
    %223 = tpu.matmul %222, %217, %cst_241 {dimension_numbers = #tpu.dot_dimension_numbers<[1], [0], [0], [1], [0, 0, 1, 1], [], []>} : vector<14x32xf32>, vector<32x84xf32>, vector<14x84xf32> -> vector<14x84xf32>
    %224 = arith.maximumf %220, %223 : vector<14x84xf32>
    %c0_242 = arith.constant 0 : index
    %c0_243 = arith.constant 0 : index
    %c0_244 = arith.constant 0 : index
    %225 = vector.load %arg3[%c0_242, %c0_243, %c0_244] : memref<3x10x14xf32, #tpu.memory_space<vmem>>, vector<1x10x14xf32>
    %226 = vector.shape_cast %225 : vector<1x10x14xf32> to vector<10x14xf32>
    %c0_245 = arith.constant 0 : index
    %c0_246 = arith.constant 0 : index
    %c0_247 = arith.constant 0 : index
    %227 = vector.load %arg12[%c0_245, %c0_246, %c0_247] : memref<3x84x60xf32, #tpu.memory_space<vmem>>, vector<1x84x60xf32>
    %228 = vector.shape_cast %227 : vector<1x84x60xf32> to vector<84x60xf32>
    %cst_248 = arith.constant dense<0.000000e+00> : vector<14x60xf32>
    %229 = tpu.matmul %224, %228, %cst_248 {dimension_numbers = #tpu.dot_dimension_numbers<[1], [0], [0], [1], [0, 0, 1, 1], [], []>} : vector<14x84xf32>, vector<84x60xf32>, vector<14x60xf32> -> vector<14x60xf32>
    %cst_249 = arith.constant dense<0.000000e+00> : vector<10x60xf32>
    %230 = tpu.matmul %226, %229, %cst_249 {dimension_numbers = #tpu.dot_dimension_numbers<[1], [0], [0], [1], [0, 0, 1, 1], [], []>} : vector<10x14xf32>, vector<14x60xf32>, vector<10x60xf32> -> vector<10x60xf32>
    %c1_250 = arith.constant 1 : index
    %c0_251 = arith.constant 0 : index
    %c0_252 = arith.constant 0 : index
    %231 = vector.load %arg3[%c1_250, %c0_251, %c0_252] : memref<3x10x14xf32, #tpu.memory_space<vmem>>, vector<1x10x14xf32>
    %232 = vector.shape_cast %231 : vector<1x10x14xf32> to vector<10x14xf32>
    %c1_253 = arith.constant 1 : index
    %c0_254 = arith.constant 0 : index
    %c0_255 = arith.constant 0 : index
    %233 = vector.load %arg12[%c1_253, %c0_254, %c0_255] : memref<3x84x60xf32, #tpu.memory_space<vmem>>, vector<1x84x60xf32>
    %234 = vector.shape_cast %233 : vector<1x84x60xf32> to vector<84x60xf32>
    %cst_256 = arith.constant dense<0.000000e+00> : vector<14x60xf32>
    %235 = tpu.matmul %224, %234, %cst_256 {dimension_numbers = #tpu.dot_dimension_numbers<[1], [0], [0], [1], [0, 0, 1, 1], [], []>} : vector<14x84xf32>, vector<84x60xf32>, vector<14x60xf32> -> vector<14x60xf32>
    %cst_257 = arith.constant dense<0.000000e+00> : vector<10x60xf32>
    %236 = tpu.matmul %232, %235, %cst_257 {dimension_numbers = #tpu.dot_dimension_numbers<[1], [0], [0], [1], [0, 0, 1, 1], [], []>} : vector<10x14xf32>, vector<14x60xf32>, vector<10x60xf32> -> vector<10x60xf32>
    %237 = arith.addf %230, %236 : vector<10x60xf32>
    %c2_258 = arith.constant 2 : index
    %c0_259 = arith.constant 0 : index
    %c0_260 = arith.constant 0 : index
    %238 = vector.load %arg3[%c2_258, %c0_259, %c0_260] : memref<3x10x14xf32, #tpu.memory_space<vmem>>, vector<1x10x14xf32>
    %239 = vector.shape_cast %238 : vector<1x10x14xf32> to vector<10x14xf32>
    %c2_261 = arith.constant 2 : index
    %c0_262 = arith.constant 0 : index
    %c0_263 = arith.constant 0 : index
    %240 = vector.load %arg12[%c2_261, %c0_262, %c0_263] : memref<3x84x60xf32, #tpu.memory_space<vmem>>, vector<1x84x60xf32>
    %241 = vector.shape_cast %240 : vector<1x84x60xf32> to vector<84x60xf32>
    %cst_264 = arith.constant dense<0.000000e+00> : vector<14x60xf32>
    %242 = tpu.matmul %224, %241, %cst_264 {dimension_numbers = #tpu.dot_dimension_numbers<[1], [0], [0], [1], [0, 0, 1, 1], [], []>} : vector<14x84xf32>, vector<84x60xf32>, vector<14x60xf32> -> vector<14x60xf32>
    %cst_265 = arith.constant dense<0.000000e+00> : vector<10x60xf32>
    %243 = tpu.matmul %239, %242, %cst_265 {dimension_numbers = #tpu.dot_dimension_numbers<[1], [0], [0], [1], [0, 0, 1, 1], [], []>} : vector<10x14xf32>, vector<14x60xf32>, vector<10x60xf32> -> vector<10x60xf32>
    %244 = arith.addf %237, %243 : vector<10x60xf32>
    %c0_266 = arith.constant 0 : index
    %c0_267 = arith.constant 0 : index
    %245 = vector.load %arg21[%c0_266, %c0_267] : memref<1x60xf32, #tpu.memory_space<vmem>>, vector<1x60xf32>
    %246 = vector.broadcast %245 : vector<1x60xf32> to vector<10x60xf32>
    %247 = arith.addf %244, %246 : vector<10x60xf32>
    %cst_268 = arith.constant 0.000000e+00 : f32
    %248 = vector.broadcast %cst_268 : f32 to vector<10x60xf32>
    %249 = arith.maximumf %247, %248 : vector<10x60xf32>
    %c0_269 = arith.constant 0 : index
    %c0_270 = arith.constant 0 : index
    %250 = vector.load %arg28[%c0_269, %c0_270] : memref<60x10xf32, #tpu.memory_space<vmem>>, vector<60x10xf32>
    %cst_271 = arith.constant dense<0.000000e+00> : vector<10x10xf32>
    %251 = tpu.matmul %249, %250, %cst_271 {dimension_numbers = #tpu.dot_dimension_numbers<[1], [0], [0], [1], [0, 0, 1, 1], [], []>} : vector<10x60xf32>, vector<60x10xf32>, vector<10x10xf32> -> vector<10x10xf32>
    %c0_272 = arith.constant 0 : index
    %c0_273 = arith.constant 0 : index
    %252 = vector.load %arg29[%c0_272, %c0_273] : memref<2x10xf32, #tpu.memory_space<vmem>>, vector<2x10xf32>
    %cst_274 = arith.constant dense<0.000000e+00> : vector<2x10xf32>
    %253 = tpu.matmul %252, %251, %cst_274 {dimension_numbers = #tpu.dot_dimension_numbers<[1], [0], [0], [1], [0, 0, 1, 1], [], []>} : vector<2x10xf32>, vector<10x10xf32>, vector<2x10xf32> -> vector<2x10xf32>
    %cst_275 = arith.constant 4.000000e-02 : f32
    %254 = vector.broadcast %cst_275 : f32 to vector<2x10xf32>
    %255 = arith.mulf %253, %254 : vector<2x10xf32>
    %c0_276 = arith.constant 0 : index
    %c0_277 = arith.constant 0 : index
    %256 = vector.load %arg30[%c0_276, %c0_277] : memref<1x10xf32, #tpu.memory_space<vmem>>, vector<1x10xf32>
    %257 = vector.broadcast %256 : vector<1x10xf32> to vector<2x10xf32>
    %258 = arith.addf %255, %257 : vector<2x10xf32>
    %cst_278 = arith.constant dense<0xFF800000> : vector<2xf32>
    %259 = vector.multi_reduction <maximumf>, %258, %cst_278 [1] : vector<2x10xf32> to vector<2xf32>
    %260 = vector.shape_cast %259 : vector<2xf32> to vector<2x1xf32>
    %261 = vector.broadcast %260 : vector<2x1xf32> to vector<2x10xf32>
    %262 = arith.subf %258, %261 : vector<2x10xf32>
    %263 = math.exp %262 : vector<2x10xf32>
    %cst_279 = arith.constant dense<0.000000e+00> : vector<2xf32>
    %264 = vector.multi_reduction <add>, %263, %cst_279 [1] : vector<2x10xf32> to vector<2xf32>
    %265 = vector.shape_cast %264 : vector<2xf32> to vector<2x1xf32>
    %266 = math.log %265 : vector<2x1xf32>
    %267 = vector.broadcast %266 : vector<2x1xf32> to vector<2x10xf32>
    %268 = arith.subf %262, %267 : vector<2x10xf32>
    %c0_280 = arith.constant 0 : index
    %c0_281 = arith.constant 0 : index
    %269 = vector.load %arg31[%c0_280, %c0_281] : memref<2x10xf32, #tpu.memory_space<vmem>>, vector<2x10xf32>
    tpu.vector_store %arg31[%c0_280, %c0_281], %268 {strides = array<i32>} : memref<2x10xf32, #tpu.memory_space<vmem>>, vector<2x10xf32>,
    return
  }
}

</mosaic_0001>

<bundles_post_ra>
// kernel: forward.1
= control target key start
LH: loop header
LB: loop body
LE: loop exit
PB: predicated region body
PF: predicated region fallthrough
CT: control target
= control target key end

     0   :  { %s12037_s6 = smov 1   ;;  %s12038_s10 = smov 2   ;;  %s14194_s0 = inlined_call_operand.smem [shape: u32[32], index: -1, kind: input, shape index: {}] }
   0x1   :  { %s12105_s5 = sld [smem:[%s14194_s0]]   ;;  %s12039_s14 = smov 3  }
   0x2   :  { %s12110_s9 = sld [smem:[%s14194_s0 + %s12037_s6]]   ;;  %s12040_s18 = smov 4  }
   0x3   :  { %s12115_s13 = sld [smem:[%s14194_s0 + %s12038_s10]]   ;;  %s12041_s22 = smov 5  }
   0x4   :  { %s12120_s17 = sld [smem:[%s14194_s0 + %s12039_s14]]   ;;  %s12042_s26 = smov 6  }
   0x5   :  { %s12125_s21 = sld [smem:[%s14194_s0 + %s12040_s18]]   ;;  %s12043_s30 = smov 7  }
   0x6   :  { %s12130_s25 = sld [smem:[%s14194_s0 + %s12041_s22]]   ;;  %s12044_s4 = smov 8  }
   0x7   :  { %14209 = sst [smem:[#allocation47_spill]] %s12105_s5  ;;  %s12045_s10 = smov 9  }
   0x8   :  { %s12135_s29 = sld [smem:[%s14194_s0 + %s12042_s26]]   ;;  %s12046_s15 = smov 10  }
   0x9   :  { %s12140_s3 = sld [smem:[%s14194_s0 + %s12043_s30]]   ;;  %s12047_s20 = smov 11  }
   0xa   :  { %14210 = sst [smem:[#allocation48_spill]] %s12120_s17  ;;  %s12048_s26 = smov 12  }
   0xb   :  { %s12145_s8 = sld [smem:[%s14194_s0 + %s12044_s4]]   ;;  %s12049_s1 = smov 13  }
   0xc   :  { %s12150_s14 = sld [smem:[%s14194_s0 + %s12045_s10]]   ;;  %s12050_s7 = smov 14  }
   0xd   :  { %s12155_s19 = sld [smem:[%s14194_s0 + %s12046_s15]]   ;;  %s12051_s15 = smov 15  }
   0xe   :  { %s12160_s24 = sld [smem:[%s14194_s0 + %s12047_s20]]   ;;  %s12052_s22 = smov 16  }
   0xf   :  { %s12165_s30 = sld [smem:[%s14194_s0 + %s12048_s26]]   ;;  %s12053_s28 = smov 17  }
  0x10   :  { %s12170_s6 = sld [smem:[%s14194_s0 + %s12049_s1]]  }
  0x11   :  { %s12175_s12 = sld [smem:[%s14194_s0 + %s12050_s7]]   ;;  %s12054_s7 = smov 18  }
  0x12   :  { %14211 = sst [smem:[#allocation49_spill]] %s12150_s14 }
  0x13   :  { %s12180_s20 = sld [smem:[%s14194_s0 + %s12051_s15]]   ;;  %s12055_s15 = smov 19  }
  0x14   :  { %s12185_s27 = sld [smem:[%s14194_s0 + %s12052_s22]]   ;;  %s12056_s22 = smov 20  }
  0x15   :  { %14212 = sst [smem:[#allocation50_spill]] %s12165_s30 }
  0x16   :  { %s12190_s4 = sld [smem:[%s14194_s0 + %s12053_s28]]   ;;  %s12057_s28 = smov 21  }
  0x17   :  { %14213 = sst [smem:[#allocation51_spill]] %s12175_s12 }
  0x18   :  { %s12195_s17 = sld [smem:[%s14194_s0 + %s12054_s7]]   ;;  %s12058_s7 = smov 22  }
  0x19   :  { %s12200_s30 = sld [smem:[%s14194_s0 + %s12055_s15]]   ;;  %s12059_s15 = smov 23  }
  0x1a   :  { %14214 = sst [smem:[#allocation52_spill]] %s12185_s27 }
  0x1b   :  { %s12205_s14 = sld [smem:[%s14194_s0 + %s12056_s22]]   ;;  %s12060_s22 = smov 24  }
  0x1c   :  { %s12210_s5 = sld [smem:[%s14194_s0 + %s12057_s28]]   ;;  %s12061_s28 = smov 25  }
  0x1d   :  { %s12220_s27 = sld [smem:[%s14194_s0 + %s12059_s15]]   ;;  %s12063_s15 = smov 27  }
  0x1e   :  { %14215 = sst [smem:[#allocation53_spill]] %s12195_s17 }
  0x1f   :  { %s12215_s17 = sld [smem:[%s14194_s0 + %s12058_s7]]   ;;  %s12062_s7 = smov 26  }
  0x20   :  { %s12230_s12 = sld [smem:[%s14194_s0 + %s12061_s28]]   ;;  %s12065_s28 = smov 29  }
  0x21   :  { %14216 = sst [smem:[#allocation54_spill]] %s12205_s14 }
  0x22   :  { %s12225_s14 = sld [smem:[%s14194_s0 + %s12060_s22]]   ;;  %s12064_s22 = smov 28  }
  0x23   :  { %14218 = sst [smem:[#allocation56_spill]] %s12220_s27 }
  0x24   :  { %s12240_s27 = sld [smem:[%s14194_s0 + %s12063_s15]]   ;;  %s12067_s15 = smov 31  }
  0x25   :  { %14217 = sst [smem:[#allocation55_spill]] %s12215_s17 }
  0x26   :  { %14220 = sst [smem:[#allocation58_spill]] %s12230_s12 }
  0x27   :  { %s12235_s17 = sld [smem:[%s14194_s0 + %s12062_s7]]   ;;  %s12066_s7 = smov 30  }
  0x28   :  { %14219 = sst [smem:[#allocation57_spill]] %s12225_s14 }
  0x29   :  { %s12245_s14 = sld [smem:[%s14194_s0 + %s12064_s22]]  }
  0x2a   :  { %14222 = sst [smem:[#allocation60_spill]] %s12240_s27 }
  0x2b   :  { %s12250_s12 = sld [smem:[%s14194_s0 + %s12065_s28]]  }
  0x2c   :  { %s12260_s27 = sld [smem:[%s14194_s0 + %s12067_s15]]  }
  0x2d   :  { %14221 = sst [smem:[#allocation59_spill]] %s12235_s17 }
  0x2e   :  { %s12255_s17 = sld [smem:[%s14194_s0 + %s12066_s7]]  }
  0x2f   :  { %68 = vsyncpa [#allocation3], 0 }
  0x30   :  { %69 = vsyncpa [#allocation6], 0 }
  0x31   :  { %70 = vsyncpa [#allocation9], 0 }
  0x32   :  { %71 = vsyncpa [#allocation12], 0 }
  0x33   :  { %72 = vsyncpa [#allocation15], 0 }
  0x34   :  { %73 = vsyncpa [#allocation18], 0 }
  0x35   :  { %74 = vsyncpa [#allocation21], 0 }
  0x36   :  { %75 = vsyncpa [#allocation24], 0 }
  0x37   :  { %76 = vsyncpa [#allocation27], 0 }
  0x38   :  { %77 = vsyncpa [#allocation30], 0 }
  0x39   :  { %78 = vsyncpa [#allocation33], 0 }
  0x3a   :  { %79 = vsyncpa [#allocation4], 0  ;;  %s12068_s22 = smov [#allocation5]   ;;  %s11551_s0 = scalar_lea.hbm %s12115_s13, 1536 }
  0x3b   :  { %s99_s23 = sshll.u32 %s12068_s22, 4  ;;  %p11552_p0 = scmp.ne.s32.totalorder %s12115_s13, %s11551_s0  ;;  %s100_s23 = int_to_ptr.vmem [resolvable:$true] %s99_s23 }
  0x3c   :  { %p11555_p1 = scmp.lt.u32.totalorder %s11551_s0, %s12115_s13 }
  0x3e   :  { %p11557_p2 = pnand %p11555_p1, %p11552_p0 }
  0x40   :  { %11560 = shalt.err (!%p11557_p2)
}
  0x41   :  { %s11561_s26 = scalar_lea.vmem %s100_s23, 1536  ;;  %p11566_p4 = scmp.lt.s32.totalorder %s100_s23, %s100_s23 }
  0x42   :  { %p11562_p3 = scmp.ne.s32.totalorder %s100_s23, %s11561_s26  ;;  %p11567_p5 = scmp.lt.s32.totalorder %s11561_s26, %s11561_s26 }
  0x44   :  { %p11568_p6 = por %p11567_p5, %p11566_p4 }
  0x46   :  { %p11569_p7 = pnand %p11568_p6, %p11562_p3 }
  0x48   :  { %11572 = shalt.err (!%p11569_p7)
}
  0x49   :  { %s12069_s28 = smov 128   ;;  %s12070_s1 = smov 8  }
  0x4a   :  { %105 = dma.hbm_to_vmem [thread:$0]  %s12115_s13, 1536, %s100_s23, [#allocation6], %s12069_s28, %s12069_s28, %s12070_s1  }
  0x4b   :  { %s12071_s2 = smov [#allocation8]   ;;  %s12072_s10 = smov [#allocation11]  }
  0x4c   :  { %s125_s7 = sshll.u32 %s12071_s2, 4  ;;  %s149_s11 = sshll.u32 %s12072_s10, 4  ;;  %s126_s7 = int_to_ptr.vmem [resolvable:$true] %s125_s7  ;;  %s150_s11 = int_to_ptr.vmem [resolvable:$true] %s149_s11 }
  0x4d   :  { %s11573_s15 = scalar_lea.hbm %s12130_s25, 17664 }
  0x4e   :  { %p11574_p8 = scmp.ne.s32.totalorder %s12130_s25, %s11573_s15  ;;  %p11577_p9 = scmp.lt.u32.totalorder %s11573_s15, %s12130_s25 }
  0x50   :  { %p11579_p10 = pnand %p11577_p9, %p11574_p8 }
  0x52   :  { %11582 = shalt.err (!%p11579_p10)
}
  0x53   :  { %s11583_s16 = scalar_lea.vmem %s126_s7, 17664  ;;  %p11588_p12 = scmp.lt.s32.totalorder %s126_s7, %s126_s7 }
  0x54   :  { %p11584_p11 = scmp.ne.s32.totalorder %s126_s7, %s11583_s16  ;;  %p11589_p13 = scmp.lt.s32.totalorder %s11583_s16, %s11583_s16 }
  0x56   :  { %p11590_p0 = por %p11589_p13, %p11588_p12 }
  0x58   :  { %p11591_p1 = pnand %p11590_p0, %p11584_p11 }
  0x5a   :  { %11594 = shalt.err (!%p11591_p1)
}
  0x5b   :  { %s12073_s18 = smov 256   ;;  %s12074_s13 = smov 16  }
  0x5c   :  { %131 = dma.hbm_to_vmem [thread:$0]  %s12130_s25, 17664, %s126_s7, [#allocation9], %s12073_s18, %s12073_s18, %s12074_s13  }
  0x5d   :  { %s11595_s22 = scalar_lea.hbm %s12140_s3, 17664 }
  0x5e   :  { %p11596_p2 = scmp.ne.s32.totalorder %s12140_s3, %s11595_s22  ;;  %p11599_p3 = scmp.lt.u32.totalorder %s11595_s22, %s12140_s3 }
  0x60   :  { %p11601_p4 = pnand %p11599_p3, %p11596_p2 }
  0x62   :  { %11604 = shalt.err (!%p11601_p4)
}
  0x63   :  { %s11605_s23 = scalar_lea.vmem %s150_s11, 17664  ;;  %p11610_p6 = scmp.lt.s32.totalorder %s150_s11, %s150_s11 }
  0x64   :  { %p11606_p5 = scmp.ne.s32.totalorder %s150_s11, %s11605_s23  ;;  %p11611_p7 = scmp.lt.s32.totalorder %s11605_s23, %s11605_s23 }
  0x66   :  { %p11612_p8 = por %p11611_p7, %p11610_p6 }
  0x68   :  { %p11613_p9 = pnand %p11612_p8, %p11606_p5 }
  0x6a   :  { %11616 = shalt.err (!%p11613_p9)
}
  0x6b   :  { %155 = dma.hbm_to_vmem [thread:$0]  %s12140_s3, 17664, %s150_s11, [#allocation12], %s12073_s18, %s12073_s18, %s12074_s13  }
  0x6c   :  { %s12075_s25 = smov [#allocation14]   ;;  %s12076_s26 = smov [#allocation17]  }
  0x6d   :  { %s175_s0 = sshll.u32 %s12075_s25, 4  ;;  %s202_s2 = sshll.u32 %s12076_s26, 4  ;;  %s176_s0 = int_to_ptr.vmem [resolvable:$true] %s175_s0  ;;  %s203_s2 = int_to_ptr.vmem [resolvable:$true] %s202_s2 }
  0x6e   :  { %s11617_s7 = scalar_lea.hbm %s12155_s19, 18432 }
  0x6f   :  { %p11618_p10 = scmp.ne.s32.totalorder %s12155_s19, %s11617_s7  ;;  %p11621_p11 = scmp.lt.u32.totalorder %s11617_s7, %s12155_s19 }
  0x71   :  { %p11623_p12 = pnand %p11621_p11, %p11618_p10 }
  0x73   :  { %11626 = shalt.err (!%p11623_p12)
}
  0x74   :  { %s11627_s10 = scalar_lea.vmem %s176_s0, 18432  ;;  %p11632_p0 = scmp.lt.s32.totalorder %s176_s0, %s176_s0 }
  0x75   :  { %p11628_p13 = scmp.ne.s32.totalorder %s176_s0, %s11627_s10  ;;  %p11633_p1 = scmp.lt.s32.totalorder %s11627_s10, %s11627_s10 }
  0x77   :  { %p11634_p2 = por %p11633_p1, %p11632_p0 }
  0x79   :  { %p11635_p3 = pnand %p11634_p2, %p11628_p13 }
  0x7b   :  { %11638 = shalt.err (!%p11635_p3)
}
  0x7c   :  { %181 = dma.hbm_to_vmem [thread:$0]  %s12155_s19, 18432, %s176_s0, [#allocation15], %s12073_s18, %s12073_s18, %s12074_s13  }
  0x7d   :  { %s11639_s3 = scalar_lea.hbm %s12170_s6, 32 }
  0x7e   :  { %p11640_p4 = scmp.ne.s32.totalorder %s12170_s6, %s11639_s3  ;;  %p11643_p5 = scmp.lt.u32.totalorder %s11639_s3, %s12170_s6 }
  0x80   :  { %p11645_p6 = pnand %p11643_p5, %p11640_p4 }
  0x82   :  { %11648 = shalt.err (!%p11645_p6)
}
  0x83   :  { %s11649_s11 = scalar_lea.vmem %s203_s2, 32  ;;  %p11654_p8 = scmp.lt.s32.totalorder %s203_s2, %s203_s2 }
  0x84   :  { %p11650_p7 = scmp.ne.s32.totalorder %s203_s2, %s11649_s11  ;;  %p11655_p9 = scmp.lt.s32.totalorder %s11649_s11, %s11649_s11 }
  0x86   :  { %p11656_p10 = por %p11655_p9, %p11654_p8 }
  0x88   :  { %p11657_p11 = pnand %p11656_p10, %p11650_p7 }
  0x8a   :  { %11660 = shalt.err (!%p11657_p11)
}
  0x8b   :  { %205 = dma.hbm_to_vmem [thread:$0]  %s12170_s6, 32, %s203_s2, [#allocation18]  }
  0x8c   :  { %s12077_s15 = smov [#allocation20]   ;;  %s12078_s16 = smov [#allocation23]  }
  0x8d   :  { %s222_s19 = sshll.u32 %s12077_s15, 4  ;;  %s242_s22 = sshll.u32 %s12078_s16, 4  ;;  %s223_s19 = int_to_ptr.vmem [resolvable:$true] %s222_s19  ;;  %s243_s22 = int_to_ptr.vmem [resolvable:$true] %s242_s22 }
  0x8e   :  { %s11661_s23 = scalar_lea.hbm %s12180_s20, 32 }
  0x8f   :  { %p11662_p12 = scmp.ne.s32.totalorder %s12180_s20, %s11661_s23  ;;  %p11665_p13 = scmp.lt.u32.totalorder %s11661_s23, %s12180_s20 }
  0x91   :  { %p11667_p0 = pnand %p11665_p13, %p11662_p12 }
  0x93   :  { %11670 = shalt.err (!%p11667_p0)
}
  0x94   :  { %s11671_s25 = scalar_lea.vmem %s223_s19, 32  ;;  %p11676_p2 = scmp.lt.s32.totalorder %s223_s19, %s223_s19 }
  0x95   :  { %p11672_p1 = scmp.ne.s32.totalorder %s223_s19, %s11671_s25  ;;  %p11677_p3 = scmp.lt.s32.totalorder %s11671_s25, %s11671_s25 }
  0x97   :  { %p11678_p4 = por %p11677_p3, %p11676_p2 }
  0x99   :  { %p11679_p5 = pnand %p11678_p4, %p11672_p1 }
  0x9b   :  { %11682 = shalt.err (!%p11679_p5)
}
  0x9c   :  { %225 = dma.hbm_to_vmem [thread:$0]  %s12180_s20, 32, %s223_s19, [#allocation21]  }
  0x9d   :  { %s11683_s6 = scalar_lea.hbm %s12190_s4, 32 }
  0x9e   :  { %p11684_p6 = scmp.ne.s32.totalorder %s12190_s4, %s11683_s6  ;;  %p11687_p7 = scmp.lt.u32.totalorder %s11683_s6, %s12190_s4 }
  0xa0   :  { %p11689_p8 = pnand %p11687_p7, %p11684_p6 }
  0xa2   :  { %11692 = shalt.err (!%p11689_p8)
}
  0xa3   :  { %s11693_s0 = scalar_lea.vmem %s243_s22, 32  ;;  %p11698_p10 = scmp.lt.s32.totalorder %s243_s22, %s243_s22 }
  0xa4   :  { %p11694_p9 = scmp.ne.s32.totalorder %s243_s22, %s11693_s0  ;;  %p11699_p11 = scmp.lt.s32.totalorder %s11693_s0, %s11693_s0 }
  0xa6   :  { %p11700_p12 = por %p11699_p11, %p11698_p10 }
  0xa8   :  { %p11701_p13 = pnand %p11700_p12, %p11694_p9 }
  0xaa   :  { %11704 = shalt.err (!%p11701_p13)
}
  0xab   :  { %245 = dma.hbm_to_vmem [thread:$0]  %s12190_s4, 32, %s243_s22, [#allocation24]  }
  0xac   :  { %s12079_s26 = smov [#allocation26]   ;;  %s12080_s2 = smov [#allocation29]  }
  0xad   :  { %s262_s20 = sshll.u32 %s12079_s26, 4  ;;  %s282_s7 = sshll.u32 %s12080_s2, 4  ;;  %s263_s20 = int_to_ptr.vmem [resolvable:$true] %s262_s20  ;;  %s283_s7 = int_to_ptr.vmem [resolvable:$true] %s282_s7 }
  0xae   :  { %s11705_s10 = scalar_lea.hbm %s12200_s30, 32 }
  0xaf   :  { %p11706_p0 = scmp.ne.s32.totalorder %s12200_s30, %s11705_s10  ;;  %p11709_p1 = scmp.lt.u32.totalorder %s11705_s10, %s12200_s30 }
  0xb1   :  { %p11711_p2 = pnand %p11709_p1, %p11706_p0 }
  0xb3   :  { %11714 = shalt.err (!%p11711_p2)
}
  0xb4   :  { %s11715_s3 = scalar_lea.vmem %s263_s20, 32  ;;  %p11720_p4 = scmp.lt.s32.totalorder %s263_s20, %s263_s20 }
  0xb5   :  { %p11716_p3 = scmp.ne.s32.totalorder %s263_s20, %s11715_s3  ;;  %p11721_p5 = scmp.lt.s32.totalorder %s11715_s3, %s11715_s3 }
  0xb7   :  { %p11722_p6 = por %p11721_p5, %p11720_p4 }
  0xb9   :  { %p11723_p7 = pnand %p11722_p6, %p11716_p3 }
  0xbb   :  { %11726 = shalt.err (!%p11723_p7)
}
  0xbc   :  { %265 = dma.hbm_to_vmem [thread:$0]  %s12200_s30, 32, %s263_s20, [#allocation27]  }
  0xbd   :  { %s11727_s4 = scalar_lea.hbm %s12210_s5, 16 }
  0xbe   :  { %p11728_p8 = scmp.ne.s32.totalorder %s12210_s5, %s11727_s4  ;;  %p11731_p9 = scmp.lt.u32.totalorder %s11727_s4, %s12210_s5 }
  0xc0   :  { %p11733_p10 = pnand %p11731_p9, %p11728_p8 }
  0xc2   :  { %11736 = shalt.err (!%p11733_p10)
}
  0xc3   :  { %s11737_s11 = scalar_lea.vmem %s283_s7, 16  ;;  %s11741_s15 = scalar_lea.vmem %s283_s7, 32 }
  0xc4   :  { %p11738_p11 = scmp.ne.s32.totalorder %s283_s7, %s11737_s11  ;;  %p11742_p12 = scmp.lt.s32.totalorder %s283_s7, %s283_s7 }
  0xc5   :  { %p11743_p13 = scmp.lt.s32.totalorder %s11741_s15, %s11737_s11 }
  0xc7   :  { %p11744_p0 = por %p11743_p13, %p11742_p12 }
  0xc9   :  { %p11745_p1 = pnand %p11744_p0, %p11738_p11 }
  0xcb   :  { %11748 = shalt.err (!%p11745_p1)
}
  0xcc   :  { %285 = dma.hbm_to_vmem [thread:$0]  %s12210_s5, 16, %s283_s7, [#allocation30]  }
  0xcd   :  { %s12081_s30 = smov [#allocation2]   ;;  %s12082_s16 = smov [#allocation7]  }
  0xce   :  { %s87_s19 = sshll.u32 %s12081_s30, 4  ;;  %s113_s22 = sshll.u32 %s12082_s16, 4  ;;  %s88_s19 = int_to_ptr.vmem [resolvable:$true] %s87_s19  ;;  %s114_s22 = int_to_ptr.vmem [resolvable:$true] %s113_s22 }
  0xcf   :  { %s11749_s23 = scalar_lea.hbm %s12110_s9, 3072 }
  0xd0   :  { %p11750_p2 = scmp.ne.s32.totalorder %s12110_s9, %s11749_s23  ;;  %p11753_p3 = scmp.lt.u32.totalorder %s11749_s23, %s12110_s9 }
  0xd2   :  { %p11755_p4 = pnand %p11753_p3, %p11750_p2 }
  0xd4   :  { %11758 = shalt.err (!%p11755_p4)
}
  0xd5   :  { %s11759_s25 = scalar_lea.vmem %s88_s19, 3072  ;;  %p11764_p6 = scmp.lt.s32.totalorder %s88_s19, %s88_s19 }
  0xd6   :  { %p11760_p5 = scmp.ne.s32.totalorder %s88_s19, %s11759_s25  ;;  %p11765_p7 = scmp.lt.s32.totalorder %s11759_s25, %s11759_s25 }
  0xd8   :  { %p11766_p8 = por %p11765_p7, %p11764_p6 }
  0xda   :  { %p11767_p9 = pnand %p11766_p8, %p11760_p5 }
  0xdc   :  { %11770 = shalt.err (!%p11767_p9)
}
  0xdd   :  { %93 = dma.hbm_to_vmem [thread:$0]  %s12110_s9, 3072, %s88_s19, [#allocation3], %s12069_s28, %s12069_s28, %s12070_s1  }
  0xde   :  { %s11771_s5 = scalar_lea.hbm %s12125_s21, 3072 }
  0xdf   :  { %p11772_p10 = scmp.ne.s32.totalorder %s12125_s21, %s11771_s5  ;;  %p11775_p11 = scmp.lt.u32.totalorder %s11771_s5, %s12125_s21 }
  0xe1   :  { %p11777_p12 = pnand %p11775_p11, %p11772_p10 }
  0xe3   :  { %11780 = shalt.err (!%p11777_p12)
}
  0xe4   :  { %s11781_s6 = scalar_lea.vmem %s114_s22, 3072  ;;  %p11786_p0 = scmp.lt.s32.totalorder %s114_s22, %s114_s22 }
  0xe5   :  { %p11782_p13 = scmp.ne.s32.totalorder %s114_s22, %s11781_s6  ;;  %p11787_p1 = scmp.lt.s32.totalorder %s11781_s6, %s11781_s6 }
  0xe7   :  { %p11788_p2 = por %p11787_p1, %p11786_p0 }
  0xe9   :  { %p11789_p3 = pnand %p11788_p2, %p11782_p13 }
  0xeb   :  { %11792 = shalt.err (!%p11789_p3)
}
  0xec   :  { %119 = dma.hbm_to_vmem [thread:$0]  %s12125_s21, 3072, %s114_s22, [#allocation6], %s12073_s18, %s12073_s18, %s12074_s13  }
  0xed   :  { %s12083_s9 = smov [#allocation10]   ;;  %s12084_s26 = smov [#allocation13]  }
  0xee   :  { %s137_s0 = sshll.u32 %s12083_s9, 4  ;;  %s161_s20 = sshll.u32 %s12084_s26, 4  ;;  %s138_s0 = int_to_ptr.vmem [resolvable:$true] %s137_s0  ;;  %s162_s20 = int_to_ptr.vmem [resolvable:$true] %s161_s20 }
  0xef   :  { %s11793_s2 = scalar_lea.hbm %s12135_s29, 17664 }
  0xf0   :  { %p11794_p4 = scmp.ne.s32.totalorder %s12135_s29, %s11793_s2  ;;  %p11797_p5 = scmp.lt.u32.totalorder %s11793_s2, %s12135_s29 }
  0xf2   :  { %p11799_p6 = pnand %p11797_p5, %p11794_p4 }
  0xf4   :  { %11802 = shalt.err (!%p11799_p6)
}
  0xf5   :  { %s11803_s7 = scalar_lea.vmem %s138_s0, 17664  ;;  %p11808_p8 = scmp.lt.s32.totalorder %s138_s0, %s138_s0 }
  0xf6   :  { %p11804_p7 = scmp.ne.s32.totalorder %s138_s0, %s11803_s7  ;;  %p11809_p9 = scmp.lt.s32.totalorder %s11803_s7, %s11803_s7 }
  0xf8   :  { %p11810_p10 = por %p11809_p9, %p11808_p8 }
  0xfa   :  { %p11811_p11 = pnand %p11810_p10, %p11804_p7 }
  0xfc   :  { %11814 = shalt.err (!%p11811_p11)
}
  0xfd   :  { %143 = dma.hbm_to_vmem [thread:$0]  %s12135_s29, 17664, %s138_s0, [#allocation9], %s12073_s18, %s12073_s18, %s12074_s13  }
  0xfe   :  { %s11815_s21 = scalar_lea.hbm %s12145_s8, 9216 }
  0xff   :  { %p11816_p12 = scmp.ne.s32.totalorder %s12145_s8, %s11815_s21  ;;  %p11819_p13 = scmp.lt.u32.totalorder %s11815_s21, %s12145_s8 }
 0x101   :  { %p11821_p0 = pnand %p11819_p13, %p11816_p12 }
 0x103   :  { %11824 = shalt.err (!%p11821_p0)
}
 0x104   :  { %s11825_s10 = scalar_lea.vmem %s162_s20, 9216  ;;  %p11830_p2 = scmp.lt.s32.totalorder %s162_s20, %s162_s20 }
 0x105   :  { %p11826_p1 = scmp.ne.s32.totalorder %s162_s20, %s11825_s10  ;;  %p11831_p3 = scmp.lt.s32.totalorder %s11825_s10, %s11825_s10 }
 0x107   :  { %p11832_p4 = por %p11831_p3, %p11830_p2 }
 0x109   :  { %p11833_p5 = pnand %p11832_p4, %p11826_p1 }
 0x10b   :  { %11836 = shalt.err (!%p11833_p5)
}
 0x10c   :  { %167 = dma.hbm_to_vmem [thread:$0]  %s12145_s8, 9216, %s162_s20, [#allocation12], %s12073_s18, %s12073_s18, %s12074_s13  }
 0x10d   :  { %s12085_s29 = smov [#allocation16]   ;;  %s12086_s4 = smov [#allocation19]  }
 0x10e   :  { %s187_s3 = sshll.u32 %s12085_s29, 4  ;;  %s212_s11 = sshll.u32 %s12086_s4, 4  ;;  %s188_s3 = int_to_ptr.vmem [resolvable:$true] %s187_s3  ;;  %s213_s11 = int_to_ptr.vmem [resolvable:$true] %s212_s11 }
 0x10f   :  { %s11837_s15 = scalar_lea.hbm %s12160_s24, 18432 }
 0x110   :  { %p11838_p6 = scmp.ne.s32.totalorder %s12160_s24, %s11837_s15  ;;  %p11841_p7 = scmp.lt.u32.totalorder %s11837_s15, %s12160_s24 }
 0x112   :  { %p11843_p8 = pnand %p11841_p7, %p11838_p6 }
 0x114   :  { %11846 = shalt.err (!%p11843_p8)
}
 0x115   :  { %s11847_s30 = scalar_lea.vmem %s188_s3, 18432  ;;  %p11852_p10 = scmp.lt.s32.totalorder %s188_s3, %s188_s3 }
 0x116   :  { %p11848_p9 = scmp.ne.s32.totalorder %s188_s3, %s11847_s30  ;;  %p11853_p11 = scmp.lt.s32.totalorder %s11847_s30, %s11847_s30 }
 0x118   :  { %p11854_p12 = por %p11853_p11, %p11852_p10 }
 0x11a   :  { %p11855_p13 = pnand %p11854_p12, %p11848_p9 }
 0x11c   :  { %11858 = shalt.err (!%p11855_p13)
}
 0x11d   :  { %s14223_s8 = sld [smem:[#allocation51_spill]] }
 0x11e   :  { %193 = dma.hbm_to_vmem [thread:$0]  %s12160_s24, 18432, %s188_s3, [#allocation15], %s12073_s18, %s12073_s18, %s12074_s13  }
 0x123   :  { %s11859_s19 = scalar_lea.hbm %s14223_s8, 32 }
 0x124   :  { %p11860_p0 = scmp.ne.s32.totalorder %s14223_s8, %s11859_s19  ;;  %p11863_p1 = scmp.lt.u32.totalorder %s11859_s19, %s14223_s8 }
 0x126   :  { %p11865_p2 = pnand %p11863_p1, %p11860_p0 }
 0x128   :  { %11868 = shalt.err (!%p11865_p2)
}
 0x129   :  { %s11869_s16 = scalar_lea.vmem %s213_s11, 32  ;;  %p11874_p4 = scmp.lt.s32.totalorder %s213_s11, %s213_s11 }
 0x12a   :  { %p11870_p3 = scmp.ne.s32.totalorder %s213_s11, %s11869_s16  ;;  %p11875_p5 = scmp.lt.s32.totalorder %s11869_s16, %s11869_s16 }
 0x12c   :  { %p11876_p6 = por %p11875_p5, %p11874_p4 }
 0x12e   :  { %p11877_p7 = pnand %p11876_p6, %p11870_p3 }
 0x130   :  { %11880 = shalt.err (!%p11877_p7)
}
 0x131   :  { %s14224_s22 = sld [smem:[#allocation52_spill]]  ;;  %s12087_s23 = smov [#allocation22]  }
 0x132   :  { %215 = dma.hbm_to_vmem [thread:$0]  %s14223_s8, 32, %s213_s11, [#allocation18]  }
 0x133   :  { %s232_s24 = sshll.u32 %s12087_s23, 4  ;;  %s12088_s25 = smov [#allocation25]   ;;  %s233_s24 = int_to_ptr.vmem [resolvable:$true] %s232_s24 }
 0x134   :  { %s252_s5 = sshll.u32 %s12088_s25, 4  ;;  %s253_s5 = int_to_ptr.vmem [resolvable:$true] %s252_s5 }
 0x137   :  { %s11881_s6 = scalar_lea.hbm %s14224_s22, 32 }
 0x138   :  { %p11882_p8 = scmp.ne.s32.totalorder %s14224_s22, %s11881_s6  ;;  %p11885_p9 = scmp.lt.u32.totalorder %s11881_s6, %s14224_s22 }
 0x13a   :  { %p11887_p10 = pnand %p11885_p9, %p11882_p8 }
 0x13c   :  { %11890 = shalt.err (!%p11887_p10)
}
 0x13d   :  { %s11891_s9 = scalar_lea.vmem %s233_s24, 32  ;;  %p11896_p12 = scmp.lt.s32.totalorder %s233_s24, %s233_s24 }
 0x13e   :  { %p11892_p11 = scmp.ne.s32.totalorder %s233_s24, %s11891_s9  ;;  %p11897_p13 = scmp.lt.s32.totalorder %s11891_s9, %s11891_s9 }
 0x140   :  { %p11898_p0 = por %p11897_p13, %p11896_p12 }
 0x142   :  { %p11899_p1 = pnand %p11898_p0, %p11892_p11 }
 0x144   :  { %11902 = shalt.err (!%p11899_p1)
}
 0x145   :  { %s14225_s0 = sld [smem:[#allocation53_spill]] }
 0x146   :  { %235 = dma.hbm_to_vmem [thread:$0]  %s14224_s22, 32, %s233_s24, [#allocation21]  }
 0x14b   :  { %s11903_s26 = scalar_lea.hbm %s14225_s0, 32 }
 0x14c   :  { %p11904_p2 = scmp.ne.s32.totalorder %s14225_s0, %s11903_s26  ;;  %p11907_p3 = scmp.lt.u32.totalorder %s11903_s26, %s14225_s0 }
 0x14e   :  { %p11909_p4 = pnand %p11907_p3, %p11904_p2 }
 0x150   :  { %11912 = shalt.err (!%p11909_p4)
}
 0x151   :  { %s11913_s20 = scalar_lea.vmem %s253_s5, 32  ;;  %p11918_p6 = scmp.lt.s32.totalorder %s253_s5, %s253_s5 }
 0x152   :  { %p11914_p5 = scmp.ne.s32.totalorder %s253_s5, %s11913_s20  ;;  %p11919_p7 = scmp.lt.s32.totalorder %s11913_s20, %s11913_s20 }
 0x154   :  { %p11920_p8 = por %p11919_p7, %p11918_p6 }
 0x156   :  { %p11921_p9 = pnand %p11920_p8, %p11914_p5 }
 0x158   :  { %11924 = shalt.err (!%p11921_p9)
}
 0x159   :  { %s14226_s2 = sld [smem:[#allocation54_spill]]  ;;  %s12089_s7 = smov [#allocation28]  }
 0x15a   :  { %255 = dma.hbm_to_vmem [thread:$0]  %s14225_s0, 32, %s253_s5, [#allocation24]  }
 0x15b   :  { %s272_s21 = sshll.u32 %s12089_s7, 4  ;;  %s12090_s10 = smov [#allocation31]   ;;  %s273_s21 = int_to_ptr.vmem [resolvable:$true] %s272_s21 }
 0x15c   :  { %s291_s29 = sshll.u32 %s12090_s10, 4  ;;  %s292_s29 = int_to_ptr.vmem [resolvable:$true] %s291_s29 }
 0x15f   :  { %s11925_s3 = scalar_lea.hbm %s14226_s2, 32 }
 0x160   :  { %p11926_p10 = scmp.ne.s32.totalorder %s14226_s2, %s11925_s3  ;;  %p11929_p11 = scmp.lt.u32.totalorder %s11925_s3, %s14226_s2 }
 0x162   :  { %p11931_p12 = pnand %p11929_p11, %p11926_p10 }
 0x164   :  { %11934 = shalt.err (!%p11931_p12)
}
 0x165   :  { %s11935_s4 = scalar_lea.vmem %s273_s21, 32  ;;  %p11940_p0 = scmp.lt.s32.totalorder %s273_s21, %s273_s21 }
 0x166   :  { %p11936_p13 = scmp.ne.s32.totalorder %s273_s21, %s11935_s4  ;;  %p11941_p1 = scmp.lt.s32.totalorder %s11935_s4, %s11935_s4 }
 0x168   :  { %p11942_p2 = por %p11941_p1, %p11940_p0 }
 0x16a   :  { %p11943_p3 = pnand %p11942_p2, %p11936_p13 }
 0x16c   :  { %11946 = shalt.err (!%p11943_p3)
}
 0x16d   :  { %s14227_s11 = sld [smem:[#allocation55_spill]] }
 0x16e   :  { %275 = dma.hbm_to_vmem [thread:$0]  %s14226_s2, 32, %s273_s21, [#allocation27]  }
 0x173   :  { %s11947_s15 = scalar_lea.hbm %s14227_s11, 5888 }
 0x174   :  { %p11948_p4 = scmp.ne.s32.totalorder %s14227_s11, %s11947_s15  ;;  %p11951_p5 = scmp.lt.u32.totalorder %s11947_s15, %s14227_s11 }
 0x176   :  { %p11953_p6 = pnand %p11951_p5, %p11948_p4 }
 0x178   :  { %11956 = shalt.err (!%p11953_p6)
}
 0x179   :  { %s11957_s30 = scalar_lea.vmem %s292_s29, 5888  ;;  %p11962_p8 = scmp.lt.s32.totalorder %s292_s29, %s292_s29 }
 0x17a   :  { %p11958_p7 = scmp.ne.s32.totalorder %s292_s29, %s11957_s30  ;;  %p11963_p9 = scmp.lt.s32.totalorder %s11957_s30, %s11957_s30 }
 0x17c   :  { %p11964_p10 = por %p11963_p9, %p11962_p8 }
 0x17e   :  { %p11965_p11 = pnand %p11964_p10, %p11958_p7 }
 0x180   :  { %11968 = shalt.err (!%p11965_p11)
}
 0x181   :  { %s14228_s8 = sld [smem:[#allocation56_spill]]  ;;  %s12091_s19 = smov [#allocation32]  }
 0x182   :  { %297 = dma.hbm_to_vmem [thread:$0]  %s14227_s11, 5888, %s292_s29, [#allocation30], %s12073_s18, %s12073_s18, %s12074_s13  }
 0x183   :  { %s303_s16 = sshll.u32 %s12091_s19, 4  ;;  %s304_s16 = int_to_ptr.vmem [resolvable:$true] %s303_s16 }
 0x187   :  { %s11969_s22 = scalar_lea.hbm %s14228_s8, 2944 }
 0x188   :  { %p11970_p12 = scmp.ne.s32.totalorder %s14228_s8, %s11969_s22  ;;  %p11973_p13 = scmp.lt.u32.totalorder %s11969_s22, %s14228_s8 }
 0x18a   :  { %p11975_p0 = pnand %p11973_p13, %p11970_p12 }
 0x18c   :  { %11978 = shalt.err (!%p11975_p0)
}
 0x18d   :  { %s11979_s23 = scalar_lea.vmem %s304_s16, 2944  ;;  %p11984_p2 = scmp.lt.s32.totalorder %s304_s16, %s304_s16 }
 0x18e   :  { %p11980_p1 = scmp.ne.s32.totalorder %s304_s16, %s11979_s23  ;;  %p11985_p3 = scmp.lt.s32.totalorder %s11979_s23, %s11979_s23 }
 0x190   :  { %p11986_p4 = por %p11985_p3, %p11984_p2 }
 0x192   :  { %p11987_p5 = pnand %p11986_p4, %p11980_p1 }
 0x194   :  { %11990 = shalt.err (!%p11987_p5)
}
 0x195   :  { %309 = dma.hbm_to_vmem [thread:$0]  %s14228_s8, 2944, %s304_s16, [#allocation33], %s12069_s28, %s12069_s28, %s12070_s1  }
 0x196   :  { %12013 = dma.done.wait [#allocation3], 3072  }
 0x197   :  { %12014 = vsyncadd [#allocation3], 4294964224 }
 0x198   :  { %12015 = dma.done.wait [#allocation6], 4608  }
 0x199   :  { %12016 = vsyncadd [#allocation6], 4294962688 }
 0x19a   :  { %12017 = dma.done.wait [#allocation9], 35328  }
 0x19b   :  { %12018 = vsyncadd [#allocation9], 4294931968 }
 0x19c   :  { %12019 = dma.done.wait [#allocation12], 26880  }
 0x19d   :  { %12020 = vsyncadd [#allocation12], 4294940416 }
 0x19e   :  { %12021 = dma.done.wait [#allocation15], 36864  }
 0x19f   :  { %12022 = vsyncadd [#allocation15], 4294930432 }
 0x1a0   :  { %12023 = dma.done.wait [#allocation18], 64  }
 0x1a1   :  { %12024 = vsyncadd [#allocation18], 4294967232 }
 0x1a2   :  { %12025 = dma.done.wait [#allocation21], 64  }
 0x1a3   :  { %12026 = vsyncadd [#allocation21], 4294967232 }
 0x1a4   :  { %12027 = dma.done.wait [#allocation24], 64  }
 0x1a5   :  { %12028 = vsyncadd [#allocation24], 4294967232 }
 0x1a6   :  { %12029 = dma.done.wait [#allocation27], 64  }
 0x1a7   :  { %12030 = vsyncadd [#allocation27], 4294967232 }
 0x1a8   :  { %12031 = dma.done.wait [#allocation30], 5904  }
 0x1a9   :  { %12032 = vsyncadd [#allocation30], 4294961392 }
 0x1aa   :  { %12033 = dma.done.wait [#allocation33], 2944  }
 0x1ab   :  { %12034 = vsyncadd [#allocation33], 4294964352  ;;  %v12092_v0 = vmov 0.0   ;;  %vm433_vm0 = vcmask 1045504   ;;  %v564_v1 = vld [vmem:[#allocation7 + $0x48] sm:$0xff]  ;;  %v566_v2 = vld [vmem:[#allocation7 + $0x58] sm:$0xff] }
 0x1ac   :  { %641 = vmatprep.mubr.f32.mxu1 %v12092_v0  ;;  %504 = vmatprep.mubr.f32.mxu0 %v12092_v0  ;;  %v563_v3 = vld [vmem:[#allocation7 + $0x40] sm:$0xff]  ;;  %v9671_v4 = vpack.c.bf16 %v566_v2, %v564_v1  ;;  %v565_v5 = vld [vmem:[#allocation7 + $0x50] sm:$0xff]  ;;  %v568_v6 = vld [vmem:[#allocation7 + $0x68] sm:$0xff]  ;;  %vm12093_vm1 = vmmov 1   ;;  %s14231_s28 = sld [smem:[#allocation47_spill]]  ;;  %vm408_vm3 = vcmask 244736  }
 0x1ad   :  { %v570_v7 = vld [vmem:[#allocation7 + $0x78] sm:$0x3f]  ;;  %v9673_v8 = vpack.c.bf16 %v565_v5, %v563_v3  ;;  %vm12378_vm2 = vmpackc.low %vm433_vm0, %vm12093_vm1  ;;  %v567_v11 = vld [vmem:[#allocation7 + $0x60] sm:$0xff]  ;;  %vm715_vm4 = vcmask 1043456   ;;  %vm690_vm6 = vcmask 490496   ;;  %vm1364_vm7 = vcmask 424960  }
 0x1ae   :  { %v9675_v10 = vpack.c.bf16 %v570_v7, %v568_v6  ;;  %v569_v12 = vld [vmem:[#allocation7 + $0x70] sm:$0x3f]  ;;  %9672 = vmatprep.subr.bf16.mxu1 %v9671_v4  ;;  %v401_v14 = vld [vmem:[#allocation7 + $0x8] sm:$0xff]  ;;  %v403_v15 = vld [vmem:[#allocation7 + $0x18] sm:$0xff]  ;;  %s14234_s1 = sld [smem:[#allocation57_spill]]  ;;  %vm4731_vm8 = vcmask 785408  }
 0x1af   :  { %9674 = vmatpush1.bf16.msra.mxu1 %v9673_v8  ;;  %v9678_v13 = vpack.c.bf16 %v569_v12, %v567_v11  ;;  %v9661_v16 = vpack.c.bf16 %v403_v15, %v401_v14  ;;  %v400_v17 = vld [vmem:[#allocation7] sm:$0xff]  ;;  %v402_v18 = vld [vmem:[#allocation7 + $0x10] sm:$0xff]  ;;  %v405_v20 = vld [vmem:[#allocation7 + $0x28] sm:$0xff]  ;;  %s14235_s18 = sld [smem:[#allocation49_spill]]  ;;  %vm4952_vm9 = vcmask 261120   ;;  %vm5459_vm10 = vcmask 523264  }
 0x1b0   :  { %9677 = vmatprep.subr.msk.bf16.mxu1 %vm12378_vm2, %v9675_v10  ;;  %v9663_v19 = vpack.c.bf16 %v402_v18, %v400_v17  ;;  %v407_v21 = vld [vmem:[#allocation7 + $0x38] sm:$0x3f]  ;;  %v404_v22 = vld [vmem:[#allocation7 + $0x20] sm:$0xff]  ;;  %v406_v25 = vld [vmem:[#allocation7 + $0x30] sm:$0x3f]  ;;  %s14236_s13 = sld [smem:[#allocation58_spill]] }
 0x1b1   :  { %9662 = vmatprep.subr.bf16.mxu0 %v9661_v16  ;;  %v9665_v24 = vpack.c.bf16 %v407_v21, %v405_v20  ;;  %v9668_v26 = vpack.c.bf16 %v406_v25, %v404_v22  ;;  %v989_v27 = vld [vmem:[#allocation7 + $0x88] sm:$0xff]  ;;  %v991_v28 = vld [vmem:[#allocation7 + $0x98] sm:$0xff]  ;;  %v988_v29 = vld [vmem:[#allocation7 + $0x80] sm:$0xff]  ;;  %s14237_s24 = sld [smem:[#allocation59_spill]]  ;;  %s14238_s25 = sld [smem:[#allocation60_spill]]  ;;  %vm8056_vm11 = vcmask 687104  }
 0x1b2   :  { %v12385_v23 = vld [vmem:[%s14231_s28] sm:$0xff]  ;;  %9664 = vmatpush1.bf16.msra.mxu0 %v9663_v19  ;;  %v9717_v30 = vpack.c.bf16 %v991_v28, %v989_v27  ;;  %v990_v31 = vld [vmem:[#allocation7 + $0x90] sm:$0xff]  ;;  %v993_v32 = vld [vmem:[#allocation7 + $0xa8] sm:$0xff]  ;;  %s14239_s5 = sld [smem:[#allocation50_spill]]  ;;  %s14240_s6 = sld [smem:[#allocation48_spill]]  ;;  %vm8234_vm12 = vcmask 113664  }
 0x1b3   :  { %9680 = vmatpush1.bf16.msk.msra.mxu1 %vm12378_vm2, %v9678_v13  ;;  %9667 = vmatprep.subr.msk.bf16.mxu0 %vm12378_vm2, %v9665_v24  ;;  %v995_v33 = vld [vmem:[#allocation7 + $0xb8] sm:$0x3f]  ;;  %v9719_v34 = vpack.c.bf16 %v990_v31, %v988_v29  ;;  %v992_v36 = vld [vmem:[#allocation7 + $0xa0] sm:$0xff]  ;;  %v994_v37 = vld [vmem:[#allocation7 + $0xb0] sm:$0x3f]  ;;  %vm12095_vm13 = vmmov 0  }
 0x1b4   :  { %v9721_v35 = vpack.c.bf16 %v995_v33, %v993_v32  ;;  %9718 = vmatprep.subr.bf16.mxu1 %v9717_v30  ;;  %v385_v38 = vld [vmem:[%s14231_s28 + $0x8] sm:$0xff]  ;;  %v9724_v39 = vpack.c.bf16 %v994_v37, %v992_v36  ;;  %v386_v40 = vld [vmem:[%s14231_s28 + $0x10] sm:$0xff]  ;;  %v387_v41 = vld [vmem:[%s14231_s28 + $0x18] sm:$0xff]  ;;  %vm8690_vm14 = vcmask 1041408   ;;  %vm8686_vm0 = vcmask 80896  }
 0x1b5   :  { %v388_v42 = vld [vmem:[%s14231_s28 + $0x20] sm:$0xff]  ;;  %v389_v43 = vld [vmem:[%s14231_s28 + $0x28] sm:$0xff]  ;;  %v390_v44 = vld [vmem:[%s14231_s28 + $0x30] sm:$0xff] }
 0x1b6   :  { %8855 = vmatmul.mubr.msk.f32.vlgmr.msra.gmra.mrb[0].mxu1 %vm408_vm3, %v12385_v23  ;;  %9670 = vmatpush1.bf16.msk.msra.mxu0 %vm12378_vm2, %v9668_v26  ;;  %v391_v45 = vld [vmem:[%s14231_s28 + $0x38] sm:$0xf]  ;;  %v1319_v47 = vld [vmem:[#allocation8 + $0x8] sm:$0xff]  ;;  %v1318_v49 = vld [vmem:[#allocation8] sm:$0xff] }
 0x1b7   :  { %647 = vmatprep.mubr.f32.mxu1 %v12092_v0  ;;  %9720 = vmatpush1.bf16.msra.mxu1 %v9719_v34  ;;  %v1321_v48 = vld [vmem:[#allocation8 + $0x18] sm:$0xff]  ;;  %v1320_v52 = vld [vmem:[#allocation8 + $0x10] sm:$0xff]  ;;  %v1323_v53 = vld [vmem:[#allocation8 + $0x28] sm:$0xff] }
 0x1b8   :  { %9723 = vmatprep.subr.msk.bf16.mxu1 %vm12378_vm2, %v9721_v35  ;;  %v9745_v51 = vpack.c.bf16 %v1321_v48, %v1319_v47  ;;  %v1325_v54 = vld [vmem:[#allocation8 + $0x38] sm:$0xff]  ;;  %v9747_v55 = vpack.c.bf16 %v1320_v52, %v1318_v49  ;;  %v1322_v57 = vld [vmem:[#allocation8 + $0x20] sm:$0xff]  ;;  %v1324_v58 = vld [vmem:[#allocation8 + $0x30] sm:$0xff] }
 0x1b9   :  { %8845 = vmatmul.mubr.msk.f32.vlgmr.msra.gmra.mrb[0].mxu0 %vm408_vm3, %v12385_v23  ;;  %v9749_v56 = vpack.c.bf16 %v1325_v54, %v1323_v53  ;;  %v1327_v59 = vld [vmem:[#allocation8 + $0x48] sm:$0xff]  ;;  %v1329_v60 = vld [vmem:[#allocation8 + $0x58] sm:$0xff]  ;;  %v9751_v63 = vpack.c.bf16 %v1324_v58, %v1322_v57  ;;  %v1326_v5 = vld [vmem:[#allocation8 + $0x40] sm:$0xff] }
 0x1ba   :  { %8856 = vmatmul.mubr.msk.f32.gmra.mrb[2].mxu1 %vm408_vm3, %v385_v38  ;;  %510 = vmatprep.mubr.f32.mxu0 %v12092_v0  ;;  %v9753_v4 = vpack.c.bf16 %v1329_v60, %v1327_v59  ;;  %v1328_v6 = vld [vmem:[#allocation8 + $0x50] sm:$0xff]  ;;  %v1331_v8 = vld [vmem:[#allocation8 + $0x68] sm:$0xff]  ;;  %v1333_v10 = vld [vmem:[#allocation8 + $0x78] sm:$0xff] }
 0x1bb   :  { %653 = vmatprep.mubr.f32.mxu1 %v12092_v0  ;;  %9726 = vmatpush1.bf16.msk.msra.mxu1 %vm12378_vm2, %v9724_v39  ;;  %v9755_v13 = vpack.c.bf16 %v1328_v6, %v1326_v5  ;;  %v9757_v17 = vpack.c.bf16 %v1333_v10, %v1331_v8  ;;  %v1330_v18 = vld [vmem:[#allocation8 + $0x60] sm:$0xff]  ;;  %v1332_v19 = vld [vmem:[#allocation8 + $0x70] sm:$0xff]  ;;  %v1335_v21 = vld [vmem:[#allocation8 + $0x88] sm:$0xff] }
 0x1bc   :  { %9746 = vmatprep.subr.bf16.mxu1 %v9745_v51  ;;  %v1337_v22 = vld [vmem:[#allocation8 + $0x98] sm:$0xff]  ;;  %v9759_v25 = vpack.c.bf16 %v1332_v19, %v1330_v18  ;;  %v1334_v30 = vld [vmem:[#allocation8 + $0x80] sm:$0xff]  ;;  %v1336_v31 = vld [vmem:[#allocation8 + $0x90] sm:$0xff] }
 0x1bd   :  { %8846 = vmatmul.mubr.msk.f32.gmra.mrb[2].mxu0 %vm408_vm3, %v385_v38  ;;  %v9761_v29 = vpack.c.bf16 %v1337_v22, %v1335_v21  ;;  %v1339_v33 = vld [vmem:[#allocation8 + $0xa8] sm:$0xff]  ;;  %v1341_v34 = vld [vmem:[#allocation8 + $0xb8] sm:$0xff]  ;;  %v9763_v37 = vpack.c.bf16 %v1336_v31, %v1334_v30  ;;  %v1342_v54 = vld [vmem:[#allocation8 + $0xc0] sm:$0xff] }
 0x1be   :  { %8857 = vmatmul.mubr.msk.f32.gmra.mrb[4].mxu1 %vm408_vm3, %v386_v40  ;;  %516 = vmatprep.mubr.f32.mxu0 %v12092_v0  ;;  %v1347_v57 = vld [vmem:[#allocation8 + $0xe8] sm:$0xff]  ;;  %v1349_v58 = vld [vmem:[#allocation8 + $0xf8] sm:$0xff]  ;;  %v1346_v5 = vld [vmem:[#allocation8 + $0xe0] sm:$0xff] }
 0x1bf   :  { %659 = vmatprep.mubr.f32.mxu1 %v12092_v0  ;;  %v1348_v6 = vld [vmem:[#allocation8 + $0xf0] sm:$0xff]  ;;  %v1351_v8 = vld [vmem:[#allocation8 + $0x108] sm:$0xff]  ;;  %v1353_v10 = vld [vmem:[#allocation8 + $0x118] sm:$0xff] }
 0x1c0   :  { %vm12491_vm5 = vmpackc.low %vm715_vm4, %vm12093_vm1  ;;  %v9777_v22 = vpack.c.bf16 %v1353_v10, %v1351_v8  ;;  %v398_v8 = vld [vmem:[#allocation2 + $0x30] sm:$0xff]  ;;  %v399_v10 = vld [vmem:[#allocation2 + $0x38] sm:$0xf] }
 0x1c1   :  { %8847 = vmatmul.mubr.msk.f32.gmra.mrb[4].mxu0 %vm408_vm3, %v386_v40  ;;  %v9366_v9 = vld [vmem:[#allocation29] ss:$0 sm:$0xff]  ;;  %vm11214_vm15 = vmpackc.low %vm8690_vm14, %vm12093_vm1 }
 0x1c2   :  { %8858 = vmatmul.mubr.msk.f32.gmra.mrb[6].mxu1 %vm408_vm3, %v387_v41  ;;  %522 = vmatprep.mubr.f32.mxu0 %v12092_v0 }
 0x1c3   :  { %665 = vmatprep.mubr.f32.mxu1 %v12092_v0 }
 0x1c5   :  { %8848 = vmatmul.mubr.msk.f32.gmra.mrb[6].mxu0 %vm408_vm3, %v387_v41 }
 0x1c6   :  { %8859 = vmatmul.mubr.msk.f32.gmra.mrb[8].mxu1 %vm408_vm3, %v388_v42  ;;  %528 = vmatprep.mubr.f32.mxu0 %v12092_v0 }
 0x1c7   :  { %671 = vmatprep.mubr.f32.mxu1 %v12092_v0 }
 0x1c9   :  { %8849 = vmatmul.mubr.msk.f32.gmra.mrb[8].mxu0 %vm408_vm3, %v388_v42 }
 0x1ca   :  { %8860 = vmatmul.mubr.msk.f32.gmra.mrb[10].mxu1 %vm408_vm3, %v389_v43  ;;  %534 = vmatprep.mubr.f32.mxu0 %v12092_v0 }
 0x1cb   :  { %677 = vmatprep.mubr.f32.mxu1 %v12092_v0 }
 0x1cd   :  { %8850 = vmatmul.mubr.msk.f32.gmra.mrb[10].mxu0 %vm408_vm3, %v389_v43 }
 0x1ce   :  { %8861 = vmatmul.mubr.msk.f32.gmra.mrb[12].mxu1 %vm408_vm3, %v390_v44  ;;  %540 = vmatprep.mubr.f32.mxu0 %v12092_v0 }
 0x1cf   :  { %683 = vmatprep.mubr.f32.mxu1 %v12092_v0 }
 0x1d1   :  { %8851 = vmatmul.mubr.msk.f32.gmra.mrb[12].mxu0 %vm408_vm3, %v390_v44 }
 0x1d2   :  { %8862 = vmatmul.mubr.msk.f32.gmra.mrb[14].mxu1 %vm408_vm3, %v391_v45  ;;  %546 = vmatprep.mubr.f32.mxu0 %v12092_v0 }
 0x1d3   :  { %1066 = vmatprep.mubr.f32.mxu1 %v12092_v0 }
 0x1d5   :  { %8852 = vmatmul.mubr.msk.f32.gmra.mrb[14].mxu0 %vm408_vm3, %v391_v45 }
 0x1d6   :  { %8885 = vmatmul.mubr.msk.f32.vlgmr.msra.gmra.mrb[16].mxu1 %vm408_vm3, %v12385_v23  ;;  %786 = vmatprep.mubr.f32.mxu0 %v12092_v0 }
 0x1d7   :  { %1072 = vmatprep.mubr.f32.mxu1 %v12092_v0  ;;  %9748 = vmatpush1.bf16.msra.mxu1 %v9747_v55  ;;  %v1344_v55 = vld [vmem:[#allocation8 + $0xd0] sm:$0xff] }
 0x1d8   :  { %9750 = vmatprep.subr.bf16.mxu1 %v9749_v56 }
 0x1da   :  { %8886 = vmatmul.mubr.msk.f32.gmra.mrb[18].mxu1 %vm408_vm3, %v385_v38 }
 0x1db   :  { %1078 = vmatprep.mubr.f32.mxu1 %v12092_v0  ;;  %9752 = vmatpush1.bf16.msra.mxu1 %v9751_v63 }
 0x1dc   :  { %9754 = vmatprep.subr.bf16.mxu1 %v9753_v4  ;;  %v9773_v4 = vpack.c.bf16 %v1349_v58, %v1347_v57 }
 0x1de   :  { %8887 = vmatmul.mubr.msk.f32.gmra.mrb[20].mxu1 %vm408_vm3, %v386_v40 }
 0x1df   :  { %1084 = vmatprep.mubr.f32.mxu1 %v12092_v0  ;;  %9756 = vmatpush1.bf16.msra.mxu1 %v9755_v13 }
 0x1e0   :  { %9758 = vmatprep.subr.bf16.mxu1 %v9757_v17 }
 0x1e2   :  { %8888 = vmatmul.mubr.msk.f32.gmra.mrb[22].mxu1 %vm408_vm3, %v387_v41  ;;  %v9765_v41 = vpack.c.bf16 %v1341_v34, %v1339_v33  ;;  %v554_v33 = vld [vmem:[#allocation2 + $0x40] sm:$0xff] }
 0x1e3   :  { %1090 = vmatprep.mubr.f32.mxu1 %v12092_v0  ;;  %9760 = vmatpush1.bf16.msra.mxu1 %v9759_v25  ;;  %v1352_v25 = vld [vmem:[#allocation8 + $0x110] sm:$0xff] }
 0x1e4   :  { %9762 = vmatprep.subr.bf16.mxu1 %v9761_v29  ;;  %v1357_v29 = vld [vmem:[#allocation8 + $0x138] sm:$0xff] }
 0x1e6   :  { %8889 = vmatmul.mubr.msk.f32.gmra.mrb[24].mxu1 %vm408_vm3, %v388_v42  ;;  %v1338_v42 = vld [vmem:[#allocation8 + $0xa0] sm:$0xff] }
 0x1e7   :  { %1096 = vmatprep.mubr.f32.mxu1 %v12092_v0  ;;  %9764 = vmatpush1.bf16.msra.mxu1 %v9763_v37 }
 0x1e8   :  { %9766 = vmatprep.subr.bf16.mxu1 %v9765_v41  ;;  %v1356_v41 = vld [vmem:[#allocation8 + $0x130] sm:$0xff] }
 0x1ea   :  { %8890 = vmatmul.mubr.msk.f32.gmra.mrb[26].mxu1 %vm408_vm3, %v389_v43  ;;  %v1340_v43 = vld [vmem:[#allocation8 + $0xb0] sm:$0xff] }
 0x1eb   :  { %1102 = vmatprep.mubr.f32.mxu1 %v12092_v0  ;;  %v9767_v49 = vpack.c.bf16 %v1340_v43, %v1338_v42 }
 0x1ed   :  { %9768 = vmatpush1.bf16.msra.mxu1 %v9767_v49 }
 0x1ee   :  { %8891 = vmatmul.mubr.msk.f32.gmra.mrb[28].mxu1 %vm408_vm3, %v390_v44 }
 0x1ef   :  { %1108 = vmatprep.mubr.f32.mxu1 %v12092_v0 }
 0x1f2   :  { %8892 = vmatmul.mubr.msk.f32.gmra.mrb[30].mxu1 %vm408_vm3, %v391_v45  ;;  %v1343_v45 = vld [vmem:[#allocation8 + $0xc8] sm:$0xff] }
 0x289   :  { %v643_v46 = vpop.f32.mrb[0].mxu1 }
 0x28a   :  { %v645_v50 = vpop.f32.mrb[1].mxu1 }
 0x28c   :  { %v12454_v62 = vpop.f32.mrb[0].mxu0 }
 0x28d   :  { %v649_v61 = vpop.f32.mrb[2].mxu1  ;;  %v12456_v3 = vpop.f32.mrb[1].mxu0 }
 0x28e   :  { %v9683_v1 = vpack.c.bf16 %v649_v61, %v643_v46  ;;  %v651_v2 = vpop.f32.mrb[3].mxu1  ;;  %v1345_v46 = vld [vmem:[#allocation8 + $0xd8] sm:$0xff]  ;;  %v9771_v61 = vpack.c.bf16 %v1344_v55, %v1342_v54 }
 0x28f   :  { %v9681_v7 = vpack.c.bf16 %v651_v2, %v645_v50  ;;  %v9769_v53 = vpack.c.bf16 %v1345_v46, %v1343_v45 }
 0x290   :  { %v12458_v12 = vpop.f32.mrb[2].mxu0 }
 0x291   :  { %v655_v11 = vpop.f32.mrb[4].mxu1  ;;  %9682 = vmatprep.subr.bf16.mxu0 %v9681_v7  ;;  %v9701_v15 = vpack.c.bf16 %v12458_v12, %v12454_v62  ;;  %v12462_v16 = vpop.f32.mrb[3].mxu0  ;;  %9770 = vmatprep.subr.bf16.mxu1 %v9769_v53  ;;  %v556_v62 = vld [vmem:[#allocation2 + $0x50] sm:$0xff] }
 0x292   :  { %v657_v14 = vpop.f32.mrb[5].mxu1  ;;  %9684 = vmatpush1.bf16.msra.mxu0 %v9683_v1  ;;  %v9699_v20 = vpack.c.bf16 %v12462_v16, %v12456_v3  ;;  %9772 = vmatpush1.bf16.msra.mxu1 %v9771_v61 }
 0x293   :  { %9774 = vmatprep.subr.bf16.mxu1 %v9773_v4  ;;  %v394_v4 = vld [vmem:[#allocation2 + $0x10] sm:$0xff] }
 0x294   :  { %v12466_v24 = vpop.f32.mrb[4].mxu0 }
 0x295   :  { %v661_v23 = vpop.f32.mrb[6].mxu1  ;;  %v12468_v28 = vpop.f32.mrb[5].mxu0 }
 0x296   :  { %v9687_v26 = vpack.c.bf16 %v661_v23, %v655_v11  ;;  %v663_v27 = vpop.f32.mrb[7].mxu1  ;;  %v1350_v23 = vld [vmem:[#allocation8 + $0x100] sm:$0xff] }
 0x297   :  { %v9685_v32 = vpack.c.bf16 %v663_v27, %v657_v14  ;;  %v9775_v14 = vpack.c.bf16 %v1348_v6, %v1346_v5  ;;  %v1355_v27 = vld [vmem:[#allocation8 + $0x128] sm:$0xff]  ;;  %v395_v5 = vld [vmem:[#allocation2 + $0x18] sm:$0xff]  ;;  %v396_v6 = vld [vmem:[#allocation2 + $0x20] sm:$0xff] }
 0x298   :  { %v12470_v36 = vpop.f32.mrb[6].mxu0  ;;  %v9781_v43 = vpack.c.bf16 %v1357_v29, %v1355_v27  ;;  %v1358_v29 = vld [vmem:[#allocation8 + $0x140] sm:$0xff] }
 0x299   :  { %v667_v35 = vpop.f32.mrb[8].mxu1  ;;  %9686 = vmatprep.subr.bf16.mxu0 %v9685_v32  ;;  %v9705_v39 = vpack.c.bf16 %v12470_v36, %v12466_v24  ;;  %v12474_v40 = vpop.f32.mrb[7].mxu0  ;;  %9776 = vmatpush1.bf16.msra.mxu1 %v9775_v14  ;;  %v9779_v32 = vpack.c.bf16 %v1352_v25, %v1350_v23  ;;  %v981_v14 = vld [vmem:[#allocation2 + $0x90] sm:$0xff]  ;;  %v986_v23 = vld [vmem:[#allocation2 + $0xb8] sm:$0xf]  ;;  %v1359_v25 = vld [vmem:[#allocation8 + $0x148] sm:$0xff] }
 0x29a   :  { %v669_v38 = vpop.f32.mrb[9].mxu1  ;;  %9688 = vmatpush1.bf16.msra.mxu0 %v9687_v26  ;;  %v9703_v44 = vpack.c.bf16 %v12474_v40, %v12468_v28  ;;  %9778 = vmatprep.subr.bf16.mxu1 %v9777_v22  ;;  %v985_v22 = vld [vmem:[#allocation2 + $0xb0] sm:$0xff] }
 0x29c   :  { %v12478_v48 = vpop.f32.mrb[8].mxu0 }
 0x29d   :  { %v673_v47 = vpop.f32.mrb[10].mxu1  ;;  %v12480_v52 = vpop.f32.mrb[9].mxu0  ;;  %9780 = vmatpush1.bf16.msra.mxu1 %v9779_v32  ;;  %v1363_v32 = vld [vmem:[#allocation8 + $0x168] sm:$0xf] }
 0x29e   :  { %v9691_v50 = vpack.c.bf16 %v673_v47, %v667_v35  ;;  %v675_v51 = vpop.f32.mrb[11].mxu1  ;;  %v555_v47 = vld [vmem:[#allocation2 + $0x48] sm:$0xff]  ;;  %9782 = vmatprep.subr.bf16.mxu1 %v9781_v43  ;;  %v1274_v43 = vld [vmem:[#allocation17] sm:$0x3] }
 0x29f   :  { %v9689_v56 = vpack.c.bf16 %v675_v51, %v669_v38  ;;  %v1354_v38 = vld [vmem:[#allocation8 + $0x120] sm:$0xff]  ;;  %v559_v51 = vld [vmem:[#allocation2 + $0x68] sm:$0xff] }
 0x2a0   :  { %v12482_v60 = vpop.f32.mrb[10].mxu0  ;;  %v9783_v46 = vpack.c.bf16 %v1356_v41, %v1354_v38  ;;  %v1276_v38 = vlaneseq }
 0x2a1   :  { %v679_v59 = vpop.f32.mrb[12].mxu1  ;;  %9690 = vmatprep.subr.bf16.mxu0 %v9689_v56  ;;  %v9709_v1 = vpack.c.bf16 %v12482_v60, %v12478_v48  ;;  %v538_v2 = vpop.f32.mrb[11].mxu0  ;;  %v560_v56 = vld [vmem:[#allocation2 + $0x70] sm:$0xff] }
 0x2a2   :  { %v681_v63 = vpop.f32.mrb[13].mxu1  ;;  %9692 = vmatpush1.bf16.msra.mxu0 %v9691_v50  ;;  %v9707_v7 = vpack.c.bf16 %v538_v2, %v12480_v52  ;;  %9784 = vmatpush1.bf16.msra.mxu1 %v9783_v46  ;;  %v393_v2 = vld [vmem:[#allocation2 + $0x8] sm:$0xff]  ;;  %v1277_v41 = vshrl.u32 %v1276_v38, 7  ;;  %v1530_v38 = vld [vmem:[#allocation8 + $0x218] sm:$0xff] }
 0x2a4   :  { %v12487_v13 = vpop.f32.mrb[12].mxu0 }
 0x2a5   :  { %v685_v11 = vpop.f32.mrb[14].mxu1  ;;  %v544_v21 = vpop.f32.mrb[13].mxu0 }
 0x2a6   :  { %v9696_v18 = vpack.c.bf16 %v685_v11, %v679_v59  ;;  %v687_v19 = vpop.f32.mrb[15].mxu1  ;;  %v561_v59 = vld [vmem:[#allocation2 + $0x78] sm:$0xf]  ;;  %v979_v11 = vld [vmem:[#allocation2 + $0x80] sm:$0xff] }
 0x2a7   :  { %v9693_v26 = vpack.c.bf16 %v687_v19, %v681_v63  ;;  %v983_v19 = vld [vmem:[#allocation2 + $0xa0] sm:$0xff] }
 0x2a8   :  { %v548_v30 = vpop.f32.mrb[14].mxu0 }
 0x2a9   :  { %9695 = vmatprep.subr.msk.bf16.mxu0 %vm12491_vm5, %v9693_v26  ;;  %v12497_v31 = vpop.f32.mrb[16].mxu1  ;;  %v9714_v34 = vpack.c.bf16 %v548_v30, %v12487_v13  ;;  %v550_v35 = vpop.f32.mrb[15].mxu0  ;;  %v980_v13 = vld [vmem:[#allocation2 + $0x88] sm:$0xff]  ;;  %v1361_v26 = vld [vmem:[#allocation8 + $0x158] sm:$0xff]  ;;  %v1360_v30 = vld [vmem:[#allocation8 + $0x150] sm:$0xff] }
 0x2aa   :  { %9698 = vmatpush1.bf16.msk.msra.mxu0 %vm12491_vm5, %v9696_v18  ;;  %v1070_v37 = vpop.f32.mrb[17].mxu1  ;;  %v9711_v42 = vpack.c.bf16 %v550_v35, %v544_v21  ;;  %v982_v18 = vld [vmem:[#allocation2 + $0x98] sm:$0xff]  ;;  %v984_v21 = vld [vmem:[#allocation2 + $0xa8] sm:$0xff]  ;;  %v9785_v27 = vpack.c.bf16 %v1361_v26, %v1359_v25  ;;  %v1362_v35 = vld [vmem:[#allocation8 + $0x160] sm:$0xf] }
 0x2ab   :  { %9700 = vmatprep.subr.bf16.mxu0 %v9699_v20  ;;  %v557_v20 = vld [vmem:[#allocation2 + $0x58] sm:$0xff]  ;;  %v1528_v25 = vld [vmem:[#allocation8 + $0x208] sm:$0xff] }
 0x2ac   :  { %9786 = vmatprep.subr.bf16.mxu1 %v9785_v27 }
 0x2ad   :  { %8865 = vmatmul.mubr.msk.f32.vlgmr.msra.gmra.mrb[16].mxu0 %vm690_vm6, %v554_v33  ;;  %v1074_v45 = vpop.f32.mrb[18].mxu1  ;;  %v1510_v33 = vld [vmem:[#allocation8 + $0x178] sm:$0xff] }
 0x2ae   :  { %9702 = vmatpush1.bf16.msra.mxu0 %v9701_v15  ;;  %792 = vmatprep.mubr.f32.mxu0 %v12092_v0  ;;  %v9729_v49 = vpack.c.bf16 %v1074_v45, %v12497_v31  ;;  %v1076_v50 = vpop.f32.mrb[19].mxu1  ;;  %v9787_v31 = vpack.c.bf16 %v1360_v30, %v1358_v29  ;;  %v12578_v45 = vsub.s32 1, %v1277_v41 }
 0x2af   :  { %9704 = vmatprep.subr.bf16.mxu0 %v9703_v44  ;;  %v9727_v3 = vpack.c.bf16 %v1076_v50, %v1070_v37 }
 0x2b0   :  { %9788 = vmatpush1.bf16.msra.mxu1 %v9787_v31 }
 0x2b1   :  { %8866 = vmatmul.mubr.msk.f32.gmra.mrb[18].mxu0 %vm690_vm6, %v555_v47  ;;  %v1080_v16 = vpop.f32.mrb[20].mxu1  ;;  %8903 = vmatprep.subr.msk.mxu1 %vm715_vm4, %v1363_v32  ;;  %v12584_v47 = vrot.slane %v1274_v43, %v12578_v45 }
 0x2b2   :  { %798 = vmatprep.mubr.f32.mxu0 %v12092_v0  ;;  %9706 = vmatpush1.bf16.msra.mxu0 %v9705_v39  ;;  %v1082_v12 = vpop.f32.mrb[21].mxu1  ;;  %v558_v39 = vld [vmem:[#allocation2 + $0x60] sm:$0xff] }
 0x2b3   :  { %9708 = vmatprep.subr.bf16.mxu0 %v9707_v7  ;;  %v397_v7 = vld [vmem:[#allocation2 + $0x28] sm:$0xff] }
 0x2b4   :  { %8904 = vmatpush1.msk.msra.mxu1 %vm715_vm4, %v1362_v35  ;;  %v1527_v35 = vld [vmem:[#allocation8 + $0x200] sm:$0xff] }
 0x2b5   :  { %8867 = vmatmul.mubr.msk.f32.gmra.mrb[20].mxu0 %vm690_vm6, %v556_v62  ;;  %v1086_v15 = vpop.f32.mrb[22].mxu1  ;;  %v1511_v62 = vld [vmem:[#allocation8 + $0x180] sm:$0xff] }
 0x2b6   :  { %804 = vmatprep.mubr.f32.mxu0 %v12092_v0  ;;  %9710 = vmatpush1.bf16.msra.mxu0 %v9709_v1  ;;  %v9733_v28 = vpack.c.bf16 %v1086_v15, %v1080_v16  ;;  %v1088_v40 = vpop.f32.mrb[23].mxu1  ;;  %v392_v1 = vld [vmem:[#allocation2] sm:$0xff]  ;;  %v1509_v16 = vld [vmem:[#allocation8 + $0x170] sm:$0xff]  ;;  %v1514_v15 = vld [vmem:[#allocation8 + $0x198] sm:$0xff] }
 0x2b7   :  { %9713 = vmatprep.subr.msk.bf16.mxu0 %vm12491_vm5, %v9711_v42  ;;  %v9731_v24 = vpack.c.bf16 %v1088_v40, %v1082_v12  ;;  %v12576_v42 = vsub.s32 0, %v1277_v41  ;;  %v1532_v41 = vld [vmem:[#allocation8 + $0x228] sm:$0xff] }
 0x2b9   :  { %8868 = vmatmul.mubr.msk.f32.gmra.mrb[22].mxu0 %vm690_vm6, %v557_v20  ;;  %v1092_v36 = vpop.f32.mrb[24].mxu1  ;;  %v12581_v46 = vrot.slane %v1274_v43, %v12576_v42  ;;  %v1516_v20 = vld [vmem:[#allocation8 + $0x1a8] sm:$0xff] }
 0x2ba   :  { %810 = vmatprep.mubr.f32.mxu0 %v12092_v0  ;;  %9716 = vmatpush1.bf16.msk.msra.mxu0 %vm12491_vm5, %v9714_v34  ;;  %v1094_v44 = vpop.f32.mrb[25].mxu1  ;;  %v1512_v34 = vld [vmem:[#allocation8 + $0x188] sm:$0xff] }
 0x2bb   :  { %9728 = vmatprep.subr.bf16.mxu0 %v9727_v3  ;;  %v9789_v37 = vpack.c.bf16 %v1512_v34, %v1510_v33  ;;  %v1525_v34 = vld [vmem:[#allocation8 + $0x1f0] sm:$0xff] }
 0x2bd   :  { %8869 = vmatmul.mubr.msk.f32.gmra.mrb[24].mxu0 %vm690_vm6, %v558_v39  ;;  %v1098_v48 = vpop.f32.mrb[26].mxu1  ;;  %9790 = vmatprep.subr.bf16.mxu1 %v9789_v37 }
 0x2be   :  { %816 = vmatprep.mubr.f32.mxu0 %v12092_v0  ;;  %v9737_v52 = vpack.c.bf16 %v1098_v48, %v1092_v36  ;;  %v1100_v53 = vpop.f32.mrb[27].mxu1  ;;  %v9793_v48 = vpack.c.bf16 %v1516_v20, %v1514_v15  ;;  %v1529_v15 = vld [vmem:[#allocation8 + $0x210] sm:$0xff]  ;;  %v1531_v20 = vld [vmem:[#allocation8 + $0x220] sm:$0xff] }
 0x2bf   :  { %v9735_v54 = vpack.c.bf16 %v1100_v53, %v1094_v44 }
 0x2c1   :  { %8870 = vmatmul.mubr.msk.f32.gmra.mrb[26].mxu0 %vm690_vm6, %v559_v51  ;;  %v1104_v55 = vpop.f32.mrb[28].mxu1  ;;  %v1513_v51 = vld [vmem:[#allocation8 + $0x190] sm:$0xff] }
 0x2c2   :  { %822 = vmatprep.mubr.f32.mxu0 %v12092_v0  ;;  %v1106_v57 = vpop.f32.mrb[29].mxu1 }
 0x2c5   :  { %8871 = vmatmul.mubr.msk.f32.gmra.mrb[28].mxu0 %vm690_vm6, %v560_v56  ;;  %v1110_v58 = vpop.f32.mrb[30].mxu1 }
 0x2c6   :  { %828 = vmatprep.mubr.f32.mxu0 %v12092_v0  ;;  %v9742_v60 = vpack.c.bf16 %v1110_v58, %v1104_v55  ;;  %v1112_v61 = vpop.f32.mrb[31].mxu1  ;;  %v1520_v55 = vld [vmem:[#allocation8 + $0x1c8] sm:$0xff] }
 0x2c7   :  { %v9739_v63 = vpack.c.bf16 %v1112_v61, %v1106_v57 }
 0x2c9   :  { %8872 = vmatmul.mubr.msk.f32.gmra.mrb[30].mxu0 %vm690_vm6, %v561_v59 }
 0x2ca   :  { %929 = vmatprep.mubr.f32.mxu0 %v12092_v0 }
 0x2cd   :  { %8875 = vmatmul.mubr.msk.f32.vlgmr.msra.gmra.mrb[16].mxu0 %vm690_vm6, %v392_v1  ;;  %v1517_v1 = vld [vmem:[#allocation8 + $0x1b0] sm:$0xff] }
 0x2ce   :  { %9730 = vmatpush1.bf16.msra.mxu0 %v9729_v49  ;;  %935 = vmatprep.mubr.f32.mxu0 %v12092_v0 }
 0x2cf   :  { %9732 = vmatprep.subr.bf16.mxu0 %v9731_v24  ;;  %v9791_v24 = vpack.c.bf16 %v1511_v62, %v1509_v16 }
 0x2d1   :  { %8876 = vmatmul.mubr.msk.f32.gmra.mrb[18].mxu0 %vm690_vm6, %v393_v2  ;;  %v1519_v2 = vld [vmem:[#allocation8 + $0x1c0] sm:$0xff] }
 0x2d2   :  { %941 = vmatprep.mubr.f32.mxu0 %v12092_v0  ;;  %9734 = vmatpush1.bf16.msra.mxu0 %v9733_v28 }
 0x2d3   :  { %9736 = vmatprep.subr.bf16.mxu0 %v9735_v54  ;;  %v1518_v54 = vld [vmem:[#allocation8 + $0x1b8] sm:$0xff] }
 0x2d5   :  { %8877 = vmatmul.mubr.msk.f32.gmra.mrb[20].mxu0 %vm690_vm6, %v394_v4 }
 0x2d6   :  { %947 = vmatprep.mubr.f32.mxu0 %v12092_v0  ;;  %9738 = vmatpush1.bf16.msra.mxu0 %v9737_v52  ;;  %v1515_v52 = vld [vmem:[#allocation8 + $0x1a0] sm:$0xff] }
 0x2d7   :  { %9741 = vmatprep.subr.msk.bf16.mxu0 %vm12491_vm5, %v9739_v63  ;;  %v9795_v58 = vpack.c.bf16 %v1515_v52, %v1513_v51  ;;  %v9797_v63 = vpack.c.bf16 %v1520_v55, %v1518_v54  ;;  %v9811_v51 = vpack.c.bf16 %v1531_v20, %v1529_v15  ;;  %v1914_v15 = vld [vmem:[#allocation8 + $0x2e8] sm:$0xff]  ;;  %v1916_v20 = vld [vmem:[#allocation8 + $0x2f8] sm:$0xff] }
 0x2d9   :  { %8878 = vmatmul.mubr.msk.f32.gmra.mrb[22].mxu0 %vm690_vm6, %v395_v5  ;;  %v1522_v5 = vld [vmem:[#allocation8 + $0x1d8] sm:$0xff] }
 0x2da   :  { %953 = vmatprep.mubr.f32.mxu0 %v12092_v0  ;;  %9744 = vmatpush1.bf16.msk.msra.mxu0 %vm12491_vm5, %v9742_v60 }
 0x2dd   :  { %8879 = vmatmul.mubr.msk.f32.gmra.mrb[24].mxu0 %vm690_vm6, %v396_v6  ;;  %v1524_v6 = vld [vmem:[#allocation8 + $0x1e8] sm:$0xff] }
 0x2de   :  { %959 = vmatprep.mubr.f32.mxu0 %v12092_v0 }
 0x2e1   :  { %8880 = vmatmul.mubr.msk.f32.gmra.mrb[26].mxu0 %vm690_vm6, %v397_v7 }
 0x2e2   :  { %965 = vmatprep.mubr.f32.mxu0 %v12092_v0 }
 0x2e5   :  { %8881 = vmatmul.mubr.msk.f32.gmra.mrb[28].mxu0 %vm690_vm6, %v398_v8 }
 0x2e6   :  { %971 = vmatprep.mubr.f32.mxu0 %v12092_v0 }
 0x2e9   :  { %8882 = vmatmul.mubr.msk.f32.gmra.mrb[30].mxu0 %vm690_vm6, %v399_v10  ;;  %v9799_v10 = vpack.c.bf16 %v1519_v2, %v1517_v1 }
 0x2ea   :  { %1209 = vmatprep.mubr.f32.mxu0 %v12092_v0 }
 0x2ed   :  { %8895 = vmatmul.mubr.msk.f32.vlgmr.msra.gmra.mrb[16].mxu0 %vm690_vm6, %v979_v11 }
 0x2ee   :  { %1215 = vmatprep.mubr.f32.mxu0 %v12092_v0 }
 0x2f1   :  { %8896 = vmatmul.mubr.msk.f32.gmra.mrb[18].mxu0 %vm690_vm6, %v980_v13 }
 0x2f2   :  { %1221 = vmatprep.mubr.f32.mxu0 %v12092_v0 }
 0x2f5   :  { %8897 = vmatmul.mubr.msk.f32.gmra.mrb[20].mxu0 %vm690_vm6, %v981_v14 }
 0x2f6   :  { %1227 = vmatprep.mubr.f32.mxu0 %v12092_v0 }
 0x2f9   :  { %8898 = vmatmul.mubr.msk.f32.gmra.mrb[22].mxu0 %vm690_vm6, %v982_v18  ;;  %v9801_v18 = vpack.c.bf16 %v1524_v6, %v1522_v5 }
 0x2fa   :  { %1233 = vmatprep.mubr.f32.mxu0 %v12092_v0 }
 0x2fd   :  { %8899 = vmatmul.mubr.msk.f32.gmra.mrb[24].mxu0 %vm690_vm6, %v983_v19  ;;  %v1521_v19 = vld [vmem:[#allocation8 + $0x1d0] sm:$0xff] }
 0x2fe   :  { %1239 = vmatprep.mubr.f32.mxu0 %v12092_v0 }
 0x301   :  { %8900 = vmatmul.mubr.msk.f32.gmra.mrb[26].mxu0 %vm690_vm6, %v984_v21  ;;  %v1523_v21 = vld [vmem:[#allocation8 + $0x1e0] sm:$0xff] }
 0x302   :  { %1245 = vmatprep.mubr.f32.mxu0 %v12092_v0  ;;  %v9803_v29 = vpack.c.bf16 %v1523_v21, %v1521_v19  ;;  %v1542_v19 = vld [vmem:[#allocation8 + $0x278] sm:$0xff]  ;;  %v1544_v21 = vld [vmem:[#allocation8 + $0x288] sm:$0xff] }
 0x305   :  { %8901 = vmatmul.mubr.msk.f32.gmra.mrb[28].mxu0 %vm690_vm6, %v985_v22 }
 0x306   :  { %1251 = vmatprep.mubr.f32.mxu0 %v12092_v0 }
 0x309   :  { %8902 = vmatmul.mubr.msk.f32.gmra.mrb[30].mxu0 %vm690_vm6, %v986_v23  ;;  %v1526_v23 = vld [vmem:[#allocation8 + $0x1f8] sm:$0xff] }
 0x30a   :  { %1744 = vmatprep.mubr.f32.mxu0 %v12092_v0  ;;  %v9805_v33 = vpack.c.bf16 %v1528_v25, %v1526_v23 }
 0x3c0   :  { %v1211_v49 = vpop.f32.mrb[16].mxu0 }
 0x3c1   :  { %v1286_v50 = vadd.f32 %v12581_v46, %v1211_v49  ;;  %v1213_v3 = vpop.f32.mrb[17].mxu0 }
 0x3c2   :  { %v1287_v12 = vadd.f32 %v12584_v47, %v1213_v3 }
 0x3c3   :  { %v12590_v36 = vmax.f32 %v1286_v50, 0.0  ;;  %v9807_v50 = vpack.c.bf16 %v1527_v35, %v1525_v34  ;;  %v1545_v34 = vld [vmem:[#allocation8 + $0x290] sm:$0xff]  ;;  %v1547_v35 = vld [vmem:[#allocation8 + $0x2a0] sm:$0xff] }
 0x3c4   :  { %v12588_v28 = vmax.f32 %v1287_v12, 0.0  ;;  %v1217_v40 = vpop.f32.mrb[18].mxu0  ;;  %v9809_v12 = vpack.c.bf16 %v1532_v41, %v1530_v38  ;;  %v1552_v38 = vld [vmem:[#allocation8 + $0x2c8] sm:$0xff]  ;;  %v9827_v41 = vpack.c.bf16 %v1547_v35, %v1545_v34  ;;  %v1933_v35 = vld [vmem:[#allocation8 + $0x380] sm:$0xff] }
 0x3c5   :  { %v1288_v39 = vadd.f32 %v12581_v46, %v1217_v40  ;;  %v1219_v44 = vpop.f32.mrb[19].mxu0 }
 0x3c6   :  { %v1289_v53 = vadd.f32 %v12584_v47, %v1219_v44  ;;  %8905 = vmatprep.mubr.msk.f32.mxu1 %vm1364_vm7, %v12588_v28 }
 0x3c7   :  { %1460 = vmatmul.mubr.f32.vlgmr.msra.gmra.mrb[32].mxu1 %v12590_v36  ;;  %v12599_v59 = vmax.f32 %v1288_v39, 0.0  ;;  %v1536_v39 = vld [vmem:[#allocation8 + $0x248] sm:$0xff] }
 0x3c8   :  { %v12597_v56 = vmax.f32 %v1289_v53, 0.0  ;;  %9792 = vmatpush1.bf16.msra.mxu1 %v9791_v24  ;;  %v1223_v57 = vpop.f32.mrb[20].mxu0  ;;  %v1534_v24 = vld [vmem:[#allocation8 + $0x238] sm:$0xff] }
 0x3c9   :  { %v1290_v60 = vadd.f32 %v12581_v46, %v1223_v57  ;;  %v1225_v61 = vpop.f32.mrb[21].mxu0  ;;  %9794 = vmatprep.subr.bf16.mxu1 %v9793_v48  ;;  %v9813_v55 = vpack.c.bf16 %v1536_v39, %v1534_v24  ;;  %v1533_v57 = vld [vmem:[#allocation8 + $0x230] sm:$0xff]  ;;  %v1918_v39 = vld [vmem:[#allocation8 + $0x308] sm:$0xff] }
 0x3ca   :  { %v1291_v4 = vadd.f32 %v12584_v47, %v1225_v61  ;;  %8906 = vmatprep.mubr.msk.f32.mxu1 %vm1364_vm7, %v12597_v56  ;;  %v1538_v61 = vld [vmem:[#allocation8 + $0x258] sm:$0xff]  ;;  %v1915_v24 = vld [vmem:[#allocation8 + $0x2f0] sm:$0xff] }
 0x3cb   :  { %1466 = vmatmul.mubr.f32.gmra.mrb[34].mxu1 %v12599_v59  ;;  %v12608_v11 = vmax.f32 %v1290_v60, 0.0 }
 0x3cc   :  { %v12606_v7 = vmax.f32 %v1291_v4, 0.0  ;;  %9796 = vmatpush1.bf16.msra.mxu1 %v9795_v58  ;;  %v1229_v8 = vpop.f32.mrb[22].mxu0  ;;  %v1535_v58 = vld [vmem:[#allocation8 + $0x240] sm:$0xff] }
 0x3cd   :  { %v1292_v13 = vadd.f32 %v12581_v46, %v1229_v8  ;;  %v1231_v14 = vpop.f32.mrb[23].mxu0  ;;  %9798 = vmatprep.subr.bf16.mxu1 %v9797_v63  ;;  %v1540_v63 = vld [vmem:[#allocation8 + $0x268] sm:$0xff]  ;;  %v9815_v4 = vpack.c.bf16 %v1535_v58, %v1533_v57  ;;  %v1917_v57 = vld [vmem:[#allocation8 + $0x300] sm:$0xff]  ;;  %v1919_v58 = vld [vmem:[#allocation8 + $0x310] sm:$0xff] }
 0x3ce   :  { %v1293_v22 = vadd.f32 %v12584_v47, %v1231_v14  ;;  %8907 = vmatprep.mubr.msk.f32.mxu1 %vm1364_vm7, %v12606_v7  ;;  %v1539_v14 = vld [vmem:[#allocation8 + $0x260] sm:$0xff] }
 0x3cf   :  { %1472 = vmatmul.mubr.f32.gmra.mrb[36].mxu1 %v12608_v11  ;;  %v12617_v30 = vmax.f32 %v1292_v13, 0.0  ;;  %v1537_v13 = vld [vmem:[#allocation8 + $0x250] sm:$0xff] }
 0x3d0   :  { %v12615_v26 = vmax.f32 %v1293_v22, 0.0  ;;  %9800 = vmatpush1.bf16.msra.mxu1 %v9799_v10  ;;  %v1235_v27 = vpop.f32.mrb[24].mxu0  ;;  %v9817_v10 = vpack.c.bf16 %v1540_v63, %v1538_v61  ;;  %v9819_v23 = vpack.c.bf16 %v1539_v14, %v1537_v13  ;;  %v1924_v61 = vld [vmem:[#allocation8 + $0x338] sm:$0xff]  ;;  %v9875_v63 = vpack.c.bf16 %v1919_v58, %v1917_v57  ;;  %v1947_v57 = vld [vmem:[#allocation8 + $0x3f0] sm:$0xff]  ;;  %v1950_v58 = vld [vmem:[#allocation8 + $0x408] sm:$0xff] }
 0x3d1   :  { %v1294_v31 = vadd.f32 %v12581_v46, %v1235_v27  ;;  %v1237_v32 = vpop.f32.mrb[25].mxu0  ;;  %9802 = vmatprep.subr.bf16.mxu1 %v9801_v18  ;;  %v1541_v27 = vld [vmem:[#allocation8 + $0x270] sm:$0xff] }
 0x3d2   :  { %v1295_v37 = vadd.f32 %v12584_v47, %v1237_v32  ;;  %8908 = vmatprep.mubr.msk.f32.mxu1 %vm1364_vm7, %v12615_v26 }
 0x3d3   :  { %1478 = vmatmul.mubr.f32.gmra.mrb[38].mxu1 %v12617_v30  ;;  %v12626_v3 = vmax.f32 %v1294_v31, 0.0  ;;  %v1548_v31 = vld [vmem:[#allocation8 + $0x2a8] sm:$0xff] }
 0x3d4   :  { %v12624_v43 = vmax.f32 %v1295_v37, 0.0  ;;  %9804 = vmatpush1.bf16.msra.mxu1 %v9803_v29  ;;  %v1241_v49 = vpop.f32.mrb[26].mxu0  ;;  %v1543_v29 = vld [vmem:[#allocation8 + $0x280] sm:$0xff]  ;;  %v1550_v37 = vld [vmem:[#allocation8 + $0x2b8] sm:$0xff] }
 0x3d5   :  { %v1296_v16 = vadd.f32 %v12581_v46, %v1241_v49  ;;  %v1243_v62 = vpop.f32.mrb[27].mxu0  ;;  %9806 = vmatprep.subr.bf16.mxu1 %v9805_v33  ;;  %v9823_v32 = vpack.c.bf16 %v1543_v29, %v1541_v27  ;;  %v9829_v49 = vpack.c.bf16 %v1552_v38, %v1550_v37  ;;  %v1929_v29 = vld [vmem:[#allocation8 + $0x360] sm:$0xff]  ;;  %v1935_v37 = vld [vmem:[#allocation8 + $0x390] sm:$0xff]  ;;  %v1938_v38 = vld [vmem:[#allocation8 + $0x3a8] sm:$0xff] }
 0x3d6   :  { %v1297_v40 = vadd.f32 %v12584_v47, %v1243_v62  ;;  %8909 = vmatprep.mubr.msk.f32.mxu1 %vm1364_vm7, %v12624_v43 }
 0x3d7   :  { %1484 = vmatmul.mubr.f32.gmra.mrb[40].mxu1 %v12626_v3  ;;  %v12635_v52 = vmax.f32 %v1296_v16, 0.0  ;;  %v1551_v16 = vld [vmem:[#allocation8 + $0x2c0] sm:$0xff] }
 0x3d8   :  { %v12633_v44 = vmax.f32 %v1297_v40, 0.0  ;;  %9808 = vmatpush1.bf16.msra.mxu1 %v9807_v50  ;;  %v1247_v48 = vpop.f32.mrb[28].mxu0  ;;  %v1549_v50 = vld [vmem:[#allocation8 + $0x2b0] sm:$0xff]  ;;  %v1913_v40 = vld [vmem:[#allocation8 + $0x2e0] sm:$0xff] }
 0x3d9   :  { %v1298_v53 = vadd.f32 %v12581_v46, %v1247_v48  ;;  %v1249_v54 = vpop.f32.mrb[29].mxu0  ;;  %9810 = vmatprep.subr.bf16.mxu1 %v9809_v12  ;;  %v9831_v62 = vpack.c.bf16 %v1551_v16, %v1549_v50  ;;  %v1554_v12 = vld [vmem:[#allocation8 + $0x2d8] sm:$0xf]  ;;  %v1937_v16 = vld [vmem:[#allocation8 + $0x3a0] sm:$0xff] }
 0x3da   :  { %v1299_v60 = vadd.f32 %v12584_v47, %v1249_v54  ;;  %8910 = vmatprep.mubr.msk.f32.mxu1 %vm1364_vm7, %v12633_v44  ;;  %v1920_v48 = vld [vmem:[#allocation8 + $0x318] sm:$0xff]  ;;  %v9871_v54 = vpack.c.bf16 %v1915_v24, %v1913_v40  ;;  %v1941_v24 = vld [vmem:[#allocation8 + $0x3c0] sm:$0xff] }
 0x3db   :  { %1490 = vmatmul.mubr.f32.gmra.mrb[42].mxu1 %v12635_v52  ;;  %v12644_v5 = vmax.f32 %v1298_v53, 0.0  ;;  %v9869_v53 = vpack.c.bf16 %v1916_v20, %v1914_v15  ;;  %v1944_v15 = vld [vmem:[#allocation8 + $0x3d8] sm:$0xff] }
 0x3dc   :  { %v12642_v1 = vmax.f32 %v1299_v60, 0.0  ;;  %9812 = vmatpush1.bf16.msra.mxu1 %v9811_v51  ;;  %v1253_v2 = vpop.f32.mrb[30].mxu0  ;;  %v1553_v51 = vld [vmem:[#allocation8 + $0x2d0] sm:$0xf]  ;;  %v1922_v60 = vld [vmem:[#allocation8 + $0x328] sm:$0xff] }
 0x3dd   :  { %v1300_v6 = vadd.f32 %v12581_v46, %v1253_v2  ;;  %v1255_v8 = vpop.f32.mrb[31].mxu0  ;;  %9814 = vmatprep.subr.bf16.mxu1 %v9813_v55  ;;  %v9821_v46 = vpack.c.bf16 %v1544_v21, %v1542_v19  ;;  %v9873_v55 = vpack.c.bf16 %v1920_v48, %v1918_v39  ;;  %v9877_v2 = vpack.c.bf16 %v1924_v61, %v1922_v60  ;;  %v1927_v19 = vld [vmem:[#allocation8 + $0x350] sm:$0xff]  ;;  %v1930_v21 = vld [vmem:[#allocation8 + $0x368] sm:$0xff]  ;;  %v1952_v60 = vld [vmem:[#allocation8 + $0x418] sm:$0xff] }
 0x3de   :  { %v1301_v18 = vadd.f32 %v12584_v47, %v1255_v8  ;;  %8911 = vmatprep.mubr.msk.f32.mxu1 %vm1364_vm7, %v12642_v1  ;;  %v1546_v47 = vld [vmem:[#allocation8 + $0x298] sm:$0xff]  ;;  %v1926_v8 = vld [vmem:[#allocation8 + $0x348] sm:$0xff]  ;;  %v1943_v39 = vld [vmem:[#allocation8 + $0x3d0] sm:$0xff] }
 0x3df   :  { %1496 = vmatmul.mubr.f32.gmra.mrb[44].mxu1 %v12644_v5  ;;  %v12653_v25 = vmax.f32 %v1300_v6, 0.0  ;;  %v9825_v33 = vpack.c.bf16 %v1548_v31, %v1546_v47  ;;  %v1923_v6 = vld [vmem:[#allocation8 + $0x330] sm:$0xff]  ;;  %v1934_v31 = vld [vmem:[#allocation8 + $0x388] sm:$0xff] }
 0x3e0   :  { %v12651_v22 = vmax.f32 %v1301_v18, 0.0  ;;  %9816 = vmatpush1.bf16.msra.mxu1 %v9815_v4  ;;  %v1921_v4 = vld [vmem:[#allocation8 + $0x320] sm:$0xff]  ;;  %v1931_v47 = vld [vmem:[#allocation8 + $0x370] sm:$0xff]  ;;  %v1946_v48 = vld [vmem:[#allocation8 + $0x3e8] sm:$0xff] }
 0x3e1   :  { %9818 = vmatprep.subr.bf16.mxu1 %v9817_v10  ;;  %v1928_v10 = vld [vmem:[#allocation8 + $0x358] sm:$0xff]  ;;  %v9879_v13 = vpack.c.bf16 %v1923_v6, %v1921_v4  ;;  %v1925_v18 = vld [vmem:[#allocation8 + $0x340] sm:$0xff]  ;;  %v1951_v4 = vld [vmem:[#allocation8 + $0x410] sm:$0xff] }
 0x3e2   :  { %8912 = vmatprep.mubr.msk.f32.mxu1 %vm1364_vm7, %v12651_v22  ;;  %v9881_v14 = vpack.c.bf16 %v1928_v10, %v1926_v8  ;;  %v1954_v6 = vld [vmem:[#allocation8 + $0x428] sm:$0xff]  ;;  %v1956_v8 = vld [vmem:[#allocation8 + $0x438] sm:$0xff] }
 0x3e3   :  { %1502 = vmatmul.mubr.f32.gmra.mrb[46].mxu1 %v12653_v25 }
 0x3e4   :  { %9820 = vmatpush1.bf16.msra.mxu1 %v9819_v23  ;;  %8915 = vmatprep.mubr.msk.f32.mxu1 %vm1364_vm7, %v12588_v28  ;;  %v1932_v23 = vld [vmem:[#allocation8 + $0x378] sm:$0xff] }
 0x3e5   :  { %9822 = vmatprep.subr.bf16.mxu1 %v9821_v46  ;;  %v9883_v46 = vpack.c.bf16 %v1927_v19, %v1925_v18  ;;  %v9885_v27 = vpack.c.bf16 %v1932_v23, %v1930_v21  ;;  %v1955_v18 = vld [vmem:[#allocation8 + $0x430] sm:$0xff]  ;;  %v1958_v21 = vld [vmem:[#allocation8 + $0x448] sm:$0xf] }
 0x3e8   :  { %9824 = vmatpush1.bf16.msra.mxu1 %v9823_v32  ;;  %v1936_v32 = vld [vmem:[#allocation8 + $0x398] sm:$0xff] }
 0x3e9   :  { %9826 = vmatprep.subr.bf16.mxu1 %v9825_v33  ;;  %v9887_v33 = vpack.c.bf16 %v1931_v47, %v1929_v29  ;;  %v9889_v34 = vpack.c.bf16 %v1936_v32, %v1934_v31 }
 0x3ec   :  { %9828 = vmatpush1.bf16.msra.mxu1 %v9827_v41  ;;  %v1940_v41 = vld [vmem:[#allocation8 + $0x3b8] sm:$0xff] }
 0x3ed   :  { %9830 = vmatprep.subr.bf16.mxu1 %v9829_v49  ;;  %v9891_v49 = vpack.c.bf16 %v1935_v37, %v1933_v35  ;;  %v9893_v50 = vpack.c.bf16 %v1940_v41, %v1938_v38  ;;  %v2258_v37 = vld [vmem:[#allocation10 + $0x8] sm:$0xff]  ;;  %v2260_v41 = vld [vmem:[#allocation10 + $0x18] sm:$0xff] }
 0x3f0   :  { %9832 = vmatpush1.bf16.msra.mxu1 %v9831_v62  ;;  %v1939_v62 = vld [vmem:[#allocation8 + $0x3b0] sm:$0xff] }
 0x3f1   :  { %8913 = vmatprep.subr.msk.mxu1 %vm715_vm4, %v1554_v12  ;;  %v1942_v12 = vld [vmem:[#allocation8 + $0x3c8] sm:$0xff]  ;;  %v9895_v20 = vpack.c.bf16 %v1939_v62, %v1937_v16  ;;  %v2259_v16 = vld [vmem:[#allocation10 + $0x10] sm:$0xff] }
 0x3f2   :  { %v9897_v40 = vpack.c.bf16 %v1944_v15, %v1942_v12  ;;  %v2262_v12 = vld [vmem:[#allocation10 + $0x28] sm:$0xff]  ;;  %v2264_v15 = vld [vmem:[#allocation10 + $0x38] sm:$0xff] }
 0x3f4   :  { %8914 = vmatpush1.msk.msra.mxu1 %vm715_vm4, %v1553_v51  ;;  %v1948_v51 = vld [vmem:[#allocation8 + $0x3f8] sm:$0xff] }
 0x3f5   :  { %1626 = vmatmul.mubr.f32.vlgmr.msra.gmra.mrb[48].mxu1 %v12590_v36  ;;  %9870 = vmatprep.subr.bf16.mxu1 %v9869_v53  ;;  %v9899_v53 = vpack.c.bf16 %v1943_v39, %v1941_v24  ;;  %v2261_v24 = vld [vmem:[#allocation10 + $0x20] sm:$0xff] }
 0x3f6   :  { %8916 = vmatprep.mubr.msk.f32.mxu1 %vm1364_vm7, %v12597_v56  ;;  %9872 = vmatpush1.bf16.msra.mxu1 %v9871_v54  ;;  %v9901_v54 = vpack.c.bf16 %v1948_v51, %v1946_v48  ;;  %v2263_v51 = vld [vmem:[#allocation10 + $0x30] sm:$0xff] }
 0x3f7   :  { %9874 = vmatprep.subr.bf16.mxu1 %v9873_v55  ;;  %v1945_v55 = vld [vmem:[#allocation8 + $0x3e0] sm:$0xff] }
 0x3f8   :  { %v9903_v61 = vpack.c.bf16 %v1947_v57, %v1945_v55  ;;  %v2266_v55 = vld [vmem:[#allocation10 + $0x48] sm:$0xff]  ;;  %v2268_v57 = vld [vmem:[#allocation10 + $0x58] sm:$0xff] }
 0x3f9   :  { %1632 = vmatmul.mubr.f32.gmra.mrb[50].mxu1 %v12599_v59 }
 0x3fa   :  { %8917 = vmatprep.mubr.msk.f32.mxu1 %vm1364_vm7, %v12606_v7  ;;  %9876 = vmatpush1.bf16.msra.mxu1 %v9875_v63  ;;  %v9905_v63 = vpack.c.bf16 %v1952_v60, %v1950_v58  ;;  %v9939_v58 = vpack.c.bf16 %v2268_v57, %v2266_v55  ;;  %v2265_v60 = vld [vmem:[#allocation10 + $0x40] sm:$0xff] }
 0x3fb   :  { %9878 = vmatprep.subr.bf16.mxu1 %v9877_v2  ;;  %v1949_v2 = vld [vmem:[#allocation8 + $0x400] sm:$0xff] }
 0x3fc   :  { %v9907_v10 = vpack.c.bf16 %v1951_v4, %v1949_v2  ;;  %v2270_v2 = vld [vmem:[#allocation10 + $0x68] sm:$0xff] }
 0x3fd   :  { %1638 = vmatmul.mubr.f32.gmra.mrb[52].mxu1 %v12608_v11 }
 0x3fe   :  { %8918 = vmatprep.mubr.msk.f32.mxu1 %vm1364_vm7, %v12615_v26  ;;  %9880 = vmatpush1.bf16.msra.mxu1 %v9879_v13  ;;  %v9909_v13 = vpack.c.bf16 %v1956_v8, %v1954_v6  ;;  %v2272_v8 = vld [vmem:[#allocation10 + $0x78] sm:$0xff] }
 0x3ff   :  { %9882 = vmatprep.subr.bf16.mxu1 %v9881_v14  ;;  %v1953_v14 = vld [vmem:[#allocation8 + $0x420] sm:$0xff] }
 0x400   :  { %v9911_v19 = vpack.c.bf16 %v1955_v18, %v1953_v14  ;;  %v2271_v14 = vld [vmem:[#allocation10 + $0x70] sm:$0xff]  ;;  %v2274_v18 = vld [vmem:[#allocation10 + $0x88] sm:$0xff] }
 0x401   :  { %1644 = vmatmul.mubr.f32.gmra.mrb[54].mxu1 %v12617_v30 }
 0x402   :  { %8919 = vmatprep.mubr.msk.f32.mxu1 %vm1364_vm7, %v12624_v43  ;;  %9884 = vmatpush1.bf16.msra.mxu1 %v9883_v46 }
 0x403   :  { %9886 = vmatprep.subr.bf16.mxu1 %v9885_v27 }
 0x405   :  { %1650 = vmatmul.mubr.f32.gmra.mrb[56].mxu1 %v12626_v3 }
 0x406   :  { %8920 = vmatprep.mubr.msk.f32.mxu1 %vm1364_vm7, %v12633_v44  ;;  %9888 = vmatpush1.bf16.msra.mxu1 %v9887_v33 }
 0x407   :  { %9890 = vmatprep.subr.bf16.mxu1 %v9889_v34 }
 0x409   :  { %1656 = vmatmul.mubr.f32.gmra.mrb[58].mxu1 %v12635_v52 }
 0x40a   :  { %8921 = vmatprep.mubr.msk.f32.mxu1 %vm1364_vm7, %v12642_v1  ;;  %9892 = vmatpush1.bf16.msra.mxu1 %v9891_v49  ;;  %v9931_v49 = vpack.c.bf16 %v2260_v41, %v2258_v37 }
 0x40b   :  { %9894 = vmatprep.subr.bf16.mxu1 %v9893_v50  ;;  %v2257_v50 = vld [vmem:[#allocation10] sm:$0xff] }
 0x40c   :  { %v9933_v62 = vpack.c.bf16 %v2259_v16, %v2257_v50  ;;  %v2275_v50 = vld [vmem:[#allocation10 + $0x90] sm:$0xff]  ;;  %v2278_v16 = vld [vmem:[#allocation10 + $0xa8] sm:$0xff] }
 0x40d   :  { %1662 = vmatmul.mubr.f32.gmra.mrb[60].mxu1 %v12644_v5 }
 0x40e   :  { %8922 = vmatprep.mubr.msk.f32.mxu1 %vm1364_vm7, %v12651_v22  ;;  %9896 = vmatpush1.bf16.msra.mxu1 %v9895_v20 }
 0x40f   :  { %9898 = vmatprep.subr.bf16.mxu1 %v9897_v40  ;;  %v9935_v40 = vpack.c.bf16 %v2264_v15, %v2262_v12 }
 0x411   :  { %1668 = vmatmul.mubr.f32.gmra.mrb[62].mxu1 %v12653_v25 }
 0x412   :  { %9900 = vmatpush1.bf16.msra.mxu1 %v9899_v53  ;;  %8945 = vmatprep.mubr.msk.f32.mxu1 %vm1364_vm7, %v12588_v28  ;;  %v1957_v28 = vld [vmem:[#allocation8 + $0x440] sm:$0xf] }
 0x413   :  { %9902 = vmatprep.subr.bf16.mxu1 %v9901_v54  ;;  %v9937_v54 = vpack.c.bf16 %v2263_v51, %v2261_v24  ;;  %v2277_v24 = vld [vmem:[#allocation10 + $0xa0] sm:$0xff]  ;;  %v2284_v51 = vld [vmem:[#allocation10 + $0xd8] sm:$0xff] }
 0x416   :  { %9904 = vmatpush1.bf16.msra.mxu1 %v9903_v61  ;;  %v2267_v61 = vld [vmem:[#allocation10 + $0x50] sm:$0xff] }
 0x417   :  { %9906 = vmatprep.subr.bf16.mxu1 %v9905_v63  ;;  %v9941_v6 = vpack.c.bf16 %v2267_v61, %v2265_v60  ;;  %v2281_v61 = vld [vmem:[#allocation10 + $0xc0] sm:$0xff] }
 0x41a   :  { %9908 = vmatpush1.bf16.msra.mxu1 %v9907_v10  ;;  %v9943_v10 = vpack.c.bf16 %v2272_v8, %v2270_v2  ;;  %v2286_v2 = vld [vmem:[#allocation10 + $0xe8] sm:$0xff] }
 0x41b   :  { %9910 = vmatprep.subr.bf16.mxu1 %v9909_v13  ;;  %v2269_v13 = vld [vmem:[#allocation10 + $0x60] sm:$0xff] }
 0x41c   :  { %v9945_v37 = vpack.c.bf16 %v2271_v14, %v2269_v13  ;;  %v2285_v14 = vld [vmem:[#allocation10 + $0xe0] sm:$0xff] }
 0x41e   :  { %9912 = vmatpush1.bf16.msra.mxu1 %v9911_v19  ;;  %v2276_v19 = vld [vmem:[#allocation10 + $0x98] sm:$0xff] }
 0x41f   :  { %8943 = vmatprep.subr.msk.mxu1 %vm715_vm4, %v1958_v21  ;;  %v9947_v41 = vpack.c.bf16 %v2276_v19, %v2274_v18  ;;  %v2287_v18 = vld [vmem:[#allocation10 + $0xf0] sm:$0xff]  ;;  %v2290_v19 = vld [vmem:[#allocation10 + $0x108] sm:$0xff] }
 0x422   :  { %8944 = vmatpush1.msk.msra.mxu1 %vm715_vm4, %v1957_v28 }
 0x423   :  { %2030 = vmatmul.mubr.f32.vlgmr.msra.gmra.mrb[64].mxu1 %v12590_v36  ;;  %9932 = vmatprep.subr.bf16.mxu1 %v9931_v49  ;;  %v2273_v49 = vld [vmem:[#allocation10 + $0x80] sm:$0xff] }
 0x424   :  { %8946 = vmatprep.mubr.msk.f32.mxu1 %vm1364_vm7, %v12597_v56  ;;  %9934 = vmatpush1.bf16.msra.mxu1 %v9933_v62  ;;  %v2280_v62 = vld [vmem:[#allocation10 + $0xb8] sm:$0xff] }
 0x425   :  { %9936 = vmatprep.subr.bf16.mxu1 %v9935_v40  ;;  %v9951_v40 = vpack.c.bf16 %v2280_v62, %v2278_v16  ;;  %v2291_v16 = vld [vmem:[#allocation10 + $0x110] sm:$0xff]  ;;  %v2294_v62 = vld [vmem:[#allocation10 + $0x128] sm:$0xff] }
 0x427   :  { %2036 = vmatmul.mubr.f32.gmra.mrb[66].mxu1 %v12599_v59 }
 0x428   :  { %8947 = vmatprep.mubr.msk.f32.mxu1 %vm1364_vm7, %v12606_v7  ;;  %9938 = vmatpush1.bf16.msra.mxu1 %v9937_v54 }
 0x429   :  { %9940 = vmatprep.subr.bf16.mxu1 %v9939_v58 }
 0x42b   :  { %2042 = vmatmul.mubr.f32.gmra.mrb[68].mxu1 %v12608_v11 }
 0x42c   :  { %8948 = vmatprep.mubr.msk.f32.mxu1 %vm1364_vm7, %v12615_v26  ;;  %9942 = vmatpush1.bf16.msra.mxu1 %v9941_v6 }
 0x42d   :  { %9944 = vmatprep.subr.bf16.mxu1 %v9943_v10 }
 0x42f   :  { %2048 = vmatmul.mubr.f32.gmra.mrb[70].mxu1 %v12617_v30 }
 0x430   :  { %8949 = vmatprep.mubr.msk.f32.mxu1 %vm1364_vm7, %v12624_v43  ;;  %9946 = vmatpush1.bf16.msra.mxu1 %v9945_v37 }
 0x431   :  { %9948 = vmatprep.subr.bf16.mxu1 %v9947_v41 }
 0x433   :  { %2054 = vmatmul.mubr.f32.gmra.mrb[72].mxu1 %v12626_v3 }
 0x434   :  { %8950 = vmatprep.mubr.msk.f32.mxu1 %vm1364_vm7, %v12633_v44 }
 0x437   :  { %2060 = vmatmul.mubr.f32.gmra.mrb[74].mxu1 %v12635_v52 }
 0x438   :  { %8951 = vmatprep.mubr.msk.f32.mxu1 %vm1364_vm7, %v12642_v1 }
 0x43b   :  { %2066 = vmatmul.mubr.f32.gmra.mrb[76].mxu1 %v12644_v5 }
 0x43c   :  { %8952 = vmatprep.mubr.msk.f32.mxu1 %vm1364_vm7, %v12651_v22 }
 0x43f   :  { %2072 = vmatmul.mubr.f32.gmra.mrb[78].mxu1 %v12653_v25 }
 0x49a   :  { %v12710_v36 = vpop.f32.mrb[32].mxu1 }
 0x49b   :  { %v12712_v56 = vpop.f32.mrb[33].mxu1 }
 0x49e   :  { %v12714_v59 = vpop.f32.mrb[34].mxu1 }
 0x49f   :  { %v9853_v7 = vpack.c.bf16 %v12714_v59, %v12710_v36  ;;  %v12718_v11 = vpop.f32.mrb[35].mxu1  ;;  %v11478_v36 = vld [vmem:[#allocation2 + $0x50] sm:$0xff] }
 0x4a0   :  { %v9851_v26 = vpack.c.bf16 %v12718_v11, %v12712_v56  ;;  %v11477_v11 = vld [vmem:[#allocation2 + $0x48] sm:$0xff] }
 0x4a2   :  { %v12722_v30 = vpop.f32.mrb[36].mxu1 }
 0x4a3   :  { %v12724_v43 = vpop.f32.mrb[37].mxu1 }
 0x4a6   :  { %v12726_v3 = vpop.f32.mrb[38].mxu1 }
 0x4a7   :  { %v9857_v44 = vpack.c.bf16 %v12726_v3, %v12722_v30  ;;  %v12730_v52 = vpop.f32.mrb[39].mxu1 }
 0x4a8   :  { %v9855_v1 = vpack.c.bf16 %v12730_v52, %v12724_v43  ;;  %v11480_v52 = vld [vmem:[#allocation2 + $0x60] sm:$0xff] }
 0x4aa   :  { %v12734_v5 = vpop.f32.mrb[40].mxu1 }
 0x4ab   :  { %v12736_v22 = vpop.f32.mrb[41].mxu1 }
 0x4ae   :  { %v12738_v25 = vpop.f32.mrb[42].mxu1 }
 0x4af   :  { %v9861_v23 = vpack.c.bf16 %v12738_v25, %v12734_v5  ;;  %v12742_v46 = vpop.f32.mrb[43].mxu1 }
 0x4b0   :  { %v9859_v27 = vpack.c.bf16 %v12742_v46, %v12736_v22  ;;  %v11481_v22 = vld [vmem:[#allocation2 + $0x68] sm:$0xff] }
 0x4b2   :  { %v12746_v29 = vpop.f32.mrb[44].mxu1 }
 0x4b3   :  { %v12748_v47 = vpop.f32.mrb[45].mxu1 }
 0x4b6   :  { %v12750_v31 = vpop.f32.mrb[46].mxu1 }
 0x4b7   :  { %v9866_v32 = vpack.c.bf16 %v12750_v31, %v12746_v29  ;;  %v12754_v33 = vpop.f32.mrb[47].mxu1  ;;  %v11482_v29 = vld [vmem:[#allocation2 + $0x70] sm:$0xff] }
 0x4b8   :  { %v9863_v34 = vpack.c.bf16 %v12754_v33, %v12748_v47 }
 0x4c8   :  { %v1627_v35 = vpop.f32.mrb[48].mxu1 }
 0x4c9   :  { %v1629_v38 = vpop.f32.mrb[49].mxu1 }
 0x4cc   :  { %v1633_v20 = vpop.f32.mrb[50].mxu1 }
 0x4cd   :  { %v9835_v39 = vpack.c.bf16 %v1633_v20, %v1627_v35  ;;  %v1635_v48 = vpop.f32.mrb[51].mxu1  ;;  %v9949_v20 = vpack.c.bf16 %v2275_v50, %v2273_v49  ;;  %v2289_v50 = vld [vmem:[#allocation10 + $0x100] sm:$0xff] }
 0x4ce   :  { %v9833_v53 = vpack.c.bf16 %v1635_v48, %v1629_v38  ;;  %v2282_v48 = vld [vmem:[#allocation10 + $0xc8] sm:$0xff] }
 0x4cf   :  { %9950 = vmatpush1.bf16.msra.mxu1 %v9949_v20  ;;  %v9955_v60 = vpack.c.bf16 %v2284_v51, %v2282_v48 }
 0x4d0   :  { %v1639_v63 = vpop.f32.mrb[52].mxu1  ;;  %9834 = vmatprep.subr.bf16.mxu0 %v9833_v53  ;;  %9952 = vmatprep.subr.bf16.mxu1 %v9951_v40  ;;  %v2293_v40 = vld [vmem:[#allocation10 + $0x120] sm:$0xff] }
 0x4d1   :  { %v1641_v4 = vpop.f32.mrb[53].mxu1  ;;  %9836 = vmatpush1.bf16.msra.mxu0 %v9835_v39  ;;  %v2279_v39 = vld [vmem:[#allocation10 + $0xb0] sm:$0xff] }
 0x4d2   :  { %v9953_v57 = vpack.c.bf16 %v2279_v39, %v2277_v24  ;;  %v2295_v24 = vld [vmem:[#allocation10 + $0x130] sm:$0xff] }
 0x4d3   :  { %v11476_v39 = vld [vmem:[#allocation2 + $0x40] sm:$0xff]  ;;  %v9969_v56 = vpack.c.bf16 %v2295_v24, %v2293_v40  ;;  %v2457_v24 = vld [vmem:[#allocation10 + $0x1c0] sm:$0xff] }
 0x4d4   :  { %v1645_v21 = vpop.f32.mrb[54].mxu1  ;;  %9954 = vmatpush1.bf16.msra.mxu1 %v9953_v57  ;;  %v11485_v57 = vld [vmem:[#allocation2 + $0x8] sm:$0xff]  ;;  %v2455_v40 = vld [vmem:[#allocation10 + $0x1b0] sm:$0xff] }
 0x4d5   :  { %v9839_v28 = vpack.c.bf16 %v1645_v21, %v1639_v63  ;;  %v1647_v35 = vpop.f32.mrb[55].mxu1  ;;  %v2283_v63 = vld [vmem:[#allocation10 + $0xd0] sm:$0xff]  ;;  %9956 = vmatprep.subr.bf16.mxu1 %v9955_v60  ;;  %v2292_v21 = vld [vmem:[#allocation10 + $0x118] sm:$0xff] }
 0x4d6   :  { %v9837_v38 = vpack.c.bf16 %v1647_v35, %v1641_v4  ;;  %v2288_v4 = vld [vmem:[#allocation10 + $0xf8] sm:$0xff]  ;;  %v9957_v10 = vpack.c.bf16 %v2283_v63, %v2281_v61  ;;  %v9963_v49 = vpack.c.bf16 %v2292_v21, %v2290_v19  ;;  %v2447_v19 = vld [vmem:[#allocation10 + $0x170] sm:$0xff]  ;;  %v2449_v21 = vld [vmem:[#allocation10 + $0x180] sm:$0xff] }
 0x4d7   :  { %v9959_v13 = vpack.c.bf16 %v2288_v4, %v2286_v2  ;;  %v2448_v63 = vld [vmem:[#allocation10 + $0x178] sm:$0xff]  ;;  %v2450_v2 = vld [vmem:[#allocation10 + $0x188] sm:$0xff] }
 0x4d8   :  { %v1651_v12 = vpop.f32.mrb[56].mxu1  ;;  %9838 = vmatprep.subr.bf16.mxu0 %v9837_v38  ;;  %9958 = vmatpush1.bf16.msra.mxu1 %v9957_v10  ;;  %v9961_v38 = vpack.c.bf16 %v2287_v18, %v2285_v14  ;;  %v11487_v10 = vld [vmem:[#allocation2 + $0x18] sm:$0xff]  ;;  %v11489_v14 = vld [vmem:[#allocation2 + $0x28] sm:$0xff]  ;;  %v11490_v18 = vld [vmem:[#allocation2 + $0x30] sm:$0xff] }
 0x4d9   :  { %v1653_v15 = vpop.f32.mrb[57].mxu1  ;;  %9840 = vmatpush1.bf16.msra.mxu0 %v9839_v28  ;;  %9960 = vmatprep.subr.bf16.mxu1 %v9959_v13  ;;  %v11488_v13 = vld [vmem:[#allocation2 + $0x20] sm:$0xff] }
 0x4dc   :  { %v1657_v53 = vpop.f32.mrb[58].mxu1  ;;  %9962 = vmatpush1.bf16.msra.mxu1 %v9961_v38  ;;  %v9977_v38 = vpack.c.bf16 %v2449_v21, %v2447_v19  ;;  %v2486_v19 = vld [vmem:[#allocation10 + $0x2a8] sm:$0xff] }
 0x4dd   :  { %v9843_v54 = vpack.c.bf16 %v1657_v53, %v1651_v12  ;;  %v1659_v55 = vpop.f32.mrb[59].mxu1  ;;  %v2296_v12 = vld [vmem:[#allocation10 + $0x138] sm:$0xff]  ;;  %9964 = vmatprep.subr.bf16.mxu1 %v9963_v49  ;;  %v11484_v53 = vld [vmem:[#allocation2] sm:$0xff]  ;;  %v11499_v21 = vld [vmem:[#allocation2 + $0xb8] sm:$0xf] }
 0x4de   :  { %v9841_v58 = vpack.c.bf16 %v1659_v55, %v1653_v15  ;;  %v9965_v15 = vpack.c.bf16 %v2291_v16, %v2289_v50  ;;  %v9967_v20 = vpack.c.bf16 %v2296_v12, %v2294_v62  ;;  %v2451_v49 = vld [vmem:[#allocation10 + $0x190] sm:$0xff]  ;;  %v2453_v50 = vld [vmem:[#allocation10 + $0x1a0] sm:$0xff]  ;;  %v2456_v16 = vld [vmem:[#allocation10 + $0x1b8] sm:$0xff] }
 0x4df   :  { %v2458_v62 = vld [vmem:[#allocation10 + $0x1c8] sm:$0xff]  ;;  %v11492_v12 = vld [vmem:[#allocation2 + $0x80] sm:$0xff] }
 0x4e0   :  { %v1663_v6 = vpop.f32.mrb[60].mxu1  ;;  %9842 = vmatprep.subr.bf16.mxu0 %v9841_v58  ;;  %9966 = vmatpush1.bf16.msra.mxu1 %v9965_v15  ;;  %v9981_v15 = vpack.c.bf16 %v2453_v50, %v2451_v49  ;;  %v2488_v49 = vld [vmem:[#allocation10 + $0x2b8] sm:$0xff]  ;;  %v2490_v50 = vld [vmem:[#allocation10 + $0x2c8] sm:$0xff] }
 0x4e1   :  { %v1665_v8 = vpop.f32.mrb[61].mxu1  ;;  %9844 = vmatpush1.bf16.msra.mxu0 %v9843_v54  ;;  %9968 = vmatprep.subr.bf16.mxu1 %v9967_v20  ;;  %v9983_v20 = vpack.c.bf16 %v2458_v62, %v2456_v16  ;;  %v10015_v16 = vpack.c.bf16 %v2490_v50, %v2488_v49  ;;  %v2298_v62 = vld [vmem:[#allocation10 + $0x148] sm:$0xff] }
 0x4e4   :  { %v1669_v28 = vpop.f32.mrb[62].mxu1  ;;  %9970 = vmatpush1.bf16.msra.mxu1 %v9969_v56  ;;  %v2462_v56 = vld [vmem:[#allocation10 + $0x1e8] sm:$0xff] }
 0x4e5   :  { %v9848_v35 = vpack.c.bf16 %v1669_v28, %v1663_v6  ;;  %v1671_v37 = vpop.f32.mrb[63].mxu1  ;;  %v11486_v6 = vld [vmem:[#allocation2 + $0x10] sm:$0xff]  ;;  %v2452_v28 = vld [vmem:[#allocation10 + $0x198] sm:$0xff] }
 0x4e6   :  { %v9845_v41 = vpack.c.bf16 %v1671_v37, %v1665_v8  ;;  %v9975_v8 = vpack.c.bf16 %v2450_v2, %v2448_v63  ;;  %v11491_v37 = vld [vmem:[#allocation2 + $0x38] sm:$0xf]  ;;  %v2477_v63 = vld [vmem:[#allocation10 + $0x260] sm:$0xff]  ;;  %v2480_v2 = vld [vmem:[#allocation10 + $0x278] sm:$0xff] }
 0x4e8   :  { %9847 = vmatprep.subr.msk.bf16.mxu0 %vm12491_vm5, %v9845_v41 }
 0x4e9   :  { %9850 = vmatpush1.bf16.msk.msra.mxu0 %vm12491_vm5, %v9848_v35  ;;  %v2454_v35 = vld [vmem:[#allocation10 + $0x1a8] sm:$0xff] }
 0x4ea   :  { %9852 = vmatprep.subr.bf16.mxu0 %v9851_v26  ;;  %v11479_v26 = vld [vmem:[#allocation2 + $0x58] sm:$0xff]  ;;  %v9979_v41 = vpack.c.bf16 %v2454_v35, %v2452_v28 }
 0x4ec   :  { %8925 = vmatmul.mubr.msk.f32.vlgmr.msra.gmra.mrb[32].mxu0 %vm690_vm6, %v11476_v39  ;;  %v2460_v39 = vld [vmem:[#allocation10 + $0x1d8] sm:$0xff] }
 0x4ed   :  { %9854 = vmatpush1.bf16.msra.mxu0 %v9853_v7  ;;  %1750 = vmatprep.mubr.f32.mxu0 %v12092_v0 }
 0x4ee   :  { %9856 = vmatprep.subr.bf16.mxu0 %v9855_v1 }
 0x4f0   :  { %8926 = vmatmul.mubr.msk.f32.gmra.mrb[34].mxu0 %vm690_vm6, %v11477_v11  ;;  %v11493_v11 = vld [vmem:[#allocation2 + $0x88] sm:$0xff] }
 0x4f1   :  { %9858 = vmatpush1.bf16.msra.mxu0 %v9857_v44  ;;  %1756 = vmatprep.mubr.f32.mxu0 %v12092_v0 }
 0x4f2   :  { %9860 = vmatprep.subr.bf16.mxu0 %v9859_v27 }
 0x4f4   :  { %8927 = vmatmul.mubr.msk.f32.gmra.mrb[36].mxu0 %vm690_vm6, %v11478_v36  ;;  %v9985_v36 = vpack.c.bf16 %v2457_v24, %v2455_v40  ;;  %v2489_v40 = vld [vmem:[#allocation10 + $0x2c0] sm:$0xff] }
 0x4f5   :  { %9862 = vmatpush1.bf16.msra.mxu0 %v9861_v23  ;;  %1762 = vmatprep.mubr.f32.mxu0 %v12092_v0  ;;  %v2297_v24 = vld [vmem:[#allocation10 + $0x140] sm:$0xff] }
 0x4f6   :  { %9865 = vmatprep.subr.msk.bf16.mxu0 %vm12491_vm5, %v9863_v34  ;;  %v2031_v59 = vpop.f32.mrb[64].mxu1 }
 0x4f7   :  { %v2033_v7 = vpop.f32.mrb[65].mxu1 }
 0x4f8   :  { %8928 = vmatmul.mubr.msk.f32.gmra.mrb[38].mxu0 %vm690_vm6, %v11479_v26  ;;  %v2461_v26 = vld [vmem:[#allocation10 + $0x1e0] sm:$0xff] }
 0x4f9   :  { %9868 = vmatpush1.bf16.msk.msra.mxu0 %vm12491_vm5, %v9866_v32  ;;  %1768 = vmatprep.mubr.f32.mxu0 %v12092_v0  ;;  %v11483_v32 = vld [vmem:[#allocation2 + $0x78] sm:$0xf] }
 0x4fa   :  { %v2037_v30 = vpop.f32.mrb[66].mxu1 }
 0x4fb   :  { %v9915_v43 = vpack.c.bf16 %v2037_v30, %v2031_v59  ;;  %v2039_v3 = vpop.f32.mrb[67].mxu1  ;;  %v9987_v59 = vpack.c.bf16 %v2462_v56, %v2460_v39  ;;  %v2464_v30 = vld [vmem:[#allocation10 + $0x1f8] sm:$0xff]  ;;  %v2299_v56 = vld [vmem:[#allocation10 + $0x150] sm:$0xff] }
 0x4fc   :  { %v9913_v44 = vpack.c.bf16 %v2039_v3, %v2033_v7  ;;  %8929 = vmatmul.mubr.msk.f32.gmra.mrb[40].mxu0 %vm690_vm6, %v11480_v52  ;;  %v2459_v7 = vld [vmem:[#allocation10 + $0x1d0] sm:$0xff]  ;;  %v11494_v3 = vld [vmem:[#allocation2 + $0x90] sm:$0xff] }
 0x4fd   :  { %1774 = vmatprep.mubr.f32.mxu0 %v12092_v0 }
 0x4fe   :  { %v2043_v1 = vpop.f32.mrb[68].mxu1  ;;  %9914 = vmatprep.subr.bf16.mxu0 %v9913_v44  ;;  %v9989_v44 = vpack.c.bf16 %v2461_v26, %v2459_v7  ;;  %v2854_v7 = vld [vmem:[#allocation10 + $0x2f8] sm:$0xff]  ;;  %v2302_v26 = vld [vmem:[#allocation10 + $0x168] sm:$0xf] }
 0x4ff   :  { %v2045_v5 = vpop.f32.mrb[69].mxu1 }
 0x500   :  { %8930 = vmatmul.mubr.msk.f32.gmra.mrb[42].mxu0 %vm690_vm6, %v11481_v22  ;;  %v2468_v22 = vld [vmem:[#allocation10 + $0x218] sm:$0xff] }
 0x501   :  { %1780 = vmatprep.mubr.f32.mxu0 %v12092_v0 }
 0x502   :  { %v2049_v25 = vpop.f32.mrb[70].mxu1 }
 0x503   :  { %v9919_v23 = vpack.c.bf16 %v2049_v25, %v2043_v1  ;;  %v2051_v46 = vpop.f32.mrb[71].mxu1  ;;  %v2463_v1 = vld [vmem:[#allocation10 + $0x1f0] sm:$0xff]  ;;  %v2470_v25 = vld [vmem:[#allocation10 + $0x228] sm:$0xff] }
 0x504   :  { %v9917_v27 = vpack.c.bf16 %v2051_v46, %v2045_v5  ;;  %8931 = vmatmul.mubr.msk.f32.gmra.mrb[44].mxu0 %vm690_vm6, %v11482_v29  ;;  %v2465_v5 = vld [vmem:[#allocation10 + $0x200] sm:$0xff]  ;;  %v2467_v29 = vld [vmem:[#allocation10 + $0x210] sm:$0xff] }
 0x505   :  { %1786 = vmatprep.mubr.f32.mxu0 %v12092_v0  ;;  %v9993_v46 = vpack.c.bf16 %v2465_v5, %v2463_v1 }
 0x506   :  { %v2055_v47 = vpop.f32.mrb[72].mxu1 }
 0x507   :  { %v2057_v31 = vpop.f32.mrb[73].mxu1 }
 0x508   :  { %8932 = vmatmul.mubr.msk.f32.gmra.mrb[46].mxu0 %vm690_vm6, %v11483_v32  ;;  %v2474_v32 = vld [vmem:[#allocation10 + $0x248] sm:$0xff] }
 0x509   :  { %1863 = vmatprep.mubr.f32.mxu0 %v12092_v0 }
 0x50a   :  { %v2061_v33 = vpop.f32.mrb[74].mxu1 }
 0x50b   :  { %v9923_v34 = vpack.c.bf16 %v2061_v33, %v2055_v47  ;;  %v2063_v48 = vpop.f32.mrb[75].mxu1  ;;  %v2469_v47 = vld [vmem:[#allocation10 + $0x220] sm:$0xff]  ;;  %v11496_v33 = vld [vmem:[#allocation2 + $0xa0] sm:$0xff] }
 0x50c   :  { %v9921_v51 = vpack.c.bf16 %v2063_v48, %v2057_v31  ;;  %8935 = vmatmul.mubr.msk.f32.vlgmr.msra.gmra.mrb[32].mxu0 %vm690_vm6, %v11484_v53  ;;  %v2472_v31 = vld [vmem:[#allocation10 + $0x238] sm:$0xff]  ;;  %v2473_v53 = vld [vmem:[#allocation10 + $0x240] sm:$0xff] }
 0x50d   :  { %9916 = vmatpush1.bf16.msra.mxu0 %v9915_v43  ;;  %1869 = vmatprep.mubr.f32.mxu0 %v12092_v0  ;;  %v2466_v43 = vld [vmem:[#allocation10 + $0x208] sm:$0xff]  ;;  %v9999_v48 = vpack.c.bf16 %v2474_v32, %v2472_v31 }
 0x50e   :  { %9918 = vmatprep.subr.bf16.mxu0 %v9917_v27  ;;  %v2067_v54 = vpop.f32.mrb[76].mxu1  ;;  %v9991_v52 = vpack.c.bf16 %v2466_v43, %v2464_v30  ;;  %v9995_v27 = vpack.c.bf16 %v2470_v25, %v2468_v22  ;;  %v2491_v30 = vld [vmem:[#allocation10 + $0x2d0] sm:$0xf] }
 0x50f   :  { %v2069_v55 = vpop.f32.mrb[77].mxu1 }
 0x510   :  { %8936 = vmatmul.mubr.msk.f32.gmra.mrb[34].mxu0 %vm690_vm6, %v11485_v57  ;;  %v11497_v57 = vld [vmem:[#allocation2 + $0xa8] sm:$0xff] }
 0x511   :  { %9920 = vmatpush1.bf16.msra.mxu0 %v9919_v23  ;;  %1875 = vmatprep.mubr.f32.mxu0 %v12092_v0  ;;  %v11495_v23 = vld [vmem:[#allocation2 + $0x98] sm:$0xff] }
 0x512   :  { %9922 = vmatprep.subr.bf16.mxu0 %v9921_v51  ;;  %v2073_v58 = vpop.f32.mrb[78].mxu1  ;;  %v2471_v51 = vld [vmem:[#allocation10 + $0x230] sm:$0xff] }
 0x513   :  { %v9928_v60 = vpack.c.bf16 %v2073_v58, %v2067_v54  ;;  %v2075_v61 = vpop.f32.mrb[79].mxu1  ;;  %v2476_v54 = vld [vmem:[#allocation10 + $0x258] sm:$0xff]  ;;  %v10001_v58 = vpack.c.bf16 %v2473_v53, %v2471_v51 }
 0x514   :  { %v9925_v4 = vpack.c.bf16 %v2075_v61, %v2069_v55  ;;  %8937 = vmatmul.mubr.msk.f32.gmra.mrb[36].mxu0 %vm690_vm6, %v11486_v6  ;;  %v2478_v55 = vld [vmem:[#allocation10 + $0x268] sm:$0xff]  ;;  %v2475_v61 = vld [vmem:[#allocation10 + $0x250] sm:$0xff]  ;;  %v11498_v6 = vld [vmem:[#allocation2 + $0xb0] sm:$0xff] }
 0x515   :  { %9924 = vmatpush1.bf16.msra.mxu0 %v9923_v34  ;;  %1881 = vmatprep.mubr.f32.mxu0 %v12092_v0  ;;  %v9997_v34 = vpack.c.bf16 %v2469_v47, %v2467_v29  ;;  %v2856_v29 = vld [vmem:[#allocation10 + $0x308] sm:$0xff]  ;;  %v2858_v47 = vld [vmem:[#allocation10 + $0x318] sm:$0xff] }
 0x516   :  { %9927 = vmatprep.subr.msk.bf16.mxu0 %vm12491_vm5, %v9925_v4  ;;  %v2482_v4 = vld [vmem:[#allocation10 + $0x288] sm:$0xff]  ;;  %v10059_v53 = vpack.c.bf16 %v2858_v47, %v2856_v29  ;;  %v2871_v29 = vld [vmem:[#allocation10 + $0x380] sm:$0xff]  ;;  %v2873_v47 = vld [vmem:[#allocation10 + $0x390] sm:$0xff] }
 0x518   :  { %8938 = vmatmul.mubr.msk.f32.gmra.mrb[38].mxu0 %vm690_vm6, %v11487_v10  ;;  %v10007_v10 = vpack.c.bf16 %v2482_v4, %v2480_v2 }
 0x519   :  { %9930 = vmatpush1.bf16.msk.msra.mxu0 %vm12491_vm5, %v9928_v60  ;;  %1887 = vmatprep.mubr.f32.mxu0 %v12092_v0  ;;  %v10003_v60 = vpack.c.bf16 %v2478_v55, %v2476_v54  ;;  %v2855_v54 = vld [vmem:[#allocation10 + $0x300] sm:$0xff]  ;;  %v2857_v55 = vld [vmem:[#allocation10 + $0x310] sm:$0xff] }
 0x51a   :  { %9976 = vmatprep.subr.bf16.mxu0 %v9975_v8  ;;  %v10005_v8 = vpack.c.bf16 %v2477_v63, %v2475_v61  ;;  %v10061_v2 = vpack.c.bf16 %v2857_v55, %v2855_v54  ;;  %v10077_v54 = vpack.c.bf16 %v2873_v47, %v2871_v29  ;;  %v3200_v47 = vld [vmem:[#allocation11 + $0x28] sm:$0xff] }
 0x51c   :  { %8939 = vmatmul.mubr.msk.f32.gmra.mrb[40].mxu0 %vm690_vm6, %v11488_v13  ;;  %v2479_v13 = vld [vmem:[#allocation10 + $0x270] sm:$0xff] }
 0x51d   :  { %1893 = vmatprep.mubr.f32.mxu0 %v12092_v0 }
 0x520   :  { %8940 = vmatmul.mubr.msk.f32.gmra.mrb[42].mxu0 %vm690_vm6, %v11489_v14  ;;  %v2481_v14 = vld [vmem:[#allocation10 + $0x280] sm:$0xff] }
 0x521   :  { %1899 = vmatprep.mubr.f32.mxu0 %v12092_v0  ;;  %v10009_v28 = vpack.c.bf16 %v2481_v14, %v2479_v13  ;;  %v2859_v13 = vld [vmem:[#allocation10 + $0x320] sm:$0xff]  ;;  %v2861_v14 = vld [vmem:[#allocation10 + $0x330] sm:$0xff] }
 0x524   :  { %8941 = vmatmul.mubr.msk.f32.gmra.mrb[44].mxu0 %vm690_vm6, %v11490_v18  ;;  %v2484_v18 = vld [vmem:[#allocation10 + $0x298] sm:$0xff] }
 0x525   :  { %1905 = vmatprep.mubr.f32.mxu0 %v12092_v0  ;;  %v10011_v35 = vpack.c.bf16 %v2486_v19, %v2484_v18  ;;  %v2864_v19 = vld [vmem:[#allocation10 + $0x348] sm:$0xff] }
 0x528   :  { %8942 = vmatmul.mubr.msk.f32.gmra.mrb[46].mxu0 %vm690_vm6, %v11491_v37  ;;  %v2483_v37 = vld [vmem:[#allocation10 + $0x290] sm:$0xff] }
 0x529   :  { %2148 = vmatprep.mubr.f32.mxu0 %v12092_v0 }
 0x52c   :  { %8955 = vmatmul.mubr.msk.f32.vlgmr.msra.gmra.mrb[32].mxu0 %vm690_vm6, %v11492_v12  ;;  %v2300_v12 = vld [vmem:[#allocation10 + $0x158] sm:$0xff] }
 0x52d   :  { %2154 = vmatprep.mubr.f32.mxu0 %v12092_v0  ;;  %9978 = vmatpush1.bf16.msra.mxu0 %v9977_v38  ;;  %v2485_v38 = vld [vmem:[#allocation10 + $0x2a0] sm:$0xff] }
 0x52e   :  { %9980 = vmatprep.subr.bf16.mxu0 %v9979_v41  ;;  %v10013_v41 = vpack.c.bf16 %v2485_v38, %v2483_v37  ;;  %v10065_v37 = vpack.c.bf16 %v2861_v14, %v2859_v13 }
 0x530   :  { %8956 = vmatmul.mubr.msk.f32.gmra.mrb[34].mxu0 %vm690_vm6, %v11493_v11  ;;  %v9973_v11 = vpack.c.bf16 %v2299_v56, %v2297_v24 }
 0x531   :  { %2160 = vmatprep.mubr.f32.mxu0 %v12092_v0  ;;  %9982 = vmatpush1.bf16.msra.mxu0 %v9981_v15  ;;  %v9971_v15 = vpack.c.bf16 %v2300_v12, %v2298_v62  ;;  %v2865_v62 = vld [vmem:[#allocation10 + $0x350] sm:$0xff] }
 0x532   :  { %9984 = vmatprep.subr.bf16.mxu0 %v9983_v20  ;;  %v2487_v20 = vld [vmem:[#allocation10 + $0x2b0] sm:$0xff] }
 0x533   :  { %v10017_v39 = vpack.c.bf16 %v2489_v40, %v2487_v20  ;;  %9972 = vmatprep.subr.bf16.mxu1 %v9971_v15  ;;  %v2868_v15 = vld [vmem:[#allocation10 + $0x368] sm:$0xff]  ;;  %v2870_v20 = vld [vmem:[#allocation10 + $0x378] sm:$0xff] }
 0x534   :  { %8957 = vmatmul.mubr.msk.f32.gmra.mrb[36].mxu0 %vm690_vm6, %v11494_v3  ;;  %9974 = vmatpush1.bf16.msra.mxu1 %v9973_v11  ;;  %v2301_v3 = vld [vmem:[#allocation10 + $0x160] sm:$0xf] }
 0x535   :  { %2166 = vmatprep.mubr.f32.mxu0 %v12092_v0  ;;  %9986 = vmatpush1.bf16.msra.mxu0 %v9985_v36  ;;  %v2492_v36 = vld [vmem:[#allocation10 + $0x2d8] sm:$0xf] }
 0x536   :  { %9988 = vmatprep.subr.bf16.mxu0 %v9987_v59  ;;  %v2852_v59 = vld [vmem:[#allocation10 + $0x2e8] sm:$0xff]  ;;  %8963 = vmatprep.subr.msk.mxu1 %vm715_vm4, %v2302_v26  ;;  %v2869_v26 = vld [vmem:[#allocation10 + $0x370] sm:$0xff] }
 0x537   :  { %v10055_v43 = vpack.c.bf16 %v2854_v7, %v2852_v59  ;;  %v10071_v59 = vpack.c.bf16 %v2870_v20, %v2868_v15  ;;  %v2867_v7 = vld [vmem:[#allocation10 + $0x360] sm:$0xff] }
 0x538   :  { %8958 = vmatmul.mubr.msk.f32.gmra.mrb[38].mxu0 %vm690_vm6, %v11495_v23  ;;  %8964 = vmatpush1.msk.msra.mxu1 %vm715_vm4, %v2301_v3  ;;  %v2851_v23 = vld [vmem:[#allocation10 + $0x2e0] sm:$0xff]  ;;  %v2874_v3 = vld [vmem:[#allocation10 + $0x398] sm:$0xff] }
 0x539   :  { %2172 = vmatprep.mubr.f32.mxu0 %v12092_v0  ;;  %9990 = vmatpush1.bf16.msra.mxu0 %v9989_v44  ;;  %v2213_v44 = vld [vmem:[#allocation19] sm:$0x3] }
 0x53a   :  { %9992 = vmatprep.subr.bf16.mxu0 %v9991_v52  ;;  %v12846_v52 = vrot.slane %v2213_v44, %v12576_v42  ;;  %v12849_v1 = vrot.slane %v2213_v44, %v12578_v45 }
 0x53c   :  { %8959 = vmatmul.mubr.msk.f32.gmra.mrb[40].mxu0 %vm690_vm6, %v11496_v33 }
 0x53d   :  { %2178 = vmatprep.mubr.f32.mxu0 %v12092_v0  ;;  %9994 = vmatpush1.bf16.msra.mxu0 %v9993_v46  ;;  %v2853_v46 = vld [vmem:[#allocation10 + $0x2f0] sm:$0xff] }
 0x53e   :  { %9996 = vmatprep.subr.bf16.mxu0 %v9995_v27  ;;  %v10057_v33 = vpack.c.bf16 %v2853_v46, %v2851_v23 }
 0x540   :  { %8960 = vmatmul.mubr.msk.f32.gmra.mrb[42].mxu0 %vm690_vm6, %v11497_v57 }
 0x541   :  { %2184 = vmatprep.mubr.f32.mxu0 %v12092_v0  ;;  %9998 = vmatpush1.bf16.msra.mxu0 %v9997_v34 }
 0x542   :  { %10000 = vmatprep.subr.bf16.mxu0 %v9999_v48 }
 0x544   :  { %8961 = vmatmul.mubr.msk.f32.gmra.mrb[44].mxu0 %vm690_vm6, %v11498_v6 }
 0x545   :  { %2190 = vmatprep.mubr.f32.mxu0 %v12092_v0  ;;  %10002 = vmatpush1.bf16.msra.mxu0 %v10001_v58  ;;  %v2860_v58 = vld [vmem:[#allocation10 + $0x328] sm:$0xff] }
 0x546   :  { %10004 = vmatprep.subr.bf16.mxu0 %v10003_v60  ;;  %v2862_v60 = vld [vmem:[#allocation10 + $0x338] sm:$0xff] }
 0x548   :  { %8962 = vmatmul.mubr.msk.f32.gmra.mrb[46].mxu0 %vm690_vm6, %v11499_v21  ;;  %v2866_v21 = vld [vmem:[#allocation10 + $0x358] sm:$0xff] }
 0x549   :  { %10006 = vmatpush1.bf16.msra.mxu0 %v10005_v8  ;;  %v10067_v50 = vpack.c.bf16 %v2866_v21, %v2864_v19 }
 0x54a   :  { %10008 = vmatprep.subr.bf16.mxu0 %v10007_v10  ;;  %v10063_v10 = vpack.c.bf16 %v2862_v60, %v2860_v58 }
 0x54d   :  { %10010 = vmatpush1.bf16.msra.mxu0 %v10009_v28 }
 0x54e   :  { %10012 = vmatprep.subr.bf16.mxu0 %v10011_v35 }
 0x551   :  { %10014 = vmatpush1.bf16.msra.mxu0 %v10013_v41 }
 0x552   :  { %10016 = vmatprep.subr.bf16.mxu0 %v10015_v16  ;;  %v2863_v16 = vld [vmem:[#allocation10 + $0x340] sm:$0xff] }
 0x555   :  { %10018 = vmatpush1.bf16.msra.mxu0 %v10017_v39  ;;  %v10069_v39 = vpack.c.bf16 %v2865_v62, %v2863_v16  ;;  %v2884_v16 = vld [vmem:[#allocation10 + $0x3e8] sm:$0xff]  ;;  %v2886_v62 = vld [vmem:[#allocation10 + $0x3f8] sm:$0xff] }
 0x556   :  { %8973 = vmatprep.subr.msk.mxu0 %vm715_vm4, %v2492_v36  ;;  %v10087_v20 = vpack.c.bf16 %v2886_v62, %v2884_v16  ;;  %v3207_v62 = vld [vmem:[#allocation11 + $0x60] sm:$0xff] }
 0x559   :  { %8974 = vmatpush1.msk.msra.mxu0 %vm715_vm4, %v2491_v30 }
 0x55a   :  { %10056 = vmatprep.subr.bf16.mxu0 %v10055_v43  ;;  %v2872_v43 = vld [vmem:[#allocation10 + $0x388] sm:$0xff] }
 0x5ff   :  { %v2150_v5 = vpop.f32.mrb[32].mxu0 }
 0x600   :  { %v2225_v22 = vadd.f32 %v12846_v52, %v2150_v5  ;;  %v2152_v25 = vpop.f32.mrb[33].mxu0 }
 0x601   :  { %v2226_v27 = vadd.f32 %v12849_v1, %v2152_v25 }
 0x602   :  { %v12855_v34 = vmax.f32 %v2225_v22, 0.0  ;;  %v10073_v22 = vpack.c.bf16 %v2869_v26, %v2867_v7  ;;  %v2887_v7 = vld [vmem:[#allocation10 + $0x400] sm:$0xff]  ;;  %v2889_v26 = vld [vmem:[#allocation10 + $0x410] sm:$0xff] }
 0x603   :  { %v12853_v31 = vmax.f32 %v2226_v27, 0.0  ;;  %v2156_v32 = vpop.f32.mrb[34].mxu0  ;;  %v10075_v27 = vpack.c.bf16 %v2874_v3, %v2872_v43  ;;  %v2894_v43 = vld [vmem:[#allocation10 + $0x438] sm:$0xff]  ;;  %v10093_v3 = vpack.c.bf16 %v2889_v26, %v2887_v7 }
 0x604   :  { %v2227_v48 = vadd.f32 %v12846_v52, %v2156_v32  ;;  %v2158_v51 = vpop.f32.mrb[35].mxu0 }
 0x605   :  { %v2228_v57 = vadd.f32 %v12849_v1, %v2158_v51  ;;  %8965 = vmatprep.mubr.msk.f32.mxu1 %vm1364_vm7, %v12853_v31  ;;  %8975 = vmatprep.mubr.msk.f32.mxu0 %vm1364_vm7, %v12853_v31 }
 0x606   :  { %2398 = vmatmul.mubr.f32.vlgmr.msra.gmra.mrb[80].mxu1 %v12855_v34  ;;  %2564 = vmatmul.mubr.f32.vlgmr.msra.gmra.mrb[48].mxu0 %v12855_v34  ;;  %v12867_v4 = vmax.f32 %v2227_v48, 0.0  ;;  %v2878_v48 = vld [vmem:[#allocation10 + $0x3b8] sm:$0xff] }
 0x607   :  { %v12865_v61 = vmax.f32 %v2228_v57, 0.0  ;;  %10058 = vmatpush1.bf16.msra.mxu0 %v10057_v33  ;;  %v2162_v63 = vpop.f32.mrb[36].mxu0  ;;  %v2876_v33 = vld [vmem:[#allocation10 + $0x3a8] sm:$0xff] }
 0x608   :  { %v2229_v6 = vadd.f32 %v12846_v52, %v2162_v63  ;;  %v2164_v8 = vpop.f32.mrb[37].mxu0  ;;  %10060 = vmatprep.subr.bf16.mxu0 %v10059_v53  ;;  %v10079_v60 = vpack.c.bf16 %v2878_v48, %v2876_v33  ;;  %v2875_v63 = vld [vmem:[#allocation10 + $0x3a0] sm:$0xff] }
 0x609   :  { %v2230_v18 = vadd.f32 %v12849_v1, %v2164_v8  ;;  %8966 = vmatprep.mubr.msk.f32.mxu1 %vm1364_vm7, %v12865_v61  ;;  %8976 = vmatprep.mubr.msk.f32.mxu0 %vm1364_vm7, %v12865_v61  ;;  %v2880_v8 = vld [vmem:[#allocation10 + $0x3c8] sm:$0xff] }
 0x60a   :  { %2404 = vmatmul.mubr.f32.gmra.mrb[82].mxu1 %v12867_v4  ;;  %2570 = vmatmul.mubr.f32.gmra.mrb[50].mxu0 %v12867_v4  ;;  %v12879_v38 = vmax.f32 %v2229_v6, 0.0 }
 0x60b   :  { %v12877_v28 = vmax.f32 %v2230_v18, 0.0  ;;  %10062 = vmatpush1.bf16.msra.mxu0 %v10061_v2  ;;  %v2168_v35 = vpop.f32.mrb[38].mxu0  ;;  %v2877_v2 = vld [vmem:[#allocation10 + $0x3b0] sm:$0xff] }
 0x60c   :  { %v2231_v41 = vadd.f32 %v12846_v52, %v2168_v35  ;;  %v2170_v49 = vpop.f32.mrb[39].mxu0  ;;  %10064 = vmatprep.subr.bf16.mxu0 %v10063_v10  ;;  %v2882_v10 = vld [vmem:[#allocation10 + $0x3d8] sm:$0xff]  ;;  %v10081_v18 = vpack.c.bf16 %v2877_v2, %v2875_v63 }
 0x60d   :  { %v2232_v12 = vadd.f32 %v12849_v1, %v2170_v49  ;;  %8967 = vmatprep.mubr.msk.f32.mxu1 %vm1364_vm7, %v12877_v28  ;;  %8977 = vmatprep.mubr.msk.f32.mxu0 %vm1364_vm7, %v12877_v28  ;;  %v2881_v49 = vld [vmem:[#allocation10 + $0x3d0] sm:$0xff] }
 0x60e   :  { %2410 = vmatmul.mubr.f32.gmra.mrb[84].mxu1 %v12879_v38  ;;  %2576 = vmatmul.mubr.f32.gmra.mrb[52].mxu0 %v12879_v38  ;;  %v12891_v56 = vmax.f32 %v2231_v41, 0.0  ;;  %v2879_v41 = vld [vmem:[#allocation10 + $0x3c0] sm:$0xff] }
 0x60f   :  { %v12889_v40 = vmax.f32 %v2232_v12, 0.0  ;;  %10066 = vmatpush1.bf16.msra.mxu0 %v10065_v37  ;;  %v2174_v24 = vpop.f32.mrb[40].mxu0  ;;  %v10083_v37 = vpack.c.bf16 %v2882_v10, %v2880_v8  ;;  %v10085_v12 = vpack.c.bf16 %v2881_v49, %v2879_v41  ;;  %v3204_v8 = vld [vmem:[#allocation11 + $0x48] sm:$0xff]  ;;  %v3206_v10 = vld [vmem:[#allocation11 + $0x58] sm:$0xff] }
 0x610   :  { %v2233_v11 = vadd.f32 %v12846_v52, %v2174_v24  ;;  %v2176_v36 = vpop.f32.mrb[41].mxu0  ;;  %10068 = vmatprep.subr.bf16.mxu0 %v10067_v50  ;;  %v2883_v24 = vld [vmem:[#allocation10 + $0x3e0] sm:$0xff] }
 0x611   :  { %v2234_v30 = vadd.f32 %v12849_v1, %v2176_v36  ;;  %8968 = vmatprep.mubr.msk.f32.mxu1 %vm1364_vm7, %v12889_v40  ;;  %8978 = vmatprep.mubr.msk.f32.mxu0 %vm1364_vm7, %v12889_v40 }
 0x612   :  { %2416 = vmatmul.mubr.f32.gmra.mrb[86].mxu1 %v12891_v56  ;;  %2582 = vmatmul.mubr.f32.gmra.mrb[54].mxu0 %v12891_v56  ;;  %v12903_v25 = vmax.f32 %v2233_v11, 0.0  ;;  %v2890_v11 = vld [vmem:[#allocation10 + $0x418] sm:$0xff] }
 0x613   :  { %v12901_v44 = vmax.f32 %v2234_v30, 0.0  ;;  %10070 = vmatpush1.bf16.msra.mxu0 %v10069_v39  ;;  %v2180_v5 = vpop.f32.mrb[42].mxu0  ;;  %v2888_v39 = vld [vmem:[#allocation10 + $0x408] sm:$0xff] }
 0x614   :  { %v2235_v23 = vadd.f32 %v12846_v52, %v2180_v5  ;;  %v2182_v46 = vpop.f32.mrb[43].mxu0  ;;  %10072 = vmatprep.subr.bf16.mxu0 %v10071_v59  ;;  %v10091_v59 = vpack.c.bf16 %v2890_v11, %v2888_v39  ;;  %v2892_v30 = vld [vmem:[#allocation10 + $0x428] sm:$0xff] }
 0x615   :  { %v2236_v32 = vadd.f32 %v12849_v1, %v2182_v46  ;;  %8969 = vmatprep.mubr.msk.f32.mxu1 %vm1364_vm7, %v12901_v44  ;;  %8979 = vmatprep.mubr.msk.f32.mxu0 %vm1364_vm7, %v12901_v44  ;;  %v10095_v5 = vpack.c.bf16 %v2894_v43, %v2892_v30  ;;  %v3211_v43 = vld [vmem:[#allocation11 + $0x80] sm:$0xff] }
 0x616   :  { %2422 = vmatmul.mubr.f32.gmra.mrb[88].mxu1 %v12903_v25  ;;  %2588 = vmatmul.mubr.f32.gmra.mrb[56].mxu0 %v12903_v25  ;;  %v12915_v55 = vmax.f32 %v2235_v23, 0.0  ;;  %v2893_v23 = vld [vmem:[#allocation10 + $0x430] sm:$0xff] }
 0x617   :  { %v12913_v51 = vmax.f32 %v2236_v32, 0.0  ;;  %10074 = vmatpush1.bf16.msra.mxu0 %v10073_v22  ;;  %v2186_v53 = vpop.f32.mrb[44].mxu0  ;;  %v2891_v22 = vld [vmem:[#allocation10 + $0x420] sm:$0xff]  ;;  %v3202_v32 = vld [vmem:[#allocation11 + $0x38] sm:$0xff] }
 0x618   :  { %v2237_v57 = vadd.f32 %v12846_v52, %v2186_v53  ;;  %v2188_v58 = vpop.f32.mrb[45].mxu0  ;;  %10076 = vmatprep.subr.bf16.mxu0 %v10075_v27  ;;  %v10097_v46 = vpack.c.bf16 %v2893_v23, %v2891_v22  ;;  %v2896_v27 = vld [vmem:[#allocation10 + $0x448] sm:$0xf]  ;;  %v3199_v53 = vld [vmem:[#allocation11 + $0x20] sm:$0xff] }
 0x619   :  { %v2238_v6 = vadd.f32 %v12849_v1, %v2188_v58  ;;  %8970 = vmatprep.mubr.msk.f32.mxu1 %vm1364_vm7, %v12913_v51  ;;  %8980 = vmatprep.mubr.msk.f32.mxu0 %vm1364_vm7, %v12913_v51  ;;  %v3218_v22 = vld [vmem:[#allocation11 + $0xb8] sm:$0xff] }
 0x61a   :  { %2428 = vmatmul.mubr.f32.gmra.mrb[90].mxu1 %v12915_v55  ;;  %2594 = vmatmul.mubr.f32.gmra.mrb[58].mxu0 %v12915_v55  ;;  %v12927_v19 = vmax.f32 %v2237_v57, 0.0 }
 0x61b   :  { %v12925_v13 = vmax.f32 %v2238_v6, 0.0  ;;  %10078 = vmatpush1.bf16.msra.mxu0 %v10077_v54  ;;  %v2192_v14 = vpop.f32.mrb[46].mxu0 }
 0x61c   :  { %v2239_v21 = vadd.f32 %v12846_v52, %v2192_v14  ;;  %v2194_v35 = vpop.f32.mrb[47].mxu0  ;;  %10080 = vmatprep.subr.bf16.mxu0 %v10079_v60  ;;  %v3201_v60 = vld [vmem:[#allocation11 + $0x30] sm:$0xff]  ;;  %v3203_v14 = vld [vmem:[#allocation11 + $0x40] sm:$0xff] }
 0x61d   :  { %v2240_v50 = vadd.f32 %v12849_v1, %v2194_v35  ;;  %8971 = vmatprep.mubr.msk.f32.mxu1 %vm1364_vm7, %v12925_v13  ;;  %8981 = vmatprep.mubr.msk.f32.mxu0 %vm1364_vm7, %v12925_v13  ;;  %v2885_v1 = vld [vmem:[#allocation10 + $0x3f0] sm:$0xff]  ;;  %v10123_v6 = vpack.c.bf16 %v3201_v60, %v3199_v53  ;;  %v3208_v35 = vld [vmem:[#allocation11 + $0x68] sm:$0xff] }
 0x61e   :  { %2434 = vmatmul.mubr.f32.gmra.mrb[92].mxu1 %v12927_v19  ;;  %2600 = vmatmul.mubr.f32.gmra.mrb[60].mxu0 %v12927_v19  ;;  %v2255_v15 = vmax.f32 %v2239_v21, 0.0  ;;  %v10089_v36 = vpack.c.bf16 %v2885_v1, %v2883_v24 }
 0x61f   :  { %v2256_v52 = vmax.f32 %v2240_v50, 0.0  ;;  %10082 = vmatpush1.bf16.msra.mxu0 %v10081_v18  ;;  %v3205_v18 = vld [vmem:[#allocation11 + $0x50] sm:$0xff]  ;;  %v3210_v50 = vld [vmem:[#allocation11 + $0x78] sm:$0xff] }
 0x620   :  { %10084 = vmatprep.subr.bf16.mxu0 %v10083_v37  ;;  %v10127_v49 = vpack.c.bf16 %v3205_v18, %v3203_v14  ;;  %v10129_v16 = vpack.c.bf16 %v3210_v50, %v3208_v35  ;;  %v3225_v50 = vld [vmem:[#allocation11 + $0xf0] sm:$0xff] }
 0x621   :  { %8972 = vmatprep.mubr.msk.f32.mxu1 %vm1364_vm7, %v2256_v52  ;;  %8982 = vmatprep.mubr.msk.f32.mxu0 %vm1364_vm7, %v2256_v52 }
 0x622   :  { %2440 = vmatmul.mubr.f32.gmra.mrb[94].mxu1 %v2255_v15  ;;  %2606 = vmatmul.mubr.f32.gmra.mrb[62].mxu0 %v2255_v15 }
 0x623   :  { %10086 = vmatpush1.bf16.msra.mxu0 %v10085_v12  ;;  %9005 = vmatprep.mubr.msk.f32.mxu0 %vm1364_vm7, %v12853_v31  ;;  %v2895_v31 = vld [vmem:[#allocation10 + $0x440] sm:$0xf]  ;;  %v3212_v12 = vld [vmem:[#allocation11 + $0x88] sm:$0xff] }
 0x624   :  { %10088 = vmatprep.subr.bf16.mxu0 %v10087_v20  ;;  %2682 = vmatprep.mubr.f32.mxu1 %v12092_v0 }
 0x627   :  { %10090 = vmatpush1.bf16.msra.mxu0 %v10089_v36 }
 0x628   :  { %10092 = vmatprep.subr.bf16.mxu0 %v10091_v59 }
 0x62b   :  { %10094 = vmatpush1.bf16.msra.mxu0 %v10093_v3  ;;  %v3213_v3 = vld [vmem:[#allocation11 + $0x90] sm:$0xff] }
 0x62c   :  { %10096 = vmatprep.subr.bf16.mxu0 %v10095_v5  ;;  %v3216_v5 = vld [vmem:[#allocation11 + $0xa8] sm:$0xff] }
 0x62f   :  { %10098 = vmatpush1.bf16.msra.mxu0 %v10097_v46 }
 0x630   :  { %9003 = vmatprep.subr.msk.mxu0 %vm715_vm4, %v2896_v27 }
 0x633   :  { %9004 = vmatpush1.msk.msra.mxu0 %vm715_vm4, %v2895_v31 }
 0x634   :  { %2968 = vmatmul.mubr.f32.vlgmr.msra.gmra.mrb[64].mxu0 %v12855_v34 }
 0x635   :  { %9006 = vmatprep.mubr.msk.f32.mxu0 %vm1364_vm7, %v12865_v61 }
 0x638   :  { %2974 = vmatmul.mubr.f32.gmra.mrb[66].mxu0 %v12867_v4  ;;  %v3196_v4 = vld [vmem:[#allocation11 + $0x8] sm:$0xff] }
 0x639   :  { %9007 = vmatprep.mubr.msk.f32.mxu0 %vm1364_vm7, %v12877_v28 }
 0x63c   :  { %2980 = vmatmul.mubr.f32.gmra.mrb[68].mxu0 %v12879_v38 }
 0x63d   :  { %9008 = vmatprep.mubr.msk.f32.mxu0 %vm1364_vm7, %v12889_v40  ;;  %v3198_v40 = vld [vmem:[#allocation11 + $0x18] sm:$0xff] }
 0x640   :  { %2986 = vmatmul.mubr.f32.gmra.mrb[70].mxu0 %v12891_v56  ;;  %v10117_v56 = vpack.c.bf16 %v3198_v40, %v3196_v4  ;;  %v10137_v4 = vpack.c.bf16 %v3218_v22, %v3216_v5  ;;  %v3217_v40 = vld [vmem:[#allocation11 + $0xb0] sm:$0xff]  ;;  %v3232_v22 = vld [vmem:[#allocation11 + $0x128] sm:$0xff] }
 0x641   :  { %9009 = vmatprep.mubr.msk.f32.mxu0 %vm1364_vm7, %v12901_v44  ;;  %v3195_v44 = vld [vmem:[#allocation11] sm:$0xff]  ;;  %v3229_v5 = vld [vmem:[#allocation11 + $0x110] sm:$0xff] }
 0x642   :  { %10118 = vmatprep.subr.bf16.mxu0 %v10117_v56  ;;  %v3220_v56 = vld [vmem:[#allocation11 + $0xc8] sm:$0xff] }
 0x644   :  { %2992 = vmatmul.mubr.f32.gmra.mrb[72].mxu0 %v12903_v25  ;;  %v3197_v25 = vld [vmem:[#allocation11 + $0x10] sm:$0xff] }
 0x645   :  { %9010 = vmatprep.mubr.msk.f32.mxu0 %vm1364_vm7, %v12913_v51  ;;  %v10119_v29 = vpack.c.bf16 %v3197_v25, %v3195_v44  ;;  %v10121_v51 = vpack.c.bf16 %v3202_v32, %v3200_v47  ;;  %v3222_v44 = vld [vmem:[#allocation11 + $0xd8] sm:$0xff] }
 0x646   :  { %v10141_v60 = vpack.c.bf16 %v3222_v44, %v3220_v56 }
 0x647   :  { %10120 = vmatpush1.bf16.msra.mxu0 %v10119_v29 }
 0x648   :  { %2998 = vmatmul.mubr.f32.gmra.mrb[74].mxu0 %v12915_v55  ;;  %10122 = vmatprep.subr.bf16.mxu0 %v10121_v51 }
 0x649   :  { %9011 = vmatprep.mubr.msk.f32.mxu0 %vm1364_vm7, %v12925_v13  ;;  %v10125_v13 = vpack.c.bf16 %v3206_v10, %v3204_v8  ;;  %v3224_v8 = vld [vmem:[#allocation11 + $0xe8] sm:$0xff]  ;;  %v3226_v10 = vld [vmem:[#allocation11 + $0xf8] sm:$0xff] }
 0x64b   :  { %10124 = vmatpush1.bf16.msra.mxu0 %v10123_v6  ;;  %v3221_v6 = vld [vmem:[#allocation11 + $0xd0] sm:$0xff] }
 0x64c   :  { %3004 = vmatmul.mubr.f32.gmra.mrb[76].mxu0 %v12927_v19  ;;  %10126 = vmatprep.subr.bf16.mxu0 %v10125_v13 }
 0x64d   :  { %9012 = vmatprep.mubr.msk.f32.mxu0 %vm1364_vm7, %v2256_v52  ;;  %v3209_v52 = vld [vmem:[#allocation11 + $0x70] sm:$0xff] }
 0x64e   :  { %v10131_v59 = vpack.c.bf16 %v3209_v52, %v3207_v62  ;;  %v3230_v62 = vld [vmem:[#allocation11 + $0x118] sm:$0xff] }
 0x64f   :  { %10128 = vmatpush1.bf16.msra.mxu0 %v10127_v49  ;;  %v3223_v49 = vld [vmem:[#allocation11 + $0xe0] sm:$0xff] }
 0x650   :  { %3010 = vmatmul.mubr.f32.gmra.mrb[78].mxu0 %v2255_v15  ;;  %v3214_v15 = vld [vmem:[#allocation11 + $0x98] sm:$0xff]  ;;  %10130 = vmatprep.subr.bf16.mxu0 %v10129_v16  ;;  %v3228_v16 = vld [vmem:[#allocation11 + $0x108] sm:$0xff] }
 0x651   :  { %v10133_v30 = vpack.c.bf16 %v3214_v15, %v3212_v12 }
 0x653   :  { %10132 = vmatpush1.bf16.msra.mxu0 %v10131_v59  ;;  %v10147_v59 = vpack.c.bf16 %v3225_v50, %v3223_v49  ;;  %v11510_v49 = vld [vmem:[#allocation2 + $0x10] sm:$0xff] }
 0x654   :  { %10134 = vmatprep.subr.bf16.mxu0 %v10133_v30 }
 0x6d9   :  { %v12964_v34 = vpop.f32.mrb[80].mxu1  ;;  %v2565_v61 = vpop.f32.mrb[48].mxu0 }
 0x6da   :  { %v12966_v28 = vpop.f32.mrb[81].mxu1  ;;  %v2567_v38 = vpop.f32.mrb[49].mxu0 }
 0x6dd   :  { %v12968_v33 = vpop.f32.mrb[82].mxu1  ;;  %v2571_v48 = vpop.f32.mrb[50].mxu0 }
 0x6de   :  { %v10039_v54 = vpack.c.bf16 %v12968_v33, %v12964_v34  ;;  %v10021_v55 = vpack.c.bf16 %v2571_v48, %v2565_v61  ;;  %v12972_v57 = vpop.f32.mrb[83].mxu1  ;;  %v2573_v58 = vpop.f32.mrb[51].mxu0  ;;  %v10135_v61 = vpack.c.bf16 %v3213_v3, %v3211_v43  ;;  %v10149_v43 = vpack.c.bf16 %v3230_v62, %v3228_v16  ;;  %v3227_v3 = vld [vmem:[#allocation11 + $0x100] sm:$0xff]  ;;  %v11502_v34 = vld [vmem:[#allocation2 + $0x50] sm:$0xff]  ;;  %v11511_v16 = vld [vmem:[#allocation2 + $0x18] sm:$0xff] }
 0x6df   :  { %v10037_v63 = vpack.c.bf16 %v12972_v57, %v12966_v28  ;;  %v10019_v2 = vpack.c.bf16 %v2573_v58, %v2567_v38  ;;  %v3215_v38 = vld [vmem:[#allocation11 + $0xa0] sm:$0xff]  ;;  %v11501_v57 = vld [vmem:[#allocation2 + $0x48] sm:$0xff] }
 0x6e0   :  { %10136 = vmatpush1.bf16.msra.mxu0 %v10135_v61  ;;  %v10139_v53 = vpack.c.bf16 %v3217_v40, %v3215_v38  ;;  %v3231_v61 = vld [vmem:[#allocation11 + $0x120] sm:$0xff]  ;;  %v11505_v40 = vld [vmem:[#allocation2 + $0x68] sm:$0xff] }
 0x6e1   :  { %v12976_v19 = vpop.f32.mrb[84].mxu1  ;;  %v2577_v21 = vpop.f32.mrb[52].mxu0  ;;  %10020 = vmatprep.subr.bf16.mxu1 %v10019_v2  ;;  %10138 = vmatprep.subr.bf16.mxu0 %v10137_v4  ;;  %v3219_v2 = vld [vmem:[#allocation11 + $0xc0] sm:$0xff]  ;;  %v3233_v4 = vld [vmem:[#allocation11 + $0x130] sm:$0xff] }
 0x6e2   :  { %v12978_v37 = vpop.f32.mrb[85].mxu1  ;;  %v2579_v41 = vpop.f32.mrb[53].mxu0  ;;  %10022 = vmatpush1.bf16.msra.mxu1 %v10021_v55  ;;  %v10143_v35 = vpack.c.bf16 %v3221_v6, %v3219_v2  ;;  %v11500_v38 = vld [vmem:[#allocation2 + $0x40] sm:$0xff]  ;;  %v10155_v28 = vpack.c.bf16 %v3233_v4, %v3231_v61  ;;  %v3393_v61 = vld [vmem:[#allocation11 + $0x1b0] sm:$0xff] }
 0x6e3   :  { %v11508_v2 = vld [vmem:[#allocation2] sm:$0xff] }
 0x6e4   :  { %10140 = vmatpush1.bf16.msra.mxu0 %v10139_v53  ;;  %v11512_v62 = vld [vmem:[#allocation2 + $0x20] sm:$0xff] }
 0x6e5   :  { %v12980_v20 = vpop.f32.mrb[86].mxu1  ;;  %v2583_v24 = vpop.f32.mrb[54].mxu0  ;;  %10142 = vmatprep.subr.bf16.mxu0 %v10141_v60  ;;  %v3395_v4 = vld [vmem:[#allocation11 + $0x1c0] sm:$0xff] }
 0x6e6   :  { %v10043_v1 = vpack.c.bf16 %v12980_v20, %v12976_v19  ;;  %v10025_v39 = vpack.c.bf16 %v2583_v24, %v2577_v21  ;;  %v12984_v11 = vpop.f32.mrb[87].mxu1  ;;  %v2585_v36 = vpop.f32.mrb[55].mxu0 }
 0x6e7   :  { %v10041_v7 = vpack.c.bf16 %v12984_v11, %v12978_v37  ;;  %v10023_v26 = vpack.c.bf16 %v2585_v36, %v2579_v41  ;;  %v10145_v41 = vpack.c.bf16 %v3226_v10, %v3224_v8  ;;  %v11504_v11 = vld [vmem:[#allocation2 + $0x60] sm:$0xff]  ;;  %v11509_v10 = vld [vmem:[#allocation2 + $0x8] sm:$0xff] }
 0x6e8   :  { %10144 = vmatpush1.bf16.msra.mxu0 %v10143_v35  ;;  %v3388_v35 = vld [vmem:[#allocation11 + $0x188] sm:$0xff] }
 0x6e9   :  { %v12988_v23 = vpop.f32.mrb[88].mxu1  ;;  %v2589_v46 = vpop.f32.mrb[56].mxu0  ;;  %10024 = vmatprep.subr.bf16.mxu1 %v10023_v26  ;;  %10146 = vmatprep.subr.bf16.mxu0 %v10145_v41 }
 0x6ea   :  { %v12990_v27 = vpop.f32.mrb[89].mxu1  ;;  %v2591_v31 = vpop.f32.mrb[57].mxu0  ;;  %10026 = vmatpush1.bf16.msra.mxu1 %v10025_v39 }
 0x6ec   :  { %10148 = vmatpush1.bf16.msra.mxu0 %v10147_v59  ;;  %v13060_v59 = vld [vmem:[#allocation2 + $0x38] sm:$0xf] }
 0x6ed   :  { %v12992_v25 = vpop.f32.mrb[90].mxu1  ;;  %v2595_v29 = vpop.f32.mrb[58].mxu0  ;;  %10150 = vmatprep.subr.bf16.mxu0 %v10149_v43  ;;  %v3389_v43 = vld [vmem:[#allocation11 + $0x190] sm:$0xff] }
 0x6ee   :  { %v10047_v47 = vpack.c.bf16 %v12992_v25, %v12988_v23  ;;  %v10029_v32 = vpack.c.bf16 %v2595_v29, %v2589_v46  ;;  %v12996_v48 = vpop.f32.mrb[91].mxu1  ;;  %v2597_v51 = vpop.f32.mrb[59].mxu0  ;;  %v3234_v46 = vld [vmem:[#allocation11 + $0x138] sm:$0xff] }
 0x6ef   :  { %v10045_v55 = vpack.c.bf16 %v12996_v48, %v12990_v27  ;;  %v10027_v58 = vpack.c.bf16 %v2597_v51, %v2591_v31  ;;  %v10151_v27 = vpack.c.bf16 %v3229_v5, %v3227_v3  ;;  %v10153_v31 = vpack.c.bf16 %v3234_v46, %v3232_v22  ;;  %v11507_v51 = vld [vmem:[#allocation2 + $0x78] sm:$0xf]  ;;  %v3391_v3 = vld [vmem:[#allocation11 + $0x1a0] sm:$0xff]  ;;  %v3396_v22 = vld [vmem:[#allocation11 + $0x1c8] sm:$0xff] }
 0x6f0   :  { %v3394_v5 = vld [vmem:[#allocation11 + $0x1b8] sm:$0xff]  ;;  %v13065_v46 = vld [vmem:[#allocation2 + $0x80] sm:$0xff] }
 0x6f1   :  { %v13000_v13 = vpop.f32.mrb[92].mxu1  ;;  %v2601_v14 = vpop.f32.mrb[60].mxu0  ;;  %10028 = vmatprep.subr.bf16.mxu1 %v10027_v58  ;;  %10152 = vmatpush1.bf16.msra.mxu0 %v10151_v27  ;;  %v10167_v27 = vpack.c.bf16 %v3391_v3, %v3389_v43  ;;  %v3426_v3 = vld [vmem:[#allocation11 + $0x2b8] sm:$0xff] }
 0x6f2   :  { %v2437_v18 = vpop.f32.mrb[93].mxu1  ;;  %v2603_v21 = vpop.f32.mrb[61].mxu0  ;;  %10030 = vmatpush1.bf16.msra.mxu1 %v10029_v32  ;;  %10154 = vmatprep.subr.bf16.mxu0 %v10153_v31  ;;  %v10169_v31 = vpack.c.bf16 %v3396_v22, %v3394_v5  ;;  %v3428_v5 = vld [vmem:[#allocation11 + $0x2c8] sm:$0xff] }
 0x6f3   :  { %v10201_v22 = vpack.c.bf16 %v3428_v5, %v3426_v3  ;;  %v3799_v3 = vld [vmem:[#allocation11 + $0x330] sm:$0xff] }
 0x6f5   :  { %v2441_v52 = vpop.f32.mrb[94].mxu1  ;;  %v2607_v12 = vpop.f32.mrb[62].mxu0  ;;  %10156 = vmatpush1.bf16.msra.mxu0 %v10155_v28  ;;  %v3400_v28 = vld [vmem:[#allocation11 + $0x1e8] sm:$0xff] }
 0x6f6   :  { %v10052_v15 = vpack.c.bf16 %v2441_v52, %v13000_v13  ;;  %v10034_v24 = vpack.c.bf16 %v2607_v12, %v2601_v14  ;;  %v2443_v39 = vpop.f32.mrb[95].mxu1  ;;  %v2609_v36 = vpop.f32.mrb[63].mxu0  ;;  %v11513_v52 = vld [vmem:[#allocation2 + $0x28] sm:$0xff]  ;;  %v11514_v12 = vld [vmem:[#allocation2 + $0x30] sm:$0xff] }
 0x6f7   :  { %v10049_v26 = vpack.c.bf16 %v2443_v39, %v2437_v18  ;;  %v10031_v30 = vpack.c.bf16 %v2609_v36, %v2603_v21  ;;  %v3386_v21 = vld [vmem:[#allocation11 + $0x178] sm:$0xff]  ;;  %v3392_v36 = vld [vmem:[#allocation11 + $0x1a8] sm:$0xff] }
 0x6f8   :  { %v10161_v50 = vpack.c.bf16 %v3388_v35, %v3386_v21  ;;  %v3390_v39 = vld [vmem:[#allocation11 + $0x198] sm:$0xff]  ;;  %v3415_v21 = vld [vmem:[#allocation11 + $0x260] sm:$0xff] }
 0x6f9   :  { %10033 = vmatprep.subr.msk.bf16.mxu1 %vm12491_vm5, %v10031_v30  ;;  %v10165_v30 = vpack.c.bf16 %v3392_v36, %v3390_v39  ;;  %v3418_v35 = vld [vmem:[#allocation11 + $0x278] sm:$0xff] }
 0x6fa   :  { %10036 = vmatpush1.bf16.msk.msra.mxu1 %vm12491_vm5, %v10034_v24  ;;  %v3387_v24 = vld [vmem:[#allocation11 + $0x180] sm:$0xff] }
 0x6fb   :  { %10038 = vmatprep.subr.bf16.mxu1 %v10037_v63  ;;  %v11503_v63 = vld [vmem:[#allocation2 + $0x58] sm:$0xff] }
 0x6fd   :  { %8985 = vmatmul.mubr.msk.f32.vlgmr.msra.gmra.mrb[96].mxu1 %vm690_vm6, %v11500_v38  ;;  %v3398_v38 = vld [vmem:[#allocation11 + $0x1d8] sm:$0xff] }
 0x6fe   :  { %10040 = vmatpush1.bf16.msra.mxu1 %v10039_v54  ;;  %2688 = vmatprep.mubr.f32.mxu1 %v12092_v0 }
 0x6ff   :  { %10042 = vmatprep.subr.bf16.mxu1 %v10041_v7 }
 0x701   :  { %8986 = vmatmul.mubr.msk.f32.gmra.mrb[98].mxu1 %vm690_vm6, %v11501_v57  ;;  %v13070_v57 = vld [vmem:[#allocation2 + $0x88] sm:$0xff] }
 0x702   :  { %10044 = vmatpush1.bf16.msra.mxu1 %v10043_v1  ;;  %2694 = vmatprep.mubr.f32.mxu1 %v12092_v0 }
 0x703   :  { %10046 = vmatprep.subr.bf16.mxu1 %v10045_v55 }
 0x705   :  { %8987 = vmatmul.mubr.msk.f32.gmra.mrb[100].mxu1 %vm690_vm6, %v11502_v34  ;;  %v10171_v34 = vpack.c.bf16 %v3395_v4, %v3393_v61  ;;  %v3425_v4 = vld [vmem:[#allocation11 + $0x2b0] sm:$0xff] }
 0x706   :  { %10048 = vmatpush1.bf16.msra.mxu1 %v10047_v47  ;;  %2700 = vmatprep.mubr.f32.mxu1 %v12092_v0  ;;  %v11506_v47 = vld [vmem:[#allocation2 + $0x70] sm:$0xff] }
 0x707   :  { %v2969_v33 = vpop.f32.mrb[64].mxu0  ;;  %10051 = vmatprep.subr.msk.bf16.mxu1 %vm12491_vm5, %v10049_v26 }
 0x708   :  { %v2971_v54 = vpop.f32.mrb[65].mxu0 }
 0x709   :  { %8988 = vmatmul.mubr.msk.f32.gmra.mrb[102].mxu1 %vm690_vm6, %v11503_v63  ;;  %v3399_v63 = vld [vmem:[#allocation11 + $0x1e0] sm:$0xff] }
 0x70a   :  { %10054 = vmatpush1.bf16.msk.msra.mxu1 %vm12491_vm5, %v10052_v15  ;;  %2706 = vmatprep.mubr.f32.mxu1 %v12092_v0  ;;  %v3385_v15 = vld [vmem:[#allocation11 + $0x170] sm:$0xff] }
 0x70b   :  { %v2975_v19 = vpop.f32.mrb[66].mxu0  ;;  %v10163_v26 = vpack.c.bf16 %v3387_v24, %v3385_v15  ;;  %v3424_v15 = vld [vmem:[#allocation11 + $0x2a8] sm:$0xff]  ;;  %v13100_v24 = vld [vmem:[#allocation2 + $0xb8] sm:$0xf] }
 0x70c   :  { %v10101_v37 = vpack.c.bf16 %v2975_v19, %v2969_v33  ;;  %v2977_v20 = vpop.f32.mrb[67].mxu0  ;;  %v10173_v33 = vpack.c.bf16 %v3400_v28, %v3398_v38  ;;  %v3402_v19 = vld [vmem:[#allocation11 + $0x1f8] sm:$0xff]  ;;  %v3427_v38 = vld [vmem:[#allocation11 + $0x2c0] sm:$0xff] }
 0x70d   :  { %v10099_v1 = vpack.c.bf16 %v2977_v20, %v2971_v54  ;;  %8989 = vmatmul.mubr.msk.f32.gmra.mrb[104].mxu1 %vm690_vm6, %v11504_v11  ;;  %v3397_v54 = vld [vmem:[#allocation11 + $0x1d0] sm:$0xff]  ;;  %v3235_v28 = vld [vmem:[#allocation11 + $0x140] sm:$0xff] }
 0x70e   :  { %2712 = vmatprep.mubr.f32.mxu1 %v12092_v0  ;;  %v13075_v20 = vld [vmem:[#allocation2 + $0x90] sm:$0xff] }
 0x70f   :  { %v2981_v7 = vpop.f32.mrb[68].mxu0  ;;  %10100 = vmatprep.subr.bf16.mxu1 %v10099_v1  ;;  %v10175_v1 = vpack.c.bf16 %v3399_v63, %v3397_v54  ;;  %v3430_v63 = vld [vmem:[#allocation11 + $0x2d8] sm:$0xf] }
 0x710   :  { %v2983_v23 = vpop.f32.mrb[69].mxu0 }
 0x711   :  { %8990 = vmatmul.mubr.msk.f32.gmra.mrb[106].mxu1 %vm690_vm6, %v11505_v40  ;;  %v3406_v40 = vld [vmem:[#allocation11 + $0x218] sm:$0xff] }
 0x712   :  { %2718 = vmatprep.mubr.f32.mxu1 %v12092_v0 }
 0x713   :  { %v2987_v56 = vpop.f32.mrb[70].mxu0 }
 0x714   :  { %v10105_v44 = vpack.c.bf16 %v2987_v56, %v2981_v7  ;;  %v2989_v25 = vpop.f32.mrb[71].mxu0  ;;  %v3401_v7 = vld [vmem:[#allocation11 + $0x1f0] sm:$0xff]  ;;  %v3408_v56 = vld [vmem:[#allocation11 + $0x228] sm:$0xff] }
 0x715   :  { %v10103_v29 = vpack.c.bf16 %v2989_v25, %v2983_v23  ;;  %8991 = vmatmul.mubr.msk.f32.gmra.mrb[108].mxu1 %vm690_vm6, %v11506_v47  ;;  %v3403_v23 = vld [vmem:[#allocation11 + $0x200] sm:$0xff]  ;;  %v3405_v47 = vld [vmem:[#allocation11 + $0x210] sm:$0xff] }
 0x716   :  { %2724 = vmatprep.mubr.f32.mxu1 %v12092_v0  ;;  %v10179_v25 = vpack.c.bf16 %v3403_v23, %v3401_v7  ;;  %v3239_v23 = vld [vmem:[#allocation11 + $0x160] sm:$0xf] }
 0x717   :  { %v2993_v32 = vpop.f32.mrb[72].mxu0 }
 0x718   :  { %v2995_v48 = vpop.f32.mrb[73].mxu0 }
 0x719   :  { %8992 = vmatmul.mubr.msk.f32.gmra.mrb[110].mxu1 %vm690_vm6, %v11507_v51  ;;  %v3412_v51 = vld [vmem:[#allocation11 + $0x248] sm:$0xff] }
 0x71a   :  { %2801 = vmatprep.mubr.f32.mxu1 %v12092_v0 }
 0x71b   :  { %v2999_v53 = vpop.f32.mrb[74].mxu0 }
 0x71c   :  { %v10109_v55 = vpack.c.bf16 %v2999_v53, %v2993_v32  ;;  %v3001_v58 = vpop.f32.mrb[75].mxu0  ;;  %v3407_v32 = vld [vmem:[#allocation11 + $0x220] sm:$0xff] }
 0x71d   :  { %v10107_v60 = vpack.c.bf16 %v3001_v58, %v2995_v48  ;;  %8995 = vmatmul.mubr.msk.f32.vlgmr.msra.gmra.mrb[96].mxu1 %vm690_vm6, %v11508_v2  ;;  %v3410_v48 = vld [vmem:[#allocation11 + $0x238] sm:$0xff]  ;;  %v13085_v53 = vld [vmem:[#allocation2 + $0xa0] sm:$0xff] }
 0x71e   :  { %10102 = vmatpush1.bf16.msra.mxu1 %v10101_v37  ;;  %2807 = vmatprep.mubr.f32.mxu1 %v12092_v0  ;;  %v3404_v37 = vld [vmem:[#allocation11 + $0x208] sm:$0xff]  ;;  %v10185_v58 = vpack.c.bf16 %v3412_v51, %v3410_v48  ;;  %v3411_v2 = vld [vmem:[#allocation11 + $0x240] sm:$0xff]  ;;  %v3791_v51 = vld [vmem:[#allocation11 + $0x2f0] sm:$0xff] }
 0x71f   :  { %v3005_v6 = vpop.f32.mrb[76].mxu0  ;;  %10104 = vmatprep.subr.bf16.mxu1 %v10103_v29  ;;  %v10177_v11 = vpack.c.bf16 %v3404_v37, %v3402_v19  ;;  %v10181_v29 = vpack.c.bf16 %v3408_v56, %v3406_v40  ;;  %v3790_v19 = vld [vmem:[#allocation11 + $0x2e8] sm:$0xff]  ;;  %v3792_v37 = vld [vmem:[#allocation11 + $0x2f8] sm:$0xff]  ;;  %v3151_v40 = vld [vmem:[#allocation20] sm:$0x3] }
 0x720   :  { %v3007_v8 = vpop.f32.mrb[77].mxu0  ;;  %v10241_v7 = vpack.c.bf16 %v3792_v37, %v3790_v19  ;;  %v13109_v56 = vrot.slane %v3151_v40, %v12576_v42  ;;  %v3789_v48 = vld [vmem:[#allocation11 + $0x2e0] sm:$0xff]  ;;  %v3806_v37 = vld [vmem:[#allocation11 + $0x368] sm:$0xff] }
 0x721   :  { %8996 = vmatmul.mubr.msk.f32.gmra.mrb[98].mxu1 %vm690_vm6, %v11509_v10  ;;  %v13090_v10 = vld [vmem:[#allocation2 + $0xa8] sm:$0xff] }
 0x722   :  { %10106 = vmatpush1.bf16.msra.mxu1 %v10105_v44  ;;  %2813 = vmatprep.mubr.f32.mxu1 %v12092_v0  ;;  %v13080_v44 = vld [vmem:[#allocation2 + $0x98] sm:$0xff] }
 0x723   :  { %v3011_v13 = vpop.f32.mrb[78].mxu0  ;;  %10108 = vmatprep.subr.bf16.mxu1 %v10107_v60  ;;  %v3409_v60 = vld [vmem:[#allocation11 + $0x230] sm:$0xff] }
 0x724   :  { %v10114_v14 = vpack.c.bf16 %v3011_v13, %v3005_v6  ;;  %v3013_v18 = vpop.f32.mrb[79].mxu0  ;;  %v3414_v6 = vld [vmem:[#allocation11 + $0x258] sm:$0xff]  ;;  %v10187_v13 = vpack.c.bf16 %v3411_v2, %v3409_v60 }
 0x725   :  { %v10111_v41 = vpack.c.bf16 %v3013_v18, %v3007_v8  ;;  %8997 = vmatmul.mubr.msk.f32.gmra.mrb[100].mxu1 %vm690_vm6, %v11510_v49  ;;  %v3416_v8 = vld [vmem:[#allocation11 + $0x268] sm:$0xff]  ;;  %v3413_v18 = vld [vmem:[#allocation11 + $0x250] sm:$0xff]  ;;  %v3796_v60 = vld [vmem:[#allocation11 + $0x318] sm:$0xff] }
 0x726   :  { %10110 = vmatpush1.bf16.msra.mxu1 %v10109_v55  ;;  %2819 = vmatprep.mubr.f32.mxu1 %v12092_v0  ;;  %v10183_v55 = vpack.c.bf16 %v3407_v32, %v3405_v47  ;;  %v13095_v49 = vld [vmem:[#allocation2 + $0xb0] sm:$0xff] }
 0x727   :  { %10113 = vmatprep.subr.msk.bf16.mxu1 %vm12491_vm5, %v10111_v41  ;;  %v3420_v41 = vld [vmem:[#allocation11 + $0x288] sm:$0xff] }
 0x729   :  { %8998 = vmatmul.mubr.msk.f32.gmra.mrb[102].mxu1 %vm690_vm6, %v11511_v16  ;;  %v10193_v16 = vpack.c.bf16 %v3420_v41, %v3418_v35  ;;  %v3793_v35 = vld [vmem:[#allocation11 + $0x300] sm:$0xff]  ;;  %v3795_v41 = vld [vmem:[#allocation11 + $0x310] sm:$0xff] }
 0x72a   :  { %10116 = vmatpush1.bf16.msk.msra.mxu1 %vm12491_vm5, %v10114_v14  ;;  %2825 = vmatprep.mubr.f32.mxu1 %v12092_v0  ;;  %v10189_v14 = vpack.c.bf16 %v3416_v8, %v3414_v6  ;;  %v10243_v8 = vpack.c.bf16 %v3791_v51, %v3789_v48  ;;  %v3805_v48 = vld [vmem:[#allocation11 + $0x360] sm:$0xff]  ;;  %v3807_v51 = vld [vmem:[#allocation11 + $0x370] sm:$0xff] }
 0x72b   :  { %10162 = vmatprep.subr.bf16.mxu1 %v10161_v50  ;;  %v10191_v50 = vpack.c.bf16 %v3415_v21, %v3413_v18 }
 0x72d   :  { %8999 = vmatmul.mubr.msk.f32.gmra.mrb[104].mxu1 %vm690_vm6, %v11512_v62  ;;  %v3417_v62 = vld [vmem:[#allocation11 + $0x270] sm:$0xff] }
 0x72e   :  { %2831 = vmatprep.mubr.f32.mxu1 %v12092_v0 }
 0x731   :  { %9000 = vmatmul.mubr.msk.f32.gmra.mrb[106].mxu1 %vm690_vm6, %v11513_v52  ;;  %v3419_v52 = vld [vmem:[#allocation11 + $0x280] sm:$0xff] }
 0x732   :  { %2837 = vmatprep.mubr.f32.mxu1 %v12092_v0  ;;  %v10195_v39 = vpack.c.bf16 %v3419_v52, %v3417_v62  ;;  %v3800_v62 = vld [vmem:[#allocation11 + $0x338] sm:$0xff] }
 0x735   :  { %9001 = vmatmul.mubr.msk.f32.gmra.mrb[108].mxu1 %vm690_vm6, %v11514_v12  ;;  %v3422_v12 = vld [vmem:[#allocation11 + $0x298] sm:$0xff] }
 0x736   :  { %2843 = vmatprep.mubr.f32.mxu1 %v12092_v0  ;;  %v10197_v36 = vpack.c.bf16 %v3424_v15, %v3422_v12  ;;  %v10247_v15 = vpack.c.bf16 %v3795_v41, %v3793_v35 }
 0x739   :  { %9002 = vmatmul.mubr.msk.f32.gmra.mrb[110].mxu1 %vm690_vm6, %v13060_v59 }
 0x73a   :  { %3086 = vmatprep.mubr.f32.mxu1 %v12092_v0 }
 0x73d   :  { %9015 = vmatmul.mubr.msk.f32.vlgmr.msra.gmra.mrb[96].mxu1 %vm690_vm6, %v13065_v46 }
 0x73e   :  { %3092 = vmatprep.mubr.f32.mxu1 %v12092_v0  ;;  %10164 = vmatpush1.bf16.msra.mxu1 %v10163_v26  ;;  %v3421_v26 = vld [vmem:[#allocation11 + $0x290] sm:$0xff] }
 0x73f   :  { %10166 = vmatprep.subr.bf16.mxu1 %v10165_v30  ;;  %v3423_v30 = vld [vmem:[#allocation11 + $0x2a0] sm:$0xff] }
 0x740   :  { %v10199_v43 = vpack.c.bf16 %v3423_v30, %v3421_v26 }
 0x741   :  { %9016 = vmatmul.mubr.msk.f32.gmra.mrb[98].mxu1 %vm690_vm6, %v13070_v57 }
 0x742   :  { %3098 = vmatprep.mubr.f32.mxu1 %v12092_v0  ;;  %10168 = vmatpush1.bf16.msra.mxu1 %v10167_v27  ;;  %v3236_v27 = vld [vmem:[#allocation11 + $0x148] sm:$0xff] }
 0x743   :  { %10170 = vmatprep.subr.bf16.mxu1 %v10169_v31  ;;  %v3238_v31 = vld [vmem:[#allocation11 + $0x158] sm:$0xff] }
 0x744   :  { %v10157_v61 = vpack.c.bf16 %v3238_v31, %v3236_v27  ;;  %v3804_v27 = vld [vmem:[#allocation11 + $0x358] sm:$0xff] }
 0x745   :  { %9017 = vmatmul.mubr.msk.f32.gmra.mrb[100].mxu1 %vm690_vm6, %v13075_v20 }
 0x746   :  { %3104 = vmatprep.mubr.f32.mxu1 %v12092_v0  ;;  %10172 = vmatpush1.bf16.msra.mxu1 %v10171_v34  ;;  %v10203_v34 = vpack.c.bf16 %v3427_v38, %v3425_v4 }
 0x747   :  { %10174 = vmatprep.subr.bf16.mxu1 %v10173_v33  ;;  %v3237_v33 = vld [vmem:[#allocation11 + $0x150] sm:$0xff]  ;;  %10158 = vmatprep.subr.bf16.mxu0 %v10157_v61 }
 0x748   :  { %v10159_v54 = vpack.c.bf16 %v3237_v33, %v3235_v28 }
 0x749   :  { %9018 = vmatmul.mubr.msk.f32.gmra.mrb[102].mxu1 %vm690_vm6, %v13080_v44 }
 0x74a   :  { %3110 = vmatprep.mubr.f32.mxu1 %v12092_v0  ;;  %10176 = vmatpush1.bf16.msra.mxu1 %v10175_v1  ;;  %v3240_v1 = vld [vmem:[#allocation11 + $0x168] sm:$0xf] }
 0x74b   :  { %10178 = vmatprep.subr.bf16.mxu1 %v10177_v11  ;;  %10160 = vmatpush1.bf16.msra.mxu0 %v10159_v54  ;;  %v3429_v11 = vld [vmem:[#allocation11 + $0x2d0] sm:$0xf]  ;;  %v3801_v54 = vld [vmem:[#allocation11 + $0x340] sm:$0xff] }
 0x74c   :  { %9023 = vmatprep.subr.msk.mxu0 %vm715_vm4, %v3240_v1  ;;  %v3808_v1 = vld [vmem:[#allocation11 + $0x378] sm:$0xff] }
 0x74d   :  { %9019 = vmatmul.mubr.msk.f32.gmra.mrb[104].mxu1 %vm690_vm6, %v13085_v53 }
 0x74e   :  { %3116 = vmatprep.mubr.f32.mxu1 %v12092_v0  ;;  %10180 = vmatpush1.bf16.msra.mxu1 %v10179_v25  ;;  %v13112_v25 = vrot.slane %v3151_v40, %v12578_v45 }
 0x74f   :  { %10182 = vmatprep.subr.bf16.mxu1 %v10181_v29  ;;  %9024 = vmatpush1.msk.msra.mxu0 %vm715_vm4, %v3239_v23 }
 0x751   :  { %9020 = vmatmul.mubr.msk.f32.gmra.mrb[106].mxu1 %vm690_vm6, %v13090_v10 }
 0x752   :  { %3122 = vmatprep.mubr.f32.mxu1 %v12092_v0  ;;  %10184 = vmatpush1.bf16.msra.mxu1 %v10183_v55 }
 0x753   :  { %10186 = vmatprep.subr.bf16.mxu1 %v10185_v58  ;;  %v3794_v58 = vld [vmem:[#allocation11 + $0x308] sm:$0xff] }
 0x754   :  { %v10245_v21 = vpack.c.bf16 %v3796_v60, %v3794_v58  ;;  %v3810_v58 = vld [vmem:[#allocation11 + $0x388] sm:$0xff]  ;;  %v3812_v60 = vld [vmem:[#allocation11 + $0x398] sm:$0xff] }
 0x755   :  { %9021 = vmatmul.mubr.msk.f32.gmra.mrb[108].mxu1 %vm690_vm6, %v13095_v49  ;;  %v10261_v41 = vpack.c.bf16 %v3812_v60, %v3810_v58  ;;  %v3821_v60 = vld [vmem:[#allocation11 + $0x3e0] sm:$0xff] }
 0x756   :  { %3128 = vmatprep.mubr.f32.mxu1 %v12092_v0  ;;  %10188 = vmatpush1.bf16.msra.mxu1 %v10187_v13 }
 0x757   :  { %10190 = vmatprep.subr.bf16.mxu1 %v10189_v14 }
 0x759   :  { %9022 = vmatmul.mubr.msk.f32.gmra.mrb[110].mxu1 %vm690_vm6, %v13100_v24 }
 0x75a   :  { %10192 = vmatpush1.bf16.msra.mxu1 %v10191_v50 }
 0x75b   :  { %10194 = vmatprep.subr.bf16.mxu1 %v10193_v16  ;;  %v3798_v16 = vld [vmem:[#allocation11 + $0x328] sm:$0xff] }
 0x75c   :  { %v10249_v30 = vpack.c.bf16 %v3800_v62, %v3798_v16  ;;  %v3811_v16 = vld [vmem:[#allocation11 + $0x390] sm:$0xff] }
 0x75e   :  { %10196 = vmatpush1.bf16.msra.mxu1 %v10195_v39 }
 0x75f   :  { %10198 = vmatprep.subr.bf16.mxu1 %v10197_v36 }
 0x762   :  { %10200 = vmatpush1.bf16.msra.mxu1 %v10199_v43  ;;  %v3797_v43 = vld [vmem:[#allocation11 + $0x320] sm:$0xff] }
 0x763   :  { %10202 = vmatprep.subr.bf16.mxu1 %v10201_v22  ;;  %v3802_v22 = vld [vmem:[#allocation11 + $0x348] sm:$0xff]  ;;  %v10251_v4 = vpack.c.bf16 %v3799_v3, %v3797_v43 }
 0x764   :  { %v10253_v33 = vpack.c.bf16 %v3804_v27, %v3802_v22  ;;  %v3813_v27 = vld [vmem:[#allocation11 + $0x3a0] sm:$0xff] }
 0x766   :  { %10204 = vmatpush1.bf16.msra.mxu1 %v10203_v34 }
 0x767   :  { %9033 = vmatprep.subr.msk.mxu1 %vm715_vm4, %v3430_v63  ;;  %v3803_v63 = vld [vmem:[#allocation11 + $0x350] sm:$0xff] }
 0x768   :  { %v10255_v23 = vpack.c.bf16 %v3803_v63, %v3801_v54 }
 0x76a   :  { %9034 = vmatpush1.msk.msra.mxu1 %vm715_vm4, %v3429_v11 }
 0x76b   :  { %10242 = vmatprep.subr.bf16.mxu1 %v10241_v7 }
 0x810   :  { %v3088_v29 = vpop.f32.mrb[96].mxu1 }
 0x811   :  { %v3163_v47 = vadd.f32 %v13109_v56, %v3088_v29  ;;  %v3090_v32 = vpop.f32.mrb[97].mxu1 }
 0x812   :  { %v3164_v55 = vadd.f32 %v13112_v25, %v3090_v32  ;;  %v10257_v32 = vpack.c.bf16 %v3808_v1, %v3806_v37 }
 0x813   :  { %v13118_v13 = vmax.f32 %v3163_v47, 0.0 }
 0x814   :  { %v13116_v2 = vmax.f32 %v3164_v55, 0.0  ;;  %v3094_v6 = vpop.f32.mrb[98].mxu1 }
 0x815   :  { %v3165_v14 = vadd.f32 %v13109_v56, %v3094_v6  ;;  %v3096_v18 = vpop.f32.mrb[99].mxu1 }
 0x816   :  { %v3166_v50 = vadd.f32 %v13112_v25, %v3096_v18  ;;  %9025 = vmatprep.mubr.msk.f32.mxu0 %vm1364_vm7, %v13116_v2  ;;  %9035 = vmatprep.mubr.msk.f32.mxu1 %vm1364_vm7, %v13116_v2 }
 0x817   :  { %3336 = vmatmul.mubr.f32.vlgmr.msra.gmra.mrb[80].mxu0 %v13118_v13  ;;  %3502 = vmatmul.mubr.f32.vlgmr.msra.gmra.mrb[112].mxu1 %v13118_v13  ;;  %v13130_v39 = vmax.f32 %v3165_v14, 0.0  ;;  %v10259_v14 = vpack.c.bf16 %v3807_v51, %v3805_v48  ;;  %v3824_v48 = vld [vmem:[#allocation11 + $0x3f8] sm:$0xff] }
 0x818   :  { %v13128_v52 = vmax.f32 %v3166_v50, 0.0  ;;  %10244 = vmatpush1.bf16.msra.mxu1 %v10243_v8  ;;  %v3100_v12 = vpop.f32.mrb[100].mxu1  ;;  %v3809_v50 = vld [vmem:[#allocation11 + $0x380] sm:$0xff] }
 0x819   :  { %v3167_v36 = vadd.f32 %v13109_v56, %v3100_v12  ;;  %v3102_v26 = vpop.f32.mrb[101].mxu1  ;;  %10246 = vmatprep.subr.bf16.mxu1 %v10245_v21  ;;  %v3814_v12 = vld [vmem:[#allocation11 + $0x3a8] sm:$0xff] }
 0x81a   :  { %v3168_v5 = vadd.f32 %v13112_v25, %v3102_v26  ;;  %9026 = vmatprep.mubr.msk.f32.mxu0 %vm1364_vm7, %v13128_v52  ;;  %9036 = vmatprep.mubr.msk.f32.mxu1 %vm1364_vm7, %v13128_v52 }
 0x81b   :  { %3342 = vmatmul.mubr.f32.gmra.mrb[82].mxu0 %v13130_v39  ;;  %3508 = vmatmul.mubr.f32.gmra.mrb[114].mxu1 %v13130_v39  ;;  %v13142_v38 = vmax.f32 %v3167_v36, 0.0 }
 0x81c   :  { %v13140_v31 = vmax.f32 %v3168_v5, 0.0  ;;  %10248 = vmatpush1.bf16.msra.mxu1 %v10247_v15  ;;  %v3106_v61 = vpop.f32.mrb[102].mxu1  ;;  %v3816_v15 = vld [vmem:[#allocation11 + $0x3b8] sm:$0xff] }
 0x81d   :  { %v3169_v28 = vadd.f32 %v13109_v56, %v3106_v61  ;;  %v3108_v34 = vpop.f32.mrb[103].mxu1  ;;  %10250 = vmatprep.subr.bf16.mxu1 %v10249_v30  ;;  %v10263_v30 = vpack.c.bf16 %v3811_v16, %v3809_v50  ;;  %v10265_v22 = vpack.c.bf16 %v3816_v15, %v3814_v12  ;;  %v3815_v61 = vld [vmem:[#allocation11 + $0x3b0] sm:$0xff]  ;;  %v3830_v16 = vld [vmem:[#allocation11 + $0x428] sm:$0xff] }
 0x81e   :  { %v3170_v19 = vadd.f32 %v13112_v25, %v3108_v34  ;;  %9027 = vmatprep.mubr.msk.f32.mxu0 %vm1364_vm7, %v13140_v31  ;;  %9037 = vmatprep.mubr.msk.f32.mxu1 %vm1364_vm7, %v13140_v31  ;;  %v3820_v34 = vld [vmem:[#allocation11 + $0x3d8] sm:$0xff]  ;;  %v10267_v63 = vpack.c.bf16 %v3815_v61, %v3813_v27  ;;  %v3827_v50 = vld [vmem:[#allocation11 + $0x410] sm:$0xff]  ;;  %v4137_v61 = vld [vmem:[#allocation31 + $0x20] sm:$0xff] }
 0x81f   :  { %3348 = vmatmul.mubr.f32.gmra.mrb[84].mxu0 %v13142_v38  ;;  %3514 = vmatmul.mubr.f32.gmra.mrb[116].mxu1 %v13142_v38  ;;  %v13154_v40 = vmax.f32 %v3169_v28, 0.0  ;;  %v3818_v28 = vld [vmem:[#allocation11 + $0x3c8] sm:$0xff] }
 0x820   :  { %v13152_v11 = vmax.f32 %v3170_v19, 0.0  ;;  %10252 = vmatpush1.bf16.msra.mxu1 %v10251_v4  ;;  %v3112_v7 = vpop.f32.mrb[104].mxu1 }
 0x821   :  { %v3171_v29 = vadd.f32 %v13109_v56, %v3112_v7  ;;  %v3114_v47 = vpop.f32.mrb[105].mxu1  ;;  %10254 = vmatprep.subr.bf16.mxu1 %v10253_v33  ;;  %v10269_v7 = vpack.c.bf16 %v3820_v34, %v3818_v28  ;;  %v4142_v28 = vld [vmem:[#allocation31 + $0x48] sm:$0xff]  ;;  %v4144_v34 = vld [vmem:[#allocation31 + $0x58] sm:$0xff] }
 0x822   :  { %v3172_v55 = vadd.f32 %v13112_v25, %v3114_v47  ;;  %9028 = vmatprep.mubr.msk.f32.mxu0 %vm1364_vm7, %v13152_v11  ;;  %9038 = vmatprep.mubr.msk.f32.mxu1 %vm1364_vm7, %v13152_v11 }
 0x823   :  { %3354 = vmatmul.mubr.f32.gmra.mrb[86].mxu0 %v13154_v40  ;;  %3520 = vmatmul.mubr.f32.gmra.mrb[118].mxu1 %v13154_v40  ;;  %v13166_v18 = vmax.f32 %v3171_v29, 0.0  ;;  %v3819_v29 = vld [vmem:[#allocation11 + $0x3d0] sm:$0xff] }
 0x824   :  { %v13164_v6 = vmax.f32 %v3172_v55, 0.0  ;;  %10256 = vmatpush1.bf16.msra.mxu1 %v10255_v23  ;;  %v3118_v8 = vpop.f32.mrb[106].mxu1  ;;  %v3817_v23 = vld [vmem:[#allocation11 + $0x3c0] sm:$0xff] }
 0x825   :  { %v3173_v21 = vadd.f32 %v13109_v56, %v3118_v8  ;;  %v3120_v35 = vpop.f32.mrb[107].mxu1  ;;  %10258 = vmatprep.subr.bf16.mxu1 %v10257_v32  ;;  %v3822_v32 = vld [vmem:[#allocation11 + $0x3e8] sm:$0xff]  ;;  %v10271_v51 = vpack.c.bf16 %v3819_v29, %v3817_v23  ;;  %v10311_v23 = vpack.c.bf16 %v4144_v34, %v4142_v28  ;;  %v4160_v34 = vld [vmem:[#allocation31 + $0xd8] sm:$0xff] }
 0x826   :  { %v3174_v62 = vadd.f32 %v13112_v25, %v3120_v35  ;;  %9029 = vmatprep.mubr.msk.f32.mxu0 %vm1364_vm7, %v13164_v6  ;;  %9039 = vmatprep.mubr.msk.f32.mxu1 %vm1364_vm7, %v13164_v6  ;;  %v10273_v58 = vpack.c.bf16 %v3824_v48, %v3822_v32  ;;  %v3826_v8 = vld [vmem:[#allocation11 + $0x408] sm:$0xff] }
 0x827   :  { %3360 = vmatmul.mubr.f32.gmra.mrb[88].mxu0 %v13166_v18  ;;  %3526 = vmatmul.mubr.f32.gmra.mrb[120].mxu1 %v13166_v18  ;;  %v13178_v43 = vmax.f32 %v3173_v21, 0.0  ;;  %v4141_v29 = vld [vmem:[#allocation31 + $0x40] sm:$0xff]  ;;  %v4158_v28 = vld [vmem:[#allocation31 + $0xc8] sm:$0xff] }
 0x828   :  { %v13176_v36 = vmax.f32 %v3174_v62, 0.0  ;;  %10260 = vmatpush1.bf16.msra.mxu1 %v10259_v14  ;;  %v3124_v26 = vpop.f32.mrb[108].mxu1  ;;  %v3828_v14 = vld [vmem:[#allocation11 + $0x418] sm:$0xff] }
 0x829   :  { %v3175_v3 = vadd.f32 %v13109_v56, %v3124_v26  ;;  %v3126_v5 = vpop.f32.mrb[109].mxu1  ;;  %10262 = vmatprep.subr.bf16.mxu1 %v10261_v41  ;;  %v10277_v35 = vpack.c.bf16 %v3828_v14, %v3826_v8  ;;  %v3825_v41 = vld [vmem:[#allocation11 + $0x400] sm:$0xff]  ;;  %v3832_v62 = vld [vmem:[#allocation11 + $0x438] sm:$0xff] }
 0x82a   :  { %v3176_v4 = vadd.f32 %v13112_v25, %v3126_v5  ;;  %9030 = vmatprep.mubr.msk.f32.mxu0 %vm1364_vm7, %v13176_v36  ;;  %9040 = vmatprep.mubr.msk.f32.mxu1 %vm1364_vm7, %v13176_v36  ;;  %v10279_v12 = vpack.c.bf16 %v3827_v50, %v3825_v41  ;;  %v10281_v15 = vpack.c.bf16 %v3832_v62, %v3830_v16  ;;  %v3829_v26 = vld [vmem:[#allocation11 + $0x420] sm:$0xff]  ;;  %v3834_v5 = vld [vmem:[#allocation11 + $0x448] sm:$0xf] }
 0x82b   :  { %3366 = vmatmul.mubr.f32.gmra.mrb[90].mxu0 %v13178_v43  ;;  %3532 = vmatmul.mubr.f32.gmra.mrb[122].mxu1 %v13178_v43  ;;  %v13190_v19 = vmax.f32 %v3175_v3, 0.0  ;;  %v4150_v41 = vld [vmem:[#allocation31 + $0x88] sm:$0xff]  ;;  %v4152_v50 = vld [vmem:[#allocation31 + $0x98] sm:$0xff] }
 0x82c   :  { %v13188_v33 = vmax.f32 %v3176_v4, 0.0  ;;  %10264 = vmatpush1.bf16.msra.mxu1 %v10263_v30  ;;  %v3130_v54 = vpop.f32.mrb[110].mxu1  ;;  %v3831_v30 = vld [vmem:[#allocation11 + $0x430] sm:$0xff] }
 0x82d   :  { %v3177_v37 = vadd.f32 %v13109_v56, %v3130_v54  ;;  %v3132_v1 = vpop.f32.mrb[111].mxu1  ;;  %10266 = vmatprep.subr.bf16.mxu1 %v10265_v22  ;;  %v10283_v3 = vpack.c.bf16 %v3831_v30, %v3829_v26  ;;  %v4139_v4 = vld [vmem:[#allocation31 + $0x30] sm:$0xff] }
 0x82e   :  { %v3178_v47 = vadd.f32 %v13112_v25, %v3132_v1  ;;  %9031 = vmatprep.mubr.msk.f32.mxu0 %vm1364_vm7, %v13188_v33  ;;  %9041 = vmatprep.mubr.msk.f32.mxu1 %vm1364_vm7, %v13188_v33  ;;  %v3823_v25 = vld [vmem:[#allocation11 + $0x3f0] sm:$0xff] }
 0x82f   :  { %3372 = vmatmul.mubr.f32.gmra.mrb[92].mxu0 %v13190_v19  ;;  %3538 = vmatmul.mubr.f32.gmra.mrb[124].mxu1 %v13190_v19  ;;  %v3193_v55 = vmax.f32 %v3177_v37, 0.0  ;;  %v10275_v21 = vpack.c.bf16 %v3823_v25, %v3821_v60 }
 0x830   :  { %v3194_v56 = vmax.f32 %v3178_v47, 0.0  ;;  %10268 = vmatpush1.bf16.msra.mxu1 %v10267_v63  ;;  %v10309_v63 = vpack.c.bf16 %v4139_v4, %v4137_v61  ;;  %v4143_v47 = vld [vmem:[#allocation31 + $0x50] sm:$0xff]  ;;  %v4153_v61 = vld [vmem:[#allocation31 + $0xa0] sm:$0xff] }
 0x831   :  { %10270 = vmatprep.subr.bf16.mxu1 %v10269_v7  ;;  %v10313_v60 = vpack.c.bf16 %v4143_v47, %v4141_v29  ;;  %v4155_v4 = vld [vmem:[#allocation31 + $0xb0] sm:$0xff] }
 0x832   :  { %9032 = vmatprep.mubr.msk.f32.mxu0 %vm1364_vm7, %v3194_v56  ;;  %9042 = vmatprep.mubr.msk.f32.mxu1 %vm1364_vm7, %v3194_v56 }
 0x833   :  { %3378 = vmatmul.mubr.f32.gmra.mrb[94].mxu0 %v3193_v55  ;;  %3544 = vmatmul.mubr.f32.gmra.mrb[126].mxu1 %v3193_v55 }
 0x834   :  { %10272 = vmatpush1.bf16.msra.mxu1 %v10271_v51  ;;  %9065 = vmatprep.mubr.msk.f32.mxu1 %vm1364_vm7, %v13116_v2  ;;  %v3833_v2 = vld [vmem:[#allocation11 + $0x440] sm:$0xf] }
 0x835   :  { %10274 = vmatprep.subr.bf16.mxu1 %v10273_v58  ;;  %3620 = vmatprep.mubr.f32.mxu0 %v12092_v0  ;;  %v4148_v51 = vld [vmem:[#allocation31 + $0x78] sm:$0xff] }
 0x838   :  { %10276 = vmatpush1.bf16.msra.mxu1 %v10275_v21  ;;  %v4145_v21 = vld [vmem:[#allocation31 + $0x60] sm:$0xff] }
 0x839   :  { %10278 = vmatprep.subr.bf16.mxu1 %v10277_v35  ;;  %v4147_v35 = vld [vmem:[#allocation31 + $0x70] sm:$0xff] }
 0x83c   :  { %10280 = vmatpush1.bf16.msra.mxu1 %v10279_v12  ;;  %v10317_v12 = vpack.c.bf16 %v4147_v35, %v4145_v21 }
 0x83d   :  { %10282 = vmatprep.subr.bf16.mxu1 %v10281_v15 }
 0x840   :  { %10284 = vmatpush1.bf16.msra.mxu1 %v10283_v3 }
 0x841   :  { %9063 = vmatprep.subr.msk.mxu1 %vm715_vm4, %v3834_v5  ;;  %v10319_v5 = vpack.c.bf16 %v4152_v50, %v4150_v41 }
 0x844   :  { %9064 = vmatpush1.msk.msra.mxu1 %vm715_vm4, %v3833_v2  ;;  %v4149_v2 = vld [vmem:[#allocation31 + $0x80] sm:$0xff] }
 0x845   :  { %3906 = vmatmul.mubr.f32.vlgmr.msra.gmra.mrb[128].mxu1 %v13118_v13 }
 0x846   :  { %9066 = vmatprep.mubr.msk.f32.mxu1 %vm1364_vm7, %v13128_v52 }
 0x849   :  { %3912 = vmatmul.mubr.f32.gmra.mrb[130].mxu1 %v13130_v39  ;;  %v4134_v39 = vld [vmem:[#allocation31 + $0x8] sm:$0xff] }
 0x84a   :  { %9067 = vmatprep.mubr.msk.f32.mxu1 %vm1364_vm7, %v13140_v31  ;;  %v4136_v31 = vld [vmem:[#allocation31 + $0x18] sm:$0xff] }
 0x84d   :  { %3918 = vmatmul.mubr.f32.gmra.mrb[132].mxu1 %v13142_v38  ;;  %v4133_v38 = vld [vmem:[#allocation31] sm:$0xff] }
 0x84e   :  { %9068 = vmatprep.mubr.msk.f32.mxu1 %vm1364_vm7, %v13152_v11 }
 0x851   :  { %3924 = vmatmul.mubr.f32.gmra.mrb[134].mxu1 %v13154_v40 }
 0x852   :  { %9069 = vmatprep.mubr.msk.f32.mxu1 %vm1364_vm7, %v13164_v6  ;;  %v10303_v6 = vpack.c.bf16 %v4136_v31, %v4134_v39 }
 0x854   :  { %10304 = vmatprep.subr.bf16.mxu1 %v10303_v6 }
 0x855   :  { %3930 = vmatmul.mubr.f32.gmra.mrb[136].mxu1 %v13166_v18  ;;  %v4135_v18 = vld [vmem:[#allocation31 + $0x10] sm:$0xff] }
 0x856   :  { %9070 = vmatprep.mubr.msk.f32.mxu1 %vm1364_vm7, %v13176_v36  ;;  %v4138_v36 = vld [vmem:[#allocation31 + $0x28] sm:$0xff]  ;;  %v10305_v22 = vpack.c.bf16 %v4135_v18, %v4133_v38 }
 0x857   :  { %v4154_v38 = vld [vmem:[#allocation31 + $0xa8] sm:$0xff] }
 0x858   :  { %10306 = vmatpush1.bf16.msra.mxu1 %v10305_v22 }
 0x859   :  { %3936 = vmatmul.mubr.f32.gmra.mrb[138].mxu1 %v13178_v43  ;;  %v4140_v43 = vld [vmem:[#allocation31 + $0x38] sm:$0xff] }
 0x85a   :  { %9071 = vmatprep.mubr.msk.f32.mxu1 %vm1364_vm7, %v13188_v33  ;;  %v10307_v27 = vpack.c.bf16 %v4140_v43, %v4138_v36 }
 0x85c   :  { %10308 = vmatprep.subr.bf16.mxu1 %v10307_v27 }
 0x85d   :  { %3942 = vmatmul.mubr.f32.gmra.mrb[140].mxu1 %v13190_v19 }
 0x85e   :  { %9072 = vmatprep.mubr.msk.f32.mxu1 %vm1364_vm7, %v3194_v56  ;;  %v4146_v56 = vld [vmem:[#allocation31 + $0x68] sm:$0xff]  ;;  %10310 = vmatpush1.bf16.msra.mxu1 %v10309_v63 }
 0x85f   :  { %10312 = vmatprep.subr.bf16.mxu1 %v10311_v23  ;;  %v10315_v14 = vpack.c.bf16 %v4148_v51, %v4146_v56  ;;  %v4157_v56 = vld [vmem:[#allocation31 + $0xc0] sm:$0xff]  ;;  %v4159_v51 = vld [vmem:[#allocation31 + $0xd0] sm:$0xff] }
 0x860   :  { %v10329_v41 = vpack.c.bf16 %v4159_v51, %v4157_v56  ;;  %v11525_v51 = vld [vmem:[#allocation2 + $0x48] sm:$0xff] }
 0x861   :  { %3948 = vmatmul.mubr.f32.gmra.mrb[142].mxu1 %v3193_v55 }
 0x862   :  { %10314 = vmatpush1.bf16.msra.mxu1 %v10313_v60 }
 0x863   :  { %10316 = vmatprep.subr.bf16.mxu1 %v10315_v14  ;;  %v4164_v14 = vld [vmem:[#allocation31 + $0xf8] sm:$0xff] }
 0x866   :  { %10318 = vmatpush1.bf16.msra.mxu1 %v10317_v12 }
 0x867   :  { %10320 = vmatprep.subr.bf16.mxu1 %v10319_v5  ;;  %v4166_v5 = vld [vmem:[#allocation31 + $0x108] sm:$0xff] }
 0x8ea   :  { %v13227_v13 = vpop.f32.mrb[80].mxu0  ;;  %v3503_v52 = vpop.f32.mrb[112].mxu1 }
 0x8eb   :  { %v13229_v11 = vpop.f32.mrb[81].mxu0  ;;  %v3505_v40 = vpop.f32.mrb[113].mxu1 }
 0x8ee   :  { %v13231_v33 = vpop.f32.mrb[82].mxu0  ;;  %v3509_v54 = vpop.f32.mrb[114].mxu1 }
 0x8ef   :  { %v10225_v19 = vpack.c.bf16 %v13231_v33, %v13227_v13  ;;  %v10207_v37 = vpack.c.bf16 %v3509_v54, %v3503_v52  ;;  %v13235_v1 = vpop.f32.mrb[83].mxu0  ;;  %v3511_v7 = vpop.f32.mrb[115].mxu1  ;;  %v4151_v52 = vld [vmem:[#allocation31 + $0x90] sm:$0xff] }
 0x8f0   :  { %v10223_v32 = vpack.c.bf16 %v13235_v1, %v13229_v11  ;;  %v10205_v48 = vpack.c.bf16 %v3511_v7, %v3505_v40  ;;  %v4156_v40 = vld [vmem:[#allocation31 + $0xb8] sm:$0xff]  ;;  %v10321_v36 = vpack.c.bf16 %v4151_v52, %v4149_v2  ;;  %v11526_v13 = vld [vmem:[#allocation2 + $0x50] sm:$0xff] }
 0x8f1   :  { %v10323_v27 = vpack.c.bf16 %v4156_v40, %v4154_v38  ;;  %v4168_v2 = vld [vmem:[#allocation31 + $0x118] sm:$0xff] }
 0x8f2   :  { %v13239_v55 = vpop.f32.mrb[84].mxu0  ;;  %v3515_v58 = vpop.f32.mrb[116].mxu1  ;;  %10206 = vmatprep.subr.bf16.mxu0 %v10205_v48  ;;  %10322 = vmatpush1.bf16.msra.mxu1 %v10321_v36  ;;  %v10327_v48 = vpack.c.bf16 %v4160_v34, %v4158_v28  ;;  %v4170_v34 = vld [vmem:[#allocation31 + $0x128] sm:$0xff] }
 0x8f3   :  { %v13241_v25 = vpop.f32.mrb[85].mxu0  ;;  %v3517_v8 = vpop.f32.mrb[117].mxu1  ;;  %10208 = vmatpush1.bf16.msra.mxu0 %v10207_v37  ;;  %v10325_v37 = vpack.c.bf16 %v4155_v4, %v4153_v61  ;;  %10324 = vmatprep.subr.bf16.mxu1 %v10323_v27  ;;  %v4165_v27 = vld [vmem:[#allocation31 + $0x100] sm:$0xff]  ;;  %v4167_v61 = vld [vmem:[#allocation31 + $0x110] sm:$0xff] }
 0x8f6   :  { %v13243_v16 = vpop.f32.mrb[86].mxu0  ;;  %v3521_v62 = vpop.f32.mrb[118].mxu1  ;;  %10326 = vmatpush1.bf16.msra.mxu1 %v10325_v37  ;;  %v10337_v37 = vpack.c.bf16 %v4167_v61, %v4165_v27  ;;  %v4178_v27 = vld [vmem:[#allocation31 + $0x168] sm:$0xf]  ;;  %v4339_v61 = vld [vmem:[#allocation32 + $0x8] sm:$0xff] }
 0x8f7   :  { %v10229_v15 = vpack.c.bf16 %v13243_v16, %v13239_v55  ;;  %v10211_v26 = vpack.c.bf16 %v3521_v62, %v3515_v58  ;;  %v13247_v30 = vpop.f32.mrb[87].mxu0  ;;  %v3523_v3 = vpop.f32.mrb[119].mxu1  ;;  %10328 = vmatprep.subr.bf16.mxu1 %v10327_v48  ;;  %v11524_v48 = vld [vmem:[#allocation2 + $0x40] sm:$0xff] }
 0x8f8   :  { %v10227_v39 = vpack.c.bf16 %v13247_v30, %v13241_v25  ;;  %v10209_v31 = vpack.c.bf16 %v3523_v3, %v3517_v8  ;;  %v4162_v8 = vld [vmem:[#allocation31 + $0xe8] sm:$0xff]  ;;  %v4163_v3 = vld [vmem:[#allocation31 + $0xf0] sm:$0xff]  ;;  %v11528_v16 = vld [vmem:[#allocation2 + $0x60] sm:$0xff] }
 0x8f9   :  { %v10331_v12 = vpack.c.bf16 %v4164_v14, %v4162_v8 }
 0x8fa   :  { %v13251_v6 = vpop.f32.mrb[88].mxu0  ;;  %v3527_v18 = vpop.f32.mrb[120].mxu1  ;;  %10210 = vmatprep.subr.bf16.mxu0 %v10209_v31  ;;  %10330 = vmatpush1.bf16.msra.mxu1 %v10329_v41 }
 0x8fb   :  { %v13253_v43 = vpop.f32.mrb[89].mxu0  ;;  %v3529_v22 = vpop.f32.mrb[121].mxu1  ;;  %10212 = vmatpush1.bf16.msra.mxu0 %v10211_v26  ;;  %v4161_v26 = vld [vmem:[#allocation31 + $0xe0] sm:$0xff]  ;;  %10332 = vmatprep.subr.bf16.mxu1 %v10331_v12 }
 0x8fc   :  { %v10333_v38 = vpack.c.bf16 %v4163_v3, %v4161_v26  ;;  %v11532_v12 = vld [vmem:[#allocation2] sm:$0xff] }
 0x8fe   :  { %v13255_v54 = vpop.f32.mrb[90].mxu0  ;;  %v3533_v63 = vpop.f32.mrb[122].mxu1  ;;  %10334 = vmatpush1.bf16.msra.mxu1 %v10333_v38 }
 0x8ff   :  { %v10233_v7 = vpack.c.bf16 %v13255_v54, %v13251_v6  ;;  %v10215_v23 = vpack.c.bf16 %v3533_v63, %v3527_v18  ;;  %v3369_v29 = vpop.f32.mrb[91].mxu0  ;;  %v3535_v47 = vpop.f32.mrb[123].mxu1  ;;  %v4172_v63 = vld [vmem:[#allocation31 + $0x138] sm:$0xff] }
 0x900   :  { %v10231_v58 = vpack.c.bf16 %v3369_v29, %v13253_v43  ;;  %v10213_v60 = vpack.c.bf16 %v3535_v47, %v3529_v22  ;;  %v10335_v22 = vpack.c.bf16 %v4168_v2, %v4166_v5  ;;  %v4171_v29 = vld [vmem:[#allocation31 + $0x130] sm:$0xff]  ;;  %v10339_v47 = vpack.c.bf16 %v4172_v63, %v4170_v34  ;;  %v11533_v5 = vld [vmem:[#allocation2 + $0x8] sm:$0xff] }
 0x901   :  { %v4341_v34 = vld [vmem:[#allocation32 + $0x18] sm:$0xff] }
 0x902   :  { %v13260_v21 = vpop.f32.mrb[92].mxu0  ;;  %v3539_v35 = vpop.f32.mrb[124].mxu1  ;;  %10214 = vmatprep.subr.bf16.mxu0 %v10213_v60  ;;  %10336 = vmatprep.subr.bf16.mxu1 %v10335_v22  ;;  %v11530_v60 = vld [vmem:[#allocation2 + $0x70] sm:$0xff] }
 0x903   :  { %v3375_v50 = vpop.f32.mrb[93].mxu0  ;;  %v3541_v62 = vpop.f32.mrb[125].mxu1  ;;  %10216 = vmatpush1.bf16.msra.mxu0 %v10215_v23  ;;  %v4169_v23 = vld [vmem:[#allocation31 + $0x120] sm:$0xff]  ;;  %10338 = vmatpush1.bf16.msra.mxu1 %v10337_v37  ;;  %v11538_v22 = vld [vmem:[#allocation2 + $0x30] sm:$0xff] }
 0x904   :  { %v10341_v56 = vpack.c.bf16 %v4171_v29, %v4169_v23  ;;  %10340 = vmatprep.subr.bf16.mxu1 %v10339_v47  ;;  %v4342_v37 = vld [vmem:[#allocation32 + $0x20] sm:$0xff]  ;;  %v4343_v23 = vld [vmem:[#allocation32 + $0x28] sm:$0xff]  ;;  %v4344_v47 = vld [vmem:[#allocation32 + $0x30] sm:$0xff] }
 0x905   :  { %v10354_v29 = vpack.c.bf16 %v4343_v23, %v4342_v37 }
 0x906   :  { %v3379_v52 = vpop.f32.mrb[94].mxu0  ;;  %v3545_v31 = vpop.f32.mrb[126].mxu1 }
 0x907   :  { %v10238_v40 = vpack.c.bf16 %v3379_v52, %v13260_v21  ;;  %v10220_v18 = vpack.c.bf16 %v3545_v31, %v3539_v35  ;;  %v3381_v36 = vpop.f32.mrb[95].mxu0  ;;  %v3547_v43 = vpop.f32.mrb[127].mxu1  ;;  %10342 = vmatpush1.bf16.msra.mxu1 %v10341_v56  ;;  %v11531_v21 = vld [vmem:[#allocation2 + $0x78] sm:$0xf] }
 0x908   :  { %v10235_v4 = vpack.c.bf16 %v3381_v36, %v3375_v50  ;;  %v10217_v28 = vpack.c.bf16 %v3547_v43, %v3541_v62  ;;  %v11536_v36 = vld [vmem:[#allocation2 + $0x20] sm:$0xff]  ;;  %v11537_v43 = vld [vmem:[#allocation2 + $0x28] sm:$0xff] }
 0x90a   :  { %10219 = vmatprep.subr.msk.bf16.mxu0 %vm12491_vm5, %v10217_v28  ;;  %v12094_v28 = vmov 0.0|0.0  }
 0x90b   :  { %10222 = vmatpush1.bf16.msk.msra.mxu0 %vm12491_vm5, %v10220_v18  ;;  %v11535_v18 = vld [vmem:[#allocation2 + $0x18] sm:$0xff] }
 0x90c   :  { %10224 = vmatprep.subr.bf16.mxu0 %v10223_v32 }
 0x90e   :  { %9045 = vmatmul.mubr.msk.f32.vlgmr.msra.gmra.mrb[96].mxu0 %vm690_vm6, %v11524_v48  ;;  %v4345_v48 = vld [vmem:[#allocation32 + $0x38] sm:$0xff] }
 0x90f   :  { %10226 = vmatpush1.bf16.msra.mxu0 %v10225_v19  ;;  %3626 = vmatprep.mubr.f32.mxu0 %v12092_v0  ;;  %v11527_v19 = vld [vmem:[#allocation2 + $0x58] sm:$0xff]  ;;  %v10357_v56 = vpack.c.bf16 %v4345_v48, %v4344_v47 }
 0x910   :  { %10228 = vmatprep.subr.bf16.mxu0 %v10227_v39  ;;  %v11529_v39 = vld [vmem:[#allocation2 + $0x68] sm:$0xff] }
 0x912   :  { %9046 = vmatmul.mubr.msk.f32.gmra.mrb[98].mxu0 %vm690_vm6, %v11525_v51  ;;  %v4346_v51 = vld [vmem:[#allocation32 + $0x40] sm:$0xff] }
 0x913   :  { %10230 = vmatpush1.bf16.msra.mxu0 %v10229_v15  ;;  %3632 = vmatprep.mubr.f32.mxu0 %v12092_v0 }
 0x914   :  { %10232 = vmatprep.subr.bf16.mxu0 %v10231_v58 }
 0x916   :  { %9047 = vmatmul.mubr.msk.f32.gmra.mrb[100].mxu0 %vm690_vm6, %v11526_v13  ;;  %v4347_v13 = vld [vmem:[#allocation32 + $0x48] sm:$0xff] }
 0x917   :  { %10234 = vmatpush1.bf16.msra.mxu0 %v10233_v7  ;;  %3638 = vmatprep.mubr.f32.mxu0 %v12092_v0 }
 0x918   :  { %v3907_v11 = vpop.f32.mrb[128].mxu1  ;;  %10237 = vmatprep.subr.msk.bf16.mxu0 %vm12491_vm5, %v10235_v4  ;;  %v4340_v4 = vld [vmem:[#allocation32 + $0x10] sm:$0xff] }
 0x919   :  { %v3909_v33 = vpop.f32.mrb[129].mxu1  ;;  %v10351_v63 = vpack.c.bf16 %v4341_v34, %v4340_v4 }
 0x91a   :  { %9048 = vmatmul.mubr.msk.f32.gmra.mrb[102].mxu0 %vm690_vm6, %v11527_v19  ;;  %v4349_v19 = vld [vmem:[#allocation32 + $0x58] sm:$0xff] }
 0x91b   :  { %10240 = vmatpush1.bf16.msk.msra.mxu0 %vm12491_vm5, %v10238_v40  ;;  %3644 = vmatprep.mubr.f32.mxu0 %v12092_v0  ;;  %v11534_v40 = vld [vmem:[#allocation2 + $0x10] sm:$0xff] }
 0x91c   :  { %v3913_v1 = vpop.f32.mrb[130].mxu1 }
 0x91d   :  { %v10287_v32 = vpack.c.bf16 %v3913_v1, %v3907_v11  ;;  %v3915_v55 = vpop.f32.mrb[131].mxu1  ;;  %v10360_v11 = vpack.c.bf16 %v4347_v13, %v4346_v51 }
 0x91e   :  { %v10285_v25 = vpack.c.bf16 %v3915_v55, %v3909_v33  ;;  %9049 = vmatmul.mubr.msk.f32.gmra.mrb[104].mxu0 %vm690_vm6, %v11528_v16  ;;  %v4348_v33 = vld [vmem:[#allocation32 + $0x50] sm:$0xff]  ;;  %v4351_v55 = vld [vmem:[#allocation32 + $0x68] sm:$0xff] }
 0x91f   :  { %3650 = vmatprep.mubr.f32.mxu0 %v12092_v0  ;;  %v10363_v1 = vpack.c.bf16 %v4349_v19, %v4348_v33  ;;  %v4352_v16 = vld [vmem:[#allocation32 + $0x70] sm:$0xff] }
 0x920   :  { %v3919_v15 = vpop.f32.mrb[132].mxu1  ;;  %10286 = vmatprep.subr.bf16.mxu0 %v10285_v25 }
 0x921   :  { %v3921_v30 = vpop.f32.mrb[133].mxu1 }
 0x922   :  { %9050 = vmatmul.mubr.msk.f32.gmra.mrb[106].mxu0 %vm690_vm6, %v11529_v39  ;;  %v4354_v39 = vld [vmem:[#allocation32 + $0x80] sm:$0xff] }
 0x923   :  { %3656 = vmatprep.mubr.f32.mxu0 %v12092_v0 }
 0x924   :  { %v3925_v6 = vpop.f32.mrb[134].mxu1 }
 0x925   :  { %v10291_v54 = vpack.c.bf16 %v3925_v6, %v3919_v15  ;;  %v3927_v7 = vpop.f32.mrb[135].mxu1  ;;  %v4353_v15 = vld [vmem:[#allocation32 + $0x78] sm:$0xff]  ;;  %v4355_v6 = vld [vmem:[#allocation32 + $0x88] sm:$0xff] }
 0x926   :  { %v10289_v58 = vpack.c.bf16 %v3927_v7, %v3921_v30  ;;  %9051 = vmatmul.mubr.msk.f32.gmra.mrb[108].mxu0 %vm690_vm6, %v11530_v60  ;;  %v10369_v30 = vpack.c.bf16 %v4353_v15, %v4352_v16  ;;  %v4356_v7 = vld [vmem:[#allocation32 + $0x90] sm:$0xff] }
 0x927   :  { %3662 = vmatprep.mubr.f32.mxu0 %v12092_v0 }
 0x928   :  { %v3931_v8 = vpop.f32.mrb[136].mxu1 }
 0x929   :  { %v3933_v14 = vpop.f32.mrb[137].mxu1 }
 0x92a   :  { %9052 = vmatmul.mubr.msk.f32.gmra.mrb[110].mxu0 %vm690_vm6, %v11531_v21 }
 0x92b   :  { %3739 = vmatprep.mubr.f32.mxu0 %v12092_v0 }
 0x92c   :  { %v3937_v35 = vpop.f32.mrb[138].mxu1 }
 0x92d   :  { %v10295_v41 = vpack.c.bf16 %v3937_v35, %v3931_v8  ;;  %v3939_v50 = vpop.f32.mrb[139].mxu1  ;;  %v4089_v8 = vld [vmem:[#allocation22] sm:$0x3] }
 0x92e   :  { %v10293_v62 = vpack.c.bf16 %v3939_v50, %v3933_v14  ;;  %9055 = vmatmul.mubr.msk.f32.vlgmr.msra.gmra.mrb[96].mxu0 %vm690_vm6, %v11532_v12  ;;  %v4094_v14 = vrot.slane %v4089_v8, %v12576_v42  ;;  %v4098_v21 = vrot.slane %v4089_v8, %v12578_v45 }
 0x92f   :  { %10288 = vmatpush1.bf16.msra.mxu0 %v10287_v32  ;;  %3745 = vmatprep.mubr.f32.mxu0 %v12092_v0  ;;  %v4350_v32 = vld [vmem:[#allocation32 + $0x60] sm:$0xff] }
 0x930   :  { %v3943_v26 = vpop.f32.mrb[140].mxu1  ;;  %10290 = vmatprep.subr.bf16.mxu0 %v10289_v58  ;;  %v10366_v25 = vpack.c.bf16 %v4351_v55, %v4350_v32  ;;  %v4357_v58 = vld [vmem:[#allocation32 + $0x98] sm:$0xff] }
 0x931   :  { %v3945_v3 = vpop.f32.mrb[141].mxu1  ;;  %v10375_v60 = vpack.c.bf16 %v4357_v58, %v4356_v7 }
 0x932   :  { %9056 = vmatmul.mubr.msk.f32.gmra.mrb[98].mxu0 %vm690_vm6, %v11533_v5 }
 0x933   :  { %10292 = vmatpush1.bf16.msra.mxu0 %v10291_v54  ;;  %3751 = vmatprep.mubr.f32.mxu0 %v12092_v0  ;;  %v10372_v54 = vpack.c.bf16 %v4355_v6, %v4354_v39  ;;  %v4359_v39 = vld [vmem:[#allocation32 + $0xa8] sm:$0xff] }
 0x934   :  { %v3949_v2 = vpop.f32.mrb[142].mxu1  ;;  %10294 = vmatprep.subr.bf16.mxu0 %v10293_v62 }
 0x935   :  { %v10300_v52 = vpack.c.bf16 %v3949_v2, %v3943_v26  ;;  %v3951_v31 = vpop.f32.mrb[143].mxu1 }
 0x936   :  { %v10297_v38 = vpack.c.bf16 %v3951_v31, %v3945_v3  ;;  %9057 = vmatmul.mubr.msk.f32.gmra.mrb[100].mxu0 %vm690_vm6, %v11534_v40 }
 0x937   :  { %10296 = vmatpush1.bf16.msra.mxu0 %v10295_v41  ;;  %3757 = vmatprep.mubr.f32.mxu0 %v12092_v0 }
 0x938   :  { %10299 = vmatprep.subr.msk.bf16.mxu0 %vm12491_vm5, %v10297_v38 }
 0x93a   :  { %9058 = vmatmul.mubr.msk.f32.gmra.mrb[102].mxu0 %vm690_vm6, %v11535_v18 }
 0x93b   :  { %10302 = vmatpush1.bf16.msk.msra.mxu0 %vm12491_vm5, %v10300_v52  ;;  %3763 = vmatprep.mubr.f32.mxu0 %v12092_v0 }
 0x93c   :  { %10347 = vmatprep.subr.bf16.mxu0 %v12094_v28 }
 0x93e   :  { %9059 = vmatmul.mubr.msk.f32.gmra.mrb[104].mxu0 %vm690_vm6, %v11536_v36 }
 0x93f   :  { %3769 = vmatprep.mubr.f32.mxu0 %v12092_v0 }
 0x942   :  { %9060 = vmatmul.mubr.msk.f32.gmra.mrb[106].mxu0 %vm690_vm6, %v11537_v43 }
 0x943   :  { %3775 = vmatprep.mubr.f32.mxu0 %v12092_v0 }
 0x946   :  { %9061 = vmatmul.mubr.msk.f32.gmra.mrb[108].mxu0 %vm690_vm6, %v11538_v22 }
 0x947   :  { %3781 = vmatprep.mubr.f32.mxu0 %v12092_v0 }
 0x94a   :  { %9062 = vmatmul.mubr.msk.f32.gmra.mrb[110].mxu0 %vm690_vm6, %v13060_v59  ;;  %v4174_v59 = vld [vmem:[#allocation31 + $0x148] sm:$0xff] }
 0x94b   :  { %4024 = vmatprep.mubr.f32.mxu0 %v12092_v0 }
 0x94e   :  { %9075 = vmatmul.mubr.msk.f32.vlgmr.msra.gmra.mrb[96].mxu0 %vm690_vm6, %v13065_v46  ;;  %v4176_v46 = vld [vmem:[#allocation31 + $0x158] sm:$0xff] }
 0x94f   :  { %4030 = vmatprep.mubr.f32.mxu0 %v12092_v0 }
 0x952   :  { %9076 = vmatmul.mubr.msk.f32.gmra.mrb[98].mxu0 %vm690_vm6, %v13070_v57  ;;  %v10343_v57 = vpack.c.bf16 %v4176_v46, %v4174_v59 }
 0x953   :  { %4036 = vmatprep.mubr.f32.mxu0 %v12092_v0 }
 0x954   :  { %10344 = vmatprep.subr.bf16.mxu1 %v10343_v57 }
 0x956   :  { %9077 = vmatmul.mubr.msk.f32.gmra.mrb[100].mxu0 %vm690_vm6, %v13075_v20  ;;  %v4173_v20 = vld [vmem:[#allocation31 + $0x140] sm:$0xff] }
 0x957   :  { %4042 = vmatprep.mubr.f32.mxu0 %v12092_v0 }
 0x95a   :  { %9078 = vmatmul.mubr.msk.f32.gmra.mrb[102].mxu0 %vm690_vm6, %v13080_v44  ;;  %v4175_v44 = vld [vmem:[#allocation31 + $0x150] sm:$0xff] }
 0x95b   :  { %4048 = vmatprep.mubr.f32.mxu0 %v12092_v0 }
 0x95e   :  { %9079 = vmatmul.mubr.msk.f32.gmra.mrb[104].mxu0 %vm690_vm6, %v13085_v53  ;;  %v10345_v53 = vpack.c.bf16 %v4175_v44, %v4173_v20 }
 0x95f   :  { %4054 = vmatprep.mubr.f32.mxu0 %v12092_v0 }
 0x960   :  { %10346 = vmatpush1.bf16.msra.mxu1 %v10345_v53 }
 0x961   :  { %9083 = vmatprep.subr.msk.mxu1 %vm715_vm4, %v4178_v27 }
 0x962   :  { %9080 = vmatmul.mubr.msk.f32.gmra.mrb[106].mxu0 %vm690_vm6, %v13090_v10  ;;  %v4177_v10 = vld [vmem:[#allocation31 + $0x160] sm:$0xf] }
 0x963   :  { %4060 = vmatprep.mubr.f32.mxu0 %v12092_v0 }
 0x964   :  { %9084 = vmatpush1.msk.msra.mxu1 %vm715_vm4, %v4177_v10 }
 0x966   :  { %9081 = vmatmul.mubr.msk.f32.gmra.mrb[108].mxu0 %vm690_vm6, %v13095_v49  ;;  %v4338_v49 = vld [vmem:[#allocation32] sm:$0xff] }
 0x967   :  { %4066 = vmatprep.mubr.f32.mxu0 %v12092_v0 }
 0x96a   :  { %9082 = vmatmul.mubr.msk.f32.gmra.mrb[110].mxu0 %vm690_vm6, %v13100_v24  ;;  %v10348_v24 = vpack.c.bf16 %v4339_v61, %v4338_v49 }
 0x96c   :  { %10349 = vmatpush1.bf16.msra.mxu0 %v10348_v24 }
 0x96d   :  { %10350 = vmatprep.subr.bf16.mxu0 %v12094_v28 }
 0x970   :  { %10352 = vmatpush1.bf16.msra.mxu0 %v10351_v63 }
 0x971   :  { %10353 = vmatprep.subr.bf16.mxu0 %v12094_v28 }
 0x974   :  { %10355 = vmatpush1.bf16.msra.mxu0 %v10354_v29 }
 0x975   :  { %10356 = vmatprep.subr.bf16.mxu0 %v12094_v28 }
 0x978   :  { %10358 = vmatpush1.bf16.msra.mxu0 %v10357_v56 }
 0x979   :  { %10359 = vmatprep.subr.bf16.mxu0 %v12094_v28 }
 0x97c   :  { %10361 = vmatpush1.bf16.msra.mxu0 %v10360_v11 }
 0x97d   :  { %10362 = vmatprep.subr.bf16.mxu0 %v12094_v28 }
 0x980   :  { %10364 = vmatpush1.bf16.msra.mxu0 %v10363_v1 }
 0x981   :  { %10365 = vmatprep.subr.bf16.mxu0 %v12094_v28 }
 0x984   :  { %10367 = vmatpush1.bf16.msra.mxu0 %v10366_v25 }
 0x985   :  { %10368 = vmatprep.subr.bf16.mxu0 %v12094_v28 }
 0x988   :  { %10370 = vmatpush1.bf16.msra.mxu0 %v10369_v30  ;;  %v4358_v30 = vld [vmem:[#allocation32 + $0xa0] sm:$0xff] }
 0x989   :  { %10371 = vmatprep.subr.bf16.mxu0 %v12094_v28  ;;  %v10378_v6 = vpack.c.bf16 %v4359_v39, %v4358_v30 }
 0x98c   :  { %10373 = vmatpush1.bf16.msra.mxu0 %v10372_v54  ;;  %v4360_v54 = vld [vmem:[#allocation32 + $0xb0] sm:$0xf] }
 0x98d   :  { %10374 = vmatprep.subr.bf16.mxu0 %v12094_v28 }
 0x990   :  { %10376 = vmatpush1.bf16.msra.mxu0 %v10375_v60 }
 0x991   :  { %10377 = vmatprep.subr.bf16.mxu0 %v12094_v28 }
 0x994   :  { %10379 = vmatpush1.bf16.msra.mxu0 %v10378_v6 }
 0x995   :  { %4432 = vmatprep.subr.mxu0 %v12092_v0 }
 0x998   :  { %9093 = vmatpush1.msk.msra.mxu0 %vm715_vm4, %v4360_v54 }
 0xa21   :  { %v4026_v35 = vpop.f32.mrb[96].mxu0 }
 0xa22   :  { %v13361_v41 = vadd.f32 %v4094_v14, %v4026_v35  ;;  %v4028_v50 = vpop.f32.mrb[97].mxu0 }
 0xa23   :  { %v13363_v62 = vadd.f32 %v4098_v21, %v4028_v50 }
 0xa24   :  { %v4117_v3 = vmax.f32 %v13361_v41, 0.0 }
 0xa25   :  { %v4118_v12 = vmax.f32 %v13363_v62, 0.0  ;;  %v4032_v26 = vpop.f32.mrb[98].mxu0 }
 0xa26   :  { %v13367_v5 = vadd.f32 %v4094_v14, %v4032_v26  ;;  %v4034_v2 = vpop.f32.mrb[99].mxu0 }
 0xa27   :  { %v13369_v52 = vadd.f32 %v4098_v21, %v4034_v2  ;;  %9085 = vmatprep.mubr.msk.f32.mxu1 %vm1364_vm7, %v4118_v12 }
 0xa28   :  { %4274 = vmatmul.mubr.f32.vlgmr.msra.gmra.mrb[144].mxu1 %v4117_v3  ;;  %v4119_v40 = vmax.f32 %v13367_v5, 0.0 }
 0xa29   :  { %v4120_v31 = vmax.f32 %v13369_v52, 0.0  ;;  %v4038_v38 = vpop.f32.mrb[100].mxu0 }
 0xa2a   :  { %v13378_v18 = vadd.f32 %v4094_v14, %v4038_v38  ;;  %v4040_v36 = vpop.f32.mrb[101].mxu0 }
 0xa2b   :  { %v13380_v43 = vadd.f32 %v4098_v21, %v4040_v36  ;;  %9086 = vmatprep.mubr.msk.f32.mxu1 %vm1364_vm7, %v4120_v31 }
 0xa2c   :  { %4280 = vmatmul.mubr.f32.gmra.mrb[146].mxu1 %v4119_v40  ;;  %v4121_v46 = vmax.f32 %v13378_v18, 0.0 }
 0xa2d   :  { %v4122_v22 = vmax.f32 %v13380_v43, 0.0  ;;  %v4044_v59 = vpop.f32.mrb[102].mxu0 }
 0xa2e   :  { %v13389_v57 = vadd.f32 %v4094_v14, %v4044_v59  ;;  %v4046_v20 = vpop.f32.mrb[103].mxu0 }
 0xa2f   :  { %v13391_v44 = vadd.f32 %v4098_v21, %v4046_v20  ;;  %9087 = vmatprep.mubr.msk.f32.mxu1 %vm1364_vm7, %v4122_v22 }
 0xa30   :  { %4286 = vmatmul.mubr.f32.gmra.mrb[148].mxu1 %v4121_v46  ;;  %v4123_v10 = vmax.f32 %v13389_v57, 0.0 }
 0xa31   :  { %v4124_v53 = vmax.f32 %v13391_v44, 0.0  ;;  %v4050_v27 = vpop.f32.mrb[104].mxu0 }
 0xa32   :  { %v13400_v49 = vadd.f32 %v4094_v14, %v4050_v27  ;;  %v4052_v61 = vpop.f32.mrb[105].mxu0 }
 0xa33   :  { %v13402_v4 = vadd.f32 %v4098_v21, %v4052_v61  ;;  %9088 = vmatprep.mubr.msk.f32.mxu1 %vm1364_vm7, %v4124_v53  ;;  %v4493_v61 = vld [vmem:[%s14234_s1] sm:$0xff] }
 0xa34   :  { %4292 = vmatmul.mubr.f32.gmra.mrb[150].mxu1 %v4123_v10  ;;  %v4125_v63 = vmax.f32 %v13400_v49, 0.0 }
 0xa35   :  { %v4126_v24 = vmax.f32 %v13402_v4, 0.0  ;;  %v4056_v34 = vpop.f32.mrb[106].mxu0  ;;  %v4708_v4 = vld [vmem:[#allocation13 + $0x8] sm:$0xff] }
 0xa36   :  { %v13409_v37 = vadd.f32 %v4094_v14, %v4056_v34  ;;  %v4058_v23 = vpop.f32.mrb[107].mxu0 }
 0xa37   :  { %v13411_v29 = vadd.f32 %v4098_v21, %v4058_v23  ;;  %9089 = vmatprep.mubr.msk.f32.mxu1 %vm1364_vm7, %v4126_v24 }
 0xa38   :  { %4298 = vmatmul.mubr.f32.gmra.mrb[152].mxu1 %v4125_v63  ;;  %v4127_v56 = vmax.f32 %v13409_v37, 0.0  ;;  %v4709_v37 = vld [vmem:[#allocation13 + $0x10] sm:$0xff] }
 0xa39   :  { %v4128_v47 = vmax.f32 %v13411_v29, 0.0  ;;  %v4062_v48 = vpop.f32.mrb[108].mxu0 }
 0xa3a   :  { %v13416_v51 = vadd.f32 %v4094_v14, %v4062_v48  ;;  %v4064_v13 = vpop.f32.mrb[109].mxu0 }
 0xa3b   :  { %v4114_v11 = vadd.f32 %v4098_v21, %v4064_v13  ;;  %9090 = vmatprep.mubr.msk.f32.mxu1 %vm1364_vm7, %v4128_v47 }
 0xa3c   :  { %4304 = vmatmul.mubr.f32.gmra.mrb[154].mxu1 %v4127_v56  ;;  %v4129_v1 = vmax.f32 %v13416_v51, 0.0 }
 0xa3d   :  { %v4130_v33 = vmax.f32 %v4114_v11, 0.0  ;;  %v4068_v19 = vpop.f32.mrb[110].mxu0 }
 0xa3e   :  { %v4115_v32 = vadd.f32 %v4094_v14, %v4068_v19  ;;  %v4070_v55 = vpop.f32.mrb[111].mxu0 }
 0xa3f   :  { %v4116_v25 = vadd.f32 %v4098_v21, %v4070_v55  ;;  %9091 = vmatprep.mubr.msk.f32.mxu1 %vm1364_vm7, %v4130_v33 }
 0xa40   :  { %4310 = vmatmul.mubr.f32.gmra.mrb[156].mxu1 %v4129_v1  ;;  %v4131_v15 = vmax.f32 %v4115_v32, 0.0 }
 0xa41   :  { %v4132_v16 = vmax.f32 %v4116_v25, 0.0 }
 0xa43   :  { %9092 = vmatprep.mubr.msk.f32.mxu1 %vm1364_vm7, %v4132_v16 }
 0xa44   :  { %4316 = vmatmul.mubr.f32.gmra.mrb[158].mxu1 %v4131_v15 }
 0xa45   :  { %9489 = vmatprep.mubr.msk.f32.mxu1 %vm690_vm6, %v4493_v61  ;;  %v4849_v61 = vld [vmem:[#allocation13 + $0x110] sm:$0xff] }
 0xafb   :  { %v4275_v7 = vpop.f32.mrb[144].mxu1 }
 0xafc   :  { %v4277_v58 = vpop.f32.mrb[145].mxu1  ;;  %v4322_v8 = vmax.f32 %v4117_v3, %v4275_v7 }
 0xafd   :  { %v4323_v60 = vmax.f32 %v4118_v12, %v4277_v58  ;;  %v4494_v58 = vld [vmem:[%s14234_s1 + $0x8] sm:$0xff] }
 0xaff   :  { %v4281_v14 = vpop.f32.mrb[146].mxu1  ;;  %9094 = vmatprep.mubr.msk.f32.mxu0 %vm1364_vm7, %v4323_v60  ;;  %v4495_v60 = vld [vmem:[%s14234_s1 + $0x10] sm:$0xff] }
 0xb00   :  { %v4283_v21 = vpop.f32.mrb[147].mxu1  ;;  %4453 = vmatmul.mubr.f32.vlgmr.msra.gmra.mrb[112].mxu0 %v4322_v8  ;;  %v4324_v50 = vmax.f32 %v4119_v40, %v4281_v14  ;;  %v4496_v8 = vld [vmem:[%s14234_s1 + $0x18] sm:$0xff]  ;;  %v9107_v14 = vld [vmem:[%s14234_s1 + $0x20] sm:$0xff] }
 0xb01   :  { %v4325_v35 = vmax.f32 %v4120_v31, %v4283_v21  ;;  %v4840_v21 = vld [vmem:[#allocation13 + $0xc8] sm:$0xff] }
 0xb03   :  { %v4287_v26 = vpop.f32.mrb[148].mxu1  ;;  %9095 = vmatprep.mubr.msk.f32.mxu0 %vm1364_vm7, %v4325_v35  ;;  %v4842_v35 = vld [vmem:[#allocation13 + $0xd8] sm:$0xff] }
 0xb04   :  { %v4289_v2 = vpop.f32.mrb[149].mxu1  ;;  %4458 = vmatmul.mubr.f32.gmra.mrb[114].mxu0 %v4324_v50  ;;  %v4326_v62 = vmax.f32 %v4121_v46, %v4287_v26  ;;  %v10440_v50 = vpack.c.bf16 %v4842_v35, %v4840_v21  ;;  %v4839_v26 = vld [vmem:[#allocation13 + $0xc0] sm:$0xff] }
 0xb05   :  { %v4327_v41 = vmax.f32 %v4122_v22, %v4289_v2  ;;  %v4841_v2 = vld [vmem:[#allocation13 + $0xd0] sm:$0xff] }
 0xb07   :  { %v4293_v12 = vpop.f32.mrb[150].mxu1  ;;  %9096 = vmatprep.mubr.msk.f32.mxu0 %vm1364_vm7, %v4327_v41  ;;  %v4844_v41 = vld [vmem:[#allocation13 + $0xe8] sm:$0xff] }
 0xb08   :  { %v4295_v3 = vpop.f32.mrb[151].mxu1  ;;  %4463 = vmatmul.mubr.f32.gmra.mrb[116].mxu0 %v4326_v62  ;;  %v4328_v52 = vmax.f32 %v4123_v10, %v4293_v12  ;;  %v4846_v62 = vld [vmem:[#allocation13 + $0xf8] sm:$0xff] }
 0xb09   :  { %v4329_v5 = vmax.f32 %v4124_v53, %v4295_v3  ;;  %v9108_v12 = vld [vmem:[%s14234_s1 + $0x28] sm:$0xff]  ;;  %v10442_v3 = vpack.c.bf16 %v4841_v2, %v4839_v26  ;;  %v4859_v2 = vld [vmem:[#allocation13 + $0x160] sm:$0xff] }
 0xb0a   :  { %v4730_v26 = vld [vmem:[#allocation13 + $0xb8] sm:$0xff] }
 0xb0b   :  { %v4299_v31 = vpop.f32.mrb[152].mxu1  ;;  %9097 = vmatprep.mubr.msk.f32.mxu0 %vm1364_vm7, %v4329_v5  ;;  %v9109_v5 = vld [vmem:[%s14234_s1 + $0x30] sm:$0xff] }
 0xb0c   :  { %v4301_v38 = vpop.f32.mrb[153].mxu1  ;;  %4468 = vmatmul.mubr.f32.gmra.mrb[118].mxu0 %v4328_v52  ;;  %v4330_v36 = vmax.f32 %v4125_v63, %v4299_v31  ;;  %v4707_v63 = vld [vmem:[#allocation13] sm:$0xff]  ;;  %v10444_v52 = vpack.c.bf16 %v4846_v62, %v4844_v41  ;;  %v9110_v31 = vld [vmem:[%s14234_s1 + $0x38] sm:$0xff]  ;;  %v4861_v62 = vld [vmem:[#allocation13 + $0x170] sm:$0xff] }
 0xb0d   :  { %v4331_v40 = vmax.f32 %v4126_v24, %v4301_v38  ;;  %v4710_v24 = vld [vmem:[#allocation13 + $0x18] sm:$0xff]  ;;  %v10418_v23 = vpack.c.bf16 %v4709_v37, %v4707_v63  ;;  %v4712_v38 = vld [vmem:[#allocation13 + $0x28] sm:$0xff]  ;;  %v4717_v63 = vld [vmem:[#allocation13 + $0x50] sm:$0xff] }
 0xb0e   :  { %v10416_v34 = vpack.c.bf16 %v4710_v24, %v4708_v4  ;;  %v4852_v37 = vld [vmem:[#allocation13 + $0x128] sm:$0xff] }
 0xb0f   :  { %v4305_v43 = vpop.f32.mrb[154].mxu1  ;;  %9098 = vmatprep.mubr.msk.f32.mxu0 %vm1364_vm7, %v4331_v40  ;;  %v4714_v40 = vld [vmem:[#allocation13 + $0x38] sm:$0xff] }
 0xb10   :  { %v4307_v18 = vpop.f32.mrb[155].mxu1  ;;  %4473 = vmatmul.mubr.f32.gmra.mrb[120].mxu0 %v4330_v36  ;;  %v4332_v59 = vmax.f32 %v4127_v56, %v4305_v43  ;;  %10417 = vmatprep.subr.bf16.mxu0 %v10416_v34  ;;  %v4843_v36 = vld [vmem:[#allocation13 + $0xe0] sm:$0xff]  ;;  %v10420_v43 = vpack.c.bf16 %v4714_v40, %v4712_v38  ;;  %v5164_v38 = vld [vmem:[#allocation13 + $0x198] sm:$0xff] }
 0xb11   :  { %v4333_v22 = vmax.f32 %v4128_v47, %v4307_v18  ;;  %10419 = vmatpush1.bf16.msra.mxu0 %v10418_v23  ;;  %v4845_v18 = vld [vmem:[#allocation13 + $0xf0] sm:$0xff]  ;;  %v4715_v34 = vld [vmem:[#allocation13 + $0x40] sm:$0xff] }
 0xb12   :  { %10421 = vmatprep.subr.bf16.mxu0 %v10420_v43  ;;  %v10426_v23 = vpack.c.bf16 %v4717_v63, %v4715_v34  ;;  %v5170_v34 = vld [vmem:[#allocation13 + $0x1c8] sm:$0xff]  ;;  %v5172_v63 = vld [vmem:[#allocation13 + $0x1d8] sm:$0xff] }
 0xb13   :  { %v4311_v46 = vpop.f32.mrb[156].mxu1  ;;  %9099 = vmatprep.mubr.msk.f32.mxu0 %vm1364_vm7, %v4333_v22  ;;  %v4711_v22 = vld [vmem:[#allocation13 + $0x20] sm:$0xff] }
 0xb14   :  { %v4313_v57 = vpop.f32.mrb[157].mxu1  ;;  %4478 = vmatmul.mubr.f32.gmra.mrb[122].mxu0 %v4332_v59  ;;  %v4334_v44 = vmax.f32 %v4129_v1, %v4311_v46  ;;  %v4713_v59 = vld [vmem:[#allocation13 + $0x30] sm:$0xff]  ;;  %v10446_v46 = vpack.c.bf16 %v4845_v18, %v4843_v36 }
 0xb15   :  { %v4335_v20 = vmax.f32 %v4130_v33, %v4313_v57  ;;  %v10422_v57 = vpack.c.bf16 %v4713_v59, %v4711_v22  ;;  %v5161_v59 = vld [vmem:[#allocation13 + $0x180] sm:$0xff] }
 0xb17   :  { %v4317_v53 = vpop.f32.mrb[158].mxu1  ;;  %9100 = vmatprep.mubr.msk.f32.mxu0 %vm1364_vm7, %v4335_v20  ;;  %v4848_v20 = vld [vmem:[#allocation13 + $0x108] sm:$0xff]  ;;  %10423 = vmatpush1.bf16.msra.mxu0 %v10422_v57 }
 0xb18   :  { %v4319_v27 = vpop.f32.mrb[159].mxu1  ;;  %4483 = vmatmul.mubr.f32.gmra.mrb[124].mxu0 %v4334_v44  ;;  %v4336_v49 = vmax.f32 %v4131_v15, %v4317_v53  ;;  %v4850_v44 = vld [vmem:[#allocation13 + $0x118] sm:$0xff]  ;;  %v4716_v53 = vld [vmem:[#allocation13 + $0x48] sm:$0xff] }
 0xb19   :  { %v4337_v10 = vmax.f32 %v4132_v16, %v4319_v27  ;;  %v10448_v27 = vpack.c.bf16 %v4850_v44, %v4848_v20  ;;  %v5166_v57 = vld [vmem:[#allocation13 + $0x1a8] sm:$0xff]  ;;  %v5168_v20 = vld [vmem:[#allocation13 + $0x1b8] sm:$0xff] }
 0xb1b   :  { %9101 = vmatprep.mubr.msk.f32.mxu0 %vm1364_vm7, %v4337_v10  ;;  %v4718_v10 = vld [vmem:[#allocation13 + $0x58] sm:$0xff] }
 0xb1c   :  { %4488 = vmatmul.mubr.f32.gmra.mrb[126].mxu0 %v4336_v49  ;;  %v4847_v49 = vld [vmem:[#allocation13 + $0x100] sm:$0xff]  ;;  %v10424_v4 = vpack.c.bf16 %v4718_v10, %v4716_v53 }
 0xb1d   :  { %4808 = vmatprep.mubr.f32.mxu0 %v12092_v0  ;;  %v10450_v24 = vpack.c.bf16 %v4849_v61, %v4847_v49  ;;  %v10484_v61 = vpack.c.bf16 %v5168_v20, %v5166_v57  ;;  %v5426_v57 = vld [vmem:[%s14235_s18 + $0x78] sm:$0xff] }
 0xb1e   :  { %10425 = vmatprep.subr.bf16.mxu0 %v10424_v4  ;;  %v5165_v4 = vld [vmem:[#allocation13 + $0x1a0] sm:$0xff] }
 0xb1f   :  { %10427 = vmatpush1.bf16.msra.mxu0 %v10426_v23 }
 0xbd3   :  { %v4454_v29 = vpop.f32.mrb[112].mxu0 }
 0xbd4   :  { %v4456_v47 = vpop.f32.mrb[113].mxu0 }
 0xbd5   :  { %v4720_v47 = vld [vmem:[#allocation13 + $0x68] sm:$0xff] }
 0xbd7   :  { %v4459_v48 = vpop.f32.mrb[114].mxu0 }
 0xbd8   :  { %v10380_v56 = vpack.c.bf16 %v4459_v48, %v4454_v29  ;;  %v4461_v51 = vpop.f32.mrb[115].mxu0  ;;  %v4854_v29 = vld [vmem:[#allocation13 + $0x138] sm:$0xff] }
 0xbd9   :  { %v4722_v48 = vld [vmem:[#allocation13 + $0x78] sm:$0xff] }
 0xbda   :  { %10381 = vmatprep.subr.bf16.mxu1 %v10380_v56  ;;  %v10428_v51 = vpack.c.bf16 %v4722_v48, %v4720_v47 }
 0xbdb   :  { %v4464_v13 = vpop.f32.mrb[116].mxu0  ;;  %10383 = vmatpush3.bf16.msra.mxu1 %v10380_v56 }
 0xbdc   :  { %v4466_v11 = vpop.f32.mrb[117].mxu0  ;;  %10429 = vmatprep.subr.bf16.mxu0 %v10428_v51  ;;  %v5169_v51 = vld [vmem:[#allocation13 + $0x1c0] sm:$0xff] }
 0xbdd   :  { %v4853_v11 = vld [vmem:[#allocation13 + $0x130] sm:$0xff] }
 0xbdf   :  { %v4469_v33 = vpop.f32.mrb[118].mxu0 }
 0xbe0   :  { %v10384_v19 = vpack.c.bf16 %v4469_v33, %v4464_v13  ;;  %v4471_v1 = vpop.f32.mrb[119].mxu0  ;;  %v4851_v13 = vld [vmem:[#allocation13 + $0x120] sm:$0xff] }
 0xbe1   :  { %v4719_v33 = vld [vmem:[#allocation13 + $0x60] sm:$0xff]  ;;  %v4721_v1 = vld [vmem:[#allocation13 + $0x70] sm:$0xff] }
 0xbe2   :  { %10385 = vmatprep.subr.bf16.mxu1 %v10384_v19 }
 0xbe3   :  { %v4474_v32 = vpop.f32.mrb[120].mxu0  ;;  %10387 = vmatpush3.bf16.msra.mxu1 %v10384_v19 }
 0xbe4   :  { %v4476_v55 = vpop.f32.mrb[121].mxu0 }
 0xbe5   :  { %v4858_v55 = vld [vmem:[#allocation13 + $0x158] sm:$0xff] }
 0xbe7   :  { %v4479_v25 = vpop.f32.mrb[122].mxu0 }
 0xbe8   :  { %v10388_v16 = vpack.c.bf16 %v4479_v25, %v4474_v32  ;;  %v4481_v15 = vpop.f32.mrb[123].mxu0  ;;  %v4856_v32 = vld [vmem:[#allocation13 + $0x148] sm:$0xff]  ;;  %v10430_v25 = vpack.c.bf16 %v4721_v1, %v4719_v33  ;;  %v5176_v33 = vld [vmem:[#allocation13 + $0x1f8] sm:$0xff] }
 0xbe9   :  { %v4724_v15 = vld [vmem:[#allocation13 + $0x88] sm:$0xff] }
 0xbea   :  { %10389 = vmatprep.subr.bf16.mxu1 %v10388_v16  ;;  %10431 = vmatpush1.bf16.msra.mxu0 %v10430_v25  ;;  %v5178_v25 = vld [vmem:[#allocation13 + $0x208] sm:$0xff] }
 0xbeb   :  { %v4484_v30 = vpop.f32.mrb[124].mxu0  ;;  %10391 = vmatpush3.bf16.msra.mxu1 %v10388_v16 }
 0xbec   :  { %v4486_v39 = vpop.f32.mrb[125].mxu0 }
 0xbed   :  { %v4855_v39 = vld [vmem:[#allocation13 + $0x140] sm:$0xff] }
 0xbef   :  { %v4489_v6 = vpop.f32.mrb[126].mxu0 }
 0xbf0   :  { %v10392_v54 = vpack.c.bf16 %v4489_v6, %v4484_v30  ;;  %v4491_v7 = vpop.f32.mrb[127].mxu0  ;;  %v4726_v30 = vld [vmem:[#allocation13 + $0x98] sm:$0xff] }
 0xbf1   :  { %v10432_v6 = vpack.c.bf16 %v4726_v30, %v4724_v15  ;;  %v4723_v7 = vld [vmem:[#allocation13 + $0x80] sm:$0xff] }
 0xbf2   :  { %10394 = vmatprep.subr.msk.bf16.mxu1 %vm12491_vm5, %v10392_v54 }
 0xbf3   :  { %10397 = vmatpush3.bf16.msk.msra.mxu1 %vm12491_vm5, %v10392_v54  ;;  %10433 = vmatprep.subr.bf16.mxu0 %v10432_v6  ;;  %v5179_v6 = vld [vmem:[#allocation13 + $0x210] sm:$0xff] }
 0xbf4   :  { %10399 = vmatprep.subr.bf16.mxu1 %v10380_v56 }
 0xbf6   :  { %9490 = vmatmul.mubr.msk.f32.vlgmr.msra.gmra.mrb[160].mxu1 %vm690_vm6, %v4494_v58  ;;  %v4725_v58 = vld [vmem:[#allocation13 + $0x90] sm:$0xff] }
 0xbf7   :  { %10401 = vmatpush3.bf16.msra.mxu1 %v10380_v56  ;;  %9492 = vmatprep.mubr.msk.f32.mxu1 %vm690_vm6, %v4495_v60  ;;  %v10452_v56 = vpack.c.bf16 %v4854_v29, %v4852_v37  ;;  %v4860_v60 = vld [vmem:[#allocation13 + $0x168] sm:$0xff]  ;;  %v10434_v21 = vpack.c.bf16 %v4725_v58, %v4723_v7  ;;  %v5184_v7 = vld [vmem:[#allocation13 + $0x238] sm:$0xff] }
 0xbf8   :  { %10403 = vmatprep.subr.bf16.mxu1 %v10384_v19 }
 0xbf9   :  { %10435 = vmatpush1.bf16.msra.mxu0 %v10434_v21 }
 0xbfa   :  { %9493 = vmatmul.mubr.msk.f32.gmra.mrb[162].mxu1 %vm690_vm6, %v4496_v8  ;;  %v4862_v8 = vld [vmem:[#allocation13 + $0x178] sm:$0xff] }
 0xbfb   :  { %10405 = vmatpush3.bf16.msra.mxu1 %v10384_v19  ;;  %9511 = vmatprep.mubr.msk.f32.mxu1 %vm690_vm6, %v9107_v14  ;;  %v10454_v19 = vpack.c.bf16 %v4853_v11, %v4851_v13  ;;  %v10460_v35 = vpack.c.bf16 %v4862_v8, %v4860_v60  ;;  %v5171_v13 = vld [vmem:[#allocation13 + $0x1d0] sm:$0xff]  ;;  %v5174_v11 = vld [vmem:[#allocation13 + $0x1e8] sm:$0xff]  ;;  %v5181_v8 = vld [vmem:[#allocation13 + $0x220] sm:$0xff] }
 0xbfc   :  { %10407 = vmatprep.subr.bf16.mxu1 %v10388_v16  ;;  %v10492_v1 = vpack.c.bf16 %v5176_v33, %v5174_v11  ;;  %v5435_v11 = vld [vmem:[%s14235_s18 + $0xc0] sm:$0xff]  ;;  %v5437_v33 = vld [vmem:[%s14235_s18 + $0xd0] sm:$0xff] }
 0xbff   :  { %10409 = vmatpush3.bf16.msra.mxu1 %v10388_v16  ;;  %v10456_v16 = vpack.c.bf16 %v4858_v55, %v4856_v32  ;;  %v5173_v32 = vld [vmem:[#allocation13 + $0x1e0] sm:$0xff]  ;;  %v5175_v55 = vld [vmem:[#allocation13 + $0x1f0] sm:$0xff] }
 0xc00   :  { %10412 = vmatprep.subr.msk.bf16.mxu1 %vm12491_vm5, %v10392_v54  ;;  %v10494_v15 = vpack.c.bf16 %v5175_v55, %v5173_v32  ;;  %v10538_v32 = vpack.c.bf16 %v5437_v33, %v5435_v11 }
 0xc03   :  { %10415 = vmatpush3.bf16.msk.msra.mxu1 %vm12491_vm5, %v10392_v54  ;;  %v4857_v54 = vld [vmem:[#allocation13 + $0x150] sm:$0xff] }
 0xc04   :  { %10441 = vmatprep.subr.bf16.mxu1 %v10440_v50  ;;  %v10458_v14 = vpack.c.bf16 %v4857_v54, %v4855_v39  ;;  %v4728_v50 = vld [vmem:[#allocation13 + $0xa8] sm:$0xff]  ;;  %v5177_v39 = vld [vmem:[#allocation13 + $0x200] sm:$0xff] }
 0xc05   :  { %v10436_v41 = vpack.c.bf16 %v4730_v26, %v4728_v50  ;;  %v5182_v54 = vld [vmem:[#allocation13 + $0x228] sm:$0xff]  ;;  %v10498_v58 = vpack.c.bf16 %v5179_v6, %v5177_v39 }
 0xc06   :  { %9512 = vmatmul.mubr.msk.f32.vlgmr.msra.gmra.mrb[164].mxu1 %vm690_vm6, %v9108_v12  ;;  %v4727_v12 = vld [vmem:[#allocation13 + $0xa0] sm:$0xff]  ;;  %v10500_v60 = vpack.c.bf16 %v5184_v7, %v5182_v54  ;;  %v5414_v50 = vld [vmem:[%s14235_s18 + $0x18] sm:$0xff]  ;;  %v5443_v54 = vld [vmem:[%s14235_s18 + $0x100] sm:$0xff] }
 0xc07   :  { %9514 = vmatprep.mubr.msk.f32.mxu1 %vm690_vm6, %v9109_v5  ;;  %10443 = vmatpush1.bf16.msra.mxu1 %v10442_v3  ;;  %v4729_v3 = vld [vmem:[#allocation13 + $0xb0] sm:$0xff]  ;;  %v10462_v5 = vpack.c.bf16 %v4861_v62, %v4859_v2  ;;  %v5445_v7 = vld [vmem:[%s14235_s18 + $0x110] sm:$0xff] }
 0xc08   :  { %10445 = vmatprep.subr.bf16.mxu1 %v10444_v52  ;;  %v10438_v52 = vpack.c.bf16 %v4729_v3, %v4727_v12  ;;  %10437 = vmatprep.subr.bf16.mxu0 %v10436_v41  ;;  %v5411_v2 = vld [vmem:[%s14235_s18] sm:$0xff]  ;;  %v5413_v41 = vld [vmem:[%s14235_s18 + $0x10] sm:$0xff]  ;;  %v5416_v12 = vld [vmem:[%s14235_s18 + $0x28] sm:$0xff] }
 0xc09   :  { %v10514_v62 = vpack.c.bf16 %v5413_v41, %v5411_v2  ;;  %v5418_v3 = vld [vmem:[%s14235_s18 + $0x38] sm:$0xff] }
 0xc0a   :  { %9515 = vmatmul.mubr.msk.f32.gmra.mrb[166].mxu1 %vm690_vm6, %v9110_v31  ;;  %v5162_v31 = vld [vmem:[#allocation13 + $0x188] sm:$0xff]  ;;  %10439 = vmatpush1.bf16.msra.mxu0 %v10438_v52  ;;  %v5415_v52 = vld [vmem:[%s14235_s18 + $0x20] sm:$0xff] }
 0xc0b   :  { %4927 = vmatprep.mubr.f32.mxu1 %v12092_v0  ;;  %10447 = vmatpush1.bf16.msra.mxu1 %v10446_v46  ;;  %v10480_v40 = vpack.c.bf16 %v5164_v38, %v5162_v31  ;;  %v5163_v46 = vld [vmem:[#allocation13 + $0x190] sm:$0xff]  ;;  %v5417_v31 = vld [vmem:[%s14235_s18 + $0x30] sm:$0xff] }
 0xc0c   :  { %10449 = vmatprep.subr.bf16.mxu1 %v10448_v27  ;;  %v10482_v10 = vpack.c.bf16 %v5163_v46, %v5161_v59  ;;  %v10518_v38 = vpack.c.bf16 %v5417_v31, %v5415_v52  ;;  %v5424_v59 = vld [vmem:[%s14235_s18 + $0x68] sm:$0xff] }
 0xc0d   :  { %v10524_v20 = vpack.c.bf16 %v5426_v57, %v5424_v59 }
 0xc0f   :  { %10451 = vmatpush1.bf16.msra.mxu1 %v10450_v24  ;;  %v5167_v24 = vld [vmem:[#allocation13 + $0x1b0] sm:$0xff] }
 0xc10   :  { %10453 = vmatprep.subr.bf16.mxu1 %v10452_v56  ;;  %v10486_v47 = vpack.c.bf16 %v5167_v24, %v5165_v4  ;;  %v10488_v56 = vpack.c.bf16 %v5172_v63, %v5170_v34  ;;  %v5427_v4 = vld [vmem:[%s14235_s18 + $0x80] sm:$0xff]  ;;  %v5429_v24 = vld [vmem:[%s14235_s18 + $0x90] sm:$0xff]  ;;  %v5432_v34 = vld [vmem:[%s14235_s18 + $0xa8] sm:$0xff] }
 0xc11   :  { %v5434_v63 = vld [vmem:[%s14235_s18 + $0xb8] sm:$0xff] }
 0xc13   :  { %10455 = vmatpush1.bf16.msra.mxu1 %v10454_v19  ;;  %v10490_v19 = vpack.c.bf16 %v5171_v13, %v5169_v51 }
 0xc14   :  { %10457 = vmatprep.subr.bf16.mxu1 %v10456_v16  ;;  %v5180_v16 = vld [vmem:[#allocation13 + $0x218] sm:$0xff] }
 0xc15   :  { %v10496_v30 = vpack.c.bf16 %v5180_v16, %v5178_v25  ;;  %v5439_v25 = vld [vmem:[%s14235_s18 + $0xe0] sm:$0xff]  ;;  %v5441_v16 = vld [vmem:[%s14235_s18 + $0xf0] sm:$0xff] }
 0xc16   :  { %v10542_v39 = vpack.c.bf16 %v5441_v16, %v5439_v25 }
 0xc17   :  { %10459 = vmatpush1.bf16.msra.mxu1 %v10458_v14  ;;  %v5183_v14 = vld [vmem:[#allocation13 + $0x230] sm:$0xff] }
 0xc18   :  { %10461 = vmatprep.subr.bf16.mxu1 %v10460_v35  ;;  %v10502_v21 = vpack.c.bf16 %v5183_v14, %v5181_v8  ;;  %v5412_v35 = vld [vmem:[%s14235_s18 + $0x8] sm:$0xff]  ;;  %v10546_v8 = vpack.c.bf16 %v5445_v7, %v5443_v54  ;;  %v13579_v54 = vld [vmem:[#allocation5 + $0x18] sm:$0xff]  ;;  %v9144_v7 = vld [vmem:[%s14235_s18 + $0x180] sm:$0xff] }
 0xc19   :  { %v10512_v26 = vpack.c.bf16 %v5414_v50, %v5412_v35  ;;  %v5449_v35 = vld [vmem:[%s14235_s18 + $0x130] sm:$0xff]  ;;  %v5452_v50 = vld [vmem:[%s14235_s18 + $0x148] sm:$0xff] }
 0xc1b   :  { %10463 = vmatpush1.bf16.msra.mxu1 %v10462_v5  ;;  %v10516_v5 = vpack.c.bf16 %v5418_v3, %v5416_v12 }
 0xc1c   :  { %10481 = vmatprep.subr.bf16.mxu1 %v10480_v40  ;;  %v5420_v40 = vld [vmem:[%s14235_s18 + $0x48] sm:$0xff] }
 0xcc9   :  { %v9491_v36 = vpop.f32.mrb[160].mxu1 }
 0xcca   :  { %v4578_v43 = vpop.f32.mrb[161].mxu1 }
 0xccd   :  { %v9494_v18 = vpop.f32.mrb[162].mxu1 }
 0xcce   :  { %v4588_v22 = vpop.f32.mrb[163].mxu1 }
 0xcd9   :  { %v9513_v44 = vpop.f32.mrb[164].mxu1 }
 0xcda   :  { %v13472_v53 = vmax.f32 %v9491_v36, %v9513_v44  ;;  %v4680_v27 = vpop.f32.mrb[165].mxu1  ;;  %v5422_v36 = vld [vmem:[%s14235_s18 + $0x58] sm:$0xff]  ;;  %v5423_v44 = vld [vmem:[%s14235_s18 + $0x60] sm:$0xff] }
 0xcdb   :  { %v4699_v49 = vmax.f32 %v4578_v43, %v4680_v27  ;;  %v10520_v43 = vpack.c.bf16 %v5422_v36, %v5420_v40  ;;  %v5428_v27 = vld [vmem:[%s14235_s18 + $0x88] sm:$0xff] }
 0xcdd   :  { %v9516_v37 = vpop.f32.mrb[166].mxu1  ;;  %9116 = vmatmul.mubr.msk.f32.vlgmr.msra.gmra.mrb[128].mxu0 %vm4731_vm8, %v4699_v49  ;;  %9120 = vmatmul.mubr.msk.f32.vlgmr.msra.gmra.mrb[168].mxu1 %vm4731_vm8, %v4699_v49 }
 0xcde   :  { %v4702_v23 = vmax.f32 %v9494_v18, %v9516_v37  ;;  %10483 = vmatpush1.bf16.msra.mxu1 %v10482_v10  ;;  %v4690_v29 = vpop.f32.mrb[167].mxu1  ;;  %4814 = vmatprep.mubr.f32.mxu0 %v12092_v0  ;;  %v5419_v18 = vld [vmem:[%s14235_s18 + $0x40] sm:$0xff]  ;;  %v5430_v10 = vld [vmem:[%s14235_s18 + $0x98] sm:$0xff]  ;;  %v10530_v37 = vpack.c.bf16 %v5429_v24, %v5427_v4 }
 0xcdf   :  { %v4701_v48 = vmax.f32 %v4588_v22, %v4690_v29  ;;  %4933 = vmatprep.mubr.f32.mxu1 %v12092_v0  ;;  %10485 = vmatprep.subr.bf16.mxu1 %v10484_v61  ;;  %v5421_v22 = vld [vmem:[%s14235_s18 + $0x50] sm:$0xff]  ;;  %v10528_v61 = vpack.c.bf16 %v5430_v10, %v5428_v27  ;;  %v5431_v29 = vld [vmem:[%s14235_s18 + $0xa0] sm:$0xff] }
 0xce0   :  { %v10522_v46 = vpack.c.bf16 %v5421_v22, %v5419_v18 }
 0xce1   :  { %9117 = vmatmul.mubr.msk.f32.gmra.mrb[130].mxu0 %vm4731_vm8, %v13472_v53  ;;  %9121 = vmatmul.mubr.msk.f32.gmra.mrb[170].mxu1 %vm4731_vm8, %v13472_v53 }
 0xce2   :  { %10487 = vmatpush1.bf16.msra.mxu1 %v10486_v47  ;;  %4820 = vmatprep.mubr.f32.mxu0 %v12092_v0  ;;  %v5433_v47 = vld [vmem:[%s14235_s18 + $0xb0] sm:$0xff] }
 0xce3   :  { %4939 = vmatprep.mubr.f32.mxu1 %v12092_v0  ;;  %10489 = vmatprep.subr.bf16.mxu1 %v10488_v56  ;;  %v5438_v56 = vld [vmem:[%s14235_s18 + $0xd8] sm:$0xff]  ;;  %v10534_v51 = vpack.c.bf16 %v5433_v47, %v5431_v29  ;;  %v13552_v29 = vld [vmem:[#allocation5 + $0x30] sm:$0xff] }
 0xce5   :  { %9118 = vmatmul.mubr.msk.f32.gmra.mrb[132].mxu0 %vm4731_vm8, %v4701_v48  ;;  %9122 = vmatmul.mubr.msk.f32.gmra.mrb[172].mxu1 %vm4731_vm8, %v4701_v48 }
 0xce6   :  { %10491 = vmatpush1.bf16.msra.mxu1 %v10490_v19  ;;  %4826 = vmatprep.mubr.f32.mxu0 %v12092_v0  ;;  %v5440_v19 = vld [vmem:[%s14235_s18 + $0xe8] sm:$0xff] }
 0xce7   :  { %4945 = vmatprep.mubr.f32.mxu1 %v12092_v0  ;;  %10493 = vmatprep.subr.bf16.mxu1 %v10492_v1  ;;  %v5442_v1 = vld [vmem:[%s14235_s18 + $0xf8] sm:$0xff] }
 0xce8   :  { %v10540_v55 = vpack.c.bf16 %v5442_v1, %v5440_v19  ;;  %v13562_v19 = vld [vmem:[#allocation5] sm:$0xff]  ;;  %v9145_v1 = vld [vmem:[%s14235_s18 + $0x188] sm:$0xff] }
 0xce9   :  { %9119 = vmatmul.mubr.msk.f32.gmra.mrb[134].mxu0 %vm4731_vm8, %v4702_v23  ;;  %9123 = vmatmul.mubr.msk.f32.gmra.mrb[174].mxu1 %vm4731_vm8, %v4702_v23 }
 0xcea   :  { %10495 = vmatpush1.bf16.msra.mxu1 %v10494_v15  ;;  %5249 = vmatprep.mubr.f32.mxu1 %v12092_v0  ;;  %v5444_v15 = vld [vmem:[%s14235_s18 + $0x108] sm:$0xff] }
 0xceb   :  { %10497 = vmatprep.subr.bf16.mxu1 %v10496_v30  ;;  %5029 = vmatprep.mubr.f32.mxu0 %v12092_v0  ;;  %v5446_v30 = vld [vmem:[%s14235_s18 + $0x118] sm:$0xff] }
 0xcec   :  { %v10544_v6 = vpack.c.bf16 %v5446_v30, %v5444_v15  ;;  %v13569_v15 = vld [vmem:[#allocation5 + $0x8] sm:$0xff] }
 0xcee   :  { %10499 = vmatpush1.bf16.msra.mxu1 %v10498_v58  ;;  %v5448_v58 = vld [vmem:[%s14235_s18 + $0x128] sm:$0xff] }
 0xcef   :  { %10501 = vmatprep.subr.bf16.mxu1 %v10500_v60  ;;  %v5450_v60 = vld [vmem:[%s14235_s18 + $0x138] sm:$0xff] }
 0xcf0   :  { %v10548_v14 = vpack.c.bf16 %v5450_v60, %v5448_v58  ;;  %v9146_v58 = vld [vmem:[%s14235_s18 + $0x190] sm:$0xff]  ;;  %v9149_v60 = vld [vmem:[%s14235_s18 + $0x1a8] sm:$0xff] }
 0xcf2   :  { %10503 = vmatpush1.bf16.msra.mxu1 %v10502_v21  ;;  %v5447_v21 = vld [vmem:[%s14235_s18 + $0x120] sm:$0xff] }
 0xcf3   :  { %10513 = vmatprep.subr.bf16.mxu1 %v10512_v26  ;;  %v5454_v26 = vld [vmem:[%s14235_s18 + $0x158] sm:$0xff]  ;;  %v10550_v2 = vpack.c.bf16 %v5449_v35, %v5447_v21  ;;  %v10562_v21 = vpack.c.bf16 %v9146_v58, %v9144_v7 }
 0xcf4   :  { %v10552_v41 = vpack.c.bf16 %v5454_v26, %v5452_v50  ;;  %v9148_v50 = vld [vmem:[%s14235_s18 + $0x1a0] sm:$0xff]  ;;  %v9150_v26 = vld [vmem:[%s14235_s18 + $0x1b0] sm:$0xff] }
 0xcf5   :  { %9132 = vmatmul.mubr.msk.f32.vlgmr.msra.gmra.mrb[176].mxu1 %vm4731_vm8, %v4699_v49 }
 0xcf6   :  { %5255 = vmatprep.mubr.f32.mxu1 %v12092_v0  ;;  %10515 = vmatpush1.bf16.msra.mxu1 %v10514_v62 }
 0xcf7   :  { %10517 = vmatprep.subr.bf16.mxu1 %v10516_v5 }
 0xcf9   :  { %9133 = vmatmul.mubr.msk.f32.gmra.mrb[178].mxu1 %vm4731_vm8, %v13472_v53  ;;  %v5425_v53 = vld [vmem:[%s14235_s18 + $0x70] sm:$0xff] }
 0xcfa   :  { %5261 = vmatprep.mubr.f32.mxu1 %v12092_v0  ;;  %10519 = vmatpush1.bf16.msra.mxu1 %v10518_v38  ;;  %v10526_v49 = vpack.c.bf16 %v5425_v53, %v5423_v44 }
 0xcfb   :  { %10521 = vmatprep.subr.bf16.mxu1 %v10520_v43 }
 0xcfd   :  { %9134 = vmatmul.mubr.msk.f32.gmra.mrb[180].mxu1 %vm4731_vm8, %v4701_v48  ;;  %v5436_v48 = vld [vmem:[%s14235_s18 + $0xc8] sm:$0xff] }
 0xcfe   :  { %5267 = vmatprep.mubr.f32.mxu1 %v12092_v0  ;;  %10523 = vmatpush1.bf16.msra.mxu1 %v10522_v46  ;;  %v10536_v13 = vpack.c.bf16 %v5438_v56, %v5436_v48 }
 0xcff   :  { %10525 = vmatprep.subr.bf16.mxu1 %v10524_v20 }
 0xd01   :  { %9135 = vmatmul.mubr.msk.f32.gmra.mrb[182].mxu1 %vm4731_vm8, %v4702_v23  ;;  %v10532_v23 = vpack.c.bf16 %v5434_v63, %v5432_v34  ;;  %v13542_v34 = vld [vmem:[#allocation5 + $0x20] sm:$0xff]  ;;  %v13547_v63 = vld [vmem:[#allocation5 + $0x28] sm:$0xff] }
 0xd02   :  { %10527 = vmatpush1.bf16.msra.mxu1 %v10526_v49 }
 0xd03   :  { %10529 = vmatprep.subr.bf16.mxu1 %v10528_v61 }
 0xd06   :  { %10531 = vmatpush1.bf16.msra.mxu1 %v10530_v37 }
 0xd07   :  { %10533 = vmatprep.subr.bf16.mxu1 %v10532_v23 }
 0xd0a   :  { %10535 = vmatpush1.bf16.msra.mxu1 %v10534_v51  ;;  %v13557_v51 = vld [vmem:[#allocation5 + $0x38] sm:$0xff] }
 0xd0b   :  { %10537 = vmatprep.subr.bf16.mxu1 %v10536_v13 }
 0xd0e   :  { %10539 = vmatpush1.bf16.msra.mxu1 %v10538_v32  ;;  %v9147_v32 = vld [vmem:[%s14235_s18 + $0x198] sm:$0xff] }
 0xd0f   :  { %10541 = vmatprep.subr.bf16.mxu1 %v10540_v55 }
 0xd12   :  { %10543 = vmatpush1.bf16.msra.mxu1 %v10542_v39  ;;  %v10560_v39 = vpack.c.bf16 %v9147_v32, %v9145_v1  ;;  %v9175_v1 = vld [vmem:[%s14235_s18 + $0x278] sm:$0xff] }
 0xd13   :  { %10545 = vmatprep.subr.bf16.mxu1 %v10544_v6  ;;  %v13574_v6 = vld [vmem:[#allocation5 + $0x10] sm:$0xff] }
 0xd16   :  { %10547 = vmatpush1.bf16.msra.mxu1 %v10546_v8  ;;  %v9151_v8 = vld [vmem:[%s14235_s18 + $0x1b8] sm:$0xff] }
 0xd17   :  { %10549 = vmatprep.subr.bf16.mxu1 %v10548_v14  ;;  %v13588_v14 = vld [vmem:[#allocation5 + $0x40] sm:$0xff]  ;;  %v10564_v35 = vpack.c.bf16 %v9151_v8, %v9149_v60  ;;  %v9178_v8 = vld [vmem:[%s14235_s18 + $0x290] sm:$0xff] }
 0xd18   :  { %v9176_v60 = vld [vmem:[%s14235_s18 + $0x280] sm:$0xff] }
 0xd1a   :  { %10551 = vmatpush1.bf16.msra.mxu1 %v10550_v2  ;;  %v9153_v2 = vld [vmem:[%s14235_s18 + $0x1c8] sm:$0xff] }
 0xd1b   :  { %10553 = vmatprep.subr.bf16.mxu1 %v10552_v41  ;;  %v9155_v41 = vld [vmem:[%s14235_s18 + $0x1d8] sm:$0xff] }
 0xdb0   :  { %v4810_v62 = vpop.f32.mrb[128].mxu0  ;;  %v4929_v12 = vpop.f32.mrb[168].mxu1 }
 0xdb1   :  { %v4812_v3 = vpop.f32.mrb[129].mxu0  ;;  %v4931_v5 = vpop.f32.mrb[169].mxu1 }
 0xdb4   :  { %v4816_v52 = vpop.f32.mrb[130].mxu0  ;;  %v4935_v31 = vpop.f32.mrb[170].mxu1 }
 0xdb5   :  { %v10474_v38 = vpack.c.bf16 %v4816_v52, %v4810_v62  ;;  %v10466_v40 = vpack.c.bf16 %v4935_v31, %v4929_v12  ;;  %v4818_v36 = vpop.f32.mrb[131].mxu0  ;;  %v4937_v43 = vpop.f32.mrb[171].mxu1  ;;  %v13597_v62 = vld [vmem:[#allocation5 + $0x48] sm:$0xff]  ;;  %v10566_v12 = vpack.c.bf16 %v9150_v26, %v9148_v50  ;;  %v9154_v52 = vld [vmem:[%s14235_s18 + $0x1d0] sm:$0xff]  ;;  %v10594_v50 = vpack.c.bf16 %v9178_v8, %v9176_v60 }
 0xdb6   :  { %v10472_v18 = vpack.c.bf16 %v4818_v36, %v4812_v3  ;;  %v10464_v22 = vpack.c.bf16 %v4937_v43, %v4931_v5  ;;  %v10568_v3 = vpack.c.bf16 %v9155_v41, %v9153_v2  ;;  %v9152_v5 = vld [vmem:[%s14235_s18 + $0x1c0] sm:$0xff]  ;;  %v9157_v31 = vld [vmem:[%s14235_s18 + $0x1e8] sm:$0xff]  ;;  %v9182_v41 = vld [vmem:[%s14235_s18 + $0x2b0] sm:$0xff] }
 0xdb7   :  { %v10570_v36 = vpack.c.bf16 %v9154_v52, %v9152_v5  ;;  %v9180_v2 = vld [vmem:[%s14235_s18 + $0x2a0] sm:$0xff] }
 0xdb8   :  { %v4822_v59 = vpop.f32.mrb[132].mxu0  ;;  %v4941_v46 = vpop.f32.mrb[172].mxu1  ;;  %10465 = vmatprep.subr.bf16.mxu0 %v10464_v22  ;;  %v9158_v22 = vld [vmem:[%s14235_s18 + $0x1f0] sm:$0xff]  ;;  %v10598_v5 = vpack.c.bf16 %v9182_v41, %v9180_v2 }
 0xdb9   :  { %v4824_v57 = vpop.f32.mrb[133].mxu0  ;;  %v4943_v20 = vpop.f32.mrb[173].mxu1  ;;  %10467 = vmatpush1.bf16.msra.mxu0 %v10466_v40  ;;  %v13606_v40 = vld [vmem:[#allocation5 + $0x50] sm:$0xff] }
 0xdba   :  { %v9210_v2 = vld [vmem:[%s14235_s18 + $0x330] sm:$0xff] }
 0xdbc   :  { %v4828_v44 = vpop.f32.mrb[134].mxu0  ;;  %v4947_v53 = vpop.f32.mrb[174].mxu1 }
 0xdbd   :  { %v10478_v27 = vpack.c.bf16 %v4828_v44, %v4822_v59  ;;  %v10470_v10 = vpack.c.bf16 %v4947_v53, %v4941_v46  ;;  %v4830_v49 = vpop.f32.mrb[135].mxu0  ;;  %v4949_v61 = vpop.f32.mrb[175].mxu1  ;;  %v9161_v59 = vld [vmem:[%s14235_s18 + $0x208] sm:$0xff]  ;;  %v9163_v46 = vld [vmem:[%s14235_s18 + $0x218] sm:$0xff]  ;;  %v9160_v53 = vld [vmem:[%s14235_s18 + $0x200] sm:$0xff] }
 0xdbe   :  { %v10476_v4 = vpack.c.bf16 %v4830_v49, %v4824_v57  ;;  %v10468_v24 = vpack.c.bf16 %v4949_v61, %v4943_v20  ;;  %v13615_v57 = vld [vmem:[#allocation5 + $0x58] sm:$0xff]  ;;  %v10576_v44 = vpack.c.bf16 %v9163_v46, %v9161_v59  ;;  %v9189_v59 = vld [vmem:[%s14235_s18 + $0x2e8] sm:$0xff] }
 0xdbf   :  { %v9167_v49 = vld [vmem:[%s14235_s18 + $0x238] sm:$0xff] }
 0xdc0   :  { %10469 = vmatprep.subr.bf16.mxu0 %v10468_v24  ;;  %v9164_v24 = vld [vmem:[%s14235_s18 + $0x220] sm:$0xff]  ;;  %v9191_v46 = vld [vmem:[%s14235_s18 + $0x2f8] sm:$0xff] }
 0xdc1   :  { %10471 = vmatpush1.bf16.msra.mxu0 %v10470_v10  ;;  %v9165_v10 = vld [vmem:[%s14235_s18 + $0x228] sm:$0xff] }
 0xdc2   :  { %10473 = vmatprep.subr.bf16.mxu0 %v10472_v18  ;;  %v9156_v18 = vld [vmem:[%s14235_s18 + $0x1e0] sm:$0xff] }
 0xdc3   :  { %v10574_v20 = vpack.c.bf16 %v9158_v22, %v9156_v18  ;;  %v5453_v18 = vld [vmem:[%s14235_s18 + $0x150] sm:$0xff] }
 0xdc4   :  { %9124 = vmatmul.mubr.msk.f32.vlgmr.msra.gmra.mrb[136].mxu0 %vm4952_vm9, %v13542_v34 }
 0xdc5   :  { %10475 = vmatpush1.bf16.msra.mxu0 %v10474_v38  ;;  %5035 = vmatprep.mubr.f32.mxu0 %v12092_v0  ;;  %v9159_v38 = vld [vmem:[%s14235_s18 + $0x1f8] sm:$0xff] }
 0xdc6   :  { %10477 = vmatprep.subr.bf16.mxu0 %v10476_v4  ;;  %v10572_v43 = vpack.c.bf16 %v9159_v38, %v9157_v31  ;;  %v10580_v4 = vpack.c.bf16 %v9167_v49, %v9165_v10  ;;  %v9184_v31 = vld [vmem:[%s14235_s18 + $0x2c0] sm:$0xff]  ;;  %v9186_v38 = vld [vmem:[%s14235_s18 + $0x2d0] sm:$0xff] }
 0xdc7   :  { %v9190_v49 = vld [vmem:[%s14235_s18 + $0x2f0] sm:$0xff] }
 0xdc8   :  { %v5251_v37 = vpop.f32.mrb[176].mxu1  ;;  %9125 = vmatmul.mubr.msk.f32.gmra.mrb[138].mxu0 %vm4952_vm9, %v13547_v63 }
 0xdc9   :  { %v5253_v23 = vpop.f32.mrb[177].mxu1  ;;  %10479 = vmatpush1.bf16.msra.mxu0 %v10478_v27  ;;  %5041 = vmatprep.mubr.f32.mxu0 %v12092_v0  ;;  %v9162_v27 = vld [vmem:[%s14235_s18 + $0x210] sm:$0xff] }
 0xdca   :  { %v10578_v61 = vpack.c.bf16 %v9162_v27, %v9160_v53  ;;  %v5458_v53 = vld [vmem:[%s14235_s18 + $0x178] sm:$0xff]  ;;  %v9188_v27 = vld [vmem:[%s14235_s18 + $0x2e0] sm:$0xff] }
 0xdcc   :  { %v5257_v47 = vpop.f32.mrb[178].mxu1  ;;  %9126 = vmatmul.mubr.msk.f32.gmra.mrb[140].mxu0 %vm4952_vm9, %v13552_v29 }
 0xdcd   :  { %v10506_v48 = vpack.c.bf16 %v5257_v47, %v5251_v37  ;;  %v5259_v56 = vpop.f32.mrb[179].mxu1  ;;  %5047 = vmatprep.mubr.f32.mxu0 %v12092_v0  ;;  %v9166_v37 = vld [vmem:[%s14235_s18 + $0x230] sm:$0xff]  ;;  %v9171_v47 = vld [vmem:[%s14235_s18 + $0x258] sm:$0xff] }
 0xdce   :  { %v10504_v13 = vpack.c.bf16 %v5259_v56, %v5253_v23  ;;  %v9169_v23 = vld [vmem:[%s14235_s18 + $0x248] sm:$0xff] }
 0xdcf   :  { %v10584_v56 = vpack.c.bf16 %v9171_v47, %v9169_v23  ;;  %v9205_v23 = vld [vmem:[%s14235_s18 + $0x308] sm:$0xff]  ;;  %v9207_v47 = vld [vmem:[%s14235_s18 + $0x318] sm:$0xff] }
 0xdd0   :  { %v5263_v11 = vpop.f32.mrb[180].mxu1  ;;  %10505 = vmatprep.subr.bf16.mxu0 %v10504_v13  ;;  %9127 = vmatmul.mubr.msk.f32.gmra.mrb[142].mxu0 %vm4952_vm9, %v13557_v51  ;;  %v9168_v13 = vld [vmem:[%s14235_s18 + $0x240] sm:$0xff] }
 0xdd1   :  { %v5265_v33 = vpop.f32.mrb[181].mxu1  ;;  %5130 = vmatprep.mubr.f32.mxu0 %v12092_v0 }
 0xdd4   :  { %v5269_v55 = vpop.f32.mrb[182].mxu1  ;;  %9128 = vmatmul.mubr.msk.f32.vlgmr.msra.gmra.mrb[136].mxu0 %vm4952_vm9, %v13562_v19 }
 0xdd5   :  { %v10510_v25 = vpack.c.bf16 %v5269_v55, %v5263_v11  ;;  %v5271_v16 = vpop.f32.mrb[183].mxu1  ;;  %10507 = vmatpush1.bf16.msra.mxu0 %v10506_v48  ;;  %5136 = vmatprep.mubr.f32.mxu0 %v12092_v0  ;;  %v10582_v48 = vpack.c.bf16 %v9166_v37, %v9164_v24  ;;  %v9170_v11 = vld [vmem:[%s14235_s18 + $0x250] sm:$0xff]  ;;  %v10606_v24 = vpack.c.bf16 %v9190_v49, %v9188_v27 }
 0xdd6   :  { %v10508_v30 = vpack.c.bf16 %v5271_v16, %v5265_v33  ;;  %v9173_v33 = vld [vmem:[%s14235_s18 + $0x268] sm:$0xff]  ;;  %v10586_v32 = vpack.c.bf16 %v9170_v11, %v9168_v13  ;;  %v9174_v16 = vld [vmem:[%s14235_s18 + $0x270] sm:$0xff] }
 0xdd7   :  { %v10588_v55 = vpack.c.bf16 %v9175_v1, %v9173_v33 }
 0xdd8   :  { %10509 = vmatprep.subr.bf16.mxu0 %v10508_v30  ;;  %9129 = vmatmul.mubr.msk.f32.gmra.mrb[138].mxu0 %vm4952_vm9, %v13569_v15  ;;  %v9177_v30 = vld [vmem:[%s14235_s18 + $0x288] sm:$0xff] }
 0xdd9   :  { %10511 = vmatpush1.bf16.msra.mxu0 %v10510_v25  ;;  %5142 = vmatprep.mubr.f32.mxu0 %v12092_v0  ;;  %v9172_v25 = vld [vmem:[%s14235_s18 + $0x260] sm:$0xff] }
 0xdda   :  { %10561 = vmatprep.subr.bf16.mxu0 %v10560_v39  ;;  %v9179_v39 = vld [vmem:[%s14235_s18 + $0x298] sm:$0xff]  ;;  %v10590_v7 = vpack.c.bf16 %v9174_v16, %v9172_v25  ;;  %v9206_v25 = vld [vmem:[%s14235_s18 + $0x310] sm:$0xff] }
 0xddb   :  { %v10592_v58 = vpack.c.bf16 %v9179_v39, %v9177_v30  ;;  %v9209_v30 = vld [vmem:[%s14235_s18 + $0x328] sm:$0xff]  ;;  %v9211_v39 = vld [vmem:[%s14235_s18 + $0x338] sm:$0xff] }
 0xddc   :  { %9130 = vmatmul.mubr.msk.f32.gmra.mrb[140].mxu0 %vm4952_vm9, %v13574_v6 }
 0xddd   :  { %5148 = vmatprep.mubr.f32.mxu0 %v12092_v0 }
 0xde0   :  { %9131 = vmatmul.mubr.msk.f32.gmra.mrb[142].mxu0 %vm4952_vm9, %v13579_v54 }
 0xde1   :  { %5350 = vmatprep.mubr.f32.mxu0 %v12092_v0 }
 0xde4   :  { %9136 = vmatmul.mubr.msk.f32.vlgmr.msra.gmra.mrb[136].mxu0 %vm4952_vm9, %v13588_v14 }
 0xde5   :  { %5356 = vmatprep.mubr.f32.mxu0 %v12092_v0  ;;  %10563 = vmatpush1.bf16.msra.mxu0 %v10562_v21  ;;  %v9181_v21 = vld [vmem:[%s14235_s18 + $0x2a8] sm:$0xff] }
 0xde6   :  { %10565 = vmatprep.subr.bf16.mxu0 %v10564_v35  ;;  %v9183_v35 = vld [vmem:[%s14235_s18 + $0x2b8] sm:$0xff] }
 0xde7   :  { %v10596_v26 = vpack.c.bf16 %v9183_v35, %v9181_v21 }
 0xde8   :  { %9137 = vmatmul.mubr.msk.f32.gmra.mrb[138].mxu0 %vm4952_vm9, %v13597_v62 }
 0xde9   :  { %5362 = vmatprep.mubr.f32.mxu0 %v12092_v0  ;;  %10567 = vmatpush1.bf16.msra.mxu0 %v10566_v12  ;;  %v9185_v12 = vld [vmem:[%s14235_s18 + $0x2c8] sm:$0xff] }
 0xdea   :  { %10569 = vmatprep.subr.bf16.mxu0 %v10568_v3  ;;  %v9187_v3 = vld [vmem:[%s14235_s18 + $0x2d8] sm:$0xff] }
 0xdeb   :  { %v10600_v52 = vpack.c.bf16 %v9187_v3, %v9185_v12  ;;  %v9213_v12 = vld [vmem:[%s14235_s18 + $0x348] sm:$0xff]  ;;  %v9215_v3 = vld [vmem:[%s14235_s18 + $0x358] sm:$0xff] }
 0xdec   :  { %9138 = vmatmul.mubr.msk.f32.gmra.mrb[140].mxu0 %vm4952_vm9, %v13606_v40 }
 0xded   :  { %5368 = vmatprep.mubr.f32.mxu0 %v12092_v0  ;;  %10571 = vmatpush1.bf16.msra.mxu0 %v10570_v36  ;;  %v10602_v36 = vpack.c.bf16 %v9186_v38, %v9184_v31 }
 0xdee   :  { %10573 = vmatprep.subr.bf16.mxu0 %v10572_v43  ;;  %v5451_v43 = vld [vmem:[%s14235_s18 + $0x140] sm:$0xff] }
 0xdef   :  { %v10554_v22 = vpack.c.bf16 %v5453_v18, %v5451_v43  ;;  %v10632_v18 = vpack.c.bf16 %v9215_v3, %v9213_v12  ;;  %v9235_v12 = vld [vmem:[%s14235_s18 + $0x3f8] sm:$0xff] }
 0xdf0   :  { %9139 = vmatmul.mubr.msk.f32.gmra.mrb[142].mxu0 %vm4952_vm9, %v13615_v57 }
 0xdf1   :  { %10575 = vmatpush1.bf16.msra.mxu0 %v10574_v20  ;;  %10555 = vmatpush1.bf16.msra.mxu1 %v10554_v22  ;;  %v10604_v20 = vpack.c.bf16 %v9191_v46, %v9189_v59  ;;  %v9212_v22 = vld [vmem:[%s14235_s18 + $0x340] sm:$0xff]  ;;  %v9214_v59 = vld [vmem:[%s14235_s18 + $0x350] sm:$0xff] }
 0xdf2   :  { %10577 = vmatprep.subr.bf16.mxu0 %v10576_v44  ;;  %v5456_v44 = vld [vmem:[%s14235_s18 + $0x168] sm:$0xff] }
 0xdf3   :  { %v10556_v10 = vpack.c.bf16 %v5458_v53, %v5456_v44  ;;  %v9219_v44 = vld [vmem:[%s14235_s18 + $0x378] sm:$0xff] }
 0xdf5   :  { %10579 = vmatpush1.bf16.msra.mxu0 %v10578_v61  ;;  %v5455_v61 = vld [vmem:[%s14235_s18 + $0x160] sm:$0xff]  ;;  %10557 = vmatprep.subr.bf16.mxu1 %v10556_v10  ;;  %v10634_v10 = vpack.c.bf16 %v9214_v59, %v9212_v22 }
 0xdf6   :  { %10581 = vmatprep.subr.bf16.mxu0 %v10580_v4  ;;  %v5457_v4 = vld [vmem:[%s14235_s18 + $0x170] sm:$0xff] }
 0xdf7   :  { %v10558_v37 = vpack.c.bf16 %v5457_v4, %v5455_v61 }
 0xdf9   :  { %10583 = vmatpush1.bf16.msra.mxu0 %v10582_v48  ;;  %10559 = vmatpush1.bf16.msra.mxu1 %v10558_v37  ;;  %v10624_v48 = vpack.c.bf16 %v9207_v47, %v9205_v23  ;;  %v9216_v37 = vld [vmem:[%s14235_s18 + $0x360] sm:$0xff]  ;;  %v9218_v23 = vld [vmem:[%s14235_s18 + $0x370] sm:$0xff] }
 0xdfa   :  { %10585 = vmatprep.subr.bf16.mxu0 %v10584_v56  ;;  %v5383_v56 = vld [vmem:[#allocation23] sm:$0x3] }
 0xdfb   :  { %v5388_v13 = vrot.slane %v5383_v56, %v12576_v42  ;;  %v5392_v11 = vrot.slane %v5383_v56, %v12578_v45  ;;  %v9223_v56 = vld [vmem:[%s14235_s18 + $0x398] sm:$0xff] }
 0xdfd   :  { %10587 = vmatpush1.bf16.msra.mxu0 %v10586_v32 }
 0xdfe   :  { %10589 = vmatprep.subr.bf16.mxu0 %v10588_v55  ;;  %v9204_v55 = vld [vmem:[%s14235_s18 + $0x300] sm:$0xff] }
 0xdff   :  { %v10626_v60 = vpack.c.bf16 %v9206_v25, %v9204_v55  ;;  %v9222_v55 = vld [vmem:[%s14235_s18 + $0x390] sm:$0xff]  ;;  %v9225_v25 = vld [vmem:[%s14235_s18 + $0x3a8] sm:$0xff] }
 0xe01   :  { %10591 = vmatpush1.bf16.msra.mxu0 %v10590_v7 }
 0xe02   :  { %10593 = vmatprep.subr.bf16.mxu0 %v10592_v58 }
 0xe05   :  { %10595 = vmatpush1.bf16.msra.mxu0 %v10594_v50  ;;  %v10628_v50 = vpack.c.bf16 %v9211_v39, %v9209_v30 }
 0xe06   :  { %10597 = vmatprep.subr.bf16.mxu0 %v10596_v26  ;;  %v9208_v26 = vld [vmem:[%s14235_s18 + $0x320] sm:$0xff] }
 0xe07   :  { %v10630_v31 = vpack.c.bf16 %v9210_v2, %v9208_v26  ;;  %v9228_v2 = vld [vmem:[%s14235_s18 + $0x3c0] sm:$0xff] }
 0xe09   :  { %10599 = vmatpush1.bf16.msra.mxu0 %v10598_v5 }
 0xe0a   :  { %10601 = vmatprep.subr.bf16.mxu0 %v10600_v52 }
 0xe0d   :  { %10603 = vmatpush1.bf16.msra.mxu0 %v10602_v36 }
 0xe0e   :  { %10605 = vmatprep.subr.bf16.mxu0 %v10604_v20  ;;  %v9217_v20 = vld [vmem:[%s14235_s18 + $0x368] sm:$0xff] }
 0xe11   :  { %10607 = vmatpush1.bf16.msra.mxu0 %v10606_v24  ;;  %v10636_v24 = vpack.c.bf16 %v9219_v44, %v9217_v20  ;;  %v9238_v20 = vld [vmem:[%s14235_s18 + $0x410] sm:$0xff]  ;;  %v9241_v44 = vld [vmem:[%s14235_s18 + $0x428] sm:$0xff] }
 0xe12   :  { %10625 = vmatprep.subr.bf16.mxu0 %v10624_v48  ;;  %v9221_v48 = vld [vmem:[%s14235_s18 + $0x388] sm:$0xff] }
 0xeb7   :  { %v5352_v33 = vpop.f32.mrb[136].mxu0 }
 0xeb8   :  { %v5395_v1 = vadd.f32 %v5388_v13, %v5352_v33  ;;  %v5354_v32 = vpop.f32.mrb[137].mxu0  ;;  %v10638_v33 = vpack.c.bf16 %v9218_v23, %v9216_v37  ;;  %v9245_v37 = vld [vmem:[%s14235_s18 + $0x448] sm:$0xff]  ;;  %v9247_v23 = vld [vmem:[%s14235_s18 + $0x458] sm:$0xff] }
 0xeb9   :  { %v5396_v16 = vadd.f32 %v5392_v11, %v5354_v32  ;;  %v9220_v32 = vld [vmem:[%s14235_s18 + $0x380] sm:$0xff] }
 0xeba   :  { %v13665_v8 = vmax.f32 %v5395_v1, 0.0  ;;  %v10642_v30 = vpack.c.bf16 %v9222_v55, %v9220_v32  ;;  %v9251_v32 = vld [vmem:[%s14235_s18 + $0x478] sm:$0xff] }
 0xebb   :  { %v13663_v7 = vmax.f32 %v5396_v16, 0.0  ;;  %v5358_v58 = vpop.f32.mrb[138].mxu0  ;;  %v9227_v16 = vld [vmem:[%s14235_s18 + $0x3b8] sm:$0xff] }
 0xebc   :  { %v5397_v21 = vadd.f32 %v5388_v13, %v5358_v58  ;;  %v5360_v35 = vpop.f32.mrb[139].mxu0  ;;  %v10644_v39 = vpack.c.bf16 %v9227_v16, %v9225_v25  ;;  %v9224_v58 = vld [vmem:[%s14235_s18 + $0x3a0] sm:$0xff] }
 0xebd   :  { %v5398_v41 = vadd.f32 %v5392_v11, %v5360_v35  ;;  %9140 = vmatprep.mubr.msk.f32.mxu1 %vm5459_vm10, %v13663_v7  ;;  %9192 = vmatprep.mubr.msk.f32.mxu0 %vm5459_vm10, %v13663_v7  ;;  %v9231_v35 = vld [vmem:[%s14235_s18 + $0x3d8] sm:$0xff]  ;;  %v9248_v16 = vld [vmem:[%s14235_s18 + $0x460] sm:$0xff] }
 0xebe   :  { %5537 = vmatmul.mubr.f32.vlgmr.msra.gmra.mrb[184].mxu1 %v13665_v8  ;;  %5675 = vmatmul.mubr.f32.vlgmr.msra.gmra.mrb[144].mxu0 %v13665_v8  ;;  %v13679_v38 = vmax.f32 %v5397_v21, 0.0  ;;  %v9229_v21 = vld [vmem:[%s14235_s18 + $0x3c8] sm:$0xff] }
 0xebf   :  { %v13677_v5 = vmax.f32 %v5398_v41, 0.0  ;;  %10627 = vmatpush1.bf16.msra.mxu0 %v10626_v60  ;;  %v5364_v52 = vpop.f32.mrb[140].mxu0  ;;  %v9226_v60 = vld [vmem:[%s14235_s18 + $0x3b0] sm:$0xff]  ;;  %v10648_v26 = vpack.c.bf16 %v9231_v35, %v9229_v21  ;;  %v9233_v41 = vld [vmem:[%s14235_s18 + $0x3e8] sm:$0xff] }
 0xec0   :  { %v5399_v36 = vadd.f32 %v5388_v13, %v5364_v52  ;;  %v5366_v43 = vpop.f32.mrb[141].mxu0  ;;  %10629 = vmatprep.subr.bf16.mxu0 %v10628_v50  ;;  %v10646_v50 = vpack.c.bf16 %v9226_v60, %v9224_v58  ;;  %v10652_v52 = vpack.c.bf16 %v9235_v12, %v9233_v41  ;;  %v6291_v58 = vld [vmem:[#allocation14 + $0x188] sm:$0xff]  ;;  %v6293_v60 = vld [vmem:[#allocation14 + $0x198] sm:$0xff]  ;;  %v6290_v35 = vld [vmem:[#allocation14 + $0x180] sm:$0xff] }
 0xec1   :  { %v5400_v46 = vadd.f32 %v5392_v11, %v5366_v43  ;;  %9141 = vmatprep.mubr.msk.f32.mxu1 %vm5459_vm10, %v13677_v5  ;;  %9193 = vmatprep.mubr.msk.f32.mxu0 %vm5459_vm10, %v13677_v5  ;;  %v9237_v43 = vld [vmem:[%s14235_s18 + $0x408] sm:$0xff]  ;;  %v10728_v21 = vpack.c.bf16 %v6293_v60, %v6291_v58  ;;  %v6298_v12 = vld [vmem:[#allocation14 + $0x1c0] sm:$0xff]  ;;  %v6320_v58 = vld [vmem:[#allocation14 + $0x270] sm:$0xff] }
 0xec2   :  { %5543 = vmatmul.mubr.f32.gmra.mrb[186].mxu1 %v13679_v38  ;;  %5681 = vmatmul.mubr.f32.gmra.mrb[146].mxu0 %v13679_v38  ;;  %v13693_v49 = vmax.f32 %v5399_v36, 0.0  ;;  %v9234_v36 = vld [vmem:[%s14235_s18 + $0x3f0] sm:$0xff]  ;;  %v6301_v41 = vld [vmem:[#allocation14 + $0x1d8] sm:$0xff]  ;;  %v6323_v60 = vld [vmem:[#allocation14 + $0x288] sm:$0xff] }
 0xec3   :  { %v13691_v53 = vmax.f32 %v5400_v46, 0.0  ;;  %10631 = vmatpush1.bf16.msra.mxu0 %v10630_v31  ;;  %v5370_v27 = vpop.f32.mrb[142].mxu0  ;;  %v9232_v31 = vld [vmem:[%s14235_s18 + $0x3e0] sm:$0xff] }
 0xec4   :  { %v5401_v61 = vadd.f32 %v5388_v13, %v5370_v27  ;;  %v5372_v4 = vpop.f32.mrb[143].mxu0  ;;  %10633 = vmatprep.subr.bf16.mxu0 %v10632_v18  ;;  %v9239_v18 = vld [vmem:[%s14235_s18 + $0x418] sm:$0xff]  ;;  %v10654_v22 = vpack.c.bf16 %v9234_v36, %v9232_v31  ;;  %v9236_v46 = vld [vmem:[%s14235_s18 + $0x400] sm:$0xff]  ;;  %v6305_v31 = vld [vmem:[#allocation14 + $0x1f8] sm:$0xff] }
 0xec5   :  { %v5402_v47 = vadd.f32 %v5392_v11, %v5372_v4  ;;  %9142 = vmatprep.mubr.msk.f32.mxu1 %vm5459_vm10, %v13691_v53  ;;  %9194 = vmatprep.mubr.msk.f32.mxu0 %vm5459_vm10, %v13691_v53  ;;  %v10640_v11 = vpack.c.bf16 %v9223_v56, %v9221_v48  ;;  %v10656_v59 = vpack.c.bf16 %v9239_v18, %v9237_v43  ;;  %v9243_v27 = vld [vmem:[%s14235_s18 + $0x438] sm:$0xff]  ;;  %v9240_v4 = vld [vmem:[%s14235_s18 + $0x420] sm:$0xff]  ;;  %v6302_v43 = vld [vmem:[#allocation14 + $0x1e0] sm:$0xff] }
 0xec6   :  { %5549 = vmatmul.mubr.f32.gmra.mrb[188].mxu1 %v13693_v49  ;;  %5687 = vmatmul.mubr.f32.gmra.mrb[148].mxu0 %v13693_v49  ;;  %v13707_v1 = vmax.f32 %v5401_v61, 0.0  ;;  %v10660_v61 = vpack.c.bf16 %v9243_v27, %v9241_v44  ;;  %v10664_v48 = vpack.c.bf16 %v9247_v23, %v9245_v37  ;;  %v9244_v56 = vld [vmem:[%s14235_s18 + $0x440] sm:$0xff]  ;;  %v6306_v44 = vld [vmem:[#allocation14 + $0x200] sm:$0xff] }
 0xec7   :  { %v13705_v13 = vmax.f32 %v5402_v47, 0.0  ;;  %10635 = vmatpush1.bf16.msra.mxu0 %v10634_v10  ;;  %v10658_v10 = vpack.c.bf16 %v9238_v20, %v9236_v46  ;;  %v6304_v18 = vld [vmem:[#allocation14 + $0x1f0] sm:$0xff]  ;;  %v6310_v37 = vld [vmem:[#allocation14 + $0x220] sm:$0xff] }
 0xec8   :  { %10637 = vmatprep.subr.bf16.mxu0 %v10636_v24  ;;  %v9242_v24 = vld [vmem:[%s14235_s18 + $0x430] sm:$0xff]  ;;  %v10742_v46 = vpack.c.bf16 %v6304_v18, %v6302_v43  ;;  %v6308_v27 = vld [vmem:[#allocation14 + $0x210] sm:$0xff] }
 0xec9   :  { %9143 = vmatprep.mubr.msk.f32.mxu1 %vm5459_vm10, %v13705_v13  ;;  %9195 = vmatprep.mubr.msk.f32.mxu0 %vm5459_vm10, %v13705_v13  ;;  %v10662_v47 = vpack.c.bf16 %v9242_v24, %v9240_v4  ;;  %v10746_v4 = vpack.c.bf16 %v6308_v27, %v6306_v44  ;;  %v6312_v23 = vld [vmem:[#allocation14 + $0x230] sm:$0xff] }
 0xeca   :  { %5555 = vmatmul.mubr.f32.gmra.mrb[190].mxu1 %v13707_v1  ;;  %5693 = vmatmul.mubr.f32.gmra.mrb[150].mxu0 %v13707_v1 }
 0xecb   :  { %10639 = vmatpush1.bf16.msra.mxu0 %v10638_v33  ;;  %9252 = vmatprep.mubr.msk.f32.mxu0 %vm5459_vm10, %v13663_v7  ;;  %v9230_v7 = vld [vmem:[%s14235_s18 + $0x3d0] sm:$0xff] }
 0xecc   :  { %10641 = vmatprep.subr.bf16.mxu0 %v10640_v11  ;;  %5763 = vmatprep.mubr.f32.mxu1 %v12092_v0  ;;  %v10650_v3 = vpack.c.bf16 %v9230_v7, %v9228_v2  ;;  %v9246_v33 = vld [vmem:[%s14235_s18 + $0x450] sm:$0xff]  ;;  %v9249_v11 = vld [vmem:[%s14235_s18 + $0x468] sm:$0xff] }
 0xecd   :  { %v10666_v55 = vpack.c.bf16 %v9246_v33, %v9244_v56  ;;  %v10668_v25 = vpack.c.bf16 %v9251_v32, %v9249_v11  ;;  %v6294_v2 = vld [vmem:[#allocation14 + $0x1a0] sm:$0xff]  ;;  %v10750_v56 = vpack.c.bf16 %v6312_v23, %v6310_v37  ;;  %v6316_v32 = vld [vmem:[#allocation14 + $0x250] sm:$0xff] }
 0xece   :  { %v6314_v11 = vld [vmem:[#allocation14 + $0x240] sm:$0xff] }
 0xecf   :  { %10643 = vmatpush1.bf16.msra.mxu0 %v10642_v30  ;;  %v9250_v30 = vld [vmem:[%s14235_s18 + $0x470] sm:$0xff] }
 0xed0   :  { %10645 = vmatprep.subr.bf16.mxu0 %v10644_v39  ;;  %v10670_v39 = vpack.c.bf16 %v9250_v30, %v9248_v16  ;;  %v10754_v16 = vpack.c.bf16 %v6316_v32, %v6314_v11 }
 0xed3   :  { %10647 = vmatpush1.bf16.msra.mxu0 %v10646_v50 }
 0xed4   :  { %10649 = vmatprep.subr.bf16.mxu0 %v10648_v26  ;;  %v6295_v26 = vld [vmem:[#allocation14 + $0x1a8] sm:$0xff] }
 0xed7   :  { %10651 = vmatpush1.bf16.msra.mxu0 %v10650_v3 }
 0xed8   :  { %10653 = vmatprep.subr.bf16.mxu0 %v10652_v52  ;;  %v6303_v52 = vld [vmem:[#allocation14 + $0x1e8] sm:$0xff] }
 0xed9   :  { %v10740_v36 = vpack.c.bf16 %v6305_v31, %v6303_v52  ;;  %v6332_v52 = vld [vmem:[#allocation14 + $0x2d0] sm:$0xff] }
 0xedb   :  { %10655 = vmatpush1.bf16.msra.mxu0 %v10654_v22  ;;  %v6307_v22 = vld [vmem:[#allocation14 + $0x208] sm:$0xff] }
 0xedc   :  { %10657 = vmatprep.subr.bf16.mxu0 %v10656_v59  ;;  %v6309_v59 = vld [vmem:[#allocation14 + $0x218] sm:$0xff] }
 0xedd   :  { %v10744_v20 = vpack.c.bf16 %v6309_v59, %v6307_v22 }
 0xedf   :  { %10659 = vmatpush1.bf16.msra.mxu0 %v10658_v10  ;;  %v6311_v10 = vld [vmem:[#allocation14 + $0x228] sm:$0xff] }
 0xee0   :  { %10661 = vmatprep.subr.bf16.mxu0 %v10660_v61  ;;  %v6313_v61 = vld [vmem:[#allocation14 + $0x238] sm:$0xff] }
 0xee1   :  { %v10748_v24 = vpack.c.bf16 %v6313_v61, %v6311_v10 }
 0xee3   :  { %10663 = vmatpush1.bf16.msra.mxu0 %v10662_v47  ;;  %v6315_v47 = vld [vmem:[#allocation14 + $0x248] sm:$0xff] }
 0xee4   :  { %10665 = vmatprep.subr.bf16.mxu0 %v10664_v48  ;;  %v6317_v48 = vld [vmem:[#allocation14 + $0x258] sm:$0xff] }
 0xee5   :  { %v10752_v33 = vpack.c.bf16 %v6317_v48, %v6315_v47 }
 0xee7   :  { %10667 = vmatpush1.bf16.msra.mxu0 %v10666_v55  ;;  %v6319_v55 = vld [vmem:[#allocation14 + $0x268] sm:$0xff] }
 0xee8   :  { %10669 = vmatprep.subr.bf16.mxu0 %v10668_v25  ;;  %v6321_v25 = vld [vmem:[#allocation14 + $0x278] sm:$0xff] }
 0xee9   :  { %v10756_v30 = vpack.c.bf16 %v6321_v25, %v6319_v55 }
 0xeeb   :  { %10671 = vmatpush1.bf16.msra.mxu0 %v10670_v39  ;;  %v6318_v39 = vld [vmem:[#allocation14 + $0x260] sm:$0xff] }
 0xeec   :  { %10729 = vmatprep.subr.bf16.mxu0 %v10728_v21  ;;  %v6325_v21 = vld [vmem:[#allocation14 + $0x298] sm:$0xff] }
 0xeee   :  { %5991 = vmatmul.mubr.f32.vlgmr.msra.gmra.mrb[152].mxu0 %v13665_v8  ;;  %v6292_v8 = vld [vmem:[#allocation14 + $0x190] sm:$0xff] }
 0xeef   :  { %9253 = vmatprep.mubr.msk.f32.mxu0 %vm5459_vm10, %v13677_v5  ;;  %v10730_v50 = vpack.c.bf16 %v6292_v8, %v6290_v35  ;;  %v6297_v5 = vld [vmem:[#allocation14 + $0x1b8] sm:$0xff]  ;;  %v10758_v35 = vpack.c.bf16 %v6320_v58, %v6318_v39  ;;  %v10760_v8 = vpack.c.bf16 %v6325_v21, %v6323_v60  ;;  %v6141_v58 = vld [vmem:[#allocation14 + $0x8] sm:$0xff] }
 0xef0   :  { %v6143_v60 = vld [vmem:[#allocation14 + $0x18] sm:$0xff] }
 0xef1   :  { %10731 = vmatpush1.bf16.msra.mxu0 %v10730_v50  ;;  %v6322_v50 = vld [vmem:[#allocation14 + $0x280] sm:$0xff] }
 0xef2   :  { %5997 = vmatmul.mubr.f32.gmra.mrb[154].mxu0 %v13679_v38  ;;  %v10732_v38 = vpack.c.bf16 %v6297_v5, %v6295_v26  ;;  %v6324_v26 = vld [vmem:[#allocation14 + $0x290] sm:$0xff]  ;;  %v6327_v5 = vld [vmem:[#allocation14 + $0x2a8] sm:$0xff] }
 0xef3   :  { %9254 = vmatprep.mubr.msk.f32.mxu0 %vm5459_vm10, %v13691_v53  ;;  %v6296_v53 = vld [vmem:[#allocation14 + $0x1b0] sm:$0xff] }
 0xef4   :  { %v10734_v7 = vpack.c.bf16 %v6296_v53, %v6294_v2  ;;  %10733 = vmatprep.subr.bf16.mxu0 %v10732_v38  ;;  %v6329_v38 = vld [vmem:[#allocation14 + $0x2b8] sm:$0xff]  ;;  %v10762_v2 = vpack.c.bf16 %v6324_v26, %v6322_v50  ;;  %v10680_v50 = vpack.c.bf16 %v6143_v60, %v6141_v58  ;;  %v6140_v26 = vld [vmem:[#allocation14] sm:$0xff] }
 0xef5   :  { %v10764_v53 = vpack.c.bf16 %v6329_v38, %v6327_v5  ;;  %v6145_v5 = vld [vmem:[#allocation14 + $0x28] sm:$0xff]  ;;  %v6147_v38 = vld [vmem:[#allocation14 + $0x38] sm:$0xff] }
 0xef6   :  { %6003 = vmatmul.mubr.f32.gmra.mrb[156].mxu0 %v13693_v49  ;;  %v6299_v49 = vld [vmem:[#allocation14 + $0x1c8] sm:$0xff]  ;;  %v6179_v58 = vld [vmem:[#allocation14 + $0x138] sm:$0xff] }
 0xef7   :  { %9255 = vmatprep.mubr.msk.f32.mxu0 %vm5459_vm10, %v13705_v13  ;;  %v10736_v13 = vpack.c.bf16 %v6301_v41, %v6299_v49  ;;  %10735 = vmatpush1.bf16.msra.mxu0 %v10734_v7  ;;  %v6326_v7 = vld [vmem:[#allocation14 + $0x2a0] sm:$0xff]  ;;  %v6328_v49 = vld [vmem:[#allocation14 + $0x2b0] sm:$0xff]  ;;  %v6331_v41 = vld [vmem:[#allocation14 + $0x2c8] sm:$0xff] }
 0xef9   :  { %10737 = vmatprep.subr.bf16.mxu0 %v10736_v13  ;;  %v6333_v13 = vld [vmem:[#allocation14 + $0x2d8] sm:$0xff] }
 0xefa   :  { %6009 = vmatmul.mubr.f32.gmra.mrb[158].mxu0 %v13707_v1  ;;  %v6300_v1 = vld [vmem:[#allocation14 + $0x1d0] sm:$0xff] }
 0xefb   :  { %v10738_v3 = vpack.c.bf16 %v6300_v1, %v6298_v12  ;;  %v10766_v12 = vpack.c.bf16 %v6328_v49, %v6326_v7  ;;  %v10768_v1 = vpack.c.bf16 %v6333_v13, %v6331_v41  ;;  %v6144_v7 = vld [vmem:[#allocation14 + $0x20] sm:$0xff]  ;;  %v6146_v49 = vld [vmem:[#allocation14 + $0x30] sm:$0xff]  ;;  %v6149_v41 = vld [vmem:[#allocation14 + $0x48] sm:$0xff] }
 0xefc   :  { %v6151_v13 = vld [vmem:[#allocation14 + $0x58] sm:$0xff] }
 0xefd   :  { %10739 = vmatpush1.bf16.msra.mxu0 %v10738_v3  ;;  %v6330_v3 = vld [vmem:[#allocation14 + $0x2c0] sm:$0xff] }
 0xefe   :  { %10741 = vmatprep.subr.bf16.mxu0 %v10740_v36  ;;  %v10770_v31 = vpack.c.bf16 %v6332_v52, %v6330_v3  ;;  %v6148_v3 = vld [vmem:[#allocation14 + $0x40] sm:$0xff]  ;;  %v6150_v52 = vld [vmem:[#allocation14 + $0x50] sm:$0xff] }
 0xf01   :  { %10743 = vmatpush1.bf16.msra.mxu0 %v10742_v46 }
 0xf02   :  { %10745 = vmatprep.subr.bf16.mxu0 %v10744_v20 }
 0xf05   :  { %10747 = vmatpush1.bf16.msra.mxu0 %v10746_v4 }
 0xf06   :  { %10749 = vmatprep.subr.bf16.mxu0 %v10748_v24 }
 0xf09   :  { %10751 = vmatpush1.bf16.msra.mxu0 %v10750_v56 }
 0xf0a   :  { %10753 = vmatprep.subr.bf16.mxu0 %v10752_v33 }
 0xf0d   :  { %10755 = vmatpush1.bf16.msra.mxu0 %v10754_v16 }
 0xf0e   :  { %10757 = vmatprep.subr.bf16.mxu0 %v10756_v30 }
 0xf11   :  { %10759 = vmatpush1.bf16.msra.mxu0 %v10758_v35 }
 0xf12   :  { %10761 = vmatprep.subr.bf16.mxu0 %v10760_v8 }
 0xf15   :  { %10763 = vmatpush1.bf16.msra.mxu0 %v10762_v2 }
 0xf16   :  { %10765 = vmatprep.subr.bf16.mxu0 %v10764_v53  ;;  %v10684_v53 = vpack.c.bf16 %v6147_v38, %v6145_v5  ;;  %v6180_v5 = vld [vmem:[#allocation14 + $0x140] sm:$0xff]  ;;  %v6182_v38 = vld [vmem:[#allocation14 + $0x150] sm:$0xff] }
 0xf19   :  { %10767 = vmatpush1.bf16.msra.mxu0 %v10766_v12  ;;  %v10686_v12 = vpack.c.bf16 %v6146_v49, %v6144_v7  ;;  %v6337_v7 = vld [vmem:[#allocation14 + $0x2f8] sm:$0xff] }
 0xf1a   :  { %10769 = vmatprep.subr.bf16.mxu0 %v10768_v1  ;;  %v10688_v1 = vpack.c.bf16 %v6151_v13, %v6149_v41  ;;  %v6185_v41 = vld [vmem:[#allocation14 + $0x168] sm:$0xff]  ;;  %v6187_v13 = vld [vmem:[#allocation14 + $0x178] sm:$0xff] }
 0xf1d   :  { %10771 = vmatpush1.bf16.msra.mxu0 %v10770_v31  ;;  %v6153_v31 = vld [vmem:[#allocation14 + $0x68] sm:$0xff] }
 0xf91   :  { %v5538_v36 = vpop.f32.mrb[184].mxu1  ;;  %v5676_v43 = vpop.f32.mrb[144].mxu0 }
 0xf92   :  { %v5540_v18 = vpop.f32.mrb[185].mxu1  ;;  %v5678_v22 = vpop.f32.mrb[145].mxu0 }
 0xf95   :  { %v5544_v59 = vpop.f32.mrb[186].mxu1  ;;  %v5682_v46 = vpop.f32.mrb[146].mxu0 }
 0xf96   :  { %v10618_v20 = vpack.c.bf16 %v5544_v59, %v5538_v36  ;;  %v10610_v44 = vpack.c.bf16 %v5682_v46, %v5676_v43  ;;  %v5546_v27 = vpop.f32.mrb[187].mxu1  ;;  %v5684_v10 = vpop.f32.mrb[147].mxu0  ;;  %v6155_v36 = vld [vmem:[#allocation14 + $0x78] sm:$0xff]  ;;  %v10690_v43 = vpack.c.bf16 %v6150_v52, %v6148_v3  ;;  %v6157_v59 = vld [vmem:[#allocation14 + $0x88] sm:$0xff]  ;;  %v6336_v3 = vld [vmem:[#allocation14 + $0x2f0] sm:$0xff] }
 0xf97   :  { %v10616_v61 = vpack.c.bf16 %v5546_v27, %v5540_v18  ;;  %v10608_v4 = vpack.c.bf16 %v5684_v10, %v5678_v22  ;;  %v10692_v18 = vpack.c.bf16 %v6155_v36, %v6153_v31  ;;  %v6154_v22 = vld [vmem:[#allocation14 + $0x70] sm:$0xff]  ;;  %v6159_v46 = vld [vmem:[#allocation14 + $0x98] sm:$0xff]  ;;  %v6161_v10 = vld [vmem:[#allocation14 + $0xa8] sm:$0xff] }
 0xf98   :  { %v6158_v27 = vld [vmem:[#allocation14 + $0x90] sm:$0xff]  ;;  %v6184_v52 = vld [vmem:[#allocation14 + $0x160] sm:$0xff] }
 0xf99   :  { %v5550_v24 = vpop.f32.mrb[188].mxu1  ;;  %v5688_v37 = vpop.f32.mrb[148].mxu0  ;;  %10609 = vmatprep.subr.bf16.mxu1 %v10608_v4  ;;  %v6186_v31 = vld [vmem:[#allocation14 + $0x170] sm:$0xff] }
 0xf9a   :  { %v5552_v23 = vpop.f32.mrb[189].mxu1  ;;  %v5690_v47 = vpop.f32.mrb[149].mxu0  ;;  %10611 = vmatpush1.bf16.msra.mxu1 %v10610_v44  ;;  %v10696_v44 = vpack.c.bf16 %v6159_v46, %v6157_v59  ;;  %v6112_v59 = vld [vmem:[#allocation25] sm:$0x3] }
 0xf9b   :  { %v6117_v46 = vrot.slane %v6112_v59, %v12576_v42 }
 0xf9d   :  { %v5556_v48 = vpop.f32.mrb[190].mxu1  ;;  %v5694_v56 = vpop.f32.mrb[150].mxu0 }
 0xf9e   :  { %v10622_v33 = vpack.c.bf16 %v5556_v48, %v5550_v24  ;;  %v10614_v11 = vpack.c.bf16 %v5694_v56, %v5688_v37  ;;  %v5558_v32 = vpop.f32.mrb[191].mxu1  ;;  %v5696_v55 = vpop.f32.mrb[151].mxu0  ;;  %v6160_v37 = vld [vmem:[#allocation14 + $0xa0] sm:$0xff] }
 0xf9f   :  { %v10620_v25 = vpack.c.bf16 %v5558_v32, %v5552_v23  ;;  %v10612_v16 = vpack.c.bf16 %v5696_v55, %v5690_v47  ;;  %v6162_v23 = vld [vmem:[#allocation14 + $0xb0] sm:$0xff]  ;;  %v6167_v47 = vld [vmem:[#allocation14 + $0xd8] sm:$0xff]  ;;  %v6169_v32 = vld [vmem:[#allocation14 + $0xe8] sm:$0xff] }
 0xfa0   :  { %v10702_v48 = vpack.c.bf16 %v6162_v23, %v6160_v37  ;;  %v6171_v55 = vld [vmem:[#allocation14 + $0xf8] sm:$0xff] }
 0xfa1   :  { %10613 = vmatprep.subr.bf16.mxu1 %v10612_v16  ;;  %v6168_v16 = vld [vmem:[#allocation14 + $0xe0] sm:$0xff]  ;;  %v6613_v37 = vld [vmem:[#allocation14 + $0x338] sm:$0xff] }
 0xfa2   :  { %10615 = vmatpush1.bf16.msra.mxu1 %v10614_v11  ;;  %v6166_v11 = vld [vmem:[#allocation14 + $0xd0] sm:$0xff] }
 0xfa3   :  { %10617 = vmatprep.subr.bf16.mxu1 %v10616_v61  ;;  %v6163_v61 = vld [vmem:[#allocation14 + $0xb8] sm:$0xff] }
 0xfa4   :  { %v10700_v24 = vpack.c.bf16 %v6163_v61, %v6161_v10  ;;  %v6606_v10 = vld [vmem:[#allocation14 + $0x300] sm:$0xff]  ;;  %v6608_v61 = vld [vmem:[#allocation14 + $0x310] sm:$0xff] }
 0xfa5   :  { %9196 = vmatmul.mubr.msk.f32.vlgmr.msra.gmra.mrb[192].mxu1 %vm4952_vm9, %v13542_v34 }
 0xfa6   :  { %10619 = vmatpush1.bf16.msra.mxu1 %v10618_v20  ;;  %5769 = vmatprep.mubr.f32.mxu1 %v12092_v0 }
 0xfa7   :  { %10621 = vmatprep.subr.bf16.mxu1 %v10620_v25 }
 0xfa9   :  { %9197 = vmatmul.mubr.msk.f32.gmra.mrb[194].mxu1 %vm4952_vm9, %v13547_v63 }
 0xfaa   :  { %10623 = vmatpush1.bf16.msra.mxu1 %v10622_v33  ;;  %5775 = vmatprep.mubr.f32.mxu1 %v12092_v0  ;;  %v6164_v33 = vld [vmem:[#allocation14 + $0xc0] sm:$0xff] }
 0xfab   :  { %v10706_v25 = vpack.c.bf16 %v6166_v11, %v6164_v33 }
 0xfad   :  { %9198 = vmatmul.mubr.msk.f32.gmra.mrb[196].mxu1 %vm4952_vm9, %v13552_v29 }
 0xfae   :  { %5781 = vmatprep.mubr.f32.mxu1 %v12092_v0 }
 0xfb1   :  { %9199 = vmatmul.mubr.msk.f32.gmra.mrb[198].mxu1 %vm4952_vm9, %v13557_v51 }
 0xfb2   :  { %5852 = vmatprep.mubr.f32.mxu1 %v12092_v0 }
 0xfb5   :  { %9200 = vmatmul.mubr.msk.f32.vlgmr.msra.gmra.mrb[192].mxu1 %vm4952_vm9, %v13562_v19 }
 0xfb6   :  { %5858 = vmatprep.mubr.f32.mxu1 %v12092_v0 }
 0xfb9   :  { %9201 = vmatmul.mubr.msk.f32.gmra.mrb[194].mxu1 %vm4952_vm9, %v13569_v15 }
 0xfba   :  { %5864 = vmatprep.mubr.f32.mxu1 %v12092_v0 }
 0xfbd   :  { %9202 = vmatmul.mubr.msk.f32.gmra.mrb[196].mxu1 %vm4952_vm9, %v13574_v6 }
 0xfbe   :  { %5870 = vmatprep.mubr.f32.mxu1 %v12092_v0 }
 0xfc1   :  { %v5992_v34 = vpop.f32.mrb[152].mxu0  ;;  %9203 = vmatmul.mubr.msk.f32.gmra.mrb[198].mxu1 %vm4952_vm9, %v13579_v54  ;;  %v6142_v54 = vld [vmem:[#allocation14 + $0x10] sm:$0xff] }
 0xfc2   :  { %v5994_v63 = vpop.f32.mrb[153].mxu0  ;;  %6079 = vmatprep.mubr.f32.mxu1 %v12092_v0  ;;  %v10682_v2 = vpack.c.bf16 %v6142_v54, %v6140_v26 }
 0xfc5   :  { %v5998_v29 = vpop.f32.mrb[154].mxu0 }
 0xfc6   :  { %v10674_v51 = vpack.c.bf16 %v5998_v29, %v5992_v34  ;;  %v6000_v19 = vpop.f32.mrb[155].mxu0  ;;  %v6170_v34 = vld [vmem:[#allocation14 + $0xf0] sm:$0xff]  ;;  %v6175_v29 = vld [vmem:[#allocation14 + $0x118] sm:$0xff] }
 0xfc7   :  { %v10672_v30 = vpack.c.bf16 %v6000_v19, %v5994_v63  ;;  %v6173_v63 = vld [vmem:[#allocation14 + $0x108] sm:$0xff] }
 0xfc8   :  { %v10712_v19 = vpack.c.bf16 %v6175_v29, %v6173_v63 }
 0xfc9   :  { %v6004_v39 = vpop.f32.mrb[156].mxu0  ;;  %10673 = vmatprep.subr.bf16.mxu1 %v10672_v30  ;;  %v6172_v30 = vld [vmem:[#allocation14 + $0x100] sm:$0xff] }
 0xfca   :  { %v6006_v15 = vpop.f32.mrb[157].mxu0  ;;  %10675 = vmatpush1.bf16.msra.mxu1 %v10674_v51  ;;  %v10710_v51 = vpack.c.bf16 %v6170_v34, %v6168_v16  ;;  %v6617_v16 = vld [vmem:[#allocation14 + $0x358] sm:$0xff] }
 0xfcd   :  { %v6010_v6 = vpop.f32.mrb[158].mxu0 }
 0xfce   :  { %v10678_v21 = vpack.c.bf16 %v6010_v6, %v6004_v39  ;;  %v6012_v35 = vpop.f32.mrb[159].mxu0  ;;  %v6174_v39 = vld [vmem:[#allocation14 + $0x110] sm:$0xff] }
 0xfcf   :  { %v10676_v8 = vpack.c.bf16 %v6012_v35, %v6006_v15  ;;  %v6177_v15 = vld [vmem:[#allocation14 + $0x128] sm:$0xff]  ;;  %v10714_v60 = vpack.c.bf16 %v6174_v39, %v6172_v30  ;;  %v6178_v35 = vld [vmem:[#allocation14 + $0x130] sm:$0xff] }
 0xfd0   :  { %v10716_v6 = vpack.c.bf16 %v6179_v58, %v6177_v15  ;;  %v6614_v15 = vld [vmem:[#allocation14 + $0x340] sm:$0xff]  ;;  %v6616_v58 = vld [vmem:[#allocation14 + $0x350] sm:$0xff] }
 0xfd1   :  { %10677 = vmatprep.subr.bf16.mxu1 %v10676_v8  ;;  %v6181_v8 = vld [vmem:[#allocation14 + $0x148] sm:$0xff] }
 0xfd2   :  { %10679 = vmatpush1.bf16.msra.mxu1 %v10678_v21  ;;  %v6176_v21 = vld [vmem:[#allocation14 + $0x120] sm:$0xff] }
 0xfd3   :  { %10681 = vmatprep.subr.bf16.mxu1 %v10680_v50  ;;  %v6183_v50 = vld [vmem:[#allocation14 + $0x158] sm:$0xff]  ;;  %v10718_v26 = vpack.c.bf16 %v6178_v35, %v6176_v21 }
 0xfd4   :  { %v10720_v54 = vpack.c.bf16 %v6183_v50, %v6181_v8  ;;  %v6621_v21 = vld [vmem:[#allocation14 + $0x378] sm:$0xff]  ;;  %v10802_v50 = vpack.c.bf16 %v6616_v58, %v6614_v15 }
 0xfd5   :  { %9256 = vmatmul.mubr.msk.f32.vlgmr.msra.gmra.mrb[192].mxu1 %vm4952_vm9, %v13588_v14  ;;  %v6152_v14 = vld [vmem:[#allocation14 + $0x60] sm:$0xff] }
 0xfd6   :  { %6085 = vmatprep.mubr.f32.mxu1 %v12092_v0  ;;  %10683 = vmatpush1.bf16.msra.mxu1 %v10682_v2  ;;  %v10694_v20 = vpack.c.bf16 %v6154_v22, %v6152_v14  ;;  %v10722_v2 = vpack.c.bf16 %v6182_v38, %v6180_v5  ;;  %v6609_v14 = vld [vmem:[#allocation14 + $0x318] sm:$0xff] }
 0xfd7   :  { %10685 = vmatprep.subr.bf16.mxu1 %v10684_v53  ;;  %v6335_v53 = vld [vmem:[#allocation14 + $0x2e8] sm:$0xff] }
 0xfd8   :  { %v10772_v49 = vpack.c.bf16 %v6337_v7, %v6335_v53  ;;  %v6620_v53 = vld [vmem:[#allocation14 + $0x370] sm:$0xff] }
 0xfd9   :  { %9257 = vmatmul.mubr.msk.f32.gmra.mrb[194].mxu1 %vm4952_vm9, %v13597_v62  ;;  %v6156_v62 = vld [vmem:[#allocation14 + $0x80] sm:$0xff] }
 0xfda   :  { %6091 = vmatprep.mubr.f32.mxu1 %v12092_v0  ;;  %10687 = vmatpush1.bf16.msra.mxu1 %v10686_v12  ;;  %v10698_v4 = vpack.c.bf16 %v6158_v27, %v6156_v62  ;;  %v6334_v12 = vld [vmem:[#allocation14 + $0x2e0] sm:$0xff] }
 0xfdb   :  { %10689 = vmatprep.subr.bf16.mxu1 %v10688_v1  ;;  %v10724_v1 = vpack.c.bf16 %v6187_v13, %v6185_v41  ;;  %10773 = vmatprep.subr.bf16.mxu0 %v10772_v49  ;;  %v10774_v36 = vpack.c.bf16 %v6336_v3, %v6334_v12  ;;  %v6623_v49 = vld [vmem:[#allocation14 + $0x388] sm:$0xff]  ;;  %v6625_v41 = vld [vmem:[#allocation14 + $0x398] sm:$0xff] }
 0xfdc   :  { %v10808_v3 = vpack.c.bf16 %v6625_v41, %v6623_v49  ;;  %v7018_v41 = vld [vmem:[#allocation16 + $0x180] sm:$0xff] }
 0xfdd   :  { %9258 = vmatmul.mubr.msk.f32.gmra.mrb[196].mxu1 %vm4952_vm9, %v13606_v40  ;;  %v6165_v40 = vld [vmem:[#allocation14 + $0xc8] sm:$0xff]  ;;  %10775 = vmatpush1.bf16.msra.mxu0 %v10774_v36 }
 0xfde   :  { %6097 = vmatprep.mubr.f32.mxu1 %v12092_v0  ;;  %10691 = vmatpush1.bf16.msra.mxu1 %v10690_v43  ;;  %v10704_v56 = vpack.c.bf16 %v6167_v47, %v6165_v40  ;;  %v10726_v43 = vpack.c.bf16 %v6186_v31, %v6184_v52  ;;  %v10794_v47 = vpack.c.bf16 %v6608_v61, %v6606_v10  ;;  %v6622_v52 = vld [vmem:[#allocation14 + $0x380] sm:$0xff]  ;;  %v6624_v31 = vld [vmem:[#allocation14 + $0x390] sm:$0xff]  ;;  %v6627_v36 = vld [vmem:[#allocation14 + $0x3a8] sm:$0xff] }
 0xfdf   :  { %10693 = vmatprep.subr.bf16.mxu1 %v10692_v18  ;;  %v6607_v18 = vld [vmem:[#allocation14 + $0x308] sm:$0xff]  ;;  %v6632_v10 = vld [vmem:[#allocation14 + $0x3d0] sm:$0xff] }
 0xfe0   :  { %v10792_v22 = vpack.c.bf16 %v6609_v14, %v6607_v18  ;;  %v10810_v18 = vpack.c.bf16 %v6624_v31, %v6622_v52  ;;  %v6635_v61 = vld [vmem:[#allocation14 + $0x3e8] sm:$0xff]  ;;  %v7022_v52 = vld [vmem:[#allocation16 + $0x1a0] sm:$0xff] }
 0xfe1   :  { %9259 = vmatmul.mubr.msk.f32.gmra.mrb[198].mxu1 %vm4952_vm9, %v13615_v57  ;;  %v10708_v57 = vpack.c.bf16 %v6171_v55, %v6169_v32  ;;  %v6610_v32 = vld [vmem:[#allocation14 + $0x320] sm:$0xff]  ;;  %v6612_v55 = vld [vmem:[#allocation14 + $0x330] sm:$0xff] }
 0xfe2   :  { %10695 = vmatpush1.bf16.msra.mxu1 %v10694_v20  ;;  %10793 = vmatprep.subr.bf16.mxu0 %v10792_v22  ;;  %v6121_v20 = vrot.slane %v6112_v59, %v12578_v45  ;;  %v10798_v29 = vpack.c.bf16 %v6612_v55, %v6610_v32  ;;  %v6626_v22 = vld [vmem:[#allocation14 + $0x3a0] sm:$0xff]  ;;  %v6628_v59 = vld [vmem:[#allocation14 + $0x3b0] sm:$0xff] }
 0xfe3   :  { %10697 = vmatprep.subr.bf16.mxu1 %v10696_v44  ;;  %v6638_v32 = vld [vmem:[#allocation14 + $0x400] sm:$0xff]  ;;  %v6640_v55 = vld [vmem:[#allocation14 + $0x410] sm:$0xff] }
 0xfe6   :  { %10699 = vmatpush1.bf16.msra.mxu1 %v10698_v4 }
 0xfe7   :  { %10701 = vmatprep.subr.bf16.mxu1 %v10700_v24  ;;  %v6611_v24 = vld [vmem:[#allocation14 + $0x328] sm:$0xff] }
 0xfe8   :  { %v10796_v11 = vpack.c.bf16 %v6613_v37, %v6611_v24 }
 0xfea   :  { %10703 = vmatpush1.bf16.msra.mxu1 %v10702_v48 }
 0xfeb   :  { %10705 = vmatprep.subr.bf16.mxu1 %v10704_v56 }
 0xfee   :  { %10707 = vmatpush1.bf16.msra.mxu1 %v10706_v25 }
 0xfef   :  { %10709 = vmatprep.subr.bf16.mxu1 %v10708_v57  ;;  %v6615_v57 = vld [vmem:[#allocation14 + $0x348] sm:$0xff] }
 0xff0   :  { %v10800_v39 = vpack.c.bf16 %v6617_v16, %v6615_v57  ;;  %v6645_v57 = vld [vmem:[#allocation14 + $0x438] sm:$0xff]  ;;  %v10826_v16 = vpack.c.bf16 %v6640_v55, %v6638_v32 }
 0xff2   :  { %10711 = vmatpush1.bf16.msra.mxu1 %v10710_v51 }
 0xff3   :  { %10713 = vmatprep.subr.bf16.mxu1 %v10712_v19 }
 0xff6   :  { %10715 = vmatpush1.bf16.msra.mxu1 %v10714_v60 }
 0xff7   :  { %10717 = vmatprep.subr.bf16.mxu1 %v10716_v6  ;;  %v6619_v6 = vld [vmem:[#allocation14 + $0x368] sm:$0xff] }
 0xff8   :  { %v10804_v38 = vpack.c.bf16 %v6621_v21, %v6619_v6  ;;  %v6648_v6 = vld [vmem:[#allocation14 + $0x450] sm:$0xff]  ;;  %v6651_v21 = vld [vmem:[#allocation14 + $0x468] sm:$0xff] }
 0xffa   :  { %10719 = vmatpush1.bf16.msra.mxu1 %v10718_v26 }
 0xffb   :  { %10721 = vmatprep.subr.bf16.mxu1 %v10720_v54 }
 0xffe   :  { %10723 = vmatpush1.bf16.msra.mxu1 %v10722_v2  ;;  %v6618_v2 = vld [vmem:[#allocation14 + $0x360] sm:$0xff] }
 0xfff   :  { %10725 = vmatprep.subr.bf16.mxu1 %v10724_v1  ;;  %v10806_v12 = vpack.c.bf16 %v6620_v53, %v6618_v2  ;;  %v7019_v53 = vld [vmem:[#allocation16 + $0x188] sm:$0xff] }
0x1002   :  { %10727 = vmatpush1.bf16.msra.mxu1 %v10726_v43  ;;  %v6629_v43 = vld [vmem:[#allocation14 + $0x3b8] sm:$0xff] }
0x1003   :  { %v10812_v14 = vpack.c.bf16 %v6629_v43, %v6627_v36  ;;  %v7029_v36 = vld [vmem:[#allocation16 + $0x1d8] sm:$0xff]  ;;  %v7026_v43 = vld [vmem:[#allocation16 + $0x1c0] sm:$0xff] }
0x10a8   :  { %v6081_v44 = vpop.f32.mrb[192].mxu1 }
0x10a9   :  { %v6124_v62 = vadd.f32 %v6117_v46, %v6081_v44  ;;  %v6083_v27 = vpop.f32.mrb[193].mxu1  ;;  %v10814_v44 = vpack.c.bf16 %v6628_v59, %v6626_v22  ;;  %v7033_v22 = vld [vmem:[#allocation16 + $0x1f8] sm:$0xff] }
0x10aa   :  { %v6125_v4 = vadd.f32 %v6121_v20, %v6083_v27  ;;  %v6630_v27 = vld [vmem:[#allocation14 + $0x3c0] sm:$0xff] }
0x10ab   :  { %v13797_v48 = vmax.f32 %v6124_v62, 0.0  ;;  %v10818_v24 = vpack.c.bf16 %v6632_v10, %v6630_v27 }
0x10ac   :  { %v13795_v23 = vmax.f32 %v6125_v4, 0.0  ;;  %v6087_v40 = vpop.f32.mrb[194].mxu1  ;;  %v6637_v4 = vld [vmem:[#allocation14 + $0x3f8] sm:$0xff] }
0x10ad   :  { %v6126_v56 = vadd.f32 %v6117_v46, %v6087_v40  ;;  %v6089_v33 = vpop.f32.mrb[195].mxu1  ;;  %v10820_v37 = vpack.c.bf16 %v6637_v4, %v6635_v61  ;;  %v6636_v40 = vld [vmem:[#allocation14 + $0x3f0] sm:$0xff]  ;;  %v7034_v61 = vld [vmem:[#allocation16 + $0x200] sm:$0xff] }
0x10ae   :  { %v6127_v25 = vadd.f32 %v6121_v20, %v6089_v33  ;;  %9260 = vmatprep.mubr.msk.f32.mxu1 %vm5459_vm10, %v13795_v23  ;;  %9264 = vmatprep.mubr.msk.f32.mxu0 %vm5459_vm10, %v13795_v23  ;;  %v7036_v4 = vld [vmem:[#allocation16 + $0x210] sm:$0xff] }
0x10af   :  { %6265 = vmatmul.mubr.f32.vlgmr.msra.gmra.mrb[200].mxu1 %v13797_v48  ;;  %6403 = vmatmul.mubr.f32.vlgmr.msra.gmra.mrb[160].mxu0 %v13797_v48  ;;  %v13807_v51 = vmax.f32 %v6126_v56, 0.0  ;;  %v6641_v56 = vld [vmem:[#allocation14 + $0x418] sm:$0xff] }
0x10b0   :  { %v13805_v34 = vmax.f32 %v6127_v25, 0.0  ;;  %10795 = vmatpush1.bf16.msra.mxu0 %v10794_v47  ;;  %v6093_v63 = vpop.f32.mrb[196].mxu1  ;;  %v6639_v47 = vld [vmem:[#allocation14 + $0x408] sm:$0xff] }
0x10b1   :  { %v6128_v19 = vadd.f32 %v6117_v46, %v6093_v63  ;;  %v6095_v30 = vpop.f32.mrb[197].mxu1  ;;  %10797 = vmatprep.subr.bf16.mxu0 %v10796_v11  ;;  %v10824_v11 = vpack.c.bf16 %v6641_v56, %v6639_v47  ;;  %v6643_v25 = vld [vmem:[#allocation14 + $0x428] sm:$0xff]  ;;  %v7038_v47 = vld [vmem:[#allocation16 + $0x220] sm:$0xff]  ;;  %v7040_v56 = vld [vmem:[#allocation16 + $0x230] sm:$0xff] }
0x10b2   :  { %v6129_v60 = vadd.f32 %v6121_v20, %v6095_v30  ;;  %9261 = vmatprep.mubr.msk.f32.mxu1 %vm5459_vm10, %v13805_v34  ;;  %9265 = vmatprep.mubr.msk.f32.mxu0 %vm5459_vm10, %v13805_v34  ;;  %v10828_v63 = vpack.c.bf16 %v6645_v57, %v6643_v25  ;;  %v6647_v30 = vld [vmem:[#allocation14 + $0x448] sm:$0xff]  ;;  %v10918_v32 = vpack.c.bf16 %v7040_v56, %v7038_v47  ;;  %v7042_v25 = vld [vmem:[#allocation16 + $0x240] sm:$0xff]  ;;  %v7044_v57 = vld [vmem:[#allocation16 + $0x250] sm:$0xff] }
0x10b3   :  { %6271 = vmatmul.mubr.f32.gmra.mrb[202].mxu1 %v13807_v51  ;;  %6409 = vmatmul.mubr.f32.gmra.mrb[162].mxu0 %v13807_v51  ;;  %v13817_v26 = vmax.f32 %v6128_v19, 0.0  ;;  %v6644_v19 = vld [vmem:[#allocation14 + $0x430] sm:$0xff]  ;;  %v13853_v47 = vld [vmem:[#allocation5 + $0x28] sm:$0xff]  ;;  %v13858_v56 = vld [vmem:[#allocation5 + $0x30] sm:$0xff] }
0x10b4   :  { %v13815_v35 = vmax.f32 %v6129_v60, 0.0  ;;  %10799 = vmatpush1.bf16.msra.mxu0 %v10798_v29  ;;  %v6099_v8 = vpop.f32.mrb[198].mxu1  ;;  %v6642_v29 = vld [vmem:[#allocation14 + $0x420] sm:$0xff] }
0x10b5   :  { %v6130_v54 = vadd.f32 %v6117_v46, %v6099_v8  ;;  %v6101_v5 = vpop.f32.mrb[199].mxu1  ;;  %10801 = vmatprep.subr.bf16.mxu0 %v10800_v39  ;;  %v6631_v46 = vld [vmem:[#allocation14 + $0x3c8] sm:$0xff]  ;;  %v6649_v39 = vld [vmem:[#allocation14 + $0x458] sm:$0xff]  ;;  %v10830_v15 = vpack.c.bf16 %v6644_v19, %v6642_v29  ;;  %v6646_v60 = vld [vmem:[#allocation14 + $0x440] sm:$0xff]  ;;  %v10922_v29 = vpack.c.bf16 %v7044_v57, %v7042_v25 }
0x10b6   :  { %v6131_v7 = vadd.f32 %v6121_v20, %v6101_v5  ;;  %9262 = vmatprep.mubr.msk.f32.mxu1 %vm5459_vm10, %v13815_v35  ;;  %9266 = vmatprep.mubr.msk.f32.mxu0 %vm5459_vm10, %v13815_v35  ;;  %v6633_v20 = vld [vmem:[#allocation14 + $0x3d8] sm:$0xff]  ;;  %v10832_v58 = vpack.c.bf16 %v6649_v39, %v6647_v30  ;;  %v6650_v5 = vld [vmem:[#allocation14 + $0x460] sm:$0xff]  ;;  %v7048_v39 = vld [vmem:[#allocation16 + $0x270] sm:$0xff] }
0x10b7   :  { %6277 = vmatmul.mubr.f32.gmra.mrb[204].mxu1 %v13817_v26  ;;  %6415 = vmatmul.mubr.f32.gmra.mrb[164].mxu0 %v13817_v26  ;;  %v13827_v1 = vmax.f32 %v6130_v54, 0.0  ;;  %v10816_v62 = vpack.c.bf16 %v6633_v20, %v6631_v46  ;;  %v6653_v8 = vld [vmem:[#allocation14 + $0x478] sm:$0xff]  ;;  %v7030_v46 = vld [vmem:[#allocation16 + $0x1e0] sm:$0xff]  ;;  %v7032_v20 = vld [vmem:[#allocation16 + $0x1f0] sm:$0xff] }
0x10b8   :  { %v13825_v13 = vmax.f32 %v6131_v7, 0.0  ;;  %10803 = vmatpush1.bf16.msra.mxu0 %v10802_v50  ;;  %v10834_v50 = vpack.c.bf16 %v6648_v6, %v6646_v60  ;;  %v10836_v54 = vpack.c.bf16 %v6653_v8, %v6651_v21  ;;  %v7021_v7 = vld [vmem:[#allocation16 + $0x198] sm:$0xff]  ;;  %v10910_v27 = vpack.c.bf16 %v7032_v20, %v7030_v46  ;;  %v7046_v30 = vld [vmem:[#allocation16 + $0x260] sm:$0xff]  ;;  %v7052_v8 = vld [vmem:[#allocation16 + $0x290] sm:$0xff] }
0x10b9   :  { %10805 = vmatprep.subr.bf16.mxu0 %v10804_v38  ;;  %v6652_v38 = vld [vmem:[#allocation14 + $0x470] sm:$0xff]  ;;  %v10896_v49 = vpack.c.bf16 %v7021_v7, %v7019_v53  ;;  %v10926_v60 = vpack.c.bf16 %v7048_v39, %v7046_v30  ;;  %v7050_v21 = vld [vmem:[#allocation16 + $0x280] sm:$0xff]  ;;  %v7059_v7 = vld [vmem:[#allocation16 + $0x2c8] sm:$0xff] }
0x10ba   :  { %9263 = vmatprep.mubr.msk.f32.mxu1 %vm5459_vm10, %v13825_v13  ;;  %9267 = vmatprep.mubr.msk.f32.mxu0 %vm5459_vm10, %v13825_v13  ;;  %v10838_v2 = vpack.c.bf16 %v6652_v38, %v6650_v5  ;;  %v10930_v5 = vpack.c.bf16 %v7052_v8, %v7050_v21  ;;  %v7056_v53 = vld [vmem:[#allocation16 + $0x2b0] sm:$0xff]  ;;  %v13883_v57 = vld [vmem:[#allocation5 + $0x18] sm:$0xff] }
0x10bb   :  { %6283 = vmatmul.mubr.f32.gmra.mrb[206].mxu1 %v13827_v1  ;;  %6421 = vmatmul.mubr.f32.gmra.mrb[166].mxu0 %v13827_v1 }
0x10bc   :  { %10807 = vmatpush1.bf16.msra.mxu0 %v10806_v12  ;;  %9276 = vmatprep.mubr.msk.f32.mxu0 %vm5459_vm10, %v13795_v23  ;;  %v6634_v23 = vld [vmem:[#allocation14 + $0x3e0] sm:$0xff] }
0x10bd   :  { %10809 = vmatprep.subr.bf16.mxu0 %v10808_v3  ;;  %6491 = vmatprep.mubr.f32.mxu1 %v12092_v0  ;;  %v10822_v33 = vpack.c.bf16 %v6636_v40, %v6634_v23  ;;  %v7023_v3 = vld [vmem:[#allocation16 + $0x1a8] sm:$0xff]  ;;  %v10914_v23 = vpack.c.bf16 %v7036_v4, %v7034_v61 }
0x10c0   :  { %10811 = vmatpush1.bf16.msra.mxu0 %v10810_v18 }
0x10c1   :  { %10813 = vmatprep.subr.bf16.mxu0 %v10812_v14  ;;  %v7031_v14 = vld [vmem:[#allocation16 + $0x1e8] sm:$0xff] }
0x10c2   :  { %v10908_v59 = vpack.c.bf16 %v7033_v22, %v7031_v14 }
0x10c4   :  { %10815 = vmatpush1.bf16.msra.mxu0 %v10814_v44  ;;  %v7035_v44 = vld [vmem:[#allocation16 + $0x208] sm:$0xff] }
0x10c5   :  { %10817 = vmatprep.subr.bf16.mxu0 %v10816_v62  ;;  %v7037_v62 = vld [vmem:[#allocation16 + $0x218] sm:$0xff] }
0x10c6   :  { %v10912_v10 = vpack.c.bf16 %v7037_v62, %v7035_v44 }
0x10c8   :  { %10819 = vmatpush1.bf16.msra.mxu0 %v10818_v24  ;;  %v7039_v24 = vld [vmem:[#allocation16 + $0x228] sm:$0xff] }
0x10c9   :  { %10821 = vmatprep.subr.bf16.mxu0 %v10820_v37  ;;  %v7041_v37 = vld [vmem:[#allocation16 + $0x238] sm:$0xff] }
0x10ca   :  { %v10916_v40 = vpack.c.bf16 %v7041_v37, %v7039_v24 }
0x10cc   :  { %10823 = vmatpush1.bf16.msra.mxu0 %v10822_v33  ;;  %v7043_v33 = vld [vmem:[#allocation16 + $0x248] sm:$0xff] }
0x10cd   :  { %10825 = vmatprep.subr.bf16.mxu0 %v10824_v11  ;;  %v7045_v11 = vld [vmem:[#allocation16 + $0x258] sm:$0xff] }
0x10ce   :  { %v10920_v55 = vpack.c.bf16 %v7045_v11, %v7043_v33  ;;  %v13863_v33 = vld [vmem:[#allocation5 + $0x38] sm:$0xff]  ;;  %v13868_v11 = vld [vmem:[#allocation5] sm:$0xff] }
0x10d0   :  { %10827 = vmatpush1.bf16.msra.mxu0 %v10826_v16  ;;  %v7047_v16 = vld [vmem:[#allocation16 + $0x268] sm:$0xff] }
0x10d1   :  { %10829 = vmatprep.subr.bf16.mxu0 %v10828_v63  ;;  %v7049_v63 = vld [vmem:[#allocation16 + $0x278] sm:$0xff] }
0x10d2   :  { %v10924_v19 = vpack.c.bf16 %v7049_v63, %v7047_v16 }
0x10d4   :  { %10831 = vmatpush1.bf16.msra.mxu0 %v10830_v15  ;;  %v7051_v15 = vld [vmem:[#allocation16 + $0x288] sm:$0xff] }
0x10d5   :  { %10833 = vmatprep.subr.bf16.mxu0 %v10832_v58  ;;  %v7053_v58 = vld [vmem:[#allocation16 + $0x298] sm:$0xff] }
0x10d6   :  { %v10928_v6 = vpack.c.bf16 %v7053_v58, %v7051_v15  ;;  %v6869_v58 = vld [vmem:[#allocation16 + $0x8] sm:$0xff] }
0x10d8   :  { %10835 = vmatpush1.bf16.msra.mxu0 %v10834_v50  ;;  %v7055_v50 = vld [vmem:[#allocation16 + $0x2a8] sm:$0xff] }
0x10d9   :  { %10837 = vmatprep.subr.bf16.mxu0 %v10836_v54  ;;  %v7057_v54 = vld [vmem:[#allocation16 + $0x2b8] sm:$0xff] }
0x10da   :  { %v10932_v38 = vpack.c.bf16 %v7057_v54, %v7055_v50 }
0x10dc   :  { %10839 = vmatpush1.bf16.msra.mxu0 %v10838_v2  ;;  %v7054_v2 = vld [vmem:[#allocation16 + $0x2a0] sm:$0xff] }
0x10dd   :  { %10897 = vmatprep.subr.bf16.mxu0 %v10896_v49  ;;  %v7061_v49 = vld [vmem:[#allocation16 + $0x2d8] sm:$0xff] }
0x10df   :  { %6719 = vmatmul.mubr.f32.vlgmr.msra.gmra.mrb[168].mxu0 %v13797_v48  ;;  %v7020_v48 = vld [vmem:[#allocation16 + $0x190] sm:$0xff] }
0x10e0   :  { %9277 = vmatprep.mubr.msk.f32.mxu0 %vm5459_vm10, %v13805_v34  ;;  %v10898_v12 = vpack.c.bf16 %v7020_v48, %v7018_v41  ;;  %v7025_v34 = vld [vmem:[#allocation16 + $0x1b8] sm:$0xff]  ;;  %v10934_v41 = vpack.c.bf16 %v7056_v53, %v7054_v2  ;;  %v10936_v48 = vpack.c.bf16 %v7061_v49, %v7059_v7  ;;  %v6873_v2 = vld [vmem:[#allocation16 + $0x28] sm:$0xff] }
0x10e1   :  { %v6875_v53 = vld [vmem:[#allocation16 + $0x38] sm:$0xff] }
0x10e2   :  { %10899 = vmatpush1.bf16.msra.mxu0 %v10898_v12  ;;  %v7058_v12 = vld [vmem:[#allocation16 + $0x2c0] sm:$0xff]  ;;  %v10852_v49 = vpack.c.bf16 %v6875_v53, %v6873_v2  ;;  %v6902_v53 = vld [vmem:[#allocation16 + $0x110] sm:$0xff] }
0x10e3   :  { %6725 = vmatmul.mubr.f32.gmra.mrb[170].mxu0 %v13807_v51  ;;  %v10900_v51 = vpack.c.bf16 %v7025_v34, %v7023_v3  ;;  %v7060_v3 = vld [vmem:[#allocation16 + $0x2d0] sm:$0xff]  ;;  %v6900_v2 = vld [vmem:[#allocation16 + $0x100] sm:$0xff] }
0x10e4   :  { %9278 = vmatprep.mubr.msk.f32.mxu0 %vm5459_vm10, %v13815_v35  ;;  %v7024_v35 = vld [vmem:[#allocation16 + $0x1b0] sm:$0xff]  ;;  %v10938_v34 = vpack.c.bf16 %v7060_v3, %v7058_v12  ;;  %v6877_v12 = vld [vmem:[#allocation16 + $0x48] sm:$0xff]  ;;  %v6879_v3 = vld [vmem:[#allocation16 + $0x58] sm:$0xff] }
0x10e5   :  { %v10902_v31 = vpack.c.bf16 %v7024_v35, %v7022_v52  ;;  %10901 = vmatprep.subr.bf16.mxu0 %v10900_v51 }
0x10e7   :  { %6731 = vmatmul.mubr.f32.gmra.mrb[172].mxu0 %v13817_v26  ;;  %v7027_v26 = vld [vmem:[#allocation16 + $0x1c8] sm:$0xff] }
0x10e8   :  { %9279 = vmatprep.mubr.msk.f32.mxu0 %vm5459_vm10, %v13825_v13  ;;  %v10904_v13 = vpack.c.bf16 %v7029_v36, %v7027_v26  ;;  %10903 = vmatpush1.bf16.msra.mxu0 %v10902_v31 }
0x10ea   :  { %10905 = vmatprep.subr.bf16.mxu0 %v10904_v13 }
0x10eb   :  { %6737 = vmatmul.mubr.f32.gmra.mrb[174].mxu0 %v13827_v1  ;;  %v7028_v1 = vld [vmem:[#allocation16 + $0x1d0] sm:$0xff] }
0x10ec   :  { %v10906_v18 = vpack.c.bf16 %v7028_v1, %v7026_v43 }
0x10ee   :  { %10907 = vmatpush1.bf16.msra.mxu0 %v10906_v18 }
0x10ef   :  { %10909 = vmatprep.subr.bf16.mxu0 %v10908_v59 }
0x10f2   :  { %10911 = vmatpush1.bf16.msra.mxu0 %v10910_v27 }
0x10f3   :  { %10913 = vmatprep.subr.bf16.mxu0 %v10912_v10 }
0x10f6   :  { %10915 = vmatpush1.bf16.msra.mxu0 %v10914_v23 }
0x10f7   :  { %10917 = vmatprep.subr.bf16.mxu0 %v10916_v40  ;;  %v13848_v40 = vld [vmem:[#allocation5 + $0x20] sm:$0xff] }
0x10fa   :  { %10919 = vmatpush1.bf16.msra.mxu0 %v10918_v32  ;;  %v13873_v32 = vld [vmem:[#allocation5 + $0x8] sm:$0xff] }
0x10fb   :  { %10921 = vmatprep.subr.bf16.mxu0 %v10920_v55  ;;  %v13878_v55 = vld [vmem:[#allocation5 + $0x10] sm:$0xff] }
0x10fe   :  { %10923 = vmatpush1.bf16.msra.mxu0 %v10922_v29 }
0x10ff   :  { %10925 = vmatprep.subr.bf16.mxu0 %v10924_v19 }
0x1102   :  { %10927 = vmatpush1.bf16.msra.mxu0 %v10926_v60  ;;  %v6871_v60 = vld [vmem:[#allocation16 + $0x18] sm:$0xff] }
0x1103   :  { %10929 = vmatprep.subr.bf16.mxu0 %v10928_v6  ;;  %v10848_v54 = vpack.c.bf16 %v6871_v60, %v6869_v58  ;;  %v6899_v58 = vld [vmem:[#allocation16 + $0xf8] sm:$0xff] }
0x1106   :  { %10931 = vmatpush1.bf16.msra.mxu0 %v10930_v5  ;;  %v6868_v5 = vld [vmem:[#allocation16] sm:$0xff] }
0x1107   :  { %10933 = vmatprep.subr.bf16.mxu0 %v10932_v38  ;;  %v6870_v38 = vld [vmem:[#allocation16 + $0x10] sm:$0xff] }
0x1108   :  { %v10850_v7 = vpack.c.bf16 %v6870_v38, %v6868_v5 }
0x110a   :  { %10935 = vmatpush1.bf16.msra.mxu0 %v10934_v41  ;;  %v6872_v41 = vld [vmem:[#allocation16 + $0x20] sm:$0xff] }
0x110b   :  { %10937 = vmatprep.subr.bf16.mxu0 %v10936_v48  ;;  %v6874_v48 = vld [vmem:[#allocation16 + $0x30] sm:$0xff] }
0x110e   :  { %10939 = vmatpush1.bf16.msra.mxu0 %v10938_v34  ;;  %v13888_v34 = vld [vmem:[#allocation5 + $0x40] sm:$0xff] }
0x1182   :  { %v6266_v51 = vpop.f32.mrb[200].mxu1  ;;  %v6404_v52 = vpop.f32.mrb[160].mxu0 }
0x1183   :  { %v6268_v35 = vpop.f32.mrb[201].mxu1  ;;  %v6406_v31 = vpop.f32.mrb[161].mxu0 }
0x1186   :  { %v6272_v26 = vpop.f32.mrb[202].mxu1  ;;  %v6410_v36 = vpop.f32.mrb[162].mxu0 }
0x1187   :  { %v10786_v13 = vpack.c.bf16 %v6272_v26, %v6266_v51  ;;  %v10778_v43 = vpack.c.bf16 %v6410_v36, %v6404_v52  ;;  %v6274_v1 = vpop.f32.mrb[203].mxu1  ;;  %v6412_v18 = vpop.f32.mrb[163].mxu0  ;;  %v10854_v51 = vpack.c.bf16 %v6874_v48, %v6872_v41  ;;  %v10856_v52 = vpack.c.bf16 %v6879_v3, %v6877_v12  ;;  %v6881_v26 = vld [vmem:[#allocation16 + $0x68] sm:$0xff]  ;;  %v6883_v36 = vld [vmem:[#allocation16 + $0x78] sm:$0xff]  ;;  %v6904_v12 = vld [vmem:[#allocation16 + $0x120] sm:$0xff] }
0x1188   :  { %v10784_v14 = vpack.c.bf16 %v6274_v1, %v6268_v35  ;;  %v10776_v22 = vpack.c.bf16 %v6412_v18, %v6406_v31  ;;  %v6876_v35 = vld [vmem:[#allocation16 + $0x40] sm:$0xff]  ;;  %v6878_v31 = vld [vmem:[#allocation16 + $0x50] sm:$0xff]  ;;  %v10860_v1 = vpack.c.bf16 %v6883_v36, %v6881_v26  ;;  %v10882_v41 = vpack.c.bf16 %v6902_v53, %v6900_v2 }
0x1189   :  { %v6880_v18 = vld [vmem:[#allocation16 + $0x60] sm:$0xff]  ;;  %v6906_v3 = vld [vmem:[#allocation16 + $0x130] sm:$0xff] }
0x118a   :  { %v6278_v59 = vpop.f32.mrb[204].mxu1  ;;  %v6416_v46 = vpop.f32.mrb[164].mxu0  ;;  %10777 = vmatprep.subr.bf16.mxu1 %v10776_v22  ;;  %v6885_v22 = vld [vmem:[#allocation16 + $0x88] sm:$0xff]  ;;  %v6908_v26 = vld [vmem:[#allocation16 + $0x140] sm:$0xff]  ;;  %v6910_v36 = vld [vmem:[#allocation16 + $0x150] sm:$0xff] }
0x118b   :  { %v6280_v20 = vpop.f32.mrb[205].mxu1  ;;  %v6418_v44 = vpop.f32.mrb[165].mxu0  ;;  %10779 = vmatpush1.bf16.msra.mxu1 %v10778_v43  ;;  %v10858_v43 = vpack.c.bf16 %v6878_v31, %v6876_v35  ;;  %v10886_v35 = vpack.c.bf16 %v6906_v3, %v6904_v12  ;;  %v7345_v12 = vld [vmem:[#allocation16 + $0x358] sm:$0xff] }
0x118e   :  { %v6284_v62 = vpop.f32.mrb[206].mxu1  ;;  %v6422_v27 = vpop.f32.mrb[166].mxu0 }
0x118f   :  { %v10790_v10 = vpack.c.bf16 %v6284_v62, %v6278_v59  ;;  %v10782_v61 = vpack.c.bf16 %v6422_v27, %v6416_v46  ;;  %v6286_v4 = vpop.f32.mrb[207].mxu1  ;;  %v6424_v24 = vpop.f32.mrb[167].mxu0  ;;  %v6887_v59 = vld [vmem:[#allocation16 + $0x98] sm:$0xff]  ;;  %v13898_v46 = vld [vmem:[#allocation5 + $0x50] sm:$0xff]  ;;  %v6886_v27 = vld [vmem:[#allocation16 + $0x90] sm:$0xff] }
0x1190   :  { %v10788_v37 = vpack.c.bf16 %v6286_v4, %v6280_v20  ;;  %v10780_v23 = vpack.c.bf16 %v6424_v24, %v6418_v44  ;;  %v10864_v44 = vpack.c.bf16 %v6887_v59, %v6885_v22  ;;  %v6884_v62 = vld [vmem:[#allocation16 + $0x80] sm:$0xff]  ;;  %v13903_v4 = vld [vmem:[#allocation5 + $0x58] sm:$0xff]  ;;  %v6915_v59 = vld [vmem:[#allocation16 + $0x178] sm:$0xff] }
0x1191   :  { %v10866_v24 = vpack.c.bf16 %v6886_v27, %v6884_v62  ;;  %v6913_v22 = vld [vmem:[#allocation16 + $0x168] sm:$0xff]  ;;  %v7064_v62 = vld [vmem:[#allocation16 + $0x2f0] sm:$0xff]  ;;  %v6912_v27 = vld [vmem:[#allocation16 + $0x160] sm:$0xff] }
0x1192   :  { %10781 = vmatprep.subr.bf16.mxu1 %v10780_v23  ;;  %v6888_v23 = vld [vmem:[#allocation16 + $0xa0] sm:$0xff] }
0x1193   :  { %10783 = vmatpush1.bf16.msra.mxu1 %v10782_v61  ;;  %v6891_v61 = vld [vmem:[#allocation16 + $0xb8] sm:$0xff] }
0x1194   :  { %10785 = vmatprep.subr.bf16.mxu1 %v10784_v14  ;;  %v6882_v14 = vld [vmem:[#allocation16 + $0x70] sm:$0xff] }
0x1195   :  { %v10862_v20 = vpack.c.bf16 %v6882_v14, %v6880_v18  ;;  %v7065_v18 = vld [vmem:[#allocation16 + $0x2f8] sm:$0xff] }
0x1196   :  { %9268 = vmatmul.mubr.msk.f32.vlgmr.msra.gmra.mrb[208].mxu1 %vm4952_vm9, %v13848_v40 }
0x1197   :  { %10787 = vmatpush1.bf16.msra.mxu1 %v10786_v13  ;;  %6497 = vmatprep.mubr.f32.mxu1 %v12092_v0  ;;  %v13893_v13 = vld [vmem:[#allocation5 + $0x48] sm:$0xff] }
0x1198   :  { %10789 = vmatprep.subr.bf16.mxu1 %v10788_v37 }
0x119a   :  { %9269 = vmatmul.mubr.msk.f32.gmra.mrb[210].mxu1 %vm4952_vm9, %v13853_v47 }
0x119b   :  { %10791 = vmatpush1.bf16.msra.mxu1 %v10790_v10  ;;  %6503 = vmatprep.mubr.f32.mxu1 %v12092_v0  ;;  %v6889_v10 = vld [vmem:[#allocation16 + $0xa8] sm:$0xff] }
0x119c   :  { %v10868_v37 = vpack.c.bf16 %v6891_v61, %v6889_v10  ;;  %v6914_v10 = vld [vmem:[#allocation16 + $0x170] sm:$0xff] }
0x119e   :  { %9270 = vmatmul.mubr.msk.f32.gmra.mrb[212].mxu1 %vm4952_vm9, %v13858_v56 }
0x119f   :  { %6509 = vmatprep.mubr.f32.mxu1 %v12092_v0 }
0x11a2   :  { %9271 = vmatmul.mubr.msk.f32.gmra.mrb[214].mxu1 %vm4952_vm9, %v13863_v33 }
0x11a3   :  { %6580 = vmatprep.mubr.f32.mxu1 %v12092_v0 }
0x11a6   :  { %9272 = vmatmul.mubr.msk.f32.vlgmr.msra.gmra.mrb[208].mxu1 %vm4952_vm9, %v13868_v11 }
0x11a7   :  { %6586 = vmatprep.mubr.f32.mxu1 %v12092_v0 }
0x11aa   :  { %9273 = vmatmul.mubr.msk.f32.gmra.mrb[210].mxu1 %vm4952_vm9, %v13873_v32 }
0x11ab   :  { %6592 = vmatprep.mubr.f32.mxu1 %v12092_v0 }
0x11ae   :  { %9274 = vmatmul.mubr.msk.f32.gmra.mrb[212].mxu1 %vm4952_vm9, %v13878_v55 }
0x11af   :  { %6598 = vmatprep.mubr.f32.mxu1 %v12092_v0 }
0x11b2   :  { %v6720_v25 = vpop.f32.mrb[168].mxu0  ;;  %9275 = vmatmul.mubr.msk.f32.gmra.mrb[214].mxu1 %vm4952_vm9, %v13883_v57 }
0x11b3   :  { %v6722_v16 = vpop.f32.mrb[169].mxu0  ;;  %6807 = vmatprep.mubr.f32.mxu1 %v12092_v0 }
0x11b6   :  { %v6726_v63 = vpop.f32.mrb[170].mxu0 }
0x11b7   :  { %v10842_v29 = vpack.c.bf16 %v6726_v63, %v6720_v25  ;;  %v6728_v19 = vpop.f32.mrb[171].mxu0  ;;  %v6890_v25 = vld [vmem:[#allocation16 + $0xb0] sm:$0xff]  ;;  %v6895_v63 = vld [vmem:[#allocation16 + $0xd8] sm:$0xff] }
0x11b8   :  { %v10840_v30 = vpack.c.bf16 %v6728_v19, %v6722_v16  ;;  %v6893_v16 = vld [vmem:[#allocation16 + $0xc8] sm:$0xff] }
0x11b9   :  { %v10872_v19 = vpack.c.bf16 %v6895_v63, %v6893_v16  ;;  %v6840_v16 = vld [vmem:[#allocation26] sm:$0x3] }
0x11ba   :  { %v6732_v39 = vpop.f32.mrb[172].mxu0  ;;  %10841 = vmatprep.subr.bf16.mxu1 %v10840_v30  ;;  %v6892_v30 = vld [vmem:[#allocation16 + $0xc0] sm:$0xff]  ;;  %v6845_v63 = vrot.slane %v6840_v16, %v12576_v42 }
0x11bb   :  { %v6734_v15 = vpop.f32.mrb[173].mxu0  ;;  %10843 = vmatpush1.bf16.msra.mxu1 %v10842_v29  ;;  %v10870_v29 = vpack.c.bf16 %v6890_v25, %v6888_v23  ;;  %v7337_v23 = vld [vmem:[#allocation16 + $0x318] sm:$0xff] }
0x11be   :  { %v6738_v6 = vpop.f32.mrb[174].mxu0 }
0x11bf   :  { %v10846_v21 = vpack.c.bf16 %v6738_v6, %v6732_v39  ;;  %v6740_v8 = vpop.f32.mrb[175].mxu0  ;;  %v6894_v39 = vld [vmem:[#allocation16 + $0xd0] sm:$0xff] }
0x11c0   :  { %v10844_v50 = vpack.c.bf16 %v6740_v8, %v6734_v15  ;;  %v6897_v15 = vld [vmem:[#allocation16 + $0xe8] sm:$0xff]  ;;  %v10874_v60 = vpack.c.bf16 %v6894_v39, %v6892_v30  ;;  %v6898_v8 = vld [vmem:[#allocation16 + $0xf0] sm:$0xff] }
0x11c1   :  { %v10876_v6 = vpack.c.bf16 %v6899_v58, %v6897_v15  ;;  %v7334_v15 = vld [vmem:[#allocation16 + $0x300] sm:$0xff]  ;;  %v7336_v58 = vld [vmem:[#allocation16 + $0x310] sm:$0xff] }
0x11c2   :  { %10845 = vmatprep.subr.bf16.mxu1 %v10844_v50  ;;  %v6901_v50 = vld [vmem:[#allocation16 + $0x108] sm:$0xff] }
0x11c3   :  { %10847 = vmatpush1.bf16.msra.mxu1 %v10846_v21  ;;  %v6896_v21 = vld [vmem:[#allocation16 + $0xe0] sm:$0xff] }
0x11c4   :  { %10849 = vmatprep.subr.bf16.mxu1 %v10848_v54  ;;  %v6903_v54 = vld [vmem:[#allocation16 + $0x118] sm:$0xff]  ;;  %v10878_v5 = vpack.c.bf16 %v6898_v8, %v6896_v21 }
0x11c5   :  { %v10880_v38 = vpack.c.bf16 %v6903_v54, %v6901_v50  ;;  %v7341_v21 = vld [vmem:[#allocation16 + $0x338] sm:$0xff]  ;;  %v10962_v54 = vpack.c.bf16 %v7336_v58, %v7334_v15  ;;  %v7352_v15 = vld [vmem:[#allocation16 + $0x390] sm:$0xff]  ;;  %v7355_v58 = vld [vmem:[#allocation16 + $0x3a8] sm:$0xff] }
0x11c6   :  { %9280 = vmatmul.mubr.msk.f32.vlgmr.msra.gmra.mrb[208].mxu1 %vm4952_vm9, %v13888_v34 }
0x11c7   :  { %6813 = vmatprep.mubr.f32.mxu1 %v12092_v0  ;;  %10851 = vmatpush1.bf16.msra.mxu1 %v10850_v7  ;;  %v6905_v7 = vld [vmem:[#allocation16 + $0x128] sm:$0xff] }
0x11c8   :  { %10853 = vmatprep.subr.bf16.mxu1 %v10852_v49  ;;  %v6907_v49 = vld [vmem:[#allocation16 + $0x138] sm:$0xff] }
0x11c9   :  { %v10884_v48 = vpack.c.bf16 %v6907_v49, %v6905_v7  ;;  %v7338_v7 = vld [vmem:[#allocation16 + $0x320] sm:$0xff]  ;;  %v7340_v49 = vld [vmem:[#allocation16 + $0x330] sm:$0xff] }
0x11ca   :  { %9281 = vmatmul.mubr.msk.f32.gmra.mrb[210].mxu1 %vm4952_vm9, %v13893_v13 }
0x11cb   :  { %6819 = vmatprep.mubr.f32.mxu1 %v12092_v0  ;;  %10855 = vmatpush1.bf16.msra.mxu1 %v10854_v51  ;;  %v6909_v51 = vld [vmem:[#allocation16 + $0x148] sm:$0xff] }
0x11cc   :  { %10857 = vmatprep.subr.bf16.mxu1 %v10856_v52  ;;  %v6911_v52 = vld [vmem:[#allocation16 + $0x158] sm:$0xff] }
0x11cd   :  { %v10888_v31 = vpack.c.bf16 %v6911_v52, %v6909_v51  ;;  %v10966_v52 = vpack.c.bf16 %v7340_v49, %v7338_v7  ;;  %v7358_v49 = vld [vmem:[#allocation16 + $0x3c0] sm:$0xff] }
0x11ce   :  { %9282 = vmatmul.mubr.msk.f32.gmra.mrb[212].mxu1 %vm4952_vm9, %v13898_v46 }
0x11cf   :  { %6825 = vmatprep.mubr.f32.mxu1 %v12092_v0  ;;  %10859 = vmatpush1.bf16.msra.mxu1 %v10858_v43  ;;  %v10890_v43 = vpack.c.bf16 %v6910_v36, %v6908_v26 }
0x11d0   :  { %10861 = vmatprep.subr.bf16.mxu1 %v10860_v1  ;;  %v7063_v1 = vld [vmem:[#allocation16 + $0x2e8] sm:$0xff] }
0x11d1   :  { %v10940_v14 = vpack.c.bf16 %v7065_v18, %v7063_v1  ;;  %v7344_v1 = vld [vmem:[#allocation16 + $0x350] sm:$0xff] }
0x11d2   :  { %9283 = vmatmul.mubr.msk.f32.gmra.mrb[214].mxu1 %vm4952_vm9, %v13903_v4 }
0x11d3   :  { %10863 = vmatpush1.bf16.msra.mxu1 %v10862_v20  ;;  %v7062_v20 = vld [vmem:[#allocation16 + $0x2e0] sm:$0xff]  ;;  %10941 = vmatprep.subr.bf16.mxu0 %v10940_v14  ;;  %v7347_v14 = vld [vmem:[#allocation16 + $0x368] sm:$0xff] }
0x11d4   :  { %10865 = vmatprep.subr.bf16.mxu1 %v10864_v44  ;;  %v10892_v44 = vpack.c.bf16 %v6915_v59, %v6913_v22  ;;  %v10942_v61 = vpack.c.bf16 %v7064_v62, %v7062_v20  ;;  %v7349_v22 = vld [vmem:[#allocation16 + $0x378] sm:$0xff] }
0x11d6   :  { %10943 = vmatpush1.bf16.msra.mxu0 %v10942_v61  ;;  %v10972_v61 = vpack.c.bf16 %v7349_v22, %v7347_v14  ;;  %v7368_v14 = vld [vmem:[#allocation16 + $0x410] sm:$0xff]  ;;  %v7371_v22 = vld [vmem:[#allocation16 + $0x428] sm:$0xff] }
0x11d7   :  { %10867 = vmatpush1.bf16.msra.mxu1 %v10866_v24  ;;  %v10894_v24 = vpack.c.bf16 %v6914_v10, %v6912_v27 }
0x11d8   :  { %10869 = vmatprep.subr.bf16.mxu1 %v10868_v37  ;;  %v7335_v37 = vld [vmem:[#allocation16 + $0x308] sm:$0xff] }
0x11d9   :  { %v10960_v25 = vpack.c.bf16 %v7337_v23, %v7335_v37  ;;  %v7348_v37 = vld [vmem:[#allocation16 + $0x370] sm:$0xff] }
0x11db   :  { %10871 = vmatpush1.bf16.msra.mxu1 %v10870_v29  ;;  %10961 = vmatprep.subr.bf16.mxu0 %v10960_v25  ;;  %v6849_v29 = vrot.slane %v6840_v16, %v12578_v45  ;;  %v7351_v25 = vld [vmem:[#allocation16 + $0x388] sm:$0xff]  ;;  %v7353_v16 = vld [vmem:[#allocation16 + $0x398] sm:$0xff] }
0x11dc   :  { %10873 = vmatprep.subr.bf16.mxu1 %v10872_v19 }
0x11df   :  { %10875 = vmatpush1.bf16.msra.mxu1 %v10874_v60 }
0x11e0   :  { %10877 = vmatprep.subr.bf16.mxu1 %v10876_v6  ;;  %v7339_v6 = vld [vmem:[#allocation16 + $0x328] sm:$0xff] }
0x11e1   :  { %v10964_v53 = vpack.c.bf16 %v7341_v21, %v7339_v6 }
0x11e3   :  { %10879 = vmatpush1.bf16.msra.mxu1 %v10878_v5 }
0x11e4   :  { %10881 = vmatprep.subr.bf16.mxu1 %v10880_v38 }
0x11e7   :  { %10883 = vmatpush1.bf16.msra.mxu1 %v10882_v41 }
0x11e8   :  { %10885 = vmatprep.subr.bf16.mxu1 %v10884_v48  ;;  %v7343_v48 = vld [vmem:[#allocation16 + $0x348] sm:$0xff] }
0x11e9   :  { %v10968_v36 = vpack.c.bf16 %v7345_v12, %v7343_v48  ;;  %v7363_v48 = vld [vmem:[#allocation16 + $0x3e8] sm:$0xff]  ;;  %v7365_v12 = vld [vmem:[#allocation16 + $0x3f8] sm:$0xff] }
0x11eb   :  { %10887 = vmatpush1.bf16.msra.mxu1 %v10886_v35 }
0x11ec   :  { %10889 = vmatprep.subr.bf16.mxu1 %v10888_v31 }
0x11ef   :  { %10891 = vmatpush1.bf16.msra.mxu1 %v10890_v43  ;;  %v7342_v43 = vld [vmem:[#allocation16 + $0x340] sm:$0xff] }
0x11f0   :  { %10893 = vmatprep.subr.bf16.mxu1 %v10892_v44  ;;  %v10970_v44 = vpack.c.bf16 %v7344_v1, %v7342_v43 }
0x11f3   :  { %10895 = vmatpush1.bf16.msra.mxu1 %v10894_v24  ;;  %v7346_v24 = vld [vmem:[#allocation16 + $0x360] sm:$0xff] }
0x1299   :  { %v6809_v19 = vpop.f32.mrb[208].mxu1 }
0x129a   :  { %v6852_v30 = vadd.f32 %v6845_v63, %v6809_v19  ;;  %v6811_v39 = vpop.f32.mrb[209].mxu1 }
0x129b   :  { %v6853_v60 = vadd.f32 %v6849_v29, %v6811_v39  ;;  %v7350_v39 = vld [vmem:[#allocation16 + $0x380] sm:$0xff] }
0x129c   :  { %v13911_v5 = vmax.f32 %v6852_v30, 0.0  ;;  %v10978_v6 = vpack.c.bf16 %v7352_v15, %v7350_v39  ;;  %v7381_v39 = vld [vmem:[#allocation16 + $0x478] sm:$0xff] }
0x129d   :  { %v13909_v8 = vmax.f32 %v6853_v60, 0.0  ;;  %v6815_v50 = vpop.f32.mrb[210].mxu1  ;;  %v7357_v60 = vld [vmem:[#allocation16 + $0x3b8] sm:$0xff] }
0x129e   :  { %v6854_v38 = vadd.f32 %v6845_v63, %v6815_v50  ;;  %v6817_v2 = vpop.f32.mrb[211].mxu1  ;;  %v10980_v21 = vpack.c.bf16 %v7357_v60, %v7355_v58  ;;  %v7354_v50 = vld [vmem:[#allocation16 + $0x3a0] sm:$0xff] }
0x129f   :  { %v6855_v41 = vadd.f32 %v6849_v29, %v6817_v2  ;;  %9284 = vmatprep.mubr.msk.f32.mxu1 %vm5459_vm10, %v13909_v8  ;;  %9288 = vmatprep.mubr.msk.f32.mxu0 %vm5459_vm10, %v13909_v8  ;;  %v7361_v2 = vld [vmem:[#allocation16 + $0x3d8] sm:$0xff]  ;;  %v7378_v60 = vld [vmem:[#allocation16 + $0x460] sm:$0xff] }
0x12a0   :  { %6993 = vmatmul.mubr.f32.vlgmr.msra.gmra.mrb[216].mxu1 %v13911_v5  ;;  %7131 = vmatmul.mubr.f32.vlgmr.msra.gmra.mrb[176].mxu0 %v13911_v5  ;;  %v13921_v35 = vmax.f32 %v6854_v38, 0.0  ;;  %v7359_v38 = vld [vmem:[#allocation16 + $0x3c8] sm:$0xff] }
0x12a1   :  { %v13919_v3 = vmax.f32 %v6855_v41, 0.0  ;;  %10963 = vmatpush1.bf16.msra.mxu0 %v10962_v54  ;;  %v6821_v51 = vpop.f32.mrb[212].mxu1  ;;  %v7356_v54 = vld [vmem:[#allocation16 + $0x3b0] sm:$0xff]  ;;  %v10984_v7 = vpack.c.bf16 %v7361_v2, %v7359_v38 }
0x12a2   :  { %v6856_v31 = vadd.f32 %v6845_v63, %v6821_v51  ;;  %v6823_v26 = vpop.f32.mrb[213].mxu1  ;;  %10965 = vmatprep.subr.bf16.mxu0 %v10964_v53  ;;  %v10982_v53 = vpack.c.bf16 %v7356_v54, %v7354_v50  ;;  %v7360_v41 = vld [vmem:[#allocation16 + $0x3d0] sm:$0xff] }
0x12a3   :  { %v6857_v18 = vadd.f32 %v6849_v29, %v6823_v26  ;;  %9285 = vmatprep.mubr.msk.f32.mxu1 %vm5459_vm10, %v13919_v3  ;;  %9289 = vmatprep.mubr.msk.f32.mxu0 %vm5459_vm10, %v13919_v3  ;;  %v10986_v51 = vpack.c.bf16 %v7360_v41, %v7358_v49  ;;  %v7367_v26 = vld [vmem:[#allocation16 + $0x408] sm:$0xff] }
0x12a4   :  { %6999 = vmatmul.mubr.f32.gmra.mrb[218].mxu1 %v13921_v35  ;;  %7137 = vmatmul.mubr.f32.gmra.mrb[178].mxu0 %v13921_v35  ;;  %v13931_v62 = vmax.f32 %v6856_v31, 0.0  ;;  %v7364_v31 = vld [vmem:[#allocation16 + $0x3f0] sm:$0xff] }
0x12a5   :  { %v13929_v59 = vmax.f32 %v6857_v18, 0.0  ;;  %10967 = vmatpush1.bf16.msra.mxu0 %v10966_v52  ;;  %v6827_v20 = vpop.f32.mrb[214].mxu1  ;;  %v7362_v52 = vld [vmem:[#allocation16 + $0x3e0] sm:$0xff] }
0x12a6   :  { %v6858_v27 = vadd.f32 %v6845_v63, %v6827_v20  ;;  %v6829_v10 = vpop.f32.mrb[215].mxu1  ;;  %10969 = vmatprep.subr.bf16.mxu0 %v10968_v36  ;;  %v10974_v63 = vpack.c.bf16 %v7348_v37, %v7346_v24  ;;  %v7369_v36 = vld [vmem:[#allocation16 + $0x418] sm:$0xff]  ;;  %v10990_v43 = vpack.c.bf16 %v7364_v31, %v7362_v52  ;;  %v7366_v18 = vld [vmem:[#allocation16 + $0x400] sm:$0xff]  ;;  %v7375_v24 = vld [vmem:[#allocation16 + $0x448] sm:$0xff] }
0x12a7   :  { %v6859_v23 = vadd.f32 %v6849_v29, %v6829_v10  ;;  %9286 = vmatprep.mubr.msk.f32.mxu1 %vm5459_vm10, %v13929_v59  ;;  %9290 = vmatprep.mubr.msk.f32.mxu0 %vm5459_vm10, %v13929_v59  ;;  %v10976_v29 = vpack.c.bf16 %v7353_v16, %v7351_v25  ;;  %v10992_v1 = vpack.c.bf16 %v7369_v36, %v7367_v26  ;;  %v7373_v20 = vld [vmem:[#allocation16 + $0x438] sm:$0xff]  ;;  %v7370_v10 = vld [vmem:[#allocation16 + $0x420] sm:$0xff] }
0x12a8   :  { %7005 = vmatmul.mubr.f32.gmra.mrb[220].mxu1 %v13931_v62  ;;  %7143 = vmatmul.mubr.f32.gmra.mrb[180].mxu0 %v13931_v62  ;;  %v13941_v30 = vmax.f32 %v6858_v27, 0.0  ;;  %v10996_v27 = vpack.c.bf16 %v7373_v20, %v7371_v22  ;;  %v7377_v37 = vld [vmem:[#allocation16 + $0x458] sm:$0xff]  ;;  %v7374_v16 = vld [vmem:[#allocation16 + $0x440] sm:$0xff] }
0x12a9   :  { %v13939_v19 = vmax.f32 %v6859_v23, 0.0  ;;  %10971 = vmatpush1.bf16.msra.mxu0 %v10970_v44  ;;  %v10994_v44 = vpack.c.bf16 %v7368_v14, %v7366_v18  ;;  %v11000_v25 = vpack.c.bf16 %v7377_v37, %v7375_v24  ;;  %v7597_v18 = vld [vmem:[%s14236_s13 + $0x8] sm:$0xff]  ;;  %v7599_v14 = vld [vmem:[%s14236_s13 + $0x18] sm:$0xff] }
0x12aa   :  { %10973 = vmatprep.subr.bf16.mxu0 %v10972_v61  ;;  %v7372_v61 = vld [vmem:[#allocation16 + $0x430] sm:$0xff]  ;;  %v7601_v24 = vld [vmem:[%s14236_s13 + $0x28] sm:$0xff]  ;;  %v7603_v37 = vld [vmem:[%s14236_s13 + $0x38] sm:$0xff] }
0x12ab   :  { %9287 = vmatprep.mubr.msk.f32.mxu1 %vm5459_vm10, %v13939_v19  ;;  %9291 = vmatprep.mubr.msk.f32.mxu0 %vm5459_vm10, %v13939_v19  ;;  %v10998_v23 = vpack.c.bf16 %v7372_v61, %v7370_v10  ;;  %v7596_v10 = vld [vmem:[%s14236_s13] sm:$0xff]  ;;  %v7598_v61 = vld [vmem:[%s14236_s13 + $0x10] sm:$0xff] }
0x12ac   :  { %7011 = vmatmul.mubr.f32.gmra.mrb[222].mxu1 %v13941_v30  ;;  %7149 = vmatmul.mubr.f32.gmra.mrb[182].mxu0 %v13941_v30 }
0x12ad   :  { %10975 = vmatpush1.bf16.msra.mxu0 %v10974_v63  ;;  %9300 = vmatprep.mubr.msk.f32.mxu0 %vm5459_vm10, %v13909_v8  ;;  %v10988_v8 = vpack.c.bf16 %v7365_v12, %v7363_v48  ;;  %v7376_v63 = vld [vmem:[#allocation16 + $0x450] sm:$0xff] }
0x12ae   :  { %10977 = vmatprep.subr.bf16.mxu0 %v10976_v29  ;;  %7219 = vmatprep.mubr.f32.mxu1 %v12092_v0  ;;  %v7379_v29 = vld [vmem:[#allocation16 + $0x468] sm:$0xff]  ;;  %v11002_v15 = vpack.c.bf16 %v7376_v63, %v7374_v16  ;;  %v7600_v16 = vld [vmem:[%s14236_s13 + $0x20] sm:$0xff]  ;;  %v7602_v63 = vld [vmem:[%s14236_s13 + $0x30] sm:$0xff] }
0x12af   :  { %v11004_v58 = vpack.c.bf16 %v7381_v39, %v7379_v29  ;;  %v7605_v29 = vld [vmem:[%s14236_s13 + $0x48] sm:$0xff]  ;;  %v7607_v39 = vld [vmem:[%s14236_s13 + $0x58] sm:$0xff] }
0x12b1   :  { %10979 = vmatpush1.bf16.msra.mxu0 %v10978_v6  ;;  %v7380_v6 = vld [vmem:[#allocation16 + $0x470] sm:$0xff] }
0x12b2   :  { %10981 = vmatprep.subr.bf16.mxu0 %v10980_v21  ;;  %v11006_v21 = vpack.c.bf16 %v7380_v6, %v7378_v60  ;;  %v7604_v60 = vld [vmem:[%s14236_s13 + $0x40] sm:$0xff]  ;;  %v7606_v6 = vld [vmem:[%s14236_s13 + $0x50] sm:$0xff] }
0x12b5   :  { %10983 = vmatpush1.bf16.msra.mxu0 %v10982_v53 }
0x12b6   :  { %10985 = vmatprep.subr.bf16.mxu0 %v10984_v7 }
0x12b9   :  { %10987 = vmatpush1.bf16.msra.mxu0 %v10986_v51 }
0x12ba   :  { %10989 = vmatprep.subr.bf16.mxu0 %v10988_v8 }
0x12bd   :  { %10991 = vmatpush1.bf16.msra.mxu0 %v10990_v43 }
0x12be   :  { %10993 = vmatprep.subr.bf16.mxu0 %v10992_v1 }
0x12c1   :  { %10995 = vmatpush1.bf16.msra.mxu0 %v10994_v44 }
0x12c2   :  { %10997 = vmatprep.subr.bf16.mxu0 %v10996_v27  ;;  %v11016_v27 = vpack.c.bf16 %v7599_v14, %v7597_v18  ;;  %v7635_v18 = vld [vmem:[%s14236_s13 + $0x138] sm:$0xff] }
0x12c5   :  { %10999 = vmatpush1.bf16.msra.mxu0 %v10998_v23  ;;  %v11018_v23 = vpack.c.bf16 %v7598_v61, %v7596_v10 }
0x12c6   :  { %11001 = vmatprep.subr.bf16.mxu0 %v11000_v25  ;;  %v11020_v25 = vpack.c.bf16 %v7603_v37, %v7601_v24  ;;  %v7636_v24 = vld [vmem:[%s14236_s13 + $0x140] sm:$0xff]  ;;  %v7638_v37 = vld [vmem:[%s14236_s13 + $0x150] sm:$0xff] }
0x12c9   :  { %11003 = vmatpush1.bf16.msra.mxu0 %v11002_v15  ;;  %v11022_v15 = vpack.c.bf16 %v7602_v63, %v7600_v16  ;;  %v7643_v16 = vld [vmem:[%s14236_s13 + $0x178] sm:$0xff] }
0x12ca   :  { %11005 = vmatprep.subr.bf16.mxu0 %v11004_v58  ;;  %v11024_v58 = vpack.c.bf16 %v7607_v39, %v7605_v29  ;;  %v7640_v29 = vld [vmem:[%s14236_s13 + $0x160] sm:$0xff]  ;;  %v7642_v39 = vld [vmem:[%s14236_s13 + $0x170] sm:$0xff] }
0x12cd   :  { %11007 = vmatpush1.bf16.msra.mxu0 %v11006_v21  ;;  %v7609_v21 = vld [vmem:[%s14236_s13 + $0x68] sm:$0xff] }
0x12ce   :  { %11064 = vmatprep.subr.bf16.mxu0 %v12094_v28 }
0x12d0   :  { %7447 = vmatmul.mubr.f32.vlgmr.msra.gmra.mrb[184].mxu0 %v13911_v5 }
0x12d1   :  { %9301 = vmatprep.mubr.msk.f32.mxu0 %vm5459_vm10, %v13919_v3 }
0x12d4   :  { %7453 = vmatmul.mubr.f32.gmra.mrb[186].mxu0 %v13921_v35 }
0x12d5   :  { %9302 = vmatprep.mubr.msk.f32.mxu0 %vm5459_vm10, %v13929_v59 }
0x12d8   :  { %7459 = vmatmul.mubr.f32.gmra.mrb[188].mxu0 %v13931_v62 }
0x12d9   :  { %9303 = vmatprep.mubr.msk.f32.mxu0 %vm5459_vm10, %v13939_v19 }
0x12dc   :  { %7465 = vmatmul.mubr.f32.gmra.mrb[190].mxu0 %v13941_v30 }
0x1373   :  { %v6994_v50 = vpop.f32.mrb[216].mxu1  ;;  %v7132_v54 = vpop.f32.mrb[176].mxu0 }
0x1374   :  { %v6996_v38 = vpop.f32.mrb[217].mxu1  ;;  %v7134_v2 = vpop.f32.mrb[177].mxu0 }
0x1377   :  { %v7000_v5 = vpop.f32.mrb[218].mxu1  ;;  %v7138_v53 = vpop.f32.mrb[178].mxu0 }
0x1378   :  { %v10954_v7 = vpack.c.bf16 %v7000_v5, %v6994_v50  ;;  %v10946_v3 = vpack.c.bf16 %v7138_v53, %v7132_v54  ;;  %v7002_v49 = vpop.f32.mrb[219].mxu1  ;;  %v7140_v35 = vpop.f32.mrb[179].mxu0  ;;  %v7611_v50 = vld [vmem:[%s14236_s13 + $0x78] sm:$0xff]  ;;  %v7613_v5 = vld [vmem:[%s14236_s13 + $0x88] sm:$0xff] }
0x1379   :  { %v10952_v41 = vpack.c.bf16 %v7002_v49, %v6996_v38  ;;  %v10944_v48 = vpack.c.bf16 %v7140_v35, %v7134_v2  ;;  %v11028_v54 = vpack.c.bf16 %v7611_v50, %v7609_v21  ;;  %v7608_v38 = vld [vmem:[%s14236_s13 + $0x60] sm:$0xff]  ;;  %v7610_v2 = vld [vmem:[%s14236_s13 + $0x70] sm:$0xff]  ;;  %v7615_v53 = vld [vmem:[%s14236_s13 + $0x98] sm:$0xff] }
0x137a   :  { %v7614_v49 = vld [vmem:[%s14236_s13 + $0x90] sm:$0xff]  ;;  %v7617_v35 = vld [vmem:[%s14236_s13 + $0xa8] sm:$0xff]  ;;  %v7756_v50 = vld [vmem:[%s14237_s24 + $0x18] sm:$0xff] }
0x137b   :  { %v7006_v59 = vpop.f32.mrb[220].mxu1  ;;  %v7144_v12 = vpop.f32.mrb[180].mxu0  ;;  %10945 = vmatprep.subr.bf16.mxu1 %v10944_v48 }
0x137c   :  { %v7008_v62 = vpop.f32.mrb[221].mxu1  ;;  %v7146_v51 = vpop.f32.mrb[181].mxu0  ;;  %10947 = vmatpush1.bf16.msra.mxu1 %v10946_v3  ;;  %v7612_v3 = vld [vmem:[%s14236_s13 + $0x80] sm:$0xff] }
0x137f   :  { %v7012_v19 = vpop.f32.mrb[222].mxu1  ;;  %v7150_v30 = vpop.f32.mrb[182].mxu0 }
0x1380   :  { %v10958_v8 = vpack.c.bf16 %v7012_v19, %v7006_v59  ;;  %v10950_v52 = vpack.c.bf16 %v7150_v30, %v7144_v12  ;;  %v7014_v31 = vpop.f32.mrb[223].mxu1  ;;  %v7152_v26 = vpop.f32.mrb[183].mxu0  ;;  %v7616_v59 = vld [vmem:[%s14236_s13 + $0xa0] sm:$0xff]  ;;  %v7618_v12 = vld [vmem:[%s14236_s13 + $0xb0] sm:$0xff] }
0x1381   :  { %v10956_v36 = vpack.c.bf16 %v7014_v31, %v7008_v62  ;;  %v10948_v43 = vpack.c.bf16 %v7152_v26, %v7146_v51  ;;  %v7621_v62 = vld [vmem:[%s14236_s13 + $0xc8] sm:$0xff]  ;;  %v7623_v51 = vld [vmem:[%s14236_s13 + $0xd8] sm:$0xff]  ;;  %v11038_v19 = vpack.c.bf16 %v7618_v12, %v7616_v59 }
0x1382   :  { %v11040_v30 = vpack.c.bf16 %v7623_v51, %v7621_v62  ;;  %v7627_v31 = vld [vmem:[%s14236_s13 + $0xf8] sm:$0xff]  ;;  %v7766_v59 = vld [vmem:[%s14237_s24 + $0x68] sm:$0xff]  ;;  %v7767_v62 = vld [vmem:[%s14237_s24 + $0x70] sm:$0xff] }
0x1383   :  { %10949 = vmatprep.subr.bf16.mxu1 %v10948_v43  ;;  %v7624_v43 = vld [vmem:[%s14236_s13 + $0xe0] sm:$0xff]  ;;  %v7768_v51 = vld [vmem:[%s14237_s24 + $0x78] sm:$0xff] }
0x1384   :  { %10951 = vmatpush1.bf16.msra.mxu1 %v10950_v52  ;;  %v7625_v52 = vld [vmem:[%s14236_s13 + $0xe8] sm:$0xff] }
0x1385   :  { %10953 = vmatprep.subr.bf16.mxu1 %v10952_v41  ;;  %v7619_v41 = vld [vmem:[%s14236_s13 + $0xb8] sm:$0xff] }
0x1386   :  { %v11036_v48 = vpack.c.bf16 %v7619_v41, %v7617_v35  ;;  %v7763_v35 = vld [vmem:[%s14237_s24 + $0x50] sm:$0xff]  ;;  %v7764_v41 = vld [vmem:[%s14237_s24 + $0x58] sm:$0xff] }
0x1387   :  { %9292 = vmatmul.mubr.msk.f32.vlgmr.msra.gmra.mrb[224].mxu1 %vm4952_vm9, %v13848_v40 }
0x1388   :  { %10955 = vmatpush1.bf16.msra.mxu1 %v10954_v7  ;;  %7225 = vmatprep.mubr.f32.mxu1 %v12092_v0  ;;  %v11032_v7 = vpack.c.bf16 %v7615_v53, %v7613_v5  ;;  %v7759_v5 = vld [vmem:[%s14237_s24 + $0x30] sm:$0xff]  ;;  %v7760_v53 = vld [vmem:[%s14237_s24 + $0x38] sm:$0xff] }
0x1389   :  { %10957 = vmatprep.subr.bf16.mxu1 %v10956_v36  ;;  %v11044_v36 = vpack.c.bf16 %v7627_v31, %v7625_v52  ;;  %v7771_v52 = vld [vmem:[%s14237_s24 + $0x90] sm:$0xff]  ;;  %v7772_v31 = vld [vmem:[%s14237_s24 + $0x98] sm:$0xff] }
0x138b   :  { %9293 = vmatmul.mubr.msk.f32.gmra.mrb[226].mxu1 %vm4952_vm9, %v13853_v47 }
0x138c   :  { %10959 = vmatpush1.bf16.msra.mxu1 %v10958_v8  ;;  %7231 = vmatprep.mubr.f32.mxu1 %v12092_v0  ;;  %v7620_v8 = vld [vmem:[%s14236_s13 + $0xc0] sm:$0xff] }
0x138f   :  { %9294 = vmatmul.mubr.msk.f32.gmra.mrb[228].mxu1 %vm4952_vm9, %v13858_v56 }
0x1390   :  { %7237 = vmatprep.mubr.f32.mxu1 %v12092_v0 }
0x1393   :  { %9295 = vmatmul.mubr.msk.f32.gmra.mrb[230].mxu1 %vm4952_vm9, %v13863_v33 }
0x1394   :  { %7308 = vmatprep.mubr.f32.mxu1 %v12092_v0 }
0x1397   :  { %9296 = vmatmul.mubr.msk.f32.vlgmr.msra.gmra.mrb[224].mxu1 %vm4952_vm9, %v13868_v11 }
0x1398   :  { %7314 = vmatprep.mubr.f32.mxu1 %v12092_v0 }
0x139b   :  { %9297 = vmatmul.mubr.msk.f32.gmra.mrb[226].mxu1 %vm4952_vm9, %v13873_v32 }
0x139c   :  { %7320 = vmatprep.mubr.f32.mxu1 %v12092_v0 }
0x139f   :  { %9298 = vmatmul.mubr.msk.f32.gmra.mrb[228].mxu1 %vm4952_vm9, %v13878_v55 }
0x13a0   :  { %7326 = vmatprep.mubr.f32.mxu1 %v12092_v0 }
0x13a3   :  { %v7448_v40 = vpop.f32.mrb[184].mxu0  ;;  %9299 = vmatmul.mubr.msk.f32.gmra.mrb[230].mxu1 %vm4952_vm9, %v13883_v57 }
0x13a4   :  { %v7450_v47 = vpop.f32.mrb[185].mxu0  ;;  %7535 = vmatprep.mubr.f32.mxu1 %v12092_v0 }
0x13a7   :  { %v7454_v56 = vpop.f32.mrb[186].mxu0 }
0x13a8   :  { %v11010_v33 = vpack.c.bf16 %v7454_v56, %v7448_v40  ;;  %v7456_v11 = vpop.f32.mrb[187].mxu0  ;;  %v7626_v40 = vld [vmem:[%s14236_s13 + $0xf0] sm:$0xff]  ;;  %v7631_v56 = vld [vmem:[%s14236_s13 + $0x118] sm:$0xff] }
0x13a9   :  { %v11008_v32 = vpack.c.bf16 %v7456_v11, %v7450_v47  ;;  %v7629_v47 = vld [vmem:[%s14236_s13 + $0x108] sm:$0xff] }
0x13aa   :  { %v11048_v11 = vpack.c.bf16 %v7631_v56, %v7629_v47  ;;  %v7568_v47 = vld [vmem:[#allocation28] sm:$0x3] }
0x13ab   :  { %v7460_v1 = vpop.f32.mrb[188].mxu0  ;;  %11009 = vmatprep.subr.bf16.mxu1 %v11008_v32  ;;  %v7628_v32 = vld [vmem:[%s14236_s13 + $0x100] sm:$0xff]  ;;  %v7573_v56 = vrot.slane %v7568_v47, %v12576_v42 }
0x13ac   :  { %v7462_v55 = vpop.f32.mrb[189].mxu0  ;;  %11011 = vmatpush1.bf16.msra.mxu1 %v11010_v33  ;;  %v11046_v33 = vpack.c.bf16 %v7626_v40, %v7624_v43  ;;  %v7774_v43 = vld [vmem:[%s14237_s24 + $0xa8] sm:$0xff] }
0x13af   :  { %v7466_v57 = vpop.f32.mrb[190].mxu0 }
0x13b0   :  { %v11014_v22 = vpack.c.bf16 %v7466_v57, %v7460_v1  ;;  %v7468_v20 = vpop.f32.mrb[191].mxu0  ;;  %v7630_v1 = vld [vmem:[%s14236_s13 + $0x110] sm:$0xff] }
0x13b1   :  { %v11012_v44 = vpack.c.bf16 %v7468_v20, %v7462_v55  ;;  %v7633_v55 = vld [vmem:[%s14236_s13 + $0x128] sm:$0xff]  ;;  %v11050_v14 = vpack.c.bf16 %v7630_v1, %v7628_v32  ;;  %v7634_v20 = vld [vmem:[%s14236_s13 + $0x130] sm:$0xff] }
0x13b2   :  { %v11052_v57 = vpack.c.bf16 %v7635_v18, %v7633_v55 }
0x13b3   :  { %11013 = vmatprep.subr.bf16.mxu1 %v11012_v44  ;;  %v7637_v44 = vld [vmem:[%s14236_s13 + $0x148] sm:$0xff] }
0x13b4   :  { %11015 = vmatpush1.bf16.msra.mxu1 %v11014_v22  ;;  %v7632_v22 = vld [vmem:[%s14236_s13 + $0x120] sm:$0xff] }
0x13b5   :  { %11017 = vmatprep.subr.bf16.mxu1 %v11016_v27  ;;  %v7639_v27 = vld [vmem:[%s14236_s13 + $0x158] sm:$0xff]  ;;  %v11054_v10 = vpack.c.bf16 %v7634_v20, %v7632_v22 }
0x13b6   :  { %v11056_v61 = vpack.c.bf16 %v7639_v27, %v7637_v44 }
0x13b7   :  { %9304 = vmatmul.mubr.msk.f32.vlgmr.msra.gmra.mrb[224].mxu1 %vm4952_vm9, %v13888_v34  ;;  %v11026_v34 = vpack.c.bf16 %v7606_v6, %v7604_v60  ;;  %v7754_v60 = vld [vmem:[%s14237_s24 + $0x8] sm:$0xff]  ;;  %v7755_v6 = vld [vmem:[%s14237_s24 + $0x10] sm:$0xff] }
0x13b8   :  { %7541 = vmatprep.mubr.f32.mxu1 %v12092_v0  ;;  %11019 = vmatpush1.bf16.msra.mxu1 %v11018_v23  ;;  %v11058_v23 = vpack.c.bf16 %v7638_v37, %v7636_v24 }
0x13b9   :  { %11021 = vmatprep.subr.bf16.mxu1 %v11020_v25  ;;  %v7641_v25 = vld [vmem:[%s14236_s13 + $0x168] sm:$0xff] }
0x13ba   :  { %v11060_v63 = vpack.c.bf16 %v7643_v16, %v7641_v25 }
0x13bb   :  { %9305 = vmatmul.mubr.msk.f32.gmra.mrb[226].mxu1 %vm4952_vm9, %v13893_v13  ;;  %v11030_v13 = vpack.c.bf16 %v7610_v2, %v7608_v38  ;;  %v7758_v38 = vld [vmem:[%s14237_s24 + $0x28] sm:$0xff] }
0x13bc   :  { %7547 = vmatprep.mubr.f32.mxu1 %v12092_v0  ;;  %11023 = vmatpush1.bf16.msra.mxu1 %v11022_v15  ;;  %v11062_v15 = vpack.c.bf16 %v7642_v39, %v7640_v29 }
0x13bd   :  { %11025 = vmatprep.subr.bf16.mxu1 %v11024_v58  ;;  %v7753_v58 = vld [vmem:[%s14237_s24] sm:$0xff] }
0x13be   :  { %v11065_v21 = vpack.c.bf16 %v7754_v60, %v7753_v58  ;;  %v7775_v58 = vld [vmem:[%s14237_s24 + $0xb0] sm:$0xff]  ;;  %v7776_v60 = vld [vmem:[%s14237_s24 + $0xb8] sm:$0xff] }
0x13bf   :  { %9306 = vmatmul.mubr.msk.f32.gmra.mrb[228].mxu1 %vm4952_vm9, %v13898_v46  ;;  %v11034_v46 = vpack.c.bf16 %v7614_v49, %v7612_v3  ;;  %v7762_v3 = vld [vmem:[%s14237_s24 + $0x48] sm:$0xff] }
0x13c0   :  { %7553 = vmatprep.mubr.f32.mxu1 %v12092_v0  ;;  %11027 = vmatpush1.bf16.msra.mxu1 %v11026_v34  ;;  %v11068_v34 = vpack.c.bf16 %v7756_v50, %v7755_v6  ;;  %v11098_v6 = vpack.c.bf16 %v7776_v60, %v7775_v58  ;;  %v8054_v58 = vld [vmem:[%s14239_s5 + $0x48] sm:$0xff] }
0x13c1   :  { %11029 = vmatprep.subr.bf16.mxu1 %v11028_v54  ;;  %11066 = vmatpush1.bf16.msra.mxu0 %v11065_v21  ;;  %v7757_v54 = vld [vmem:[%s14237_s24 + $0x20] sm:$0xff] }
0x13c2   :  { %11067 = vmatprep.subr.bf16.mxu0 %v12094_v28  ;;  %v11071_v2 = vpack.c.bf16 %v7758_v38, %v7757_v54 }
0x13c3   :  { %9307 = vmatmul.mubr.msk.f32.gmra.mrb[230].mxu1 %vm4952_vm9, %v13903_v4  ;;  %v7622_v4 = vld [vmem:[%s14236_s13 + $0xd0] sm:$0xff] }
0x13c4   :  { %11031 = vmatpush1.bf16.msra.mxu1 %v11030_v13  ;;  %v11042_v26 = vpack.c.bf16 %v7622_v4, %v7620_v8  ;;  %v11074_v13 = vpack.c.bf16 %v7760_v53, %v7759_v5  ;;  %v7770_v8 = vld [vmem:[%s14237_s24 + $0x88] sm:$0xff] }
0x13c5   :  { %11033 = vmatprep.subr.bf16.mxu1 %v11032_v7  ;;  %11069 = vmatpush1.bf16.msra.mxu0 %v11068_v34  ;;  %v7761_v7 = vld [vmem:[%s14237_s24 + $0x40] sm:$0xff] }
0x13c6   :  { %11070 = vmatprep.subr.bf16.mxu0 %v12094_v28  ;;  %v11077_v49 = vpack.c.bf16 %v7762_v3, %v7761_v7 }
0x13c8   :  { %11035 = vmatpush1.bf16.msra.mxu1 %v11034_v46  ;;  %v11080_v46 = vpack.c.bf16 %v7764_v41, %v7763_v35 }
0x13c9   :  { %11037 = vmatprep.subr.bf16.mxu1 %v11036_v48  ;;  %11072 = vmatpush1.bf16.msra.mxu0 %v11071_v2  ;;  %v7765_v48 = vld [vmem:[%s14237_s24 + $0x60] sm:$0xff] }
0x13ca   :  { %11073 = vmatprep.subr.bf16.mxu0 %v12094_v28  ;;  %v11083_v12 = vpack.c.bf16 %v7766_v59, %v7765_v48  ;;  %v7874_v59 = vld [vmem:[%s14238_s25] sm:$0xff] }
0x13cc   :  { %11039 = vmatpush1.bf16.msra.mxu1 %v11038_v19  ;;  %v11086_v19 = vpack.c.bf16 %v7768_v51, %v7767_v62 }
0x13cd   :  { %11041 = vmatprep.subr.bf16.mxu1 %v11040_v30  ;;  %11075 = vmatpush1.bf16.msra.mxu0 %v11074_v13  ;;  %v7769_v30 = vld [vmem:[%s14237_s24 + $0x80] sm:$0xff] }
0x13ce   :  { %11076 = vmatprep.subr.bf16.mxu0 %v12094_v28  ;;  %v11089_v4 = vpack.c.bf16 %v7770_v8, %v7769_v30 }
0x13d0   :  { %11043 = vmatpush1.bf16.msra.mxu1 %v11042_v26  ;;  %v11092_v26 = vpack.c.bf16 %v7772_v31, %v7771_v52  ;;  %v9327_v31 = vld [vmem:[%s14239_s5 + $0x58] sm:$0xff] }
0x13d1   :  { %11045 = vmatprep.subr.bf16.mxu1 %v11044_v36  ;;  %11078 = vmatpush1.bf16.msra.mxu0 %v11077_v49  ;;  %v7773_v36 = vld [vmem:[%s14237_s24 + $0xa0] sm:$0xff] }
0x13d2   :  { %11079 = vmatprep.subr.bf16.mxu0 %v12094_v28  ;;  %v11095_v40 = vpack.c.bf16 %v7774_v43, %v7773_v36  ;;  %v8045_v36 = vld [vmem:[%s14239_s5] sm:$0xff]  ;;  %v8046_v43 = vld [vmem:[%s14239_s5 + $0x8] sm:$0xff] }
0x13d4   :  { %11047 = vmatpush1.bf16.msra.mxu1 %v11046_v33  ;;  %v7577_v33 = vrot.slane %v7568_v47, %v12578_v45 }
0x13d5   :  { %11049 = vmatprep.subr.bf16.mxu1 %v11048_v11  ;;  %11081 = vmatpush1.bf16.msra.mxu0 %v11080_v46 }
0x13d6   :  { %11082 = vmatprep.subr.bf16.mxu0 %v12094_v28 }
0x13d8   :  { %11051 = vmatpush1.bf16.msra.mxu1 %v11050_v14 }
0x13d9   :  { %11053 = vmatprep.subr.bf16.mxu1 %v11052_v57  ;;  %11084 = vmatpush1.bf16.msra.mxu0 %v11083_v12  ;;  %v9318_v12 = vld [vmem:[%s14238_s25 + $0x10] sm:$0xff] }
0x13da   :  { %11085 = vmatprep.subr.bf16.mxu0 %v12094_v28 }
0x13dc   :  { %11055 = vmatpush1.bf16.msra.mxu1 %v11054_v10 }
0x13dd   :  { %11057 = vmatprep.subr.bf16.mxu1 %v11056_v61  ;;  %11087 = vmatpush1.bf16.msra.mxu0 %v11086_v19 }
0x13de   :  { %11088 = vmatprep.subr.bf16.mxu0 %v12094_v28 }
0x13e0   :  { %11059 = vmatpush1.bf16.msra.mxu1 %v11058_v23 }
0x13e1   :  { %11061 = vmatprep.subr.bf16.mxu1 %v11060_v63  ;;  %11090 = vmatpush1.bf16.msra.mxu0 %v11089_v4 }
0x13e2   :  { %11091 = vmatprep.subr.bf16.mxu0 %v12094_v28 }
0x13e4   :  { %11063 = vmatpush1.bf16.msra.mxu1 %v11062_v15 }
0x13e5   :  { %11093 = vmatpush1.bf16.msra.mxu0 %v11092_v26  ;;  %v9328_v26 = vld [vmem:[%s14239_s5 + $0x60] sm:$0xff] }
0x13e6   :  { %11094 = vmatprep.subr.bf16.mxu0 %v12094_v28 }
0x13e9   :  { %11096 = vmatpush1.bf16.msra.mxu0 %v11095_v40 }
0x13ea   :  { %11097 = vmatprep.subr.bf16.mxu0 %v12094_v28 }
0x13ed   :  { %11099 = vmatpush1.bf16.msra.mxu0 %v11098_v6 }
0x148a   :  { %v7537_v11 = vpop.f32.mrb[224].mxu1 }
0x148b   :  { %v7580_v32 = vadd.f32 %v7573_v56, %v7537_v11  ;;  %v7539_v1 = vpop.f32.mrb[225].mxu1  ;;  %v11116_v11 = vpack.c.bf16 %v8046_v43, %v8045_v36 }
0x148c   :  { %v7581_v55 = vadd.f32 %v7577_v33, %v7539_v1  ;;  %v9330_v1 = vld [vmem:[%s14239_s5 + $0x70] sm:$0xff] }
0x148d   :  { %v7588_v57 = vmax.f32 %v7580_v32, 0.0  ;;  %v9329_v32 = vld [vmem:[%s14239_s5 + $0x68] sm:$0xff] }
0x148e   :  { %v7589_v18 = vmax.f32 %v7581_v55, 0.0  ;;  %v7543_v14 = vpop.f32.mrb[226].mxu1  ;;  %v8047_v55 = vld [vmem:[%s14239_s5 + $0x10] sm:$0xff] }
0x148f   :  { %v7582_v22 = vadd.f32 %v7573_v56, %v7543_v14  ;;  %v7545_v20 = vpop.f32.mrb[227].mxu1  ;;  %v7875_v14 = vld [vmem:[%s14238_s25 + $0x8] sm:$0x3f] }
0x1490   :  { %v7583_v44 = vadd.f32 %v7577_v33, %v7545_v20  ;;  %9308 = vmatprep.mubr.msk.f32.mxu1 %vm5459_vm10, %v7589_v18 }
0x1491   :  { %7721 = vmatmul.mubr.f32.vlgmr.msra.gmra.mrb[232].mxu1 %v7588_v57  ;;  %v7590_v61 = vmax.f32 %v7582_v22, 0.0  ;;  %v11140_v22 = vpack.c.bf16 %v9330_v1, %v9329_v32  ;;  %v8593_v32 = vld [vmem:[%s12245_s14] sm:$0xff]  ;;  %v8594_v1 = vld [vmem:[%s12245_s14 + $0x8] sm:$0xff] }
0x1492   :  { %v7591_v27 = vmax.f32 %v7583_v44, 0.0  ;;  %v7549_v10 = vpop.f32.mrb[228].mxu1  ;;  %v9331_v44 = vld [vmem:[%s14239_s5 + $0x78] sm:$0xff] }
0x1493   :  { %v7584_v24 = vadd.f32 %v7573_v56, %v7549_v10  ;;  %v7551_v42 = vpop.f32.mrb[229].mxu1  ;;  %v8049_v10 = vld [vmem:[%s14239_s5 + $0x20] sm:$0xff] }
0x1494   :  { %v7585_v45 = vadd.f32 %v7577_v33, %v7551_v42  ;;  %9309 = vmatprep.mubr.msk.f32.mxu1 %vm5459_vm10, %v7591_v27 }
0x1495   :  { %7727 = vmatmul.mubr.f32.gmra.mrb[234].mxu1 %v7590_v61  ;;  %v7592_v25 = vmax.f32 %v7584_v24, 0.0 }
0x1496   :  { %v7593_v37 = vmax.f32 %v7585_v45, 0.0  ;;  %v7555_v23 = vpop.f32.mrb[230].mxu1  ;;  %v9333_v45 = vld [vmem:[%s14239_s5 + $0x88] sm:$0xff] }
0x1497   :  { %v7586_v16 = vadd.f32 %v7573_v56, %v7555_v23  ;;  %v7557_v63 = vpop.f32.mrb[231].mxu1  ;;  %v8051_v23 = vld [vmem:[%s14239_s5 + $0x30] sm:$0xff] }
0x1498   :  { %v7587_v29 = vadd.f32 %v7577_v33, %v7557_v63  ;;  %9310 = vmatprep.mubr.msk.f32.mxu1 %vm5459_vm10, %v7593_v37  ;;  %v11136_v33 = vpack.c.bf16 %v9328_v26, %v9327_v31 }
0x1499   :  { %7733 = vmatmul.mubr.f32.gmra.mrb[236].mxu1 %v7592_v25  ;;  %v7594_v15 = vmax.f32 %v7586_v16, 0.0 }
0x149a   :  { %v7595_v39 = vmax.f32 %v7587_v29, 0.0  ;;  %v9335_v29 = vld [vmem:[%s14239_s5 + $0x98] sm:$0xff] }
0x149c   :  { %9311 = vmatprep.mubr.msk.f32.mxu1 %vm5459_vm10, %v7595_v39 }
0x149d   :  { %7739 = vmatmul.mubr.f32.gmra.mrb[238].mxu1 %v7594_v15 }
0x149e   :  { %9525 = vmatprep.mubr.msk.f32.mxu1 %vm4952_vm9, %v7874_v59 }
0x1564   :  { %v7722_v21 = vpop.f32.mrb[232].mxu1 }
0x1565   :  { %v7724_v50 = vpop.f32.mrb[233].mxu1  ;;  %v7745_v54 = vmax.f32 %v7588_v57, %v7722_v21  ;;  %v9319_v57 = vld [vmem:[%s14238_s25 + $0x18] sm:$0x3f]  ;;  %v9337_v21 = vld [vmem:[%s14239_s5 + $0xa8] sm:$0xf] }
0x1566   :  { %v7746_v34 = vmax.f32 %v7589_v18, %v7724_v50  ;;  %v8048_v18 = vld [vmem:[%s14239_s5 + $0x18] sm:$0xff]  ;;  %v9349_v50 = vld [vmem:[%s14239_s5 + $0xb0] sm:$0xff] }
0x1567   :  { %v11120_v20 = vpack.c.bf16 %v8048_v18, %v8047_v55 }
0x1568   :  { %v7728_v38 = vpop.f32.mrb[234].mxu1  ;;  %9312 = vmatprep.mubr.msk.f32.mxu0 %vm5459_vm10, %v7746_v34  ;;  %v9350_v34 = vld [vmem:[%s14239_s5 + $0xb8] sm:$0xff] }
0x1569   :  { %v7730_v2 = vpop.f32.mrb[235].mxu1  ;;  %7854 = vmatmul.mubr.f32.vlgmr.msra.gmra.mrb[192].mxu0 %v7745_v54  ;;  %v7747_v53 = vmax.f32 %v7590_v61, %v7728_v38  ;;  %v8050_v61 = vld [vmem:[%s14239_s5 + $0x28] sm:$0xff]  ;;  %v8055_v54 = vld [vmem:[%s14239_s5 + $0x50] sm:$0xf]  ;;  %v11168_v38 = vpack.c.bf16 %v9350_v34, %v9349_v50 }
0x156a   :  { %v7748_v5 = vmax.f32 %v7591_v27, %v7730_v2  ;;  %v9332_v27 = vld [vmem:[%s14239_s5 + $0x80] sm:$0xff]  ;;  %v11124_v42 = vpack.c.bf16 %v8050_v61, %v8049_v10  ;;  %v8598_v61 = vld [vmem:[%s12245_s14 + $0x28] sm:$0xff] }
0x156b   :  { %v11144_v24 = vpack.c.bf16 %v9332_v27, %v9331_v44  ;;  %v9348_v44 = vld [vmem:[%s14240_s6 + $0x28] sm:$0x3]  ;;  %v8597_v10 = vld [vmem:[%s12245_s14 + $0x20] sm:$0xff] }
0x156c   :  { %v7734_v13 = vpop.f32.mrb[236].mxu1  ;;  %9313 = vmatprep.mubr.msk.f32.mxu0 %vm5459_vm10, %v7748_v5 }
0x156d   :  { %v7736_v7 = vpop.f32.mrb[237].mxu1  ;;  %7859 = vmatmul.mubr.f32.gmra.mrb[194].mxu0 %v7747_v53  ;;  %v7749_v49 = vmax.f32 %v7592_v25, %v7734_v13  ;;  %v8052_v25 = vld [vmem:[%s14239_s5 + $0x38] sm:$0xff]  ;;  %v9351_v53 = vld [vmem:[%s14239_s5 + $0xc0] sm:$0xff]  ;;  %v9352_v13 = vld [vmem:[%s14239_s5 + $0xc8] sm:$0xff] }
0x156e   :  { %v7750_v3 = vmax.f32 %v7593_v37, %v7736_v7  ;;  %v9334_v37 = vld [vmem:[%s14239_s5 + $0x90] sm:$0xff]  ;;  %v11128_v63 = vpack.c.bf16 %v8052_v25, %v8051_v23 }
0x156f   :  { %v11148_v16 = vpack.c.bf16 %v9334_v37, %v9333_v45  ;;  %v8600_v45 = vld [vmem:[%s12245_s14 + $0x38] sm:$0xf] }
0x1570   :  { %v7740_v35 = vpop.f32.mrb[238].mxu1  ;;  %9314 = vmatprep.mubr.msk.f32.mxu0 %vm5459_vm10, %v7750_v3 }
0x1571   :  { %v7742_v41 = vpop.f32.mrb[239].mxu1  ;;  %7864 = vmatmul.mubr.f32.gmra.mrb[196].mxu0 %v7749_v49  ;;  %v7751_v48 = vmax.f32 %v7594_v15, %v7740_v35  ;;  %v8053_v15 = vld [vmem:[%s14239_s5 + $0x40] sm:$0xff] }
0x1572   :  { %v7752_v46 = vmax.f32 %v7595_v39, %v7742_v41  ;;  %v9336_v39 = vld [vmem:[%s14239_s5 + $0xa0] sm:$0xff]  ;;  %v11132_v6 = vpack.c.bf16 %v8054_v58, %v8053_v15  ;;  %v11172_v41 = vpack.c.bf16 %v9352_v13, %v9351_v53 }
0x1573   :  { %v11152_v60 = vpack.c.bf16 %v9336_v39, %v9335_v29 }
0x1574   :  { %9315 = vmatprep.mubr.msk.f32.mxu0 %vm5459_vm10, %v7752_v46  ;;  %v9353_v46 = vld [vmem:[%s14239_s5 + $0xd0] sm:$0xff] }
0x1575   :  { %7869 = vmatmul.mubr.f32.gmra.mrb[198].mxu0 %v7751_v48  ;;  %v9354_v48 = vld [vmem:[%s14239_s5 + $0xd8] sm:$0xff] }
0x1576   :  { %9536 = vmatprep.mubr.msk.f32.mxu0 %vm4952_vm9, %v9318_v12  ;;  %v11176_v59 = vpack.c.bf16 %v9354_v48, %v9353_v46  ;;  %v9355_v12 = vld [vmem:[%s14239_s5 + $0xe0] sm:$0xff] }
0x163c   :  { %v7855_v62 = vpop.f32.mrb[192].mxu0 }
0x163d   :  { %v7857_v51 = vpop.f32.mrb[193].mxu0 }
0x1640   :  { %v7860_v19 = vpop.f32.mrb[194].mxu0 }
0x1641   :  { %v11100_v30 = vpack.c.bf16 %v7860_v19, %v7855_v62  ;;  %v7862_v8 = vpop.f32.mrb[195].mxu0  ;;  %v9356_v62 = vld [vmem:[%s14239_s5 + $0xe8] sm:$0xff]  ;;  %v9357_v19 = vld [vmem:[%s14239_s5 + $0xf0] sm:$0xff] }
0x1642   :  { %v11180_v51 = vpack.c.bf16 %v9356_v62, %v9355_v12 }
0x1643   :  { %11101 = vmatprep.subr.bf16.mxu1 %v11100_v30  ;;  %11109 = vmatprep.subr.bf16.mxu0 %v11100_v30 }
0x1644   :  { %v7865_v4 = vpop.f32.mrb[196].mxu0  ;;  %11103 = vmatpush3.bf16.msra.mxu1 %v11100_v30  ;;  %11111 = vmatpush3.bf16.msra.mxu0 %v11100_v30  ;;  %v9358_v30 = vld [vmem:[%s14239_s5 + $0xf8] sm:$0xff] }
0x1645   :  { %v7867_v52 = vpop.f32.mrb[197].mxu0  ;;  %v11184_v8 = vpack.c.bf16 %v9358_v30, %v9357_v19 }
0x1646   :  { %v9325_v52 = vld [vmem:[%s14240_s6 + $0x10] sm:$0xff] }
0x1648   :  { %v7870_v40 = vpop.f32.mrb[198].mxu0 }
0x1649   :  { %v11104_v47 = vpack.c.bf16 %v7870_v40, %v7865_v4  ;;  %v7872_v56 = vpop.f32.mrb[199].mxu0  ;;  %v9359_v4 = vld [vmem:[%s14239_s5 + $0x100] sm:$0xf] }
0x164a   :  { %v8043_v56 = vld [vmem:[%s14240_s6] sm:$0xff] }
0x164b   :  { %11105 = vmatprep.subr.bf16.mxu1 %v11104_v47  ;;  %11113 = vmatprep.subr.bf16.mxu0 %v11104_v47 }
0x164c   :  { %11107 = vmatpush3.bf16.msra.mxu1 %v11104_v47  ;;  %11115 = vmatpush3.bf16.msra.mxu0 %v11104_v47 }
0x164d   :  { %11137 = vmatprep.subr.bf16.mxu0 %v11136_v33  ;;  %11117 = vmatprep.subr.bf16.mxu1 %v11116_v11 }
0x164f   :  { %9526 = vmatmul.mubr.msk.f32.vlgmr.msra.gmra.mrb[240].mxu1 %vm4952_vm9, %v7875_v14  ;;  %9537 = vmatmul.mubr.msk.f32.vlgmr.msra.gmra.mrb[200].mxu0 %vm4952_vm9, %v9319_v57  ;;  %v11194_v57 = vpack.c.bf16 %v8594_v1, %v8593_v32 }
0x1650   :  { %11139 = vmatpush3.bf16.msra.mxu0 %v11136_v33  ;;  %11119 = vmatpush3.bf16.msra.mxu1 %v11116_v11  ;;  %v8044_v33 = vld [vmem:[%s14240_s6 + $0x8] sm:$0x3]  ;;  %v9347_v11 = vld [vmem:[%s14240_s6 + $0x20] sm:$0xff] }
0x1651   :  { %11141 = vmatprep.subr.bf16.mxu0 %v11140_v22  ;;  %11121 = vmatprep.subr.bf16.mxu1 %v11120_v20 }
0x1654   :  { %11143 = vmatpush3.bf16.msra.mxu0 %v11140_v22  ;;  %11123 = vmatpush3.bf16.msra.mxu1 %v11120_v20  ;;  %v8595_v22 = vld [vmem:[%s12245_s14 + $0x10] sm:$0xff]  ;;  %v8596_v20 = vld [vmem:[%s12245_s14 + $0x18] sm:$0xff] }
0x1655   :  { %11145 = vmatprep.subr.bf16.mxu0 %v11144_v24  ;;  %11125 = vmatprep.subr.bf16.mxu1 %v11124_v42  ;;  %v11198_v27 = vpack.c.bf16 %v8596_v20, %v8595_v22 }
0x1658   :  { %11147 = vmatpush3.bf16.msra.mxu0 %v11144_v24  ;;  %11127 = vmatpush3.bf16.msra.mxu1 %v11124_v42  ;;  %v11202_v24 = vpack.c.bf16 %v8598_v61, %v8597_v10  ;;  %v8599_v42 = vld [vmem:[%s12245_s14 + $0x30] sm:$0xff]  ;;  %s12096_s14 = smov [#allocation34]  }
0x1659   :  { %11149 = vmatprep.subr.bf16.mxu0 %v11148_v16  ;;  %11129 = vmatprep.subr.bf16.mxu1 %v11128_v63  ;;  %v11206_v37 = vpack.c.bf16 %v8600_v45, %v8599_v42 }
0x165c   :  { %11151 = vmatpush3.bf16.msra.mxu0 %v11148_v16  ;;  %11131 = vmatpush3.bf16.msra.mxu1 %v11128_v63 }
0x165d   :  { %11153 = vmatprep.subr.bf16.mxu0 %v11152_v60  ;;  %11133 = vmatprep.subr.bf16.mxu1 %v11132_v6 }
0x1660   :  { %11155 = vmatpush3.bf16.msra.mxu0 %v11152_v60  ;;  %11135 = vmatpush3.bf16.msra.mxu1 %v11132_v6  ;;  %v8685_v60 = vld [vmem:[%s12250_s12] sm:$0x3] }
0x1661   :  { %9584 = vmatprep.subr.msk.mxu0 %vm715_vm4, %v9337_v21  ;;  %9559 = vmatprep.subr.msk.mxu1 %vm715_vm4, %v8055_v54 }
0x1664   :  { %9585 = vmatpush3.msk.msra.mxu0 %vm715_vm4, %v9337_v21  ;;  %9560 = vmatpush3.msk.msra.mxu1 %vm715_vm4, %v8055_v54  ;;  %v9372_v21 = vld [vmem:[%s12255_s17] ss:$0 sm:$0xff]  ;;  %s8793_s17 = sshll.u32 %s12096_s14, 4  ;;  %s8794_s17 = int_to_ptr.vmem [resolvable:$true] %s8793_s17 }
0x1665   :  { %11169 = vmatprep.subr.bf16.mxu0 %v11168_v38  ;;  %s11991_s12 = scalar_lea.vmem %s8794_s17, 32  ;;  %p11996_p7 = scmp.lt.s32.totalorder %s8794_s17, %s8794_s17 }
0x1666   :  { %p11992_p6 = scmp.ne.s32.totalorder %s8794_s17, %s11991_s12  ;;  %p11997_p8 = scmp.lt.s32.totalorder %s11991_s12, %s11991_s12 }
0x1668   :  { %p11998_p9 = por %p11997_p8, %p11996_p7 }
0x166a   :  { %p11999_p10 = pnand %p11998_p9, %p11992_p6 }
0x1722   :  { %v9527_v2 = vpop.f32.mrb[240].mxu1  ;;  %v9538_v5 = vpop.f32.mrb[200].mxu0 }
0x1723   :  { %v8042_v7 = vmax.f32 %v9527_v2, %v9538_v5  ;;  %v7948_v3 = vpop.f32.mrb[241].mxu1  ;;  %v8032_v49 = vpop.f32.mrb[201].mxu0 }
0x1724   :  { %v8041_v35 = vmax.f32 %v7948_v3, %v8032_v49 }
0x1726   :  { %9561 = vmatprep.mubr.msk.f32.mxu1 %vm8056_vm11, %v8041_v35  ;;  %9586 = vmatprep.mubr.msk.f32.mxu0 %vm8056_vm11, %v8041_v35 }
0x1727   :  { %9562 = vmatmul.mubr.msk.f32.vlgmr.msra.gmra.mrb[242].mxu1 %vm8056_vm11, %v8042_v7  ;;  %9587 = vmatmul.mubr.msk.f32.vlgmr.msra.gmra.mrb[202].mxu0 %vm8056_vm11, %v8042_v7 }
0x1728   :  { %11171 = vmatpush3.bf16.msra.mxu0 %v11168_v38  ;;  %9625 = vmatprep.mubr.msk.f32.mxu0 %vm8056_vm11, %v8041_v35 }
0x1729   :  { %11173 = vmatprep.subr.bf16.mxu0 %v11172_v41  ;;  %9593 = vmatprep.mubr.msk.f32.mxu1 %vm8234_vm12, %v9325_v52 }
0x172c   :  { %11175 = vmatpush3.bf16.msra.mxu0 %v11172_v41 }
0x172d   :  { %11177 = vmatprep.subr.bf16.mxu0 %v11176_v59 }
0x1730   :  { %11179 = vmatpush3.bf16.msra.mxu0 %v11176_v59 }
0x1731   :  { %11181 = vmatprep.subr.bf16.mxu0 %v11180_v51 }
0x1734   :  { %11183 = vmatpush3.bf16.msra.mxu0 %v11180_v51 }
0x1735   :  { %11185 = vmatprep.subr.bf16.mxu0 %v11184_v8 }
0x1738   :  { %11187 = vmatpush3.bf16.msra.mxu0 %v11184_v8 }
0x1739   :  { %9623 = vmatprep.subr.msk.mxu0 %vm715_vm4, %v9359_v4 }
0x173c   :  { %9624 = vmatpush3.msk.msra.mxu0 %vm715_vm4, %v9359_v4 }
0x173d   :  { %9626 = vmatmul.mubr.msk.f32.vlgmr.msra.gmra.mrb[204].mxu0 %vm8056_vm11, %v8042_v7  ;;  %11212 = vmatprep.subr.bf16.mxu0 %v12094_v28  ;;  %v9326_v28 = vld [vmem:[%s14240_s6 + $0x18] sm:$0x3] }
0x173e   :  { %9658 = vmatprep.mubr.msk.f32.mxu0 %vm12095_vm13, %v12092_v0 }
0x17fa   :  { %v9563_v31 = vpop.f32.mrb[242].mxu1  ;;  %v9588_v26 = vpop.f32.mrb[202].mxu0 }
0x17fb   :  { %v8132_v36 = vpop.f32.mrb[243].mxu1  ;;  %v8225_v43 = vpop.f32.mrb[203].mxu0 }
0x17fc   :  { %v11162_v40 = vpack.c.bf16 %v9563_v31, %v8132_v36  ;;  %v11156_v47 = vpack.c.bf16 %v9588_v26, %v8225_v43 }
0x17fe   :  { %11158 = vmatprep.subr.msk.bf16.mxu1 %vm12378_vm2, %v11156_v47 }
0x17ff   :  { %11161 = vmatpush3.bf16.msk.msra.mxu1 %vm12378_vm2, %v11156_v47 }
0x1800   :  { %11164 = vmatprep.subr.msk.bf16.mxu1 %vm12378_vm2, %v11162_v40 }
0x1802   :  { %9594 = vmatmul.mubr.msk.f32.vlgmr.msra.gmra.mrb[244].mxu1 %vm8234_vm12, %v9326_v28 }
0x1803   :  { %11167 = vmatpush3.bf16.msk.msra.mxu1 %vm12378_vm2, %v11162_v40  ;;  %9600 = vmatprep.mubr.msk.f32.mxu1 %vm8234_vm12, %v8043_v56 }
0x180a   :  { %9601 = vmatmul.mubr.msk.f32.vlgmr.msra.gmra.mrb[244].mxu1 %vm8234_vm12, %v8044_v33 }
0x180b   :  { %9632 = vmatprep.mubr.msk.f32.mxu1 %vm8234_vm12, %v9347_v11 }
0x1810   :  { %v9627_v55 = vpop.f32.mrb[204].mxu0 }
0x1811   :  { %v8487_v18 = vpop.f32.mrb[205].mxu0 }
0x1812   :  { %v11188_v14 = vpack.c.bf16 %v9627_v55, %v8487_v18 }
0x1814   :  { %11190 = vmatprep.subr.msk.bf16.mxu1 %vm12378_vm2, %v11188_v14 }
0x1815   :  { %11193 = vmatpush3.bf16.msk.msra.mxu1 %vm12378_vm2, %v11188_v14  ;;  %vm8773_vm2 = vcmask 74752  }
0x1816   :  { %11195 = vmatprep.subr.bf16.mxu1 %v11194_v57 }
0x1818   :  { %9633 = vmatmul.mubr.msk.f32.vlgmr.msra.gmra.mrb[244].mxu1 %vm8234_vm12, %v9348_v44 }
0x1819   :  { %11197 = vmatpush3.bf16.msra.mxu1 %v11194_v57 }
0x181a   :  { %11199 = vmatprep.subr.bf16.mxu1 %v11198_v27 }
0x181d   :  { %11201 = vmatpush3.bf16.msra.mxu1 %v11198_v27 }
0x181e   :  { %11203 = vmatprep.subr.bf16.mxu1 %v11202_v24 }
0x1821   :  { %11205 = vmatpush3.bf16.msra.mxu1 %v11202_v24 }
0x1822   :  { %11208 = vmatprep.subr.msk.bf16.mxu1 %vm12491_vm5, %v11206_v37 }
0x1825   :  { %11211 = vmatpush3.bf16.msk.msra.mxu1 %vm12491_vm5, %v11206_v37 }
0x18eb   :  { %v9634_v23 = vpop.f32.mrb[244].mxu1 }
0x18ec   :  { %v8590_v25 = vadd.f32 %v9634_v23, %v9366_v9  ;;  %v8571_v16 = vpop.f32.mrb[245].mxu1 }
0x18ed   :  { %v8589_v63 = vadd.f32 %v9366_v9, %v8571_v16 }
0x18ee   :  { %v8592_v39 = vmax.f32 %v8590_v25, 0.0 }
0x18ef   :  { %v8591_v29 = vmax.f32 %v8589_v63, 0.0 }
0x18f1   :  { %9651 = vmatprep.mubr.msk.f32.mxu1 %vm690_vm6, %v8591_v29 }
0x18f2   :  { %9652 = vmatmul.mubr.msk.f32.vlgmr.msra.gmra.mrb[246].mxu1 %vm690_vm6, %v8592_v39 }
0x19c5   :  { %v9653_v15 = vpop.f32.mrb[246].mxu1 }
0x19c6   :  { %v8676_v17 = vpop.f32.mrb[247].mxu1 }
0x19c7   :  { %v11213_v58 = vpack.c.bf16 %v9653_v15, %v8676_v17 }
0x19c9   :  { %11215 = vmatpush3.bf16.msk.msra.mxu0 %vm11214_vm15, %v11213_v58 }
0x19cc   :  { %9659 = vmatmul.mubr.msk.f32.vlgmr.msra.gmra.mrb[206].mxu0 %vm8686_vm0, %v8685_v60 }
0x1a9f   :  { %v8760_v6 = vpop.f32.mrb[206].mxu0 }
0x1aa0   :  { %v8764_v50 = vmul.f32 0.04, %v8760_v6  ;;  %v9660_v34 = vpop.f32.mrb[207].mxu0 }
0x1aa2   :  { %v8772_v54 = vadd.f32 %v9372_v21, %v8764_v50 }
0x1aa4   :  { %v8774_v38 = vsel %vm8773_vm2, %v8772_v54, -inf }
0x1aa5   :  { %8775 = vmax.xlane.f32.xlu0 %v8774_v38 }
0x1b32   :  { %v8776_v0 = vpop.xlane.xlu0 %8775 }
0x1b33   :  { %v8777_v2 = vsub.f32 %v8772_v54, %v8776_v0 }
0x1b35   :  { %v8778_v5 = vmul.f32 1.442695, %v8777_v2 }
0x1b37   :  { %11472 = vpow2.f32 %v8778_v5 }
0x1b41   :  { %v11473_v53 = vpop.eup %11472 }
0x1b42   :  { %v8780_v13 = vsel %vm8773_vm2, %v11473_v53, 0.0 }
0x1b43   :  { %8781 = vadd.xlane.f32.xlu0 %v8780_v13 }
0x1bd0   :  { %v8782_v7 = vpop.xlane.xlu0 %8781 }
0x1bd1   :  { %11474 = vlog2.f32 %v8782_v7 }
0x1bdb   :  { %v11475_v3 = vpop.eup %11474 }
0x1bdc   :  { %v8784_v49 = vmul.f32 0.6931472, %v11475_v3 }
0x1bde   :  { %v8785_v35 = vsub.f32 %v8777_v2, %v8784_v49 }
0x1be0   :  { %8786 = vst.msk [vmem:[#allocation34] sm:$0x3] %vm8773_vm2, %v8785_v35 }
0x1be1   :  { %12002 = shalt.err (!%p11999_p10)
}
0x1be2   :  { %s12003_s9 = scalar_lea.hbm %s12260_s27, 32 }
0x1be3   :  { %p12004_p11 = scmp.ne.s32.totalorder %s12260_s27, %s12003_s9  ;;  %p12007_p12 = scmp.lt.u32.totalorder %s12003_s9, %s12260_s27 }
0x1be5   :  { %p12009_p13 = pnand %p12007_p12, %p12004_p11 }
0x1be7   :  { %12012 = shalt.err (!%p12009_p13)
}
0x1be8   :  { %8796 = dma.vmem_to_hbm [thread:$0]  %s8794_s17, 32, %s12260_s27, [#allocation4]  }
0x1be9   :  { %12035 = dma.done.wait [#allocation4], 32  }
0x1bea   :  { %12036 = vsyncadd [#allocation4], 4294967264 }
0x1beb   :  { %8800 = vsyncpa [#allocation3], 1 }
0x1bec   :  { %8801 = vsyncpa [#allocation6], 1 }
0x1bed   :  { %8802 = vsyncpa [#allocation9], 1 }
0x1bee   :  { %8803 = vsyncpa [#allocation12], 1 }
0x1bef   :  { %8804 = vsyncpa [#allocation15], 1 }
0x1bf0   :  { %8805 = vsyncpa [#allocation18], 1 }
0x1bf1   :  { %8806 = vsyncpa [#allocation21], 1 }
0x1bf2   :  { %8807 = vsyncpa [#allocation24], 1 }
0x1bf3   :  { %8808 = vsyncpa [#allocation27], 1 }
0x1bf4   :  { %8809 = vsyncpa [#allocation30], 1 }
0x1bf5   :  { %8810 = vsyncpa [#allocation33], 1 }
0x1bf6   :  { %8811 = vsyncpa [#allocation4], 1 }

</bundles_post_ra>
